<compile_context>
chip_gen: v7x
topology: tpu7x:2x2x1
jax: 0.10.0
libtpu: 0.0.40
codegen_flags: <defaults>
</compile_context>

<pallas_src>
import jax
import jax.numpy as jnp
from jax.experimental import pallas as pl
from jax.experimental.pallas import tpu as pltpu

BN_EPS = 1e-5
MM_DTYPE = jnp.bfloat16          # MXU operand dtype (accumulation stays f32)


def _round_up(x, m):
    return ((x + m - 1) // m) * m


def _query_vmem_limit():
    try:
        cap = int(pltpu.get_tpu_info().vmem_capacity_bytes)
    except Exception:
        cap = 64 * 1024 * 1024
    return max(32 * 1024 * 1024, (cap * 3) // 4)


_VMEM_LIMIT = _query_vmem_limit()


def _cparams(*sem):
    return pltpu.CompilerParams(dimension_semantics=sem,
                                vmem_limit_bytes=_VMEM_LIMIT)


# ----------------------------------------------------------------------------
# kernel 1: 2x2x2 stride-2 down conv as one wide matmul per tile + BN stats
# ----------------------------------------------------------------------------
def _down_conv_kernel(xp_ref, w_ref, y_ref, s_ref, q_ref):
    # xp_ref: (K, TL) bf16 patch columns; w_ref: (O, K) bf16
    # y_ref:  (O, TL) f32 conv output;    s_ref/q_ref: (1, O, 1) per-tile stats
    y = jnp.dot(w_ref[...], xp_ref[...], preferred_element_type=jnp.float32)
    y_ref[...] = y
    s_ref[0] = jnp.sum(y, axis=1, keepdims=True)
    q_ref[0] = jnp.sum(y * y, axis=1, keepdims=True)


def _down_conv(xp, wd, tl):
    k, lp = xp.shape
    o = wd.shape[0]
    ntiles = lp // tl
    return pl.pallas_call(
        _down_conv_kernel,
        grid=(ntiles,),
        in_specs=[
            pl.BlockSpec((k, tl), lambda i: (0, i)),
            pl.BlockSpec((o, k), lambda i: (0, 0)),
        ],
        out_specs=(
            pl.BlockSpec((o, tl), lambda i: (0, i)),
            pl.BlockSpec((1, o, 1), lambda i: (i, 0, 0)),
            pl.BlockSpec((1, o, 1), lambda i: (i, 0, 0)),
        ),
        out_shape=(
            jax.ShapeDtypeStruct((o, lp), jnp.float32),
            jax.ShapeDtypeStruct((ntiles, o, 1), jnp.float32),
            jax.ShapeDtypeStruct((ntiles, o, 1), jnp.float32),
        ),
        compiler_params=_cparams("parallel"),
    )(xp, wd)


# ----------------------------------------------------------------------------
# kernel 2: 5x5x5 conv (pad=2) with kd folded into the contraction + BN stats
# ----------------------------------------------------------------------------
def _make_conv5_kernel(n_ops, td, nb, c, fw, wp, nc, do_true):
    def kernel(*refs):
        x_refs = refs[:n_ops]
        cmask_ref = refs[n_ops]
        w_ref = refs[n_ops + 1]
        y_ref = refs[n_ops + 2]
        sum_ref = refs[n_ops + 3]
        sq_ref = refs[n_ops + 4]
        acc_ref = refs[n_ops + 5]
        s_acc = refs[n_ops + 6]
        q_acc = refs[n_ops + 7]

        dblk = pl.program_id(1)

        @pl.when(dblk == 0)
        def _():
            s_acc[...] = jnp.zeros_like(s_acc)
            q_acc[...] = jnp.zeros_like(q_acc)

        # Two TD-plane blocks of the same padded volume form the depth window.
        planes = jnp.concatenate([r[0] for r in x_refs], axis=0)   # (n_ops*td, C, FW)
        cmask = cmask_ref[...]                                      # (1, NC) 0/1

        for t in range(td):                       # static unroll over output depths
            slab = planes[t:t + 5].reshape(5 * c, fw)               # kd folded into K
            acc_ref[...] = jnp.zeros_like(acc_ref)
            for kh in range(5):
                for kw in range(5):
                    s0 = kh * wp + kw             # contiguous lane-offset slice
                    acc_ref[...] += jnp.dot(
                        w_ref[kh * 5 + kw], slab[:, s0:s0 + nc],
                        preferred_element_type=jnp.float32)
            acc = acc_ref[...]
            y_ref[0, t] = acc                     # (O, NC) store, full-dim lanes
            # BN partial stats: mask padded-width columns and padded depths.
            dvalid = (dblk * td + t < do_true).astype(jnp.float32)
            m = acc * (cmask * dvalid)
            s_acc[...] += jnp.sum(m, axis=1, keepdims=True)
            q_acc[...] += jnp.sum(m * m, axis=1, keepdims=True)

        @pl.when(dblk == nb - 1)                  # write stats once per batch index
        def _():
            sum_ref[0] = s_acc[...]
            sq_ref[0] = q_acc[...]

    return kernel


def _conv5(xw, w_taps, cmask, *, n_batch, nb, td, n_ops, do_true, c, o, nc, fw, wp):
    kernel = _make_conv5_kernel(n_ops, td, nb, c, fw, wp, nc, do_true)
    in_specs = [
        pl.BlockSpec((1, td, c, fw), (lambda ni, di, j=j: (ni, di + j, 0, 0)))
        for j in range(n_ops)
    ] + [
        pl.BlockSpec((1, nc), lambda ni, di: (0, 0)),
        pl.BlockSpec((25, o, 5 * c), lambda ni, di: (0, 0, 0)),
    ]
    out_specs = (
        pl.BlockSpec((1, td, o, nc), lambda ni, di: (ni, di, 0, 0)),
        pl.BlockSpec((1, o, 1), lambda ni, di: (ni, 0, 0)),
        pl.BlockSpec((1, o, 1), lambda ni, di: (ni, 0, 0)),
    )
    out_shape = (
        jax.ShapeDtypeStruct((n_batch, nb * td, o, nc), jnp.float32),
        jax.ShapeDtypeStruct((n_batch, o, 1), jnp.float32),
        jax.ShapeDtypeStruct((n_batch, o, 1), jnp.float32),
    )
    scratch = [
        pltpu.VMEM((o, nc), jnp.float32),     # matmul accumulator
        pltpu.VMEM((o, 1), jnp.float32),      # per-channel sum
        pltpu.VMEM((o, 1), jnp.float32),      # per-channel sum of squares
    ]
    return pl.pallas_call(
        kernel,
        grid=(n_batch, nb),
        in_specs=in_specs,
        out_specs=out_specs,
        out_shape=out_shape,
        scratch_shapes=scratch,
        compiler_params=_cparams("parallel", "arbitrary"),
    )(*([xw] * n_ops + [cmask, w_taps]))


# ----------------------------------------------------------------------------
# kernel 3: fused BN-apply + PReLU, streaming lane-dense tiles
# ----------------------------------------------------------------------------
def _bn_prelu_kernel(y_ref, sc_ref, sh_ref, al_ref, o_ref):
    z = y_ref[...] * sc_ref[...] + sh_ref[...]
    o_ref[...] = jnp.where(z >= 0.0, z, al_ref[...] * z)


def _bn_prelu_cols(y, scale, shift, alpha, tl):
    o, lp = y.shape
    spec = pl.BlockSpec((o, tl), lambda i: (0, i))
    pspec = pl.BlockSpec((o, 1), lambda i: (0, 0))
    return pl.pallas_call(
        _bn_prelu_kernel,
        grid=(lp // tl,),
        in_specs=[spec, pspec, pspec, pspec],
        out_specs=spec,
        out_shape=jax.ShapeDtypeStruct((o, lp), jnp.float32),
        compiler_params=_cparams("parallel"),
    )(y, scale.reshape(o, 1), shift.reshape(o, 1), alpha.reshape(o, 1))


def _bn_prelu_rows(y, scale, shift, alpha, tm):
    m, o, lanes = y.shape
    spec = pl.BlockSpec((tm, o, lanes), lambda i: (i, 0, 0))
    pspec = pl.BlockSpec((1, o, 1), lambda i: (0, 0, 0))
    return pl.pallas_call(
        _bn_prelu_kernel,
        grid=(m // tm,),
        in_specs=[spec, pspec, pspec, pspec],
        out_specs=spec,
        out_shape=jax.ShapeDtypeStruct((m, o, lanes), jnp.float32),
        compiler_params=_cparams("parallel"),
    )(y, scale.reshape(1, o, 1), shift.reshape(1, o, 1), alpha.reshape(1, o, 1))


# ----------------------------------------------------------------------------
# BN affine fold (training-mode, biased variance)
# ----------------------------------------------------------------------------
def _bn_affine(sum_vec, sq_vec, count, gamma, beta):
    mean = sum_vec / count
    var = jnp.maximum(sq_vec / count - mean * mean, 0.0)
    inv = jax.lax.rsqrt(var + BN_EPS)
    scale = gamma * inv
    shift = beta - mean * scale
    return scale, shift


# ----------------------------------------------------------------------------
# full DownTransition forward
# ----------------------------------------------------------------------------
def down_transition(x, w_down, gamma0, beta0, alpha0, conv_ws, gammas, betas, alphas):
    """x: (N, Cin, D, H, W) f32 -> (N, 2*Cin, D//2, H//2, W//2) f32."""
    n, cin, d, h, w = x.shape
    assert d % 2 == 0 and h % 2 == 0 and w % 2 == 0
    o = w_down.shape[0]                          # 2 * Cin
    do, ho, wo = d // 2, h // 2, w // 2
    total = n * do * ho * wo                     # BN population per channel
    count = float(total)
    k = cin * 8

    # ---------- phase A: down conv as (O,K)x(K,TL) matmuls + fused BN stats ----
    xp = x.reshape(n, cin, do, 2, ho, 2, wo, 2)
    xp = xp.transpose(1, 3, 5, 7, 0, 2, 4, 6).reshape(k, total)
    tl = min(2048, _round_up(total, 128))
    lp = _round_up(total, tl)
    xp = jnp.pad(xp, ((0, 0), (0, lp - total))).astype(MM_DTYPE)
    wd = w_down.reshape(o, k).astype(MM_DTYPE)

    y0, s0, q0 = _down_conv(xp, wd, tl)
    scale0, shift0 = _bn_affine(jnp.sum(s0, axis=0)[:, 0],
                                jnp.sum(q0, axis=0)[:, 0], count, gamma0, beta0)
    down = _bn_prelu_cols(y0, scale0, shift0, alpha0, tl)        # (O, LP) f32
    down5 = down[:, :total].reshape(o, n, do, ho, wo)            # channel-major view

    # ---------- ConvSteps: 5x5x5 conv + BN + PReLU -----------------------------
    n_convs = len(conv_ws)
    td, n_ops = 4, 2                       # depth block size / window operands
    nb = -(-do // td)                      # ceil(Do / TD)
    dpad = td * (nb + n_ops - 1)           # zero-padded depth planes in the input
    hp, wp = ho + 4, wo + 4
    nc = ho * wp                           # output plane, row stride = padded width
    fw = _round_up(hp * wp + 4, 128)       # flattened padded plane, lane aligned
    cmask = ((jnp.arange(nc) % wp) < wo).astype(jnp.float32).reshape(1, nc)

    act = down5.transpose(1, 2, 0, 3, 4)   # (N, Do, C, Ho, Wo) conv input layout
    for i in range(n_convs):
        xw = jnp.pad(act, ((0, 0), (2, dpad - do - 2), (0, 0), (2, 2), (2, 2)))
        xw = xw.reshape(n, dpad, o, hp * wp)
        xw = jnp.pad(xw, ((0, 0), (0, 0), (0, 0), (0, fw - hp * wp))).astype(MM_DTYPE)
        # w_taps[kh*5+kw, o, kd*C+c] = W[o, c, kd, kh, kw]
        w_taps = conv_ws[i].transpose(3, 4, 0, 2, 1).reshape(25, o, 5 * o).astype(MM_DTYPE)

        yc, sc, qc = _conv5(xw, w_taps, cmask, n_batch=n, nb=nb, td=td, n_ops=n_ops,
                            do_true=do, c=o, o=o, nc=nc, fw=fw, wp=wp)
        scale_i, shift_i = _bn_affine(jnp.sum(sc, axis=0)[:, 0],
                                      jnp.sum(qc, axis=0)[:, 0], count,
                                      gammas[i], betas[i])
        ybn = _bn_prelu_rows(yc.reshape(n * nb * td, o, nc),
                             scale_i, shift_i, alphas[i], tm=td)
        # strip padded depths and padded-width columns -> (N, Do, C, Ho, Wo)
        act = (ybn.reshape(n, nb * td, o, nc)[:, :do]
               .reshape(n, do, o, ho, wp)[..., :wo])

    # ---------- residual add (torch.add(out, down)) + back to NCDHW ------------
    down_ncdhw = down5.transpose(1, 0, 2, 3, 4)                  # (N, O, Do, Ho, Wo)
    if n_convs == 0:
        return down_ncdhw + down_ncdhw
    return act.transpose(0, 2, 1, 3, 4) + down_ncdhw


# ----------------------------------------------------------------------------
# pure-JAX reference (training-mode BN, dropout off, bf16 MXU operands to match)
# ----------------------------------------------------------------------------
def _reference(x, w_down, g0, b0, a0, conv_ws, gs, bs, as_):
    dn = ('NCDHW', 'OIDHW', 'NCDHW')

    def bn_prelu(y, g, b, a):
        mean = jnp.mean(y, axis=(0, 2, 3, 4), keepdims=True)
        var = jnp.mean((y - mean) ** 2, axis=(0, 2, 3, 4), keepdims=True)
        yh = (y - mean) * jax.lax.rsqrt(var + BN_EPS)
        yh = yh * g.reshape(1, -1, 1, 1, 1) + b.reshape(1, -1, 1, 1, 1)
        aa = a.reshape(1, -1, 1, 1, 1)
        return jnp.where(yh >= 0.0, yh, aa * yh)

    def conv(xx, ww, stride, pad):
        return jax.lax.conv_general_dilated(
            xx.astype(MM_DTYPE), ww.astype(MM_DTYPE), stride, pad,
            dimension_numbers=dn, preferred_element_type=jnp.float32)

    down = bn_prelu(conv(x, w_down, (2, 2, 2), 'VALID'), g0, b0, a0)
    out = down
    for w5, g, b, a in zip(conv_ws, gs, bs, as_):
        out = bn_prelu(conv(out, w5, (1, 1, 1), [(2, 2)] * 3), g, b, a)
    return out + down


if __name__ == "__main__":
    # Small shapes: N=2, in_chans=4 (-> out_chans=8), 16^3 volume, nConvs=2.
    N, Cin, D, H, W = 2, 4, 16, 16, 16
    Cout = 2 * Cin
    n_convs = 2

    key = jax.random.PRNGKey(0)
    ks = jax.random.split(key, 4 + 3 * n_convs)

    x = jax.random.normal(ks[0], (N, Cin, D, H, W), jnp.float32)
    w_down = jax.random.normal(ks[1], (Cout, Cin, 2, 2, 2), jnp.float32) / jnp.sqrt(Cin * 8.0)
    gamma0 = 1.0 + 0.1 * jax.random.normal(ks[2], (Cout,), jnp.float32)
    beta0 = 0.1 * jax.random.normal(ks[3], (Cout,), jnp.float32)
    alpha0 = jnp.full((Cout,), 0.25, jnp.float32)

    conv_ws, gammas, betas, alphas = [], [], [], []
    for i in range(n_convs):
        k0, k1, k2 = ks[4 + 3 * i], ks[5 + 3 * i], ks[6 + 3 * i]
        conv_ws.append(jax.random.normal(k0, (Cout, Cout, 5, 5, 5), jnp.float32)
                       / jnp.sqrt(Cout * 125.0))
        gammas.append(1.0 + 0.1 * jax.random.normal(k1, (Cout,), jnp.float32))
        betas.append(0.1 * jax.random.normal(k2, (Cout,), jnp.float32))
        alphas.append(jnp.full((Cout,), 0.25, jnp.float32))
    conv_ws, gammas, betas, alphas = map(tuple, (conv_ws, gammas, betas, alphas))

    fwd = jax.jit(down_transition)
    out = jax.block_until_ready(
        fwd(x, w_down, gamma0, beta0, alpha0, conv_ws, gammas, betas, alphas))

    ref = _reference(x, w_down, gamma0, beta0, alpha0, conv_ws, gammas, betas, alphas)
    assert out.shape == (N, Cout, D // 2, H // 2, W // 2)
    err = float(jnp.max(jnp.abs(out - ref)))
    assert jnp.allclose(out, ref, atol=1e-2, rtol=1e-2), f"mismatch vs reference (max abs {err})"

    print("KERNEL_OK")
</pallas_src>

<mosaic_0001>
module attributes {stable_mosaic.version = 11 : i64} {
  func.func @_down_conv_kernel(%arg0: i32, %arg1: memref<32x1024xbf16, #tpu.memory_space<vmem>>, %arg2: memref<8x32xbf16, #tpu.memory_space<vmem>>, %arg3: memref<8x1024xf32, #tpu.memory_space<vmem>>, %arg4: memref<1x8x1xf32, #tpu.memory_space<vmem>>, %arg5: memref<1x8x1xf32, #tpu.memory_space<vmem>>) attributes {dimension_semantics = [#tpu.dimension_semantics<parallel>], iteration_bounds = array<i64: 1>, scalar_prefetch = 0 : i64, scratch_operands = 0 : i64, tpu.core_type = #tpu.core_type<tc>, window_params = [{transform_indices = @transform_0, window_bounds = array<i64: 32, 1024>}, {pipeline_mode = #tpu.pipeline_mode<synchronous>, transform_indices = @transform_1, window_bounds = array<i64: 8, 32>}, {transform_indices = @transform_2, window_bounds = array<i64: 8, 1024>}, {transform_indices = @transform_3, window_bounds = array<i64: 1, 8, 1>}, {transform_indices = @transform_4, window_bounds = array<i64: 1, 8, 1>}]} {
    %c0 = arith.constant 0 : index
    %c0_0 = arith.constant 0 : index
    %0 = vector.load %arg2[%c0, %c0_0] : memref<8x32xbf16, #tpu.memory_space<vmem>>, vector<8x32xbf16>
    %c0_1 = arith.constant 0 : index
    %c0_2 = arith.constant 0 : index
    %1 = vector.load %arg1[%c0_1, %c0_2] : memref<32x1024xbf16, #tpu.memory_space<vmem>>, vector<32x1024xbf16>
    %cst = arith.constant dense<0.000000e+00> : vector<8x1024xf32>
    %2 = tpu.matmul %0, %1, %cst {dimension_numbers = #tpu.dot_dimension_numbers<[1], [0], [0], [1], [0, 0, 1, 1], [], []>} : vector<8x32xbf16>, vector<32x1024xbf16>, vector<8x1024xf32> -> vector<8x1024xf32>
    %c0_3 = arith.constant 0 : index
    %c0_4 = arith.constant 0 : index
    %3 = vector.load %arg3[%c0_3, %c0_4] : memref<8x1024xf32, #tpu.memory_space<vmem>>, vector<8x1024xf32>
    tpu.vector_store %arg3[%c0_3, %c0_4], %2 {strides = array<i32>} : memref<8x1024xf32, #tpu.memory_space<vmem>>, vector<8x1024xf32>,
    %cst_5 = arith.constant dense<0.000000e+00> : vector<8xf32>
    %4 = vector.multi_reduction <add>, %2, %cst_5 [1] : vector<8x1024xf32> to vector<8xf32>
    %5 = vector.shape_cast %4 : vector<8xf32> to vector<8x1xf32>
    %c0_6 = arith.constant 0 : index
    %c0_7 = arith.constant 0 : index
    %c0_8 = arith.constant 0 : index
    %6 = vector.load %arg4[%c0_6, %c0_7, %c0_8] : memref<1x8x1xf32, #tpu.memory_space<vmem>>, vector<1x8x1xf32>
    %7 = vector.shape_cast %6 : vector<1x8x1xf32> to vector<8x1xf32>
    %8 = vector.shape_cast %5 : vector<8x1xf32> to vector<1x8x1xf32>
    tpu.vector_store %arg4[%c0_6, %c0_7, %c0_8], %8 {strides = array<i32>} : memref<1x8x1xf32, #tpu.memory_space<vmem>>, vector<1x8x1xf32>,
    %9 = arith.mulf %2, %2 : vector<8x1024xf32>
    %cst_9 = arith.constant dense<0.000000e+00> : vector<8xf32>
    %10 = vector.multi_reduction <add>, %9, %cst_9 [1] : vector<8x1024xf32> to vector<8xf32>
    %11 = vector.shape_cast %10 : vector<8xf32> to vector<8x1xf32>
    %c0_10 = arith.constant 0 : index
    %c0_11 = arith.constant 0 : index
    %c0_12 = arith.constant 0 : index
    %12 = vector.load %arg5[%c0_10, %c0_11, %c0_12] : memref<1x8x1xf32, #tpu.memory_space<vmem>>, vector<1x8x1xf32>
    %13 = vector.shape_cast %12 : vector<1x8x1xf32> to vector<8x1xf32>
    %14 = vector.shape_cast %11 : vector<8x1xf32> to vector<1x8x1xf32>
    tpu.vector_store %arg5[%c0_10, %c0_11, %c0_12], %14 {strides = array<i32>} : memref<1x8x1xf32, #tpu.memory_space<vmem>>, vector<1x8x1xf32>,
    return
  }
  func.func @transform_0(%arg0: i32) -> (i32, i32) {
    %c0_i32 = arith.constant 0 : i32
    %c0_i32_0 = arith.constant 0 : i32
    return %c0_i32, %arg0 : i32, i32
  }
  func.func @transform_1(%arg0: i32) -> (i32, i32) {
    %c0_i32 = arith.constant 0 : i32
    %c0_i32_0 = arith.constant 0 : i32
    %c0_i32_1 = arith.constant 0 : i32
    return %c0_i32, %c0_i32_0 : i32, i32
  }
  func.func @transform_2(%arg0: i32) -> (i32, i32) {
    %c0_i32 = arith.constant 0 : i32
    %c0_i32_0 = arith.constant 0 : i32
    return %c0_i32, %arg0 : i32, i32
  }
  func.func @transform_3(%arg0: i32) -> (i32, i32, i32) {
    %c0_i32 = arith.constant 0 : i32
    %c0_i32_0 = arith.constant 0 : i32
    %c0_i32_1 = arith.constant 0 : i32
    return %arg0, %c0_i32, %c0_i32_0 : i32, i32, i32
  }
  func.func @transform_4(%arg0: i32) -> (i32, i32, i32) {
    %c0_i32 = arith.constant 0 : i32
    %c0_i32_0 = arith.constant 0 : i32
    %c0_i32_1 = arith.constant 0 : i32
    return %arg0, %c0_i32, %c0_i32_0 : i32, i32, i32
  }
}

module attributes {stable_mosaic.version = 11 : i64} {
  func.func @_bn_prelu_kernel(%arg0: i32, %arg1: memref<8x1024xf32, #tpu.memory_space<vmem>>, %arg2: memref<8x1xf32, #tpu.memory_space<vmem>>, %arg3: memref<8x1xf32, #tpu.memory_space<vmem>>, %arg4: memref<8x1xf32, #tpu.memory_space<vmem>>, %arg5: memref<8x1024xf32, #tpu.memory_space<vmem>>) attributes {dimension_semantics = [#tpu.dimension_semantics<parallel>], iteration_bounds = array<i64: 1>, scalar_prefetch = 0 : i64, scratch_operands = 0 : i64, tpu.core_type = #tpu.core_type<tc>, window_params = [{transform_indices = @transform_0, window_bounds = array<i64: 8, 1024>}, {pipeline_mode = #tpu.pipeline_mode<synchronous>, transform_indices = @transform_1, window_bounds = array<i64: 8, 1>}, {pipeline_mode = #tpu.pipeline_mode<synchronous>, transform_indices = @transform_2, window_bounds = array<i64: 8, 1>}, {pipeline_mode = #tpu.pipeline_mode<synchronous>, transform_indices = @transform_3, window_bounds = array<i64: 8, 1>}, {transform_indices = @transform_4, window_bounds = array<i64: 8, 1024>}]} {
    %c0 = arith.constant 0 : index
    %c0_0 = arith.constant 0 : index
    %0 = vector.load %arg1[%c0, %c0_0] : memref<8x1024xf32, #tpu.memory_space<vmem>>, vector<8x1024xf32>
    %c0_1 = arith.constant 0 : index
    %c0_2 = arith.constant 0 : index
    %1 = vector.load %arg2[%c0_1, %c0_2] : memref<8x1xf32, #tpu.memory_space<vmem>>, vector<8x1xf32>
    %2 = vector.broadcast %1 : vector<8x1xf32> to vector<8x1024xf32>
    %3 = arith.mulf %0, %2 : vector<8x1024xf32>
    %c0_3 = arith.constant 0 : index
    %c0_4 = arith.constant 0 : index
    %4 = vector.load %arg3[%c0_3, %c0_4] : memref<8x1xf32, #tpu.memory_space<vmem>>, vector<8x1xf32>
    %5 = vector.broadcast %4 : vector<8x1xf32> to vector<8x1024xf32>
    %6 = arith.addf %3, %5 : vector<8x1024xf32>
    %cst = arith.constant 0.000000e+00 : f32
    %7 = vector.broadcast %cst : f32 to vector<8x1024xf32>
    %8 = arith.cmpf oge, %6, %7 : vector<8x1024xf32>
    %c0_5 = arith.constant 0 : index
    %c0_6 = arith.constant 0 : index
    %9 = vector.load %arg4[%c0_5, %c0_6] : memref<8x1xf32, #tpu.memory_space<vmem>>, vector<8x1xf32>
    %10 = vector.broadcast %9 : vector<8x1xf32> to vector<8x1024xf32>
    %11 = arith.mulf %10, %6 : vector<8x1024xf32>
    %12 = arith.select %8, %6, %11 : vector<8x1024xi1>, vector<8x1024xf32>
    %c0_7 = arith.constant 0 : index
    %c0_8 = arith.constant 0 : index
    %13 = vector.load %arg5[%c0_7, %c0_8] : memref<8x1024xf32, #tpu.memory_space<vmem>>, vector<8x1024xf32>
    tpu.vector_store %arg5[%c0_7, %c0_8], %12 {strides = array<i32>} : memref<8x1024xf32, #tpu.memory_space<vmem>>, vector<8x1024xf32>,
    return
  }
  func.func @transform_0(%arg0: i32) -> (i32, i32) {
    %c0_i32 = arith.constant 0 : i32
    %c0_i32_0 = arith.constant 0 : i32
    return %c0_i32, %arg0 : i32, i32
  }
  func.func @transform_1(%arg0: i32) -> (i32, i32) {
    %c0_i32 = arith.constant 0 : i32
    %c0_i32_0 = arith.constant 0 : i32
    %c0_i32_1 = arith.constant 0 : i32
    return %c0_i32, %c0_i32_0 : i32, i32
  }
  func.func @transform_2(%arg0: i32) -> (i32, i32) {
    %c0_i32 = arith.constant 0 : i32
    %c0_i32_0 = arith.constant 0 : i32
    %c0_i32_1 = arith.constant 0 : i32
    return %c0_i32, %c0_i32_0 : i32, i32
  }
  func.func @transform_3(%arg0: i32) -> (i32, i32) {
    %c0_i32 = arith.constant 0 : i32
    %c0_i32_0 = arith.constant 0 : i32
    %c0_i32_1 = arith.constant 0 : i32
    return %c0_i32, %c0_i32_0 : i32, i32
  }
  func.func @transform_4(%arg0: i32) -> (i32, i32) {
    %c0_i32 = arith.constant 0 : i32
    %c0_i32_0 = arith.constant 0 : i32
    return %c0_i32, %arg0 : i32, i32
  }
}

module attributes {stable_mosaic.version = 11 : i64} {
  func.func @kernel(%arg0: i32, %arg1: i32, %arg2: memref<1x4x8x256xbf16, #tpu.memory_space<vmem>>, %arg3: memref<1x4x8x256xbf16, #tpu.memory_space<vmem>>, %arg4: memref<1x96xf32, #tpu.memory_space<vmem>>, %arg5: memref<25x8x40xbf16, #tpu.memory_space<vmem>>, %arg6: memref<1x4x8x96xf32, #tpu.memory_space<vmem>>, %arg7: memref<1x8x1xf32, #tpu.memory_space<vmem>>, %arg8: memref<1x8x1xf32, #tpu.memory_space<vmem>>, %arg9: memref<8x96xf32, #tpu.memory_space<vmem>>, %arg10: memref<8x1xf32, #tpu.memory_space<vmem>>, %arg11: memref<8x1xf32, #tpu.memory_space<vmem>>) attributes {dimension_semantics = [#tpu.dimension_semantics<parallel>, #tpu.dimension_semantics<arbitrary>], iteration_bounds = array<i64: 2, 2>, scalar_prefetch = 0 : i64, scratch_operands = 3 : i64, tpu.core_type = #tpu.core_type<tc>, window_params = [{transform_indices = @transform_0, window_bounds = array<i64: 1, 4, 8, 256>}, {transform_indices = @transform_1, window_bounds = array<i64: 1, 4, 8, 256>}, {pipeline_mode = #tpu.pipeline_mode<synchronous>, transform_indices = @transform_2, window_bounds = array<i64: 1, 96>}, {pipeline_mode = #tpu.pipeline_mode<synchronous>, transform_indices = @transform_3, window_bounds = array<i64: 25, 8, 40>}, {transform_indices = @transform_4, window_bounds = array<i64: 1, 4, 8, 96>}, {transform_indices = @transform_5, window_bounds = array<i64: 1, 8, 1>}, {transform_indices = @transform_6, window_bounds = array<i64: 1, 8, 1>}]} {
    %c0_i32 = arith.constant 0 : i32
    %0 = arith.cmpi eq, %arg1, %c0_i32 : i32
    %1 = arith.extui %0 : i1 to i32
    %c0_i32_0 = arith.constant 0 : i32
    %2 = arith.cmpi ne, %1, %c0_i32_0 : i32
    scf.if %2 {
      %cst_870 = arith.constant 0.000000e+00 : f32
      %824 = vector.broadcast %cst_870 : f32 to vector<8x1xf32>
      %c0_871 = arith.constant 0 : index
      %c0_872 = arith.constant 0 : index
      %825 = vector.load %arg10[%c0_871, %c0_872] : memref<8x1xf32, #tpu.memory_space<vmem>>, vector<8x1xf32>
      tpu.vector_store %arg10[%c0_871, %c0_872], %824 {strides = array<i32>} : memref<8x1xf32, #tpu.memory_space<vmem>>, vector<8x1xf32>,
      %cst_873 = arith.constant 0.000000e+00 : f32
      %826 = vector.broadcast %cst_873 : f32 to vector<8x1xf32>
      %c0_874 = arith.constant 0 : index
      %c0_875 = arith.constant 0 : index
      %827 = vector.load %arg11[%c0_874, %c0_875] : memref<8x1xf32, #tpu.memory_space<vmem>>, vector<8x1xf32>
      tpu.vector_store %arg11[%c0_874, %c0_875], %826 {strides = array<i32>} : memref<8x1xf32, #tpu.memory_space<vmem>>, vector<8x1xf32>,
    } else {
    }
    %c0 = arith.constant 0 : index
    %c0_1 = arith.constant 0 : index
    %c0_2 = arith.constant 0 : index
    %c0_3 = arith.constant 0 : index
    %3 = vector.load %arg2[%c0, %c0_1, %c0_2, %c0_3] : memref<1x4x8x256xbf16, #tpu.memory_space<vmem>>, vector<1x4x8x256xbf16>
    %4 = vector.shape_cast %3 : vector<1x4x8x256xbf16> to vector<4x8x256xbf16>
    %c0_4 = arith.constant 0 : index
    %c0_5 = arith.constant 0 : index
    %c0_6 = arith.constant 0 : index
    %c0_7 = arith.constant 0 : index
    %5 = vector.load %arg3[%c0_4, %c0_5, %c0_6, %c0_7] : memref<1x4x8x256xbf16, #tpu.memory_space<vmem>>, vector<1x4x8x256xbf16>
    %6 = vector.shape_cast %5 : vector<1x4x8x256xbf16> to vector<4x8x256xbf16>
    %7 = tpu.concatenate %4, %6 in 0 : vector<4x8x256xbf16>, vector<4x8x256xbf16> -> vector<8x8x256xbf16>
    %c0_8 = arith.constant 0 : index
    %c0_9 = arith.constant 0 : index
    %8 = vector.load %arg4[%c0_8, %c0_9] : memref<1x96xf32, #tpu.memory_space<vmem>>, vector<1x96xf32>
    %9 = vector.extract_strided_slice %7 {offsets = [0, 0, 0], sizes = [5, 8, 256], strides = [1, 1, 1]} : vector<8x8x256xbf16> to vector<5x8x256xbf16>
    %10 = vector.shape_cast %9 : vector<5x8x256xbf16> to vector<40x256xbf16>
    %cst = arith.constant 0.000000e+00 : f32
    %11 = vector.broadcast %cst : f32 to vector<8x96xf32>
    %c0_10 = arith.constant 0 : index
    %c0_11 = arith.constant 0 : index
    %12 = vector.load %arg9[%c0_10, %c0_11] : memref<8x96xf32, #tpu.memory_space<vmem>>, vector<8x96xf32>
    tpu.vector_store %arg9[%c0_10, %c0_11], %11 {strides = array<i32>} : memref<8x96xf32, #tpu.memory_space<vmem>>, vector<8x96xf32>,
    %c0_12 = arith.constant 0 : index
    %c0_13 = arith.constant 0 : index
    %13 = vector.load %arg9[%c0_12, %c0_13] : memref<8x96xf32, #tpu.memory_space<vmem>>, vector<8x96xf32>
    %c0_14 = arith.constant 0 : index
    %c0_15 = arith.constant 0 : index
    %c0_16 = arith.constant 0 : index
    %14 = vector.load %arg5[%c0_14, %c0_15, %c0_16] : memref<25x8x40xbf16, #tpu.memory_space<vmem>>, vector<1x8x40xbf16>
    %15 = vector.shape_cast %14 : vector<1x8x40xbf16> to vector<8x40xbf16>
    %16 = vector.extract_strided_slice %10 {offsets = [0, 0], sizes = [40, 96], strides = [1, 1]} : vector<40x256xbf16> to vector<40x96xbf16>
    %cst_17 = arith.constant dense<0.000000e+00> : vector<8x96xf32>
    %17 = tpu.matmul %15, %16, %cst_17 {dimension_numbers = #tpu.dot_dimension_numbers<[1], [0], [0], [1], [0, 0, 1, 1], [], []>} : vector<8x40xbf16>, vector<40x96xbf16>, vector<8x96xf32> -> vector<8x96xf32>
    %18 = arith.addf %13, %17 : vector<8x96xf32>
    %c0_18 = arith.constant 0 : index
    %c0_19 = arith.constant 0 : index
    %19 = vector.load %arg9[%c0_18, %c0_19] : memref<8x96xf32, #tpu.memory_space<vmem>>, vector<8x96xf32>
    tpu.vector_store %arg9[%c0_18, %c0_19], %18 {strides = array<i32>} : memref<8x96xf32, #tpu.memory_space<vmem>>, vector<8x96xf32>,
    %c0_20 = arith.constant 0 : index
    %c0_21 = arith.constant 0 : index
    %20 = vector.load %arg9[%c0_20, %c0_21] : memref<8x96xf32, #tpu.memory_space<vmem>>, vector<8x96xf32>
    %c1 = arith.constant 1 : index
    %c0_22 = arith.constant 0 : index
    %c0_23 = arith.constant 0 : index
    %21 = vector.load %arg5[%c1, %c0_22, %c0_23] : memref<25x8x40xbf16, #tpu.memory_space<vmem>>, vector<1x8x40xbf16>
    %22 = vector.shape_cast %21 : vector<1x8x40xbf16> to vector<8x40xbf16>
    %23 = vector.extract_strided_slice %10 {offsets = [0, 1], sizes = [40, 96], strides = [1, 1]} : vector<40x256xbf16> to vector<40x96xbf16>
    %cst_24 = arith.constant dense<0.000000e+00> : vector<8x96xf32>
    %24 = tpu.matmul %22, %23, %cst_24 {dimension_numbers = #tpu.dot_dimension_numbers<[1], [0], [0], [1], [0, 0, 1, 1], [], []>} : vector<8x40xbf16>, vector<40x96xbf16>, vector<8x96xf32> -> vector<8x96xf32>
    %25 = arith.addf %20, %24 : vector<8x96xf32>
    %c0_25 = arith.constant 0 : index
    %c0_26 = arith.constant 0 : index
    %26 = vector.load %arg9[%c0_25, %c0_26] : memref<8x96xf32, #tpu.memory_space<vmem>>, vector<8x96xf32>
    tpu.vector_store %arg9[%c0_25, %c0_26], %25 {strides = array<i32>} : memref<8x96xf32, #tpu.memory_space<vmem>>, vector<8x96xf32>,
    %c0_27 = arith.constant 0 : index
    %c0_28 = arith.constant 0 : index
    %27 = vector.load %arg9[%c0_27, %c0_28] : memref<8x96xf32, #tpu.memory_space<vmem>>, vector<8x96xf32>
    %c2 = arith.constant 2 : index
    %c0_29 = arith.constant 0 : index
    %c0_30 = arith.constant 0 : index
    %28 = vector.load %arg5[%c2, %c0_29, %c0_30] : memref<25x8x40xbf16, #tpu.memory_space<vmem>>, vector<1x8x40xbf16>
    %29 = vector.shape_cast %28 : vector<1x8x40xbf16> to vector<8x40xbf16>
    %30 = vector.extract_strided_slice %10 {offsets = [0, 2], sizes = [40, 96], strides = [1, 1]} : vector<40x256xbf16> to vector<40x96xbf16>
    %cst_31 = arith.constant dense<0.000000e+00> : vector<8x96xf32>
    %31 = tpu.matmul %29, %30, %cst_31 {dimension_numbers = #tpu.dot_dimension_numbers<[1], [0], [0], [1], [0, 0, 1, 1], [], []>} : vector<8x40xbf16>, vector<40x96xbf16>, vector<8x96xf32> -> vector<8x96xf32>
    %32 = arith.addf %27, %31 : vector<8x96xf32>
    %c0_32 = arith.constant 0 : index
    %c0_33 = arith.constant 0 : index
    %33 = vector.load %arg9[%c0_32, %c0_33] : memref<8x96xf32, #tpu.memory_space<vmem>>, vector<8x96xf32>
    tpu.vector_store %arg9[%c0_32, %c0_33], %32 {strides = array<i32>} : memref<8x96xf32, #tpu.memory_space<vmem>>, vector<8x96xf32>,
    %c0_34 = arith.constant 0 : index
    %c0_35 = arith.constant 0 : index
    %34 = vector.load %arg9[%c0_34, %c0_35] : memref<8x96xf32, #tpu.memory_space<vmem>>, vector<8x96xf32>
    %c3 = arith.constant 3 : index
    %c0_36 = arith.constant 0 : index
    %c0_37 = arith.constant 0 : index
    %35 = vector.load %arg5[%c3, %c0_36, %c0_37] : memref<25x8x40xbf16, #tpu.memory_space<vmem>>, vector<1x8x40xbf16>
    %36 = vector.shape_cast %35 : vector<1x8x40xbf16> to vector<8x40xbf16>
    %37 = vector.extract_strided_slice %10 {offsets = [0, 3], sizes = [40, 96], strides = [1, 1]} : vector<40x256xbf16> to vector<40x96xbf16>
    %cst_38 = arith.constant dense<0.000000e+00> : vector<8x96xf32>
    %38 = tpu.matmul %36, %37, %cst_38 {dimension_numbers = #tpu.dot_dimension_numbers<[1], [0], [0], [1], [0, 0, 1, 1], [], []>} : vector<8x40xbf16>, vector<40x96xbf16>, vector<8x96xf32> -> vector<8x96xf32>
    %39 = arith.addf %34, %38 : vector<8x96xf32>
    %c0_39 = arith.constant 0 : index
    %c0_40 = arith.constant 0 : index
    %40 = vector.load %arg9[%c0_39, %c0_40] : memref<8x96xf32, #tpu.memory_space<vmem>>, vector<8x96xf32>
    tpu.vector_store %arg9[%c0_39, %c0_40], %39 {strides = array<i32>} : memref<8x96xf32, #tpu.memory_space<vmem>>, vector<8x96xf32>,
    %c0_41 = arith.constant 0 : index
    %c0_42 = arith.constant 0 : index
    %41 = vector.load %arg9[%c0_41, %c0_42] : memref<8x96xf32, #tpu.memory_space<vmem>>, vector<8x96xf32>
    %c4 = arith.constant 4 : index
    %c0_43 = arith.constant 0 : index
    %c0_44 = arith.constant 0 : index
    %42 = vector.load %arg5[%c4, %c0_43, %c0_44] : memref<25x8x40xbf16, #tpu.memory_space<vmem>>, vector<1x8x40xbf16>
    %43 = vector.shape_cast %42 : vector<1x8x40xbf16> to vector<8x40xbf16>
    %44 = vector.extract_strided_slice %10 {offsets = [0, 4], sizes = [40, 96], strides = [1, 1]} : vector<40x256xbf16> to vector<40x96xbf16>
    %cst_45 = arith.constant dense<0.000000e+00> : vector<8x96xf32>
    %45 = tpu.matmul %43, %44, %cst_45 {dimension_numbers = #tpu.dot_dimension_numbers<[1], [0], [0], [1], [0, 0, 1, 1], [], []>} : vector<8x40xbf16>, vector<40x96xbf16>, vector<8x96xf32> -> vector<8x96xf32>
    %46 = arith.addf %41, %45 : vector<8x96xf32>
    %c0_46 = arith.constant 0 : index
    %c0_47 = arith.constant 0 : index
    %47 = vector.load %arg9[%c0_46, %c0_47] : memref<8x96xf32, #tpu.memory_space<vmem>>, vector<8x96xf32>
    tpu.vector_store %arg9[%c0_46, %c0_47], %46 {strides = array<i32>} : memref<8x96xf32, #tpu.memory_space<vmem>>, vector<8x96xf32>,
    %c0_48 = arith.constant 0 : index
    %c0_49 = arith.constant 0 : index
    %48 = vector.load %arg9[%c0_48, %c0_49] : memref<8x96xf32, #tpu.memory_space<vmem>>, vector<8x96xf32>
    %c5 = arith.constant 5 : index
    %c0_50 = arith.constant 0 : index
    %c0_51 = arith.constant 0 : index
    %49 = vector.load %arg5[%c5, %c0_50, %c0_51] : memref<25x8x40xbf16, #tpu.memory_space<vmem>>, vector<1x8x40xbf16>
    %50 = vector.shape_cast %49 : vector<1x8x40xbf16> to vector<8x40xbf16>
    %51 = vector.extract_strided_slice %10 {offsets = [0, 12], sizes = [40, 96], strides = [1, 1]} : vector<40x256xbf16> to vector<40x96xbf16>
    %cst_52 = arith.constant dense<0.000000e+00> : vector<8x96xf32>
    %52 = tpu.matmul %50, %51, %cst_52 {dimension_numbers = #tpu.dot_dimension_numbers<[1], [0], [0], [1], [0, 0, 1, 1], [], []>} : vector<8x40xbf16>, vector<40x96xbf16>, vector<8x96xf32> -> vector<8x96xf32>
    %53 = arith.addf %48, %52 : vector<8x96xf32>
    %c0_53 = arith.constant 0 : index
    %c0_54 = arith.constant 0 : index
    %54 = vector.load %arg9[%c0_53, %c0_54] : memref<8x96xf32, #tpu.memory_space<vmem>>, vector<8x96xf32>
    tpu.vector_store %arg9[%c0_53, %c0_54], %53 {strides = array<i32>} : memref<8x96xf32, #tpu.memory_space<vmem>>, vector<8x96xf32>,
    %c0_55 = arith.constant 0 : index
    %c0_56 = arith.constant 0 : index
    %55 = vector.load %arg9[%c0_55, %c0_56] : memref<8x96xf32, #tpu.memory_space<vmem>>, vector<8x96xf32>
    %c6 = arith.constant 6 : index
    %c0_57 = arith.constant 0 : index
    %c0_58 = arith.constant 0 : index
    %56 = vector.load %arg5[%c6, %c0_57, %c0_58] : memref<25x8x40xbf16, #tpu.memory_space<vmem>>, vector<1x8x40xbf16>
    %57 = vector.shape_cast %56 : vector<1x8x40xbf16> to vector<8x40xbf16>
    %58 = vector.extract_strided_slice %10 {offsets = [0, 13], sizes = [40, 96], strides = [1, 1]} : vector<40x256xbf16> to vector<40x96xbf16>
    %cst_59 = arith.constant dense<0.000000e+00> : vector<8x96xf32>
    %59 = tpu.matmul %57, %58, %cst_59 {dimension_numbers = #tpu.dot_dimension_numbers<[1], [0], [0], [1], [0, 0, 1, 1], [], []>} : vector<8x40xbf16>, vector<40x96xbf16>, vector<8x96xf32> -> vector<8x96xf32>
    %60 = arith.addf %55, %59 : vector<8x96xf32>
    %c0_60 = arith.constant 0 : index
    %c0_61 = arith.constant 0 : index
    %61 = vector.load %arg9[%c0_60, %c0_61] : memref<8x96xf32, #tpu.memory_space<vmem>>, vector<8x96xf32>
    tpu.vector_store %arg9[%c0_60, %c0_61], %60 {strides = array<i32>} : memref<8x96xf32, #tpu.memory_space<vmem>>, vector<8x96xf32>,
    %c0_62 = arith.constant 0 : index
    %c0_63 = arith.constant 0 : index
    %62 = vector.load %arg9[%c0_62, %c0_63] : memref<8x96xf32, #tpu.memory_space<vmem>>, vector<8x96xf32>
    %c7 = arith.constant 7 : index
    %c0_64 = arith.constant 0 : index
    %c0_65 = arith.constant 0 : index
    %63 = vector.load %arg5[%c7, %c0_64, %c0_65] : memref<25x8x40xbf16, #tpu.memory_space<vmem>>, vector<1x8x40xbf16>
    %64 = vector.shape_cast %63 : vector<1x8x40xbf16> to vector<8x40xbf16>
    %65 = vector.extract_strided_slice %10 {offsets = [0, 14], sizes = [40, 96], strides = [1, 1]} : vector<40x256xbf16> to vector<40x96xbf16>
    %cst_66 = arith.constant dense<0.000000e+00> : vector<8x96xf32>
    %66 = tpu.matmul %64, %65, %cst_66 {dimension_numbers = #tpu.dot_dimension_numbers<[1], [0], [0], [1], [0, 0, 1, 1], [], []>} : vector<8x40xbf16>, vector<40x96xbf16>, vector<8x96xf32> -> vector<8x96xf32>
    %67 = arith.addf %62, %66 : vector<8x96xf32>
    %c0_67 = arith.constant 0 : index
    %c0_68 = arith.constant 0 : index
    %68 = vector.load %arg9[%c0_67, %c0_68] : memref<8x96xf32, #tpu.memory_space<vmem>>, vector<8x96xf32>
    tpu.vector_store %arg9[%c0_67, %c0_68], %67 {strides = array<i32>} : memref<8x96xf32, #tpu.memory_space<vmem>>, vector<8x96xf32>,
    %c0_69 = arith.constant 0 : index
    %c0_70 = arith.constant 0 : index
    %69 = vector.load %arg9[%c0_69, %c0_70] : memref<8x96xf32, #tpu.memory_space<vmem>>, vector<8x96xf32>
    %c8 = arith.constant 8 : index
    %c0_71 = arith.constant 0 : index
    %c0_72 = arith.constant 0 : index
    %70 = vector.load %arg5[%c8, %c0_71, %c0_72] : memref<25x8x40xbf16, #tpu.memory_space<vmem>>, vector<1x8x40xbf16>
    %71 = vector.shape_cast %70 : vector<1x8x40xbf16> to vector<8x40xbf16>
    %72 = vector.extract_strided_slice %10 {offsets = [0, 15], sizes = [40, 96], strides = [1, 1]} : vector<40x256xbf16> to vector<40x96xbf16>
    %cst_73 = arith.constant dense<0.000000e+00> : vector<8x96xf32>
    %73 = tpu.matmul %71, %72, %cst_73 {dimension_numbers = #tpu.dot_dimension_numbers<[1], [0], [0], [1], [0, 0, 1, 1], [], []>} : vector<8x40xbf16>, vector<40x96xbf16>, vector<8x96xf32> -> vector<8x96xf32>
    %74 = arith.addf %69, %73 : vector<8x96xf32>
    %c0_74 = arith.constant 0 : index
    %c0_75 = arith.constant 0 : index
    %75 = vector.load %arg9[%c0_74, %c0_75] : memref<8x96xf32, #tpu.memory_space<vmem>>, vector<8x96xf32>
    tpu.vector_store %arg9[%c0_74, %c0_75], %74 {strides = array<i32>} : memref<8x96xf32, #tpu.memory_space<vmem>>, vector<8x96xf32>,
    %c0_76 = arith.constant 0 : index
    %c0_77 = arith.constant 0 : index
    %76 = vector.load %arg9[%c0_76, %c0_77] : memref<8x96xf32, #tpu.memory_space<vmem>>, vector<8x96xf32>
    %c9 = arith.constant 9 : index
    %c0_78 = arith.constant 0 : index
    %c0_79 = arith.constant 0 : index
    %77 = vector.load %arg5[%c9, %c0_78, %c0_79] : memref<25x8x40xbf16, #tpu.memory_space<vmem>>, vector<1x8x40xbf16>
    %78 = vector.shape_cast %77 : vector<1x8x40xbf16> to vector<8x40xbf16>
    %79 = vector.extract_strided_slice %10 {offsets = [0, 16], sizes = [40, 96], strides = [1, 1]} : vector<40x256xbf16> to vector<40x96xbf16>
    %cst_80 = arith.constant dense<0.000000e+00> : vector<8x96xf32>
    %80 = tpu.matmul %78, %79, %cst_80 {dimension_numbers = #tpu.dot_dimension_numbers<[1], [0], [0], [1], [0, 0, 1, 1], [], []>} : vector<8x40xbf16>, vector<40x96xbf16>, vector<8x96xf32> -> vector<8x96xf32>
    %81 = arith.addf %76, %80 : vector<8x96xf32>
    %c0_81 = arith.constant 0 : index
    %c0_82 = arith.constant 0 : index
    %82 = vector.load %arg9[%c0_81, %c0_82] : memref<8x96xf32, #tpu.memory_space<vmem>>, vector<8x96xf32>
    tpu.vector_store %arg9[%c0_81, %c0_82], %81 {strides = array<i32>} : memref<8x96xf32, #tpu.memory_space<vmem>>, vector<8x96xf32>,
    %c0_83 = arith.constant 0 : index
    %c0_84 = arith.constant 0 : index
    %83 = vector.load %arg9[%c0_83, %c0_84] : memref<8x96xf32, #tpu.memory_space<vmem>>, vector<8x96xf32>
    %c10 = arith.constant 10 : index
    %c0_85 = arith.constant 0 : index
    %c0_86 = arith.constant 0 : index
    %84 = vector.load %arg5[%c10, %c0_85, %c0_86] : memref<25x8x40xbf16, #tpu.memory_space<vmem>>, vector<1x8x40xbf16>
    %85 = vector.shape_cast %84 : vector<1x8x40xbf16> to vector<8x40xbf16>
    %86 = vector.extract_strided_slice %10 {offsets = [0, 24], sizes = [40, 96], strides = [1, 1]} : vector<40x256xbf16> to vector<40x96xbf16>
    %cst_87 = arith.constant dense<0.000000e+00> : vector<8x96xf32>
    %87 = tpu.matmul %85, %86, %cst_87 {dimension_numbers = #tpu.dot_dimension_numbers<[1], [0], [0], [1], [0, 0, 1, 1], [], []>} : vector<8x40xbf16>, vector<40x96xbf16>, vector<8x96xf32> -> vector<8x96xf32>
    %88 = arith.addf %83, %87 : vector<8x96xf32>
    %c0_88 = arith.constant 0 : index
    %c0_89 = arith.constant 0 : index
    %89 = vector.load %arg9[%c0_88, %c0_89] : memref<8x96xf32, #tpu.memory_space<vmem>>, vector<8x96xf32>
    tpu.vector_store %arg9[%c0_88, %c0_89], %88 {strides = array<i32>} : memref<8x96xf32, #tpu.memory_space<vmem>>, vector<8x96xf32>,
    %c0_90 = arith.constant 0 : index
    %c0_91 = arith.constant 0 : index
    %90 = vector.load %arg9[%c0_90, %c0_91] : memref<8x96xf32, #tpu.memory_space<vmem>>, vector<8x96xf32>
    %c11 = arith.constant 11 : index
    %c0_92 = arith.constant 0 : index
    %c0_93 = arith.constant 0 : index
    %91 = vector.load %arg5[%c11, %c0_92, %c0_93] : memref<25x8x40xbf16, #tpu.memory_space<vmem>>, vector<1x8x40xbf16>
    %92 = vector.shape_cast %91 : vector<1x8x40xbf16> to vector<8x40xbf16>
    %93 = vector.extract_strided_slice %10 {offsets = [0, 25], sizes = [40, 96], strides = [1, 1]} : vector<40x256xbf16> to vector<40x96xbf16>
    %cst_94 = arith.constant dense<0.000000e+00> : vector<8x96xf32>
    %94 = tpu.matmul %92, %93, %cst_94 {dimension_numbers = #tpu.dot_dimension_numbers<[1], [0], [0], [1], [0, 0, 1, 1], [], []>} : vector<8x40xbf16>, vector<40x96xbf16>, vector<8x96xf32> -> vector<8x96xf32>
    %95 = arith.addf %90, %94 : vector<8x96xf32>
    %c0_95 = arith.constant 0 : index
    %c0_96 = arith.constant 0 : index
    %96 = vector.load %arg9[%c0_95, %c0_96] : memref<8x96xf32, #tpu.memory_space<vmem>>, vector<8x96xf32>
    tpu.vector_store %arg9[%c0_95, %c0_96], %95 {strides = array<i32>} : memref<8x96xf32, #tpu.memory_space<vmem>>, vector<8x96xf32>,
    %c0_97 = arith.constant 0 : index
    %c0_98 = arith.constant 0 : index
    %97 = vector.load %arg9[%c0_97, %c0_98] : memref<8x96xf32, #tpu.memory_space<vmem>>, vector<8x96xf32>
    %c12 = arith.constant 12 : index
    %c0_99 = arith.constant 0 : index
    %c0_100 = arith.constant 0 : index
    %98 = vector.load %arg5[%c12, %c0_99, %c0_100] : memref<25x8x40xbf16, #tpu.memory_space<vmem>>, vector<1x8x40xbf16>
    %99 = vector.shape_cast %98 : vector<1x8x40xbf16> to vector<8x40xbf16>
    %100 = vector.extract_strided_slice %10 {offsets = [0, 26], sizes = [40, 96], strides = [1, 1]} : vector<40x256xbf16> to vector<40x96xbf16>
    %cst_101 = arith.constant dense<0.000000e+00> : vector<8x96xf32>
    %101 = tpu.matmul %99, %100, %cst_101 {dimension_numbers = #tpu.dot_dimension_numbers<[1], [0], [0], [1], [0, 0, 1, 1], [], []>} : vector<8x40xbf16>, vector<40x96xbf16>, vector<8x96xf32> -> vector<8x96xf32>
    %102 = arith.addf %97, %101 : vector<8x96xf32>
    %c0_102 = arith.constant 0 : index
    %c0_103 = arith.constant 0 : index
    %103 = vector.load %arg9[%c0_102, %c0_103] : memref<8x96xf32, #tpu.memory_space<vmem>>, vector<8x96xf32>
    tpu.vector_store %arg9[%c0_102, %c0_103], %102 {strides = array<i32>} : memref<8x96xf32, #tpu.memory_space<vmem>>, vector<8x96xf32>,
    %c0_104 = arith.constant 0 : index
    %c0_105 = arith.constant 0 : index
    %104 = vector.load %arg9[%c0_104, %c0_105] : memref<8x96xf32, #tpu.memory_space<vmem>>, vector<8x96xf32>
    %c13 = arith.constant 13 : index
    %c0_106 = arith.constant 0 : index
    %c0_107 = arith.constant 0 : index
    %105 = vector.load %arg5[%c13, %c0_106, %c0_107] : memref<25x8x40xbf16, #tpu.memory_space<vmem>>, vector<1x8x40xbf16>
    %106 = vector.shape_cast %105 : vector<1x8x40xbf16> to vector<8x40xbf16>
    %107 = vector.extract_strided_slice %10 {offsets = [0, 27], sizes = [40, 96], strides = [1, 1]} : vector<40x256xbf16> to vector<40x96xbf16>
    %cst_108 = arith.constant dense<0.000000e+00> : vector<8x96xf32>
    %108 = tpu.matmul %106, %107, %cst_108 {dimension_numbers = #tpu.dot_dimension_numbers<[1], [0], [0], [1], [0, 0, 1, 1], [], []>} : vector<8x40xbf16>, vector<40x96xbf16>, vector<8x96xf32> -> vector<8x96xf32>
    %109 = arith.addf %104, %108 : vector<8x96xf32>
    %c0_109 = arith.constant 0 : index
    %c0_110 = arith.constant 0 : index
    %110 = vector.load %arg9[%c0_109, %c0_110] : memref<8x96xf32, #tpu.memory_space<vmem>>, vector<8x96xf32>
    tpu.vector_store %arg9[%c0_109, %c0_110], %109 {strides = array<i32>} : memref<8x96xf32, #tpu.memory_space<vmem>>, vector<8x96xf32>,
    %c0_111 = arith.constant 0 : index
    %c0_112 = arith.constant 0 : index
    %111 = vector.load %arg9[%c0_111, %c0_112] : memref<8x96xf32, #tpu.memory_space<vmem>>, vector<8x96xf32>
    %c14 = arith.constant 14 : index
    %c0_113 = arith.constant 0 : index
    %c0_114 = arith.constant 0 : index
    %112 = vector.load %arg5[%c14, %c0_113, %c0_114] : memref<25x8x40xbf16, #tpu.memory_space<vmem>>, vector<1x8x40xbf16>
    %113 = vector.shape_cast %112 : vector<1x8x40xbf16> to vector<8x40xbf16>
    %114 = vector.extract_strided_slice %10 {offsets = [0, 28], sizes = [40, 96], strides = [1, 1]} : vector<40x256xbf16> to vector<40x96xbf16>
    %cst_115 = arith.constant dense<0.000000e+00> : vector<8x96xf32>
    %115 = tpu.matmul %113, %114, %cst_115 {dimension_numbers = #tpu.dot_dimension_numbers<[1], [0], [0], [1], [0, 0, 1, 1], [], []>} : vector<8x40xbf16>, vector<40x96xbf16>, vector<8x96xf32> -> vector<8x96xf32>
    %116 = arith.addf %111, %115 : vector<8x96xf32>
    %c0_116 = arith.constant 0 : index
    %c0_117 = arith.constant 0 : index
    %117 = vector.load %arg9[%c0_116, %c0_117] : memref<8x96xf32, #tpu.memory_space<vmem>>, vector<8x96xf32>
    tpu.vector_store %arg9[%c0_116, %c0_117], %116 {strides = array<i32>} : memref<8x96xf32, #tpu.memory_space<vmem>>, vector<8x96xf32>,
    %c0_118 = arith.constant 0 : index
    %c0_119 = arith.constant 0 : index
    %118 = vector.load %arg9[%c0_118, %c0_119] : memref<8x96xf32, #tpu.memory_space<vmem>>, vector<8x96xf32>
    %c15 = arith.constant 15 : index
    %c0_120 = arith.constant 0 : index
    %c0_121 = arith.constant 0 : index
    %119 = vector.load %arg5[%c15, %c0_120, %c0_121] : memref<25x8x40xbf16, #tpu.memory_space<vmem>>, vector<1x8x40xbf16>
    %120 = vector.shape_cast %119 : vector<1x8x40xbf16> to vector<8x40xbf16>
    %121 = vector.extract_strided_slice %10 {offsets = [0, 36], sizes = [40, 96], strides = [1, 1]} : vector<40x256xbf16> to vector<40x96xbf16>
    %cst_122 = arith.constant dense<0.000000e+00> : vector<8x96xf32>
    %122 = tpu.matmul %120, %121, %cst_122 {dimension_numbers = #tpu.dot_dimension_numbers<[1], [0], [0], [1], [0, 0, 1, 1], [], []>} : vector<8x40xbf16>, vector<40x96xbf16>, vector<8x96xf32> -> vector<8x96xf32>
    %123 = arith.addf %118, %122 : vector<8x96xf32>
    %c0_123 = arith.constant 0 : index
    %c0_124 = arith.constant 0 : index
    %124 = vector.load %arg9[%c0_123, %c0_124] : memref<8x96xf32, #tpu.memory_space<vmem>>, vector<8x96xf32>
    tpu.vector_store %arg9[%c0_123, %c0_124], %123 {strides = array<i32>} : memref<8x96xf32, #tpu.memory_space<vmem>>, vector<8x96xf32>,
    %c0_125 = arith.constant 0 : index
    %c0_126 = arith.constant 0 : index
    %125 = vector.load %arg9[%c0_125, %c0_126] : memref<8x96xf32, #tpu.memory_space<vmem>>, vector<8x96xf32>
    %c16 = arith.constant 16 : index
    %c0_127 = arith.constant 0 : index
    %c0_128 = arith.constant 0 : index
    %126 = vector.load %arg5[%c16, %c0_127, %c0_128] : memref<25x8x40xbf16, #tpu.memory_space<vmem>>, vector<1x8x40xbf16>
    %127 = vector.shape_cast %126 : vector<1x8x40xbf16> to vector<8x40xbf16>
    %128 = vector.extract_strided_slice %10 {offsets = [0, 37], sizes = [40, 96], strides = [1, 1]} : vector<40x256xbf16> to vector<40x96xbf16>
    %cst_129 = arith.constant dense<0.000000e+00> : vector<8x96xf32>
    %129 = tpu.matmul %127, %128, %cst_129 {dimension_numbers = #tpu.dot_dimension_numbers<[1], [0], [0], [1], [0, 0, 1, 1], [], []>} : vector<8x40xbf16>, vector<40x96xbf16>, vector<8x96xf32> -> vector<8x96xf32>
    %130 = arith.addf %125, %129 : vector<8x96xf32>
    %c0_130 = arith.constant 0 : index
    %c0_131 = arith.constant 0 : index
    %131 = vector.load %arg9[%c0_130, %c0_131] : memref<8x96xf32, #tpu.memory_space<vmem>>, vector<8x96xf32>
    tpu.vector_store %arg9[%c0_130, %c0_131], %130 {strides = array<i32>} : memref<8x96xf32, #tpu.memory_space<vmem>>, vector<8x96xf32>,
    %c0_132 = arith.constant 0 : index
    %c0_133 = arith.constant 0 : index
    %132 = vector.load %arg9[%c0_132, %c0_133] : memref<8x96xf32, #tpu.memory_space<vmem>>, vector<8x96xf32>
    %c17 = arith.constant 17 : index
    %c0_134 = arith.constant 0 : index
    %c0_135 = arith.constant 0 : index
    %133 = vector.load %arg5[%c17, %c0_134, %c0_135] : memref<25x8x40xbf16, #tpu.memory_space<vmem>>, vector<1x8x40xbf16>
    %134 = vector.shape_cast %133 : vector<1x8x40xbf16> to vector<8x40xbf16>
    %135 = vector.extract_strided_slice %10 {offsets = [0, 38], sizes = [40, 96], strides = [1, 1]} : vector<40x256xbf16> to vector<40x96xbf16>
    %cst_136 = arith.constant dense<0.000000e+00> : vector<8x96xf32>
    %136 = tpu.matmul %134, %135, %cst_136 {dimension_numbers = #tpu.dot_dimension_numbers<[1], [0], [0], [1], [0, 0, 1, 1], [], []>} : vector<8x40xbf16>, vector<40x96xbf16>, vector<8x96xf32> -> vector<8x96xf32>
    %137 = arith.addf %132, %136 : vector<8x96xf32>
    %c0_137 = arith.constant 0 : index
    %c0_138 = arith.constant 0 : index
    %138 = vector.load %arg9[%c0_137, %c0_138] : memref<8x96xf32, #tpu.memory_space<vmem>>, vector<8x96xf32>
    tpu.vector_store %arg9[%c0_137, %c0_138], %137 {strides = array<i32>} : memref<8x96xf32, #tpu.memory_space<vmem>>, vector<8x96xf32>,
    %c0_139 = arith.constant 0 : index
    %c0_140 = arith.constant 0 : index
    %139 = vector.load %arg9[%c0_139, %c0_140] : memref<8x96xf32, #tpu.memory_space<vmem>>, vector<8x96xf32>
    %c18 = arith.constant 18 : index
    %c0_141 = arith.constant 0 : index
    %c0_142 = arith.constant 0 : index
    %140 = vector.load %arg5[%c18, %c0_141, %c0_142] : memref<25x8x40xbf16, #tpu.memory_space<vmem>>, vector<1x8x40xbf16>
    %141 = vector.shape_cast %140 : vector<1x8x40xbf16> to vector<8x40xbf16>
    %142 = vector.extract_strided_slice %10 {offsets = [0, 39], sizes = [40, 96], strides = [1, 1]} : vector<40x256xbf16> to vector<40x96xbf16>
    %cst_143 = arith.constant dense<0.000000e+00> : vector<8x96xf32>
    %143 = tpu.matmul %141, %142, %cst_143 {dimension_numbers = #tpu.dot_dimension_numbers<[1], [0], [0], [1], [0, 0, 1, 1], [], []>} : vector<8x40xbf16>, vector<40x96xbf16>, vector<8x96xf32> -> vector<8x96xf32>
    %144 = arith.addf %139, %143 : vector<8x96xf32>
    %c0_144 = arith.constant 0 : index
    %c0_145 = arith.constant 0 : index
    %145 = vector.load %arg9[%c0_144, %c0_145] : memref<8x96xf32, #tpu.memory_space<vmem>>, vector<8x96xf32>
    tpu.vector_store %arg9[%c0_144, %c0_145], %144 {strides = array<i32>} : memref<8x96xf32, #tpu.memory_space<vmem>>, vector<8x96xf32>,
    %c0_146 = arith.constant 0 : index
    %c0_147 = arith.constant 0 : index
    %146 = vector.load %arg9[%c0_146, %c0_147] : memref<8x96xf32, #tpu.memory_space<vmem>>, vector<8x96xf32>
    %c19 = arith.constant 19 : index
    %c0_148 = arith.constant 0 : index
    %c0_149 = arith.constant 0 : index
    %147 = vector.load %arg5[%c19, %c0_148, %c0_149] : memref<25x8x40xbf16, #tpu.memory_space<vmem>>, vector<1x8x40xbf16>
    %148 = vector.shape_cast %147 : vector<1x8x40xbf16> to vector<8x40xbf16>
    %149 = vector.extract_strided_slice %10 {offsets = [0, 40], sizes = [40, 96], strides = [1, 1]} : vector<40x256xbf16> to vector<40x96xbf16>
    %cst_150 = arith.constant dense<0.000000e+00> : vector<8x96xf32>
    %150 = tpu.matmul %148, %149, %cst_150 {dimension_numbers = #tpu.dot_dimension_numbers<[1], [0], [0], [1], [0, 0, 1, 1], [], []>} : vector<8x40xbf16>, vector<40x96xbf16>, vector<8x96xf32> -> vector<8x96xf32>
    %151 = arith.addf %146, %150 : vector<8x96xf32>
    %c0_151 = arith.constant 0 : index
    %c0_152 = arith.constant 0 : index
    %152 = vector.load %arg9[%c0_151, %c0_152] : memref<8x96xf32, #tpu.memory_space<vmem>>, vector<8x96xf32>
    tpu.vector_store %arg9[%c0_151, %c0_152], %151 {strides = array<i32>} : memref<8x96xf32, #tpu.memory_space<vmem>>, vector<8x96xf32>,
    %c0_153 = arith.constant 0 : index
    %c0_154 = arith.constant 0 : index
    %153 = vector.load %arg9[%c0_153, %c0_154] : memref<8x96xf32, #tpu.memory_space<vmem>>, vector<8x96xf32>
    %c20 = arith.constant 20 : index
    %c0_155 = arith.constant 0 : index
    %c0_156 = arith.constant 0 : index
    %154 = vector.load %arg5[%c20, %c0_155, %c0_156] : memref<25x8x40xbf16, #tpu.memory_space<vmem>>, vector<1x8x40xbf16>
    %155 = vector.shape_cast %154 : vector<1x8x40xbf16> to vector<8x40xbf16>
    %156 = vector.extract_strided_slice %10 {offsets = [0, 48], sizes = [40, 96], strides = [1, 1]} : vector<40x256xbf16> to vector<40x96xbf16>
    %cst_157 = arith.constant dense<0.000000e+00> : vector<8x96xf32>
    %157 = tpu.matmul %155, %156, %cst_157 {dimension_numbers = #tpu.dot_dimension_numbers<[1], [0], [0], [1], [0, 0, 1, 1], [], []>} : vector<8x40xbf16>, vector<40x96xbf16>, vector<8x96xf32> -> vector<8x96xf32>
    %158 = arith.addf %153, %157 : vector<8x96xf32>
    %c0_158 = arith.constant 0 : index
    %c0_159 = arith.constant 0 : index
    %159 = vector.load %arg9[%c0_158, %c0_159] : memref<8x96xf32, #tpu.memory_space<vmem>>, vector<8x96xf32>
    tpu.vector_store %arg9[%c0_158, %c0_159], %158 {strides = array<i32>} : memref<8x96xf32, #tpu.memory_space<vmem>>, vector<8x96xf32>,
    %c0_160 = arith.constant 0 : index
    %c0_161 = arith.constant 0 : index
    %160 = vector.load %arg9[%c0_160, %c0_161] : memref<8x96xf32, #tpu.memory_space<vmem>>, vector<8x96xf32>
    %c21 = arith.constant 21 : index
    %c0_162 = arith.constant 0 : index
    %c0_163 = arith.constant 0 : index
    %161 = vector.load %arg5[%c21, %c0_162, %c0_163] : memref<25x8x40xbf16, #tpu.memory_space<vmem>>, vector<1x8x40xbf16>
    %162 = vector.shape_cast %161 : vector<1x8x40xbf16> to vector<8x40xbf16>
    %163 = vector.extract_strided_slice %10 {offsets = [0, 49], sizes = [40, 96], strides = [1, 1]} : vector<40x256xbf16> to vector<40x96xbf16>
    %cst_164 = arith.constant dense<0.000000e+00> : vector<8x96xf32>
    %164 = tpu.matmul %162, %163, %cst_164 {dimension_numbers = #tpu.dot_dimension_numbers<[1], [0], [0], [1], [0, 0, 1, 1], [], []>} : vector<8x40xbf16>, vector<40x96xbf16>, vector<8x96xf32> -> vector<8x96xf32>
    %165 = arith.addf %160, %164 : vector<8x96xf32>
    %c0_165 = arith.constant 0 : index
    %c0_166 = arith.constant 0 : index
    %166 = vector.load %arg9[%c0_165, %c0_166] : memref<8x96xf32, #tpu.memory_space<vmem>>, vector<8x96xf32>
    tpu.vector_store %arg9[%c0_165, %c0_166], %165 {strides = array<i32>} : memref<8x96xf32, #tpu.memory_space<vmem>>, vector<8x96xf32>,
    %c0_167 = arith.constant 0 : index
    %c0_168 = arith.constant 0 : index
    %167 = vector.load %arg9[%c0_167, %c0_168] : memref<8x96xf32, #tpu.memory_space<vmem>>, vector<8x96xf32>
    %c22 = arith.constant 22 : index
    %c0_169 = arith.constant 0 : index
    %c0_170 = arith.constant 0 : index
    %168 = vector.load %arg5[%c22, %c0_169, %c0_170] : memref<25x8x40xbf16, #tpu.memory_space<vmem>>, vector<1x8x40xbf16>
    %169 = vector.shape_cast %168 : vector<1x8x40xbf16> to vector<8x40xbf16>
    %170 = vector.extract_strided_slice %10 {offsets = [0, 50], sizes = [40, 96], strides = [1, 1]} : vector<40x256xbf16> to vector<40x96xbf16>
    %cst_171 = arith.constant dense<0.000000e+00> : vector<8x96xf32>
    %171 = tpu.matmul %169, %170, %cst_171 {dimension_numbers = #tpu.dot_dimension_numbers<[1], [0], [0], [1], [0, 0, 1, 1], [], []>} : vector<8x40xbf16>, vector<40x96xbf16>, vector<8x96xf32> -> vector<8x96xf32>
    %172 = arith.addf %167, %171 : vector<8x96xf32>
    %c0_172 = arith.constant 0 : index
    %c0_173 = arith.constant 0 : index
    %173 = vector.load %arg9[%c0_172, %c0_173] : memref<8x96xf32, #tpu.memory_space<vmem>>, vector<8x96xf32>
    tpu.vector_store %arg9[%c0_172, %c0_173], %172 {strides = array<i32>} : memref<8x96xf32, #tpu.memory_space<vmem>>, vector<8x96xf32>,
    %c0_174 = arith.constant 0 : index
    %c0_175 = arith.constant 0 : index
    %174 = vector.load %arg9[%c0_174, %c0_175] : memref<8x96xf32, #tpu.memory_space<vmem>>, vector<8x96xf32>
    %c23 = arith.constant 23 : index
    %c0_176 = arith.constant 0 : index
    %c0_177 = arith.constant 0 : index
    %175 = vector.load %arg5[%c23, %c0_176, %c0_177] : memref<25x8x40xbf16, #tpu.memory_space<vmem>>, vector<1x8x40xbf16>
    %176 = vector.shape_cast %175 : vector<1x8x40xbf16> to vector<8x40xbf16>
    %177 = vector.extract_strided_slice %10 {offsets = [0, 51], sizes = [40, 96], strides = [1, 1]} : vector<40x256xbf16> to vector<40x96xbf16>
    %cst_178 = arith.constant dense<0.000000e+00> : vector<8x96xf32>
    %178 = tpu.matmul %176, %177, %cst_178 {dimension_numbers = #tpu.dot_dimension_numbers<[1], [0], [0], [1], [0, 0, 1, 1], [], []>} : vector<8x40xbf16>, vector<40x96xbf16>, vector<8x96xf32> -> vector<8x96xf32>
    %179 = arith.addf %174, %178 : vector<8x96xf32>
    %c0_179 = arith.constant 0 : index
    %c0_180 = arith.constant 0 : index
    %180 = vector.load %arg9[%c0_179, %c0_180] : memref<8x96xf32, #tpu.memory_space<vmem>>, vector<8x96xf32>
    tpu.vector_store %arg9[%c0_179, %c0_180], %179 {strides = array<i32>} : memref<8x96xf32, #tpu.memory_space<vmem>>, vector<8x96xf32>,
    %c0_181 = arith.constant 0 : index
    %c0_182 = arith.constant 0 : index
    %181 = vector.load %arg9[%c0_181, %c0_182] : memref<8x96xf32, #tpu.memory_space<vmem>>, vector<8x96xf32>
    %c24 = arith.constant 24 : index
    %c0_183 = arith.constant 0 : index
    %c0_184 = arith.constant 0 : index
    %182 = vector.load %arg5[%c24, %c0_183, %c0_184] : memref<25x8x40xbf16, #tpu.memory_space<vmem>>, vector<1x8x40xbf16>
    %183 = vector.shape_cast %182 : vector<1x8x40xbf16> to vector<8x40xbf16>
    %184 = vector.extract_strided_slice %10 {offsets = [0, 52], sizes = [40, 96], strides = [1, 1]} : vector<40x256xbf16> to vector<40x96xbf16>
    %cst_185 = arith.constant dense<0.000000e+00> : vector<8x96xf32>
    %185 = tpu.matmul %183, %184, %cst_185 {dimension_numbers = #tpu.dot_dimension_numbers<[1], [0], [0], [1], [0, 0, 1, 1], [], []>} : vector<8x40xbf16>, vector<40x96xbf16>, vector<8x96xf32> -> vector<8x96xf32>
    %186 = arith.addf %181, %185 : vector<8x96xf32>
    %c0_186 = arith.constant 0 : index
    %c0_187 = arith.constant 0 : index
    %187 = vector.load %arg9[%c0_186, %c0_187] : memref<8x96xf32, #tpu.memory_space<vmem>>, vector<8x96xf32>
    tpu.vector_store %arg9[%c0_186, %c0_187], %186 {strides = array<i32>} : memref<8x96xf32, #tpu.memory_space<vmem>>, vector<8x96xf32>,
    %c0_188 = arith.constant 0 : index
    %c0_189 = arith.constant 0 : index
    %188 = vector.load %arg9[%c0_188, %c0_189] : memref<8x96xf32, #tpu.memory_space<vmem>>, vector<8x96xf32>
    %c0_190 = arith.constant 0 : index
    %c0_191 = arith.constant 0 : index
    %c0_192 = arith.constant 0 : index
    %c0_193 = arith.constant 0 : index
    %189 = vector.load %arg6[%c0_190, %c0_191, %c0_192, %c0_193] : memref<1x4x8x96xf32, #tpu.memory_space<vmem>>, vector<1x1x8x96xf32>
    %190 = vector.shape_cast %189 : vector<1x1x8x96xf32> to vector<8x96xf32>
    %191 = vector.shape_cast %188 : vector<8x96xf32> to vector<1x1x8x96xf32>
    tpu.vector_store %arg6[%c0_190, %c0_191, %c0_192, %c0_193], %191 {strides = array<i32>} : memref<1x4x8x96xf32, #tpu.memory_space<vmem>>, vector<1x1x8x96xf32>,
    %c4_i32 = arith.constant 4 : i32
    %192 = arith.muli %arg1, %c4_i32 : i32
    %c0_i32_194 = arith.constant 0 : i32
    %193 = arith.addi %192, %c0_i32_194 : i32
    %c8_i32 = arith.constant 8 : i32
    %194 = arith.cmpi slt, %193, %c8_i32 : i32
    %195 = arith.extui %194 : i1 to i32
    %196 = arith.sitofp %195 : i32 to f32
    %197 = vector.broadcast %196 : f32 to vector<1x96xf32>
    %198 = arith.mulf %8, %197 : vector<1x96xf32>
    %199 = vector.broadcast %198 : vector<1x96xf32> to vector<8x96xf32>
    %200 = arith.mulf %188, %199 : vector<8x96xf32>
    %c0_195 = arith.constant 0 : index
    %c0_196 = arith.constant 0 : index
    %201 = vector.load %arg10[%c0_195, %c0_196] : memref<8x1xf32, #tpu.memory_space<vmem>>, vector<8x1xf32>
    %cst_197 = arith.constant dense<0.000000e+00> : vector<8xf32>
    %202 = vector.multi_reduction <add>, %200, %cst_197 [1] : vector<8x96xf32> to vector<8xf32>
    %203 = vector.shape_cast %202 : vector<8xf32> to vector<8x1xf32>
    %204 = arith.addf %201, %203 : vector<8x1xf32>
    %c0_198 = arith.constant 0 : index
    %c0_199 = arith.constant 0 : index
    %205 = vector.load %arg10[%c0_198, %c0_199] : memref<8x1xf32, #tpu.memory_space<vmem>>, vector<8x1xf32>
    tpu.vector_store %arg10[%c0_198, %c0_199], %204 {strides = array<i32>} : memref<8x1xf32, #tpu.memory_space<vmem>>, vector<8x1xf32>,
    %c0_200 = arith.constant 0 : index
    %c0_201 = arith.constant 0 : index
    %206 = vector.load %arg11[%c0_200, %c0_201] : memref<8x1xf32, #tpu.memory_space<vmem>>, vector<8x1xf32>
    %207 = arith.mulf %200, %200 : vector<8x96xf32>
    %cst_202 = arith.constant dense<0.000000e+00> : vector<8xf32>
    %208 = vector.multi_reduction <add>, %207, %cst_202 [1] : vector<8x96xf32> to vector<8xf32>
    %209 = vector.shape_cast %208 : vector<8xf32> to vector<8x1xf32>
    %210 = arith.addf %206, %209 : vector<8x1xf32>
    %c0_203 = arith.constant 0 : index
    %c0_204 = arith.constant 0 : index
    %211 = vector.load %arg11[%c0_203, %c0_204] : memref<8x1xf32, #tpu.memory_space<vmem>>, vector<8x1xf32>
    tpu.vector_store %arg11[%c0_203, %c0_204], %210 {strides = array<i32>} : memref<8x1xf32, #tpu.memory_space<vmem>>, vector<8x1xf32>,
    %212 = vector.extract_strided_slice %7 {offsets = [1, 0, 0], sizes = [5, 8, 256], strides = [1, 1, 1]} : vector<8x8x256xbf16> to vector<5x8x256xbf16>
    %213 = vector.shape_cast %212 : vector<5x8x256xbf16> to vector<40x256xbf16>
    %cst_205 = arith.constant 0.000000e+00 : f32
    %214 = vector.broadcast %cst_205 : f32 to vector<8x96xf32>
    %c0_206 = arith.constant 0 : index
    %c0_207 = arith.constant 0 : index
    %215 = vector.load %arg9[%c0_206, %c0_207] : memref<8x96xf32, #tpu.memory_space<vmem>>, vector<8x96xf32>
    tpu.vector_store %arg9[%c0_206, %c0_207], %214 {strides = array<i32>} : memref<8x96xf32, #tpu.memory_space<vmem>>, vector<8x96xf32>,
    %c0_208 = arith.constant 0 : index
    %c0_209 = arith.constant 0 : index
    %216 = vector.load %arg9[%c0_208, %c0_209] : memref<8x96xf32, #tpu.memory_space<vmem>>, vector<8x96xf32>
    %c0_210 = arith.constant 0 : index
    %c0_211 = arith.constant 0 : index
    %c0_212 = arith.constant 0 : index
    %217 = vector.load %arg5[%c0_210, %c0_211, %c0_212] : memref<25x8x40xbf16, #tpu.memory_space<vmem>>, vector<1x8x40xbf16>
    %218 = vector.shape_cast %217 : vector<1x8x40xbf16> to vector<8x40xbf16>
    %219 = vector.extract_strided_slice %213 {offsets = [0, 0], sizes = [40, 96], strides = [1, 1]} : vector<40x256xbf16> to vector<40x96xbf16>
    %cst_213 = arith.constant dense<0.000000e+00> : vector<8x96xf32>
    %220 = tpu.matmul %218, %219, %cst_213 {dimension_numbers = #tpu.dot_dimension_numbers<[1], [0], [0], [1], [0, 0, 1, 1], [], []>} : vector<8x40xbf16>, vector<40x96xbf16>, vector<8x96xf32> -> vector<8x96xf32>
    %221 = arith.addf %216, %220 : vector<8x96xf32>
    %c0_214 = arith.constant 0 : index
    %c0_215 = arith.constant 0 : index
    %222 = vector.load %arg9[%c0_214, %c0_215] : memref<8x96xf32, #tpu.memory_space<vmem>>, vector<8x96xf32>
    tpu.vector_store %arg9[%c0_214, %c0_215], %221 {strides = array<i32>} : memref<8x96xf32, #tpu.memory_space<vmem>>, vector<8x96xf32>,
    %c0_216 = arith.constant 0 : index
    %c0_217 = arith.constant 0 : index
    %223 = vector.load %arg9[%c0_216, %c0_217] : memref<8x96xf32, #tpu.memory_space<vmem>>, vector<8x96xf32>
    %c1_218 = arith.constant 1 : index
    %c0_219 = arith.constant 0 : index
    %c0_220 = arith.constant 0 : index
    %224 = vector.load %arg5[%c1_218, %c0_219, %c0_220] : memref<25x8x40xbf16, #tpu.memory_space<vmem>>, vector<1x8x40xbf16>
    %225 = vector.shape_cast %224 : vector<1x8x40xbf16> to vector<8x40xbf16>
    %226 = vector.extract_strided_slice %213 {offsets = [0, 1], sizes = [40, 96], strides = [1, 1]} : vector<40x256xbf16> to vector<40x96xbf16>
    %cst_221 = arith.constant dense<0.000000e+00> : vector<8x96xf32>
    %227 = tpu.matmul %225, %226, %cst_221 {dimension_numbers = #tpu.dot_dimension_numbers<[1], [0], [0], [1], [0, 0, 1, 1], [], []>} : vector<8x40xbf16>, vector<40x96xbf16>, vector<8x96xf32> -> vector<8x96xf32>
    %228 = arith.addf %223, %227 : vector<8x96xf32>
    %c0_222 = arith.constant 0 : index
    %c0_223 = arith.constant 0 : index
    %229 = vector.load %arg9[%c0_222, %c0_223] : memref<8x96xf32, #tpu.memory_space<vmem>>, vector<8x96xf32>
    tpu.vector_store %arg9[%c0_222, %c0_223], %228 {strides = array<i32>} : memref<8x96xf32, #tpu.memory_space<vmem>>, vector<8x96xf32>,
    %c0_224 = arith.constant 0 : index
    %c0_225 = arith.constant 0 : index
    %230 = vector.load %arg9[%c0_224, %c0_225] : memref<8x96xf32, #tpu.memory_space<vmem>>, vector<8x96xf32>
    %c2_226 = arith.constant 2 : index
    %c0_227 = arith.constant 0 : index
    %c0_228 = arith.constant 0 : index
    %231 = vector.load %arg5[%c2_226, %c0_227, %c0_228] : memref<25x8x40xbf16, #tpu.memory_space<vmem>>, vector<1x8x40xbf16>
    %232 = vector.shape_cast %231 : vector<1x8x40xbf16> to vector<8x40xbf16>
    %233 = vector.extract_strided_slice %213 {offsets = [0, 2], sizes = [40, 96], strides = [1, 1]} : vector<40x256xbf16> to vector<40x96xbf16>
    %cst_229 = arith.constant dense<0.000000e+00> : vector<8x96xf32>
    %234 = tpu.matmul %232, %233, %cst_229 {dimension_numbers = #tpu.dot_dimension_numbers<[1], [0], [0], [1], [0, 0, 1, 1], [], []>} : vector<8x40xbf16>, vector<40x96xbf16>, vector<8x96xf32> -> vector<8x96xf32>
    %235 = arith.addf %230, %234 : vector<8x96xf32>
    %c0_230 = arith.constant 0 : index
    %c0_231 = arith.constant 0 : index
    %236 = vector.load %arg9[%c0_230, %c0_231] : memref<8x96xf32, #tpu.memory_space<vmem>>, vector<8x96xf32>
    tpu.vector_store %arg9[%c0_230, %c0_231], %235 {strides = array<i32>} : memref<8x96xf32, #tpu.memory_space<vmem>>, vector<8x96xf32>,
    %c0_232 = arith.constant 0 : index
    %c0_233 = arith.constant 0 : index
    %237 = vector.load %arg9[%c0_232, %c0_233] : memref<8x96xf32, #tpu.memory_space<vmem>>, vector<8x96xf32>
    %c3_234 = arith.constant 3 : index
    %c0_235 = arith.constant 0 : index
    %c0_236 = arith.constant 0 : index
    %238 = vector.load %arg5[%c3_234, %c0_235, %c0_236] : memref<25x8x40xbf16, #tpu.memory_space<vmem>>, vector<1x8x40xbf16>
    %239 = vector.shape_cast %238 : vector<1x8x40xbf16> to vector<8x40xbf16>
    %240 = vector.extract_strided_slice %213 {offsets = [0, 3], sizes = [40, 96], strides = [1, 1]} : vector<40x256xbf16> to vector<40x96xbf16>
    %cst_237 = arith.constant dense<0.000000e+00> : vector<8x96xf32>
    %241 = tpu.matmul %239, %240, %cst_237 {dimension_numbers = #tpu.dot_dimension_numbers<[1], [0], [0], [1], [0, 0, 1, 1], [], []>} : vector<8x40xbf16>, vector<40x96xbf16>, vector<8x96xf32> -> vector<8x96xf32>
    %242 = arith.addf %237, %241 : vector<8x96xf32>
    %c0_238 = arith.constant 0 : index
    %c0_239 = arith.constant 0 : index
    %243 = vector.load %arg9[%c0_238, %c0_239] : memref<8x96xf32, #tpu.memory_space<vmem>>, vector<8x96xf32>
    tpu.vector_store %arg9[%c0_238, %c0_239], %242 {strides = array<i32>} : memref<8x96xf32, #tpu.memory_space<vmem>>, vector<8x96xf32>,
    %c0_240 = arith.constant 0 : index
    %c0_241 = arith.constant 0 : index
    %244 = vector.load %arg9[%c0_240, %c0_241] : memref<8x96xf32, #tpu.memory_space<vmem>>, vector<8x96xf32>
    %c4_242 = arith.constant 4 : index
    %c0_243 = arith.constant 0 : index
    %c0_244 = arith.constant 0 : index
    %245 = vector.load %arg5[%c4_242, %c0_243, %c0_244] : memref<25x8x40xbf16, #tpu.memory_space<vmem>>, vector<1x8x40xbf16>
    %246 = vector.shape_cast %245 : vector<1x8x40xbf16> to vector<8x40xbf16>
    %247 = vector.extract_strided_slice %213 {offsets = [0, 4], sizes = [40, 96], strides = [1, 1]} : vector<40x256xbf16> to vector<40x96xbf16>
    %cst_245 = arith.constant dense<0.000000e+00> : vector<8x96xf32>
    %248 = tpu.matmul %246, %247, %cst_245 {dimension_numbers = #tpu.dot_dimension_numbers<[1], [0], [0], [1], [0, 0, 1, 1], [], []>} : vector<8x40xbf16>, vector<40x96xbf16>, vector<8x96xf32> -> vector<8x96xf32>
    %249 = arith.addf %244, %248 : vector<8x96xf32>
    %c0_246 = arith.constant 0 : index
    %c0_247 = arith.constant 0 : index
    %250 = vector.load %arg9[%c0_246, %c0_247] : memref<8x96xf32, #tpu.memory_space<vmem>>, vector<8x96xf32>
    tpu.vector_store %arg9[%c0_246, %c0_247], %249 {strides = array<i32>} : memref<8x96xf32, #tpu.memory_space<vmem>>, vector<8x96xf32>,
    %c0_248 = arith.constant 0 : index
    %c0_249 = arith.constant 0 : index
    %251 = vector.load %arg9[%c0_248, %c0_249] : memref<8x96xf32, #tpu.memory_space<vmem>>, vector<8x96xf32>
    %c5_250 = arith.constant 5 : index
    %c0_251 = arith.constant 0 : index
    %c0_252 = arith.constant 0 : index
    %252 = vector.load %arg5[%c5_250, %c0_251, %c0_252] : memref<25x8x40xbf16, #tpu.memory_space<vmem>>, vector<1x8x40xbf16>
    %253 = vector.shape_cast %252 : vector<1x8x40xbf16> to vector<8x40xbf16>
    %254 = vector.extract_strided_slice %213 {offsets = [0, 12], sizes = [40, 96], strides = [1, 1]} : vector<40x256xbf16> to vector<40x96xbf16>
    %cst_253 = arith.constant dense<0.000000e+00> : vector<8x96xf32>
    %255 = tpu.matmul %253, %254, %cst_253 {dimension_numbers = #tpu.dot_dimension_numbers<[1], [0], [0], [1], [0, 0, 1, 1], [], []>} : vector<8x40xbf16>, vector<40x96xbf16>, vector<8x96xf32> -> vector<8x96xf32>
    %256 = arith.addf %251, %255 : vector<8x96xf32>
    %c0_254 = arith.constant 0 : index
    %c0_255 = arith.constant 0 : index
    %257 = vector.load %arg9[%c0_254, %c0_255] : memref<8x96xf32, #tpu.memory_space<vmem>>, vector<8x96xf32>
    tpu.vector_store %arg9[%c0_254, %c0_255], %256 {strides = array<i32>} : memref<8x96xf32, #tpu.memory_space<vmem>>, vector<8x96xf32>,
    %c0_256 = arith.constant 0 : index
    %c0_257 = arith.constant 0 : index
    %258 = vector.load %arg9[%c0_256, %c0_257] : memref<8x96xf32, #tpu.memory_space<vmem>>, vector<8x96xf32>
    %c6_258 = arith.constant 6 : index
    %c0_259 = arith.constant 0 : index
    %c0_260 = arith.constant 0 : index
    %259 = vector.load %arg5[%c6_258, %c0_259, %c0_260] : memref<25x8x40xbf16, #tpu.memory_space<vmem>>, vector<1x8x40xbf16>
    %260 = vector.shape_cast %259 : vector<1x8x40xbf16> to vector<8x40xbf16>
    %261 = vector.extract_strided_slice %213 {offsets = [0, 13], sizes = [40, 96], strides = [1, 1]} : vector<40x256xbf16> to vector<40x96xbf16>
    %cst_261 = arith.constant dense<0.000000e+00> : vector<8x96xf32>
    %262 = tpu.matmul %260, %261, %cst_261 {dimension_numbers = #tpu.dot_dimension_numbers<[1], [0], [0], [1], [0, 0, 1, 1], [], []>} : vector<8x40xbf16>, vector<40x96xbf16>, vector<8x96xf32> -> vector<8x96xf32>
    %263 = arith.addf %258, %262 : vector<8x96xf32>
    %c0_262 = arith.constant 0 : index
    %c0_263 = arith.constant 0 : index
    %264 = vector.load %arg9[%c0_262, %c0_263] : memref<8x96xf32, #tpu.memory_space<vmem>>, vector<8x96xf32>
    tpu.vector_store %arg9[%c0_262, %c0_263], %263 {strides = array<i32>} : memref<8x96xf32, #tpu.memory_space<vmem>>, vector<8x96xf32>,
    %c0_264 = arith.constant 0 : index
    %c0_265 = arith.constant 0 : index
    %265 = vector.load %arg9[%c0_264, %c0_265] : memref<8x96xf32, #tpu.memory_space<vmem>>, vector<8x96xf32>
    %c7_266 = arith.constant 7 : index
    %c0_267 = arith.constant 0 : index
    %c0_268 = arith.constant 0 : index
    %266 = vector.load %arg5[%c7_266, %c0_267, %c0_268] : memref<25x8x40xbf16, #tpu.memory_space<vmem>>, vector<1x8x40xbf16>
    %267 = vector.shape_cast %266 : vector<1x8x40xbf16> to vector<8x40xbf16>
    %268 = vector.extract_strided_slice %213 {offsets = [0, 14], sizes = [40, 96], strides = [1, 1]} : vector<40x256xbf16> to vector<40x96xbf16>
    %cst_269 = arith.constant dense<0.000000e+00> : vector<8x96xf32>
    %269 = tpu.matmul %267, %268, %cst_269 {dimension_numbers = #tpu.dot_dimension_numbers<[1], [0], [0], [1], [0, 0, 1, 1], [], []>} : vector<8x40xbf16>, vector<40x96xbf16>, vector<8x96xf32> -> vector<8x96xf32>
    %270 = arith.addf %265, %269 : vector<8x96xf32>
    %c0_270 = arith.constant 0 : index
    %c0_271 = arith.constant 0 : index
    %271 = vector.load %arg9[%c0_270, %c0_271] : memref<8x96xf32, #tpu.memory_space<vmem>>, vector<8x96xf32>
    tpu.vector_store %arg9[%c0_270, %c0_271], %270 {strides = array<i32>} : memref<8x96xf32, #tpu.memory_space<vmem>>, vector<8x96xf32>,
    %c0_272 = arith.constant 0 : index
    %c0_273 = arith.constant 0 : index
    %272 = vector.load %arg9[%c0_272, %c0_273] : memref<8x96xf32, #tpu.memory_space<vmem>>, vector<8x96xf32>
    %c8_274 = arith.constant 8 : index
    %c0_275 = arith.constant 0 : index
    %c0_276 = arith.constant 0 : index
    %273 = vector.load %arg5[%c8_274, %c0_275, %c0_276] : memref<25x8x40xbf16, #tpu.memory_space<vmem>>, vector<1x8x40xbf16>
    %274 = vector.shape_cast %273 : vector<1x8x40xbf16> to vector<8x40xbf16>
    %275 = vector.extract_strided_slice %213 {offsets = [0, 15], sizes = [40, 96], strides = [1, 1]} : vector<40x256xbf16> to vector<40x96xbf16>
    %cst_277 = arith.constant dense<0.000000e+00> : vector<8x96xf32>
    %276 = tpu.matmul %274, %275, %cst_277 {dimension_numbers = #tpu.dot_dimension_numbers<[1], [0], [0], [1], [0, 0, 1, 1], [], []>} : vector<8x40xbf16>, vector<40x96xbf16>, vector<8x96xf32> -> vector<8x96xf32>
    %277 = arith.addf %272, %276 : vector<8x96xf32>
    %c0_278 = arith.constant 0 : index
    %c0_279 = arith.constant 0 : index
    %278 = vector.load %arg9[%c0_278, %c0_279] : memref<8x96xf32, #tpu.memory_space<vmem>>, vector<8x96xf32>
    tpu.vector_store %arg9[%c0_278, %c0_279], %277 {strides = array<i32>} : memref<8x96xf32, #tpu.memory_space<vmem>>, vector<8x96xf32>,
    %c0_280 = arith.constant 0 : index
    %c0_281 = arith.constant 0 : index
    %279 = vector.load %arg9[%c0_280, %c0_281] : memref<8x96xf32, #tpu.memory_space<vmem>>, vector<8x96xf32>
    %c9_282 = arith.constant 9 : index
    %c0_283 = arith.constant 0 : index
    %c0_284 = arith.constant 0 : index
    %280 = vector.load %arg5[%c9_282, %c0_283, %c0_284] : memref<25x8x40xbf16, #tpu.memory_space<vmem>>, vector<1x8x40xbf16>
    %281 = vector.shape_cast %280 : vector<1x8x40xbf16> to vector<8x40xbf16>
    %282 = vector.extract_strided_slice %213 {offsets = [0, 16], sizes = [40, 96], strides = [1, 1]} : vector<40x256xbf16> to vector<40x96xbf16>
    %cst_285 = arith.constant dense<0.000000e+00> : vector<8x96xf32>
    %283 = tpu.matmul %281, %282, %cst_285 {dimension_numbers = #tpu.dot_dimension_numbers<[1], [0], [0], [1], [0, 0, 1, 1], [], []>} : vector<8x40xbf16>, vector<40x96xbf16>, vector<8x96xf32> -> vector<8x96xf32>
    %284 = arith.addf %279, %283 : vector<8x96xf32>
    %c0_286 = arith.constant 0 : index
    %c0_287 = arith.constant 0 : index
    %285 = vector.load %arg9[%c0_286, %c0_287] : memref<8x96xf32, #tpu.memory_space<vmem>>, vector<8x96xf32>
    tpu.vector_store %arg9[%c0_286, %c0_287], %284 {strides = array<i32>} : memref<8x96xf32, #tpu.memory_space<vmem>>, vector<8x96xf32>,
    %c0_288 = arith.constant 0 : index
    %c0_289 = arith.constant 0 : index
    %286 = vector.load %arg9[%c0_288, %c0_289] : memref<8x96xf32, #tpu.memory_space<vmem>>, vector<8x96xf32>
    %c10_290 = arith.constant 10 : index
    %c0_291 = arith.constant 0 : index
    %c0_292 = arith.constant 0 : index
    %287 = vector.load %arg5[%c10_290, %c0_291, %c0_292] : memref<25x8x40xbf16, #tpu.memory_space<vmem>>, vector<1x8x40xbf16>
    %288 = vector.shape_cast %287 : vector<1x8x40xbf16> to vector<8x40xbf16>
    %289 = vector.extract_strided_slice %213 {offsets = [0, 24], sizes = [40, 96], strides = [1, 1]} : vector<40x256xbf16> to vector<40x96xbf16>
    %cst_293 = arith.constant dense<0.000000e+00> : vector<8x96xf32>
    %290 = tpu.matmul %288, %289, %cst_293 {dimension_numbers = #tpu.dot_dimension_numbers<[1], [0], [0], [1], [0, 0, 1, 1], [], []>} : vector<8x40xbf16>, vector<40x96xbf16>, vector<8x96xf32> -> vector<8x96xf32>
    %291 = arith.addf %286, %290 : vector<8x96xf32>
    %c0_294 = arith.constant 0 : index
    %c0_295 = arith.constant 0 : index
    %292 = vector.load %arg9[%c0_294, %c0_295] : memref<8x96xf32, #tpu.memory_space<vmem>>, vector<8x96xf32>
    tpu.vector_store %arg9[%c0_294, %c0_295], %291 {strides = array<i32>} : memref<8x96xf32, #tpu.memory_space<vmem>>, vector<8x96xf32>,
    %c0_296 = arith.constant 0 : index
    %c0_297 = arith.constant 0 : index
    %293 = vector.load %arg9[%c0_296, %c0_297] : memref<8x96xf32, #tpu.memory_space<vmem>>, vector<8x96xf32>
    %c11_298 = arith.constant 11 : index
    %c0_299 = arith.constant 0 : index
    %c0_300 = arith.constant 0 : index
    %294 = vector.load %arg5[%c11_298, %c0_299, %c0_300] : memref<25x8x40xbf16, #tpu.memory_space<vmem>>, vector<1x8x40xbf16>
    %295 = vector.shape_cast %294 : vector<1x8x40xbf16> to vector<8x40xbf16>
    %296 = vector.extract_strided_slice %213 {offsets = [0, 25], sizes = [40, 96], strides = [1, 1]} : vector<40x256xbf16> to vector<40x96xbf16>
    %cst_301 = arith.constant dense<0.000000e+00> : vector<8x96xf32>
    %297 = tpu.matmul %295, %296, %cst_301 {dimension_numbers = #tpu.dot_dimension_numbers<[1], [0], [0], [1], [0, 0, 1, 1], [], []>} : vector<8x40xbf16>, vector<40x96xbf16>, vector<8x96xf32> -> vector<8x96xf32>
    %298 = arith.addf %293, %297 : vector<8x96xf32>
    %c0_302 = arith.constant 0 : index
    %c0_303 = arith.constant 0 : index
    %299 = vector.load %arg9[%c0_302, %c0_303] : memref<8x96xf32, #tpu.memory_space<vmem>>, vector<8x96xf32>
    tpu.vector_store %arg9[%c0_302, %c0_303], %298 {strides = array<i32>} : memref<8x96xf32, #tpu.memory_space<vmem>>, vector<8x96xf32>,
    %c0_304 = arith.constant 0 : index
    %c0_305 = arith.constant 0 : index
    %300 = vector.load %arg9[%c0_304, %c0_305] : memref<8x96xf32, #tpu.memory_space<vmem>>, vector<8x96xf32>
    %c12_306 = arith.constant 12 : index
    %c0_307 = arith.constant 0 : index
    %c0_308 = arith.constant 0 : index
    %301 = vector.load %arg5[%c12_306, %c0_307, %c0_308] : memref<25x8x40xbf16, #tpu.memory_space<vmem>>, vector<1x8x40xbf16>
    %302 = vector.shape_cast %301 : vector<1x8x40xbf16> to vector<8x40xbf16>
    %303 = vector.extract_strided_slice %213 {offsets = [0, 26], sizes = [40, 96], strides = [1, 1]} : vector<40x256xbf16> to vector<40x96xbf16>
    %cst_309 = arith.constant dense<0.000000e+00> : vector<8x96xf32>
    %304 = tpu.matmul %302, %303, %cst_309 {dimension_numbers = #tpu.dot_dimension_numbers<[1], [0], [0], [1], [0, 0, 1, 1], [], []>} : vector<8x40xbf16>, vector<40x96xbf16>, vector<8x96xf32> -> vector<8x96xf32>
    %305 = arith.addf %300, %304 : vector<8x96xf32>
    %c0_310 = arith.constant 0 : index
    %c0_311 = arith.constant 0 : index
    %306 = vector.load %arg9[%c0_310, %c0_311] : memref<8x96xf32, #tpu.memory_space<vmem>>, vector<8x96xf32>
    tpu.vector_store %arg9[%c0_310, %c0_311], %305 {strides = array<i32>} : memref<8x96xf32, #tpu.memory_space<vmem>>, vector<8x96xf32>,
    %c0_312 = arith.constant 0 : index
    %c0_313 = arith.constant 0 : index
    %307 = vector.load %arg9[%c0_312, %c0_313] : memref<8x96xf32, #tpu.memory_space<vmem>>, vector<8x96xf32>
    %c13_314 = arith.constant 13 : index
    %c0_315 = arith.constant 0 : index
    %c0_316 = arith.constant 0 : index
    %308 = vector.load %arg5[%c13_314, %c0_315, %c0_316] : memref<25x8x40xbf16, #tpu.memory_space<vmem>>, vector<1x8x40xbf16>
    %309 = vector.shape_cast %308 : vector<1x8x40xbf16> to vector<8x40xbf16>
    %310 = vector.extract_strided_slice %213 {offsets = [0, 27], sizes = [40, 96], strides = [1, 1]} : vector<40x256xbf16> to vector<40x96xbf16>
    %cst_317 = arith.constant dense<0.000000e+00> : vector<8x96xf32>
    %311 = tpu.matmul %309, %310, %cst_317 {dimension_numbers = #tpu.dot_dimension_numbers<[1], [0], [0], [1], [0, 0, 1, 1], [], []>} : vector<8x40xbf16>, vector<40x96xbf16>, vector<8x96xf32> -> vector<8x96xf32>
    %312 = arith.addf %307, %311 : vector<8x96xf32>
    %c0_318 = arith.constant 0 : index
    %c0_319 = arith.constant 0 : index
    %313 = vector.load %arg9[%c0_318, %c0_319] : memref<8x96xf32, #tpu.memory_space<vmem>>, vector<8x96xf32>
    tpu.vector_store %arg9[%c0_318, %c0_319], %312 {strides = array<i32>} : memref<8x96xf32, #tpu.memory_space<vmem>>, vector<8x96xf32>,
    %c0_320 = arith.constant 0 : index
    %c0_321 = arith.constant 0 : index
    %314 = vector.load %arg9[%c0_320, %c0_321] : memref<8x96xf32, #tpu.memory_space<vmem>>, vector<8x96xf32>
    %c14_322 = arith.constant 14 : index
    %c0_323 = arith.constant 0 : index
    %c0_324 = arith.constant 0 : index
    %315 = vector.load %arg5[%c14_322, %c0_323, %c0_324] : memref<25x8x40xbf16, #tpu.memory_space<vmem>>, vector<1x8x40xbf16>
    %316 = vector.shape_cast %315 : vector<1x8x40xbf16> to vector<8x40xbf16>
    %317 = vector.extract_strided_slice %213 {offsets = [0, 28], sizes = [40, 96], strides = [1, 1]} : vector<40x256xbf16> to vector<40x96xbf16>
    %cst_325 = arith.constant dense<0.000000e+00> : vector<8x96xf32>
    %318 = tpu.matmul %316, %317, %cst_325 {dimension_numbers = #tpu.dot_dimension_numbers<[1], [0], [0], [1], [0, 0, 1, 1], [], []>} : vector<8x40xbf16>, vector<40x96xbf16>, vector<8x96xf32> -> vector<8x96xf32>
    %319 = arith.addf %314, %318 : vector<8x96xf32>
    %c0_326 = arith.constant 0 : index
    %c0_327 = arith.constant 0 : index
    %320 = vector.load %arg9[%c0_326, %c0_327] : memref<8x96xf32, #tpu.memory_space<vmem>>, vector<8x96xf32>
    tpu.vector_store %arg9[%c0_326, %c0_327], %319 {strides = array<i32>} : memref<8x96xf32, #tpu.memory_space<vmem>>, vector<8x96xf32>,
    %c0_328 = arith.constant 0 : index
    %c0_329 = arith.constant 0 : index
    %321 = vector.load %arg9[%c0_328, %c0_329] : memref<8x96xf32, #tpu.memory_space<vmem>>, vector<8x96xf32>
    %c15_330 = arith.constant 15 : index
    %c0_331 = arith.constant 0 : index
    %c0_332 = arith.constant 0 : index
    %322 = vector.load %arg5[%c15_330, %c0_331, %c0_332] : memref<25x8x40xbf16, #tpu.memory_space<vmem>>, vector<1x8x40xbf16>
    %323 = vector.shape_cast %322 : vector<1x8x40xbf16> to vector<8x40xbf16>
    %324 = vector.extract_strided_slice %213 {offsets = [0, 36], sizes = [40, 96], strides = [1, 1]} : vector<40x256xbf16> to vector<40x96xbf16>
    %cst_333 = arith.constant dense<0.000000e+00> : vector<8x96xf32>
    %325 = tpu.matmul %323, %324, %cst_333 {dimension_numbers = #tpu.dot_dimension_numbers<[1], [0], [0], [1], [0, 0, 1, 1], [], []>} : vector<8x40xbf16>, vector<40x96xbf16>, vector<8x96xf32> -> vector<8x96xf32>
    %326 = arith.addf %321, %325 : vector<8x96xf32>
    %c0_334 = arith.constant 0 : index
    %c0_335 = arith.constant 0 : index
    %327 = vector.load %arg9[%c0_334, %c0_335] : memref<8x96xf32, #tpu.memory_space<vmem>>, vector<8x96xf32>
    tpu.vector_store %arg9[%c0_334, %c0_335], %326 {strides = array<i32>} : memref<8x96xf32, #tpu.memory_space<vmem>>, vector<8x96xf32>,
    %c0_336 = arith.constant 0 : index
    %c0_337 = arith.constant 0 : index
    %328 = vector.load %arg9[%c0_336, %c0_337] : memref<8x96xf32, #tpu.memory_space<vmem>>, vector<8x96xf32>
    %c16_338 = arith.constant 16 : index
    %c0_339 = arith.constant 0 : index
    %c0_340 = arith.constant 0 : index
    %329 = vector.load %arg5[%c16_338, %c0_339, %c0_340] : memref<25x8x40xbf16, #tpu.memory_space<vmem>>, vector<1x8x40xbf16>
    %330 = vector.shape_cast %329 : vector<1x8x40xbf16> to vector<8x40xbf16>
    %331 = vector.extract_strided_slice %213 {offsets = [0, 37], sizes = [40, 96], strides = [1, 1]} : vector<40x256xbf16> to vector<40x96xbf16>
    %cst_341 = arith.constant dense<0.000000e+00> : vector<8x96xf32>
    %332 = tpu.matmul %330, %331, %cst_341 {dimension_numbers = #tpu.dot_dimension_numbers<[1], [0], [0], [1], [0, 0, 1, 1], [], []>} : vector<8x40xbf16>, vector<40x96xbf16>, vector<8x96xf32> -> vector<8x96xf32>
    %333 = arith.addf %328, %332 : vector<8x96xf32>
    %c0_342 = arith.constant 0 : index
    %c0_343 = arith.constant 0 : index
    %334 = vector.load %arg9[%c0_342, %c0_343] : memref<8x96xf32, #tpu.memory_space<vmem>>, vector<8x96xf32>
    tpu.vector_store %arg9[%c0_342, %c0_343], %333 {strides = array<i32>} : memref<8x96xf32, #tpu.memory_space<vmem>>, vector<8x96xf32>,
    %c0_344 = arith.constant 0 : index
    %c0_345 = arith.constant 0 : index
    %335 = vector.load %arg9[%c0_344, %c0_345] : memref<8x96xf32, #tpu.memory_space<vmem>>, vector<8x96xf32>
    %c17_346 = arith.constant 17 : index
    %c0_347 = arith.constant 0 : index
    %c0_348 = arith.constant 0 : index
    %336 = vector.load %arg5[%c17_346, %c0_347, %c0_348] : memref<25x8x40xbf16, #tpu.memory_space<vmem>>, vector<1x8x40xbf16>
    %337 = vector.shape_cast %336 : vector<1x8x40xbf16> to vector<8x40xbf16>
    %338 = vector.extract_strided_slice %213 {offsets = [0, 38], sizes = [40, 96], strides = [1, 1]} : vector<40x256xbf16> to vector<40x96xbf16>
    %cst_349 = arith.constant dense<0.000000e+00> : vector<8x96xf32>
    %339 = tpu.matmul %337, %338, %cst_349 {dimension_numbers = #tpu.dot_dimension_numbers<[1], [0], [0], [1], [0, 0, 1, 1], [], []>} : vector<8x40xbf16>, vector<40x96xbf16>, vector<8x96xf32> -> vector<8x96xf32>
    %340 = arith.addf %335, %339 : vector<8x96xf32>
    %c0_350 = arith.constant 0 : index
    %c0_351 = arith.constant 0 : index
    %341 = vector.load %arg9[%c0_350, %c0_351] : memref<8x96xf32, #tpu.memory_space<vmem>>, vector<8x96xf32>
    tpu.vector_store %arg9[%c0_350, %c0_351], %340 {strides = array<i32>} : memref<8x96xf32, #tpu.memory_space<vmem>>, vector<8x96xf32>,
    %c0_352 = arith.constant 0 : index
    %c0_353 = arith.constant 0 : index
    %342 = vector.load %arg9[%c0_352, %c0_353] : memref<8x96xf32, #tpu.memory_space<vmem>>, vector<8x96xf32>
    %c18_354 = arith.constant 18 : index
    %c0_355 = arith.constant 0 : index
    %c0_356 = arith.constant 0 : index
    %343 = vector.load %arg5[%c18_354, %c0_355, %c0_356] : memref<25x8x40xbf16, #tpu.memory_space<vmem>>, vector<1x8x40xbf16>
    %344 = vector.shape_cast %343 : vector<1x8x40xbf16> to vector<8x40xbf16>
    %345 = vector.extract_strided_slice %213 {offsets = [0, 39], sizes = [40, 96], strides = [1, 1]} : vector<40x256xbf16> to vector<40x96xbf16>
    %cst_357 = arith.constant dense<0.000000e+00> : vector<8x96xf32>
    %346 = tpu.matmul %344, %345, %cst_357 {dimension_numbers = #tpu.dot_dimension_numbers<[1], [0], [0], [1], [0, 0, 1, 1], [], []>} : vector<8x40xbf16>, vector<40x96xbf16>, vector<8x96xf32> -> vector<8x96xf32>
    %347 = arith.addf %342, %346 : vector<8x96xf32>
    %c0_358 = arith.constant 0 : index
    %c0_359 = arith.constant 0 : index
    %348 = vector.load %arg9[%c0_358, %c0_359] : memref<8x96xf32, #tpu.memory_space<vmem>>, vector<8x96xf32>
    tpu.vector_store %arg9[%c0_358, %c0_359], %347 {strides = array<i32>} : memref<8x96xf32, #tpu.memory_space<vmem>>, vector<8x96xf32>,
    %c0_360 = arith.constant 0 : index
    %c0_361 = arith.constant 0 : index
    %349 = vector.load %arg9[%c0_360, %c0_361] : memref<8x96xf32, #tpu.memory_space<vmem>>, vector<8x96xf32>
    %c19_362 = arith.constant 19 : index
    %c0_363 = arith.constant 0 : index
    %c0_364 = arith.constant 0 : index
    %350 = vector.load %arg5[%c19_362, %c0_363, %c0_364] : memref<25x8x40xbf16, #tpu.memory_space<vmem>>, vector<1x8x40xbf16>
    %351 = vector.shape_cast %350 : vector<1x8x40xbf16> to vector<8x40xbf16>
    %352 = vector.extract_strided_slice %213 {offsets = [0, 40], sizes = [40, 96], strides = [1, 1]} : vector<40x256xbf16> to vector<40x96xbf16>
    %cst_365 = arith.constant dense<0.000000e+00> : vector<8x96xf32>
    %353 = tpu.matmul %351, %352, %cst_365 {dimension_numbers = #tpu.dot_dimension_numbers<[1], [0], [0], [1], [0, 0, 1, 1], [], []>} : vector<8x40xbf16>, vector<40x96xbf16>, vector<8x96xf32> -> vector<8x96xf32>
    %354 = arith.addf %349, %353 : vector<8x96xf32>
    %c0_366 = arith.constant 0 : index
    %c0_367 = arith.constant 0 : index
    %355 = vector.load %arg9[%c0_366, %c0_367] : memref<8x96xf32, #tpu.memory_space<vmem>>, vector<8x96xf32>
    tpu.vector_store %arg9[%c0_366, %c0_367], %354 {strides = array<i32>} : memref<8x96xf32, #tpu.memory_space<vmem>>, vector<8x96xf32>,
    %c0_368 = arith.constant 0 : index
    %c0_369 = arith.constant 0 : index
    %356 = vector.load %arg9[%c0_368, %c0_369] : memref<8x96xf32, #tpu.memory_space<vmem>>, vector<8x96xf32>
    %c20_370 = arith.constant 20 : index
    %c0_371 = arith.constant 0 : index
    %c0_372 = arith.constant 0 : index
    %357 = vector.load %arg5[%c20_370, %c0_371, %c0_372] : memref<25x8x40xbf16, #tpu.memory_space<vmem>>, vector<1x8x40xbf16>
    %358 = vector.shape_cast %357 : vector<1x8x40xbf16> to vector<8x40xbf16>
    %359 = vector.extract_strided_slice %213 {offsets = [0, 48], sizes = [40, 96], strides = [1, 1]} : vector<40x256xbf16> to vector<40x96xbf16>
    %cst_373 = arith.constant dense<0.000000e+00> : vector<8x96xf32>
    %360 = tpu.matmul %358, %359, %cst_373 {dimension_numbers = #tpu.dot_dimension_numbers<[1], [0], [0], [1], [0, 0, 1, 1], [], []>} : vector<8x40xbf16>, vector<40x96xbf16>, vector<8x96xf32> -> vector<8x96xf32>
    %361 = arith.addf %356, %360 : vector<8x96xf32>
    %c0_374 = arith.constant 0 : index
    %c0_375 = arith.constant 0 : index
    %362 = vector.load %arg9[%c0_374, %c0_375] : memref<8x96xf32, #tpu.memory_space<vmem>>, vector<8x96xf32>
    tpu.vector_store %arg9[%c0_374, %c0_375], %361 {strides = array<i32>} : memref<8x96xf32, #tpu.memory_space<vmem>>, vector<8x96xf32>,
    %c0_376 = arith.constant 0 : index
    %c0_377 = arith.constant 0 : index
    %363 = vector.load %arg9[%c0_376, %c0_377] : memref<8x96xf32, #tpu.memory_space<vmem>>, vector<8x96xf32>
    %c21_378 = arith.constant 21 : index
    %c0_379 = arith.constant 0 : index
    %c0_380 = arith.constant 0 : index
    %364 = vector.load %arg5[%c21_378, %c0_379, %c0_380] : memref<25x8x40xbf16, #tpu.memory_space<vmem>>, vector<1x8x40xbf16>
    %365 = vector.shape_cast %364 : vector<1x8x40xbf16> to vector<8x40xbf16>
    %366 = vector.extract_strided_slice %213 {offsets = [0, 49], sizes = [40, 96], strides = [1, 1]} : vector<40x256xbf16> to vector<40x96xbf16>
    %cst_381 = arith.constant dense<0.000000e+00> : vector<8x96xf32>
    %367 = tpu.matmul %365, %366, %cst_381 {dimension_numbers = #tpu.dot_dimension_numbers<[1], [0], [0], [1], [0, 0, 1, 1], [], []>} : vector<8x40xbf16>, vector<40x96xbf16>, vector<8x96xf32> -> vector<8x96xf32>
    %368 = arith.addf %363, %367 : vector<8x96xf32>
    %c0_382 = arith.constant 0 : index
    %c0_383 = arith.constant 0 : index
    %369 = vector.load %arg9[%c0_382, %c0_383] : memref<8x96xf32, #tpu.memory_space<vmem>>, vector<8x96xf32>
    tpu.vector_store %arg9[%c0_382, %c0_383], %368 {strides = array<i32>} : memref<8x96xf32, #tpu.memory_space<vmem>>, vector<8x96xf32>,
    %c0_384 = arith.constant 0 : index
    %c0_385 = arith.constant 0 : index
    %370 = vector.load %arg9[%c0_384, %c0_385] : memref<8x96xf32, #tpu.memory_space<vmem>>, vector<8x96xf32>
    %c22_386 = arith.constant 22 : index
    %c0_387 = arith.constant 0 : index
    %c0_388 = arith.constant 0 : index
    %371 = vector.load %arg5[%c22_386, %c0_387, %c0_388] : memref<25x8x40xbf16, #tpu.memory_space<vmem>>, vector<1x8x40xbf16>
    %372 = vector.shape_cast %371 : vector<1x8x40xbf16> to vector<8x40xbf16>
    %373 = vector.extract_strided_slice %213 {offsets = [0, 50], sizes = [40, 96], strides = [1, 1]} : vector<40x256xbf16> to vector<40x96xbf16>
    %cst_389 = arith.constant dense<0.000000e+00> : vector<8x96xf32>
    %374 = tpu.matmul %372, %373, %cst_389 {dimension_numbers = #tpu.dot_dimension_numbers<[1], [0], [0], [1], [0, 0, 1, 1], [], []>} : vector<8x40xbf16>, vector<40x96xbf16>, vector<8x96xf32> -> vector<8x96xf32>
    %375 = arith.addf %370, %374 : vector<8x96xf32>
    %c0_390 = arith.constant 0 : index
    %c0_391 = arith.constant 0 : index
    %376 = vector.load %arg9[%c0_390, %c0_391] : memref<8x96xf32, #tpu.memory_space<vmem>>, vector<8x96xf32>
    tpu.vector_store %arg9[%c0_390, %c0_391], %375 {strides = array<i32>} : memref<8x96xf32, #tpu.memory_space<vmem>>, vector<8x96xf32>,
    %c0_392 = arith.constant 0 : index
    %c0_393 = arith.constant 0 : index
    %377 = vector.load %arg9[%c0_392, %c0_393] : memref<8x96xf32, #tpu.memory_space<vmem>>, vector<8x96xf32>
    %c23_394 = arith.constant 23 : index
    %c0_395 = arith.constant 0 : index
    %c0_396 = arith.constant 0 : index
    %378 = vector.load %arg5[%c23_394, %c0_395, %c0_396] : memref<25x8x40xbf16, #tpu.memory_space<vmem>>, vector<1x8x40xbf16>
    %379 = vector.shape_cast %378 : vector<1x8x40xbf16> to vector<8x40xbf16>
    %380 = vector.extract_strided_slice %213 {offsets = [0, 51], sizes = [40, 96], strides = [1, 1]} : vector<40x256xbf16> to vector<40x96xbf16>
    %cst_397 = arith.constant dense<0.000000e+00> : vector<8x96xf32>
    %381 = tpu.matmul %379, %380, %cst_397 {dimension_numbers = #tpu.dot_dimension_numbers<[1], [0], [0], [1], [0, 0, 1, 1], [], []>} : vector<8x40xbf16>, vector<40x96xbf16>, vector<8x96xf32> -> vector<8x96xf32>
    %382 = arith.addf %377, %381 : vector<8x96xf32>
    %c0_398 = arith.constant 0 : index
    %c0_399 = arith.constant 0 : index
    %383 = vector.load %arg9[%c0_398, %c0_399] : memref<8x96xf32, #tpu.memory_space<vmem>>, vector<8x96xf32>
    tpu.vector_store %arg9[%c0_398, %c0_399], %382 {strides = array<i32>} : memref<8x96xf32, #tpu.memory_space<vmem>>, vector<8x96xf32>,
    %c0_400 = arith.constant 0 : index
    %c0_401 = arith.constant 0 : index
    %384 = vector.load %arg9[%c0_400, %c0_401] : memref<8x96xf32, #tpu.memory_space<vmem>>, vector<8x96xf32>
    %c24_402 = arith.constant 24 : index
    %c0_403 = arith.constant 0 : index
    %c0_404 = arith.constant 0 : index
    %385 = vector.load %arg5[%c24_402, %c0_403, %c0_404] : memref<25x8x40xbf16, #tpu.memory_space<vmem>>, vector<1x8x40xbf16>
    %386 = vector.shape_cast %385 : vector<1x8x40xbf16> to vector<8x40xbf16>
    %387 = vector.extract_strided_slice %213 {offsets = [0, 52], sizes = [40, 96], strides = [1, 1]} : vector<40x256xbf16> to vector<40x96xbf16>
    %cst_405 = arith.constant dense<0.000000e+00> : vector<8x96xf32>
    %388 = tpu.matmul %386, %387, %cst_405 {dimension_numbers = #tpu.dot_dimension_numbers<[1], [0], [0], [1], [0, 0, 1, 1], [], []>} : vector<8x40xbf16>, vector<40x96xbf16>, vector<8x96xf32> -> vector<8x96xf32>
    %389 = arith.addf %384, %388 : vector<8x96xf32>
    %c0_406 = arith.constant 0 : index
    %c0_407 = arith.constant 0 : index
    %390 = vector.load %arg9[%c0_406, %c0_407] : memref<8x96xf32, #tpu.memory_space<vmem>>, vector<8x96xf32>
    tpu.vector_store %arg9[%c0_406, %c0_407], %389 {strides = array<i32>} : memref<8x96xf32, #tpu.memory_space<vmem>>, vector<8x96xf32>,
    %c0_408 = arith.constant 0 : index
    %c0_409 = arith.constant 0 : index
    %391 = vector.load %arg9[%c0_408, %c0_409] : memref<8x96xf32, #tpu.memory_space<vmem>>, vector<8x96xf32>
    %c0_410 = arith.constant 0 : index
    %c1_411 = arith.constant 1 : index
    %c0_412 = arith.constant 0 : index
    %c0_413 = arith.constant 0 : index
    %392 = vector.load %arg6[%c0_410, %c1_411, %c0_412, %c0_413] : memref<1x4x8x96xf32, #tpu.memory_space<vmem>>, vector<1x1x8x96xf32>
    %393 = vector.shape_cast %392 : vector<1x1x8x96xf32> to vector<8x96xf32>
    %394 = vector.shape_cast %391 : vector<8x96xf32> to vector<1x1x8x96xf32>
    tpu.vector_store %arg6[%c0_410, %c1_411, %c0_412, %c0_413], %394 {strides = array<i32>} : memref<1x4x8x96xf32, #tpu.memory_space<vmem>>, vector<1x1x8x96xf32>,
    %c4_i32_414 = arith.constant 4 : i32
    %395 = arith.muli %arg1, %c4_i32_414 : i32
    %c1_i32 = arith.constant 1 : i32
    %396 = arith.addi %395, %c1_i32 : i32
    %c8_i32_415 = arith.constant 8 : i32
    %397 = arith.cmpi slt, %396, %c8_i32_415 : i32
    %398 = arith.extui %397 : i1 to i32
    %399 = arith.sitofp %398 : i32 to f32
    %400 = vector.broadcast %399 : f32 to vector<1x96xf32>
    %401 = arith.mulf %8, %400 : vector<1x96xf32>
    %402 = vector.broadcast %401 : vector<1x96xf32> to vector<8x96xf32>
    %403 = arith.mulf %391, %402 : vector<8x96xf32>
    %c0_416 = arith.constant 0 : index
    %c0_417 = arith.constant 0 : index
    %404 = vector.load %arg10[%c0_416, %c0_417] : memref<8x1xf32, #tpu.memory_space<vmem>>, vector<8x1xf32>
    %cst_418 = arith.constant dense<0.000000e+00> : vector<8xf32>
    %405 = vector.multi_reduction <add>, %403, %cst_418 [1] : vector<8x96xf32> to vector<8xf32>
    %406 = vector.shape_cast %405 : vector<8xf32> to vector<8x1xf32>
    %407 = arith.addf %404, %406 : vector<8x1xf32>
    %c0_419 = arith.constant 0 : index
    %c0_420 = arith.constant 0 : index
    %408 = vector.load %arg10[%c0_419, %c0_420] : memref<8x1xf32, #tpu.memory_space<vmem>>, vector<8x1xf32>
    tpu.vector_store %arg10[%c0_419, %c0_420], %407 {strides = array<i32>} : memref<8x1xf32, #tpu.memory_space<vmem>>, vector<8x1xf32>,
    %c0_421 = arith.constant 0 : index
    %c0_422 = arith.constant 0 : index
    %409 = vector.load %arg11[%c0_421, %c0_422] : memref<8x1xf32, #tpu.memory_space<vmem>>, vector<8x1xf32>
    %410 = arith.mulf %403, %403 : vector<8x96xf32>
    %cst_423 = arith.constant dense<0.000000e+00> : vector<8xf32>
    %411 = vector.multi_reduction <add>, %410, %cst_423 [1] : vector<8x96xf32> to vector<8xf32>
    %412 = vector.shape_cast %411 : vector<8xf32> to vector<8x1xf32>
    %413 = arith.addf %409, %412 : vector<8x1xf32>
    %c0_424 = arith.constant 0 : index
    %c0_425 = arith.constant 0 : index
    %414 = vector.load %arg11[%c0_424, %c0_425] : memref<8x1xf32, #tpu.memory_space<vmem>>, vector<8x1xf32>
    tpu.vector_store %arg11[%c0_424, %c0_425], %413 {strides = array<i32>} : memref<8x1xf32, #tpu.memory_space<vmem>>, vector<8x1xf32>,
    %415 = vector.extract_strided_slice %7 {offsets = [2, 0, 0], sizes = [5, 8, 256], strides = [1, 1, 1]} : vector<8x8x256xbf16> to vector<5x8x256xbf16>
    %416 = vector.shape_cast %415 : vector<5x8x256xbf16> to vector<40x256xbf16>
    %cst_426 = arith.constant 0.000000e+00 : f32
    %417 = vector.broadcast %cst_426 : f32 to vector<8x96xf32>
    %c0_427 = arith.constant 0 : index
    %c0_428 = arith.constant 0 : index
    %418 = vector.load %arg9[%c0_427, %c0_428] : memref<8x96xf32, #tpu.memory_space<vmem>>, vector<8x96xf32>
    tpu.vector_store %arg9[%c0_427, %c0_428], %417 {strides = array<i32>} : memref<8x96xf32, #tpu.memory_space<vmem>>, vector<8x96xf32>,
    %c0_429 = arith.constant 0 : index
    %c0_430 = arith.constant 0 : index
    %419 = vector.load %arg9[%c0_429, %c0_430] : memref<8x96xf32, #tpu.memory_space<vmem>>, vector<8x96xf32>
    %c0_431 = arith.constant 0 : index
    %c0_432 = arith.constant 0 : index
    %c0_433 = arith.constant 0 : index
    %420 = vector.load %arg5[%c0_431, %c0_432, %c0_433] : memref<25x8x40xbf16, #tpu.memory_space<vmem>>, vector<1x8x40xbf16>
    %421 = vector.shape_cast %420 : vector<1x8x40xbf16> to vector<8x40xbf16>
    %422 = vector.extract_strided_slice %416 {offsets = [0, 0], sizes = [40, 96], strides = [1, 1]} : vector<40x256xbf16> to vector<40x96xbf16>
    %cst_434 = arith.constant dense<0.000000e+00> : vector<8x96xf32>
    %423 = tpu.matmul %421, %422, %cst_434 {dimension_numbers = #tpu.dot_dimension_numbers<[1], [0], [0], [1], [0, 0, 1, 1], [], []>} : vector<8x40xbf16>, vector<40x96xbf16>, vector<8x96xf32> -> vector<8x96xf32>
    %424 = arith.addf %419, %423 : vector<8x96xf32>
    %c0_435 = arith.constant 0 : index
    %c0_436 = arith.constant 0 : index
    %425 = vector.load %arg9[%c0_435, %c0_436] : memref<8x96xf32, #tpu.memory_space<vmem>>, vector<8x96xf32>
    tpu.vector_store %arg9[%c0_435, %c0_436], %424 {strides = array<i32>} : memref<8x96xf32, #tpu.memory_space<vmem>>, vector<8x96xf32>,
    %c0_437 = arith.constant 0 : index
    %c0_438 = arith.constant 0 : index
    %426 = vector.load %arg9[%c0_437, %c0_438] : memref<8x96xf32, #tpu.memory_space<vmem>>, vector<8x96xf32>
    %c1_439 = arith.constant 1 : index
    %c0_440 = arith.constant 0 : index
    %c0_441 = arith.constant 0 : index
    %427 = vector.load %arg5[%c1_439, %c0_440, %c0_441] : memref<25x8x40xbf16, #tpu.memory_space<vmem>>, vector<1x8x40xbf16>
    %428 = vector.shape_cast %427 : vector<1x8x40xbf16> to vector<8x40xbf16>
    %429 = vector.extract_strided_slice %416 {offsets = [0, 1], sizes = [40, 96], strides = [1, 1]} : vector<40x256xbf16> to vector<40x96xbf16>
    %cst_442 = arith.constant dense<0.000000e+00> : vector<8x96xf32>
    %430 = tpu.matmul %428, %429, %cst_442 {dimension_numbers = #tpu.dot_dimension_numbers<[1], [0], [0], [1], [0, 0, 1, 1], [], []>} : vector<8x40xbf16>, vector<40x96xbf16>, vector<8x96xf32> -> vector<8x96xf32>
    %431 = arith.addf %426, %430 : vector<8x96xf32>
    %c0_443 = arith.constant 0 : index
    %c0_444 = arith.constant 0 : index
    %432 = vector.load %arg9[%c0_443, %c0_444] : memref<8x96xf32, #tpu.memory_space<vmem>>, vector<8x96xf32>
    tpu.vector_store %arg9[%c0_443, %c0_444], %431 {strides = array<i32>} : memref<8x96xf32, #tpu.memory_space<vmem>>, vector<8x96xf32>,
    %c0_445 = arith.constant 0 : index
    %c0_446 = arith.constant 0 : index
    %433 = vector.load %arg9[%c0_445, %c0_446] : memref<8x96xf32, #tpu.memory_space<vmem>>, vector<8x96xf32>
    %c2_447 = arith.constant 2 : index
    %c0_448 = arith.constant 0 : index
    %c0_449 = arith.constant 0 : index
    %434 = vector.load %arg5[%c2_447, %c0_448, %c0_449] : memref<25x8x40xbf16, #tpu.memory_space<vmem>>, vector<1x8x40xbf16>
    %435 = vector.shape_cast %434 : vector<1x8x40xbf16> to vector<8x40xbf16>
    %436 = vector.extract_strided_slice %416 {offsets = [0, 2], sizes = [40, 96], strides = [1, 1]} : vector<40x256xbf16> to vector<40x96xbf16>
    %cst_450 = arith.constant dense<0.000000e+00> : vector<8x96xf32>
    %437 = tpu.matmul %435, %436, %cst_450 {dimension_numbers = #tpu.dot_dimension_numbers<[1], [0], [0], [1], [0, 0, 1, 1], [], []>} : vector<8x40xbf16>, vector<40x96xbf16>, vector<8x96xf32> -> vector<8x96xf32>
    %438 = arith.addf %433, %437 : vector<8x96xf32>
    %c0_451 = arith.constant 0 : index
    %c0_452 = arith.constant 0 : index
    %439 = vector.load %arg9[%c0_451, %c0_452] : memref<8x96xf32, #tpu.memory_space<vmem>>, vector<8x96xf32>
    tpu.vector_store %arg9[%c0_451, %c0_452], %438 {strides = array<i32>} : memref<8x96xf32, #tpu.memory_space<vmem>>, vector<8x96xf32>,
    %c0_453 = arith.constant 0 : index
    %c0_454 = arith.constant 0 : index
    %440 = vector.load %arg9[%c0_453, %c0_454] : memref<8x96xf32, #tpu.memory_space<vmem>>, vector<8x96xf32>
    %c3_455 = arith.constant 3 : index
    %c0_456 = arith.constant 0 : index
    %c0_457 = arith.constant 0 : index
    %441 = vector.load %arg5[%c3_455, %c0_456, %c0_457] : memref<25x8x40xbf16, #tpu.memory_space<vmem>>, vector<1x8x40xbf16>
    %442 = vector.shape_cast %441 : vector<1x8x40xbf16> to vector<8x40xbf16>
    %443 = vector.extract_strided_slice %416 {offsets = [0, 3], sizes = [40, 96], strides = [1, 1]} : vector<40x256xbf16> to vector<40x96xbf16>
    %cst_458 = arith.constant dense<0.000000e+00> : vector<8x96xf32>
    %444 = tpu.matmul %442, %443, %cst_458 {dimension_numbers = #tpu.dot_dimension_numbers<[1], [0], [0], [1], [0, 0, 1, 1], [], []>} : vector<8x40xbf16>, vector<40x96xbf16>, vector<8x96xf32> -> vector<8x96xf32>
    %445 = arith.addf %440, %444 : vector<8x96xf32>
    %c0_459 = arith.constant 0 : index
    %c0_460 = arith.constant 0 : index
    %446 = vector.load %arg9[%c0_459, %c0_460] : memref<8x96xf32, #tpu.memory_space<vmem>>, vector<8x96xf32>
    tpu.vector_store %arg9[%c0_459, %c0_460], %445 {strides = array<i32>} : memref<8x96xf32, #tpu.memory_space<vmem>>, vector<8x96xf32>,
    %c0_461 = arith.constant 0 : index
    %c0_462 = arith.constant 0 : index
    %447 = vector.load %arg9[%c0_461, %c0_462] : memref<8x96xf32, #tpu.memory_space<vmem>>, vector<8x96xf32>
    %c4_463 = arith.constant 4 : index
    %c0_464 = arith.constant 0 : index
    %c0_465 = arith.constant 0 : index
    %448 = vector.load %arg5[%c4_463, %c0_464, %c0_465] : memref<25x8x40xbf16, #tpu.memory_space<vmem>>, vector<1x8x40xbf16>
    %449 = vector.shape_cast %448 : vector<1x8x40xbf16> to vector<8x40xbf16>
    %450 = vector.extract_strided_slice %416 {offsets = [0, 4], sizes = [40, 96], strides = [1, 1]} : vector<40x256xbf16> to vector<40x96xbf16>
    %cst_466 = arith.constant dense<0.000000e+00> : vector<8x96xf32>
    %451 = tpu.matmul %449, %450, %cst_466 {dimension_numbers = #tpu.dot_dimension_numbers<[1], [0], [0], [1], [0, 0, 1, 1], [], []>} : vector<8x40xbf16>, vector<40x96xbf16>, vector<8x96xf32> -> vector<8x96xf32>
    %452 = arith.addf %447, %451 : vector<8x96xf32>
    %c0_467 = arith.constant 0 : index
    %c0_468 = arith.constant 0 : index
    %453 = vector.load %arg9[%c0_467, %c0_468] : memref<8x96xf32, #tpu.memory_space<vmem>>, vector<8x96xf32>
    tpu.vector_store %arg9[%c0_467, %c0_468], %452 {strides = array<i32>} : memref<8x96xf32, #tpu.memory_space<vmem>>, vector<8x96xf32>,
    %c0_469 = arith.constant 0 : index
    %c0_470 = arith.constant 0 : index
    %454 = vector.load %arg9[%c0_469, %c0_470] : memref<8x96xf32, #tpu.memory_space<vmem>>, vector<8x96xf32>
    %c5_471 = arith.constant 5 : index
    %c0_472 = arith.constant 0 : index
    %c0_473 = arith.constant 0 : index
    %455 = vector.load %arg5[%c5_471, %c0_472, %c0_473] : memref<25x8x40xbf16, #tpu.memory_space<vmem>>, vector<1x8x40xbf16>
    %456 = vector.shape_cast %455 : vector<1x8x40xbf16> to vector<8x40xbf16>
    %457 = vector.extract_strided_slice %416 {offsets = [0, 12], sizes = [40, 96], strides = [1, 1]} : vector<40x256xbf16> to vector<40x96xbf16>
    %cst_474 = arith.constant dense<0.000000e+00> : vector<8x96xf32>
    %458 = tpu.matmul %456, %457, %cst_474 {dimension_numbers = #tpu.dot_dimension_numbers<[1], [0], [0], [1], [0, 0, 1, 1], [], []>} : vector<8x40xbf16>, vector<40x96xbf16>, vector<8x96xf32> -> vector<8x96xf32>
    %459 = arith.addf %454, %458 : vector<8x96xf32>
    %c0_475 = arith.constant 0 : index
    %c0_476 = arith.constant 0 : index
    %460 = vector.load %arg9[%c0_475, %c0_476] : memref<8x96xf32, #tpu.memory_space<vmem>>, vector<8x96xf32>
    tpu.vector_store %arg9[%c0_475, %c0_476], %459 {strides = array<i32>} : memref<8x96xf32, #tpu.memory_space<vmem>>, vector<8x96xf32>,
    %c0_477 = arith.constant 0 : index
    %c0_478 = arith.constant 0 : index
    %461 = vector.load %arg9[%c0_477, %c0_478] : memref<8x96xf32, #tpu.memory_space<vmem>>, vector<8x96xf32>
    %c6_479 = arith.constant 6 : index
    %c0_480 = arith.constant 0 : index
    %c0_481 = arith.constant 0 : index
    %462 = vector.load %arg5[%c6_479, %c0_480, %c0_481] : memref<25x8x40xbf16, #tpu.memory_space<vmem>>, vector<1x8x40xbf16>
    %463 = vector.shape_cast %462 : vector<1x8x40xbf16> to vector<8x40xbf16>
    %464 = vector.extract_strided_slice %416 {offsets = [0, 13], sizes = [40, 96], strides = [1, 1]} : vector<40x256xbf16> to vector<40x96xbf16>
    %cst_482 = arith.constant dense<0.000000e+00> : vector<8x96xf32>
    %465 = tpu.matmul %463, %464, %cst_482 {dimension_numbers = #tpu.dot_dimension_numbers<[1], [0], [0], [1], [0, 0, 1, 1], [], []>} : vector<8x40xbf16>, vector<40x96xbf16>, vector<8x96xf32> -> vector<8x96xf32>
    %466 = arith.addf %461, %465 : vector<8x96xf32>
    %c0_483 = arith.constant 0 : index
    %c0_484 = arith.constant 0 : index
    %467 = vector.load %arg9[%c0_483, %c0_484] : memref<8x96xf32, #tpu.memory_space<vmem>>, vector<8x96xf32>
    tpu.vector_store %arg9[%c0_483, %c0_484], %466 {strides = array<i32>} : memref<8x96xf32, #tpu.memory_space<vmem>>, vector<8x96xf32>,
    %c0_485 = arith.constant 0 : index
    %c0_486 = arith.constant 0 : index
    %468 = vector.load %arg9[%c0_485, %c0_486] : memref<8x96xf32, #tpu.memory_space<vmem>>, vector<8x96xf32>
    %c7_487 = arith.constant 7 : index
    %c0_488 = arith.constant 0 : index
    %c0_489 = arith.constant 0 : index
    %469 = vector.load %arg5[%c7_487, %c0_488, %c0_489] : memref<25x8x40xbf16, #tpu.memory_space<vmem>>, vector<1x8x40xbf16>
    %470 = vector.shape_cast %469 : vector<1x8x40xbf16> to vector<8x40xbf16>
    %471 = vector.extract_strided_slice %416 {offsets = [0, 14], sizes = [40, 96], strides = [1, 1]} : vector<40x256xbf16> to vector<40x96xbf16>
    %cst_490 = arith.constant dense<0.000000e+00> : vector<8x96xf32>
    %472 = tpu.matmul %470, %471, %cst_490 {dimension_numbers = #tpu.dot_dimension_numbers<[1], [0], [0], [1], [0, 0, 1, 1], [], []>} : vector<8x40xbf16>, vector<40x96xbf16>, vector<8x96xf32> -> vector<8x96xf32>
    %473 = arith.addf %468, %472 : vector<8x96xf32>
    %c0_491 = arith.constant 0 : index
    %c0_492 = arith.constant 0 : index
    %474 = vector.load %arg9[%c0_491, %c0_492] : memref<8x96xf32, #tpu.memory_space<vmem>>, vector<8x96xf32>
    tpu.vector_store %arg9[%c0_491, %c0_492], %473 {strides = array<i32>} : memref<8x96xf32, #tpu.memory_space<vmem>>, vector<8x96xf32>,
    %c0_493 = arith.constant 0 : index
    %c0_494 = arith.constant 0 : index
    %475 = vector.load %arg9[%c0_493, %c0_494] : memref<8x96xf32, #tpu.memory_space<vmem>>, vector<8x96xf32>
    %c8_495 = arith.constant 8 : index
    %c0_496 = arith.constant 0 : index
    %c0_497 = arith.constant 0 : index
    %476 = vector.load %arg5[%c8_495, %c0_496, %c0_497] : memref<25x8x40xbf16, #tpu.memory_space<vmem>>, vector<1x8x40xbf16>
    %477 = vector.shape_cast %476 : vector<1x8x40xbf16> to vector<8x40xbf16>
    %478 = vector.extract_strided_slice %416 {offsets = [0, 15], sizes = [40, 96], strides = [1, 1]} : vector<40x256xbf16> to vector<40x96xbf16>
    %cst_498 = arith.constant dense<0.000000e+00> : vector<8x96xf32>
    %479 = tpu.matmul %477, %478, %cst_498 {dimension_numbers = #tpu.dot_dimension_numbers<[1], [0], [0], [1], [0, 0, 1, 1], [], []>} : vector<8x40xbf16>, vector<40x96xbf16>, vector<8x96xf32> -> vector<8x96xf32>
    %480 = arith.addf %475, %479 : vector<8x96xf32>
    %c0_499 = arith.constant 0 : index
    %c0_500 = arith.constant 0 : index
    %481 = vector.load %arg9[%c0_499, %c0_500] : memref<8x96xf32, #tpu.memory_space<vmem>>, vector<8x96xf32>
    tpu.vector_store %arg9[%c0_499, %c0_500], %480 {strides = array<i32>} : memref<8x96xf32, #tpu.memory_space<vmem>>, vector<8x96xf32>,
    %c0_501 = arith.constant 0 : index
    %c0_502 = arith.constant 0 : index
    %482 = vector.load %arg9[%c0_501, %c0_502] : memref<8x96xf32, #tpu.memory_space<vmem>>, vector<8x96xf32>
    %c9_503 = arith.constant 9 : index
    %c0_504 = arith.constant 0 : index
    %c0_505 = arith.constant 0 : index
    %483 = vector.load %arg5[%c9_503, %c0_504, %c0_505] : memref<25x8x40xbf16, #tpu.memory_space<vmem>>, vector<1x8x40xbf16>
    %484 = vector.shape_cast %483 : vector<1x8x40xbf16> to vector<8x40xbf16>
    %485 = vector.extract_strided_slice %416 {offsets = [0, 16], sizes = [40, 96], strides = [1, 1]} : vector<40x256xbf16> to vector<40x96xbf16>
    %cst_506 = arith.constant dense<0.000000e+00> : vector<8x96xf32>
    %486 = tpu.matmul %484, %485, %cst_506 {dimension_numbers = #tpu.dot_dimension_numbers<[1], [0], [0], [1], [0, 0, 1, 1], [], []>} : vector<8x40xbf16>, vector<40x96xbf16>, vector<8x96xf32> -> vector<8x96xf32>
    %487 = arith.addf %482, %486 : vector<8x96xf32>
    %c0_507 = arith.constant 0 : index
    %c0_508 = arith.constant 0 : index
    %488 = vector.load %arg9[%c0_507, %c0_508] : memref<8x96xf32, #tpu.memory_space<vmem>>, vector<8x96xf32>
    tpu.vector_store %arg9[%c0_507, %c0_508], %487 {strides = array<i32>} : memref<8x96xf32, #tpu.memory_space<vmem>>, vector<8x96xf32>,
    %c0_509 = arith.constant 0 : index
    %c0_510 = arith.constant 0 : index
    %489 = vector.load %arg9[%c0_509, %c0_510] : memref<8x96xf32, #tpu.memory_space<vmem>>, vector<8x96xf32>
    %c10_511 = arith.constant 10 : index
    %c0_512 = arith.constant 0 : index
    %c0_513 = arith.constant 0 : index
    %490 = vector.load %arg5[%c10_511, %c0_512, %c0_513] : memref<25x8x40xbf16, #tpu.memory_space<vmem>>, vector<1x8x40xbf16>
    %491 = vector.shape_cast %490 : vector<1x8x40xbf16> to vector<8x40xbf16>
    %492 = vector.extract_strided_slice %416 {offsets = [0, 24], sizes = [40, 96], strides = [1, 1]} : vector<40x256xbf16> to vector<40x96xbf16>
    %cst_514 = arith.constant dense<0.000000e+00> : vector<8x96xf32>
    %493 = tpu.matmul %491, %492, %cst_514 {dimension_numbers = #tpu.dot_dimension_numbers<[1], [0], [0], [1], [0, 0, 1, 1], [], []>} : vector<8x40xbf16>, vector<40x96xbf16>, vector<8x96xf32> -> vector<8x96xf32>
    %494 = arith.addf %489, %493 : vector<8x96xf32>
    %c0_515 = arith.constant 0 : index
    %c0_516 = arith.constant 0 : index
    %495 = vector.load %arg9[%c0_515, %c0_516] : memref<8x96xf32, #tpu.memory_space<vmem>>, vector<8x96xf32>
    tpu.vector_store %arg9[%c0_515, %c0_516], %494 {strides = array<i32>} : memref<8x96xf32, #tpu.memory_space<vmem>>, vector<8x96xf32>,
    %c0_517 = arith.constant 0 : index
    %c0_518 = arith.constant 0 : index
    %496 = vector.load %arg9[%c0_517, %c0_518] : memref<8x96xf32, #tpu.memory_space<vmem>>, vector<8x96xf32>
    %c11_519 = arith.constant 11 : index
    %c0_520 = arith.constant 0 : index
    %c0_521 = arith.constant 0 : index
    %497 = vector.load %arg5[%c11_519, %c0_520, %c0_521] : memref<25x8x40xbf16, #tpu.memory_space<vmem>>, vector<1x8x40xbf16>
    %498 = vector.shape_cast %497 : vector<1x8x40xbf16> to vector<8x40xbf16>
    %499 = vector.extract_strided_slice %416 {offsets = [0, 25], sizes = [40, 96], strides = [1, 1]} : vector<40x256xbf16> to vector<40x96xbf16>
    %cst_522 = arith.constant dense<0.000000e+00> : vector<8x96xf32>
    %500 = tpu.matmul %498, %499, %cst_522 {dimension_numbers = #tpu.dot_dimension_numbers<[1], [0], [0], [1], [0, 0, 1, 1], [], []>} : vector<8x40xbf16>, vector<40x96xbf16>, vector<8x96xf32> -> vector<8x96xf32>
    %501 = arith.addf %496, %500 : vector<8x96xf32>
    %c0_523 = arith.constant 0 : index
    %c0_524 = arith.constant 0 : index
    %502 = vector.load %arg9[%c0_523, %c0_524] : memref<8x96xf32, #tpu.memory_space<vmem>>, vector<8x96xf32>
    tpu.vector_store %arg9[%c0_523, %c0_524], %501 {strides = array<i32>} : memref<8x96xf32, #tpu.memory_space<vmem>>, vector<8x96xf32>,
    %c0_525 = arith.constant 0 : index
    %c0_526 = arith.constant 0 : index
    %503 = vector.load %arg9[%c0_525, %c0_526] : memref<8x96xf32, #tpu.memory_space<vmem>>, vector<8x96xf32>
    %c12_527 = arith.constant 12 : index
    %c0_528 = arith.constant 0 : index
    %c0_529 = arith.constant 0 : index
    %504 = vector.load %arg5[%c12_527, %c0_528, %c0_529] : memref<25x8x40xbf16, #tpu.memory_space<vmem>>, vector<1x8x40xbf16>
    %505 = vector.shape_cast %504 : vector<1x8x40xbf16> to vector<8x40xbf16>
    %506 = vector.extract_strided_slice %416 {offsets = [0, 26], sizes = [40, 96], strides = [1, 1]} : vector<40x256xbf16> to vector<40x96xbf16>
    %cst_530 = arith.constant dense<0.000000e+00> : vector<8x96xf32>
    %507 = tpu.matmul %505, %506, %cst_530 {dimension_numbers = #tpu.dot_dimension_numbers<[1], [0], [0], [1], [0, 0, 1, 1], [], []>} : vector<8x40xbf16>, vector<40x96xbf16>, vector<8x96xf32> -> vector<8x96xf32>
    %508 = arith.addf %503, %507 : vector<8x96xf32>
    %c0_531 = arith.constant 0 : index
    %c0_532 = arith.constant 0 : index
    %509 = vector.load %arg9[%c0_531, %c0_532] : memref<8x96xf32, #tpu.memory_space<vmem>>, vector<8x96xf32>
    tpu.vector_store %arg9[%c0_531, %c0_532], %508 {strides = array<i32>} : memref<8x96xf32, #tpu.memory_space<vmem>>, vector<8x96xf32>,
    %c0_533 = arith.constant 0 : index
    %c0_534 = arith.constant 0 : index
    %510 = vector.load %arg9[%c0_533, %c0_534] : memref<8x96xf32, #tpu.memory_space<vmem>>, vector<8x96xf32>
    %c13_535 = arith.constant 13 : index
    %c0_536 = arith.constant 0 : index
    %c0_537 = arith.constant 0 : index
    %511 = vector.load %arg5[%c13_535, %c0_536, %c0_537] : memref<25x8x40xbf16, #tpu.memory_space<vmem>>, vector<1x8x40xbf16>
    %512 = vector.shape_cast %511 : vector<1x8x40xbf16> to vector<8x40xbf16>
    %513 = vector.extract_strided_slice %416 {offsets = [0, 27], sizes = [40, 96], strides = [1, 1]} : vector<40x256xbf16> to vector<40x96xbf16>
    %cst_538 = arith.constant dense<0.000000e+00> : vector<8x96xf32>
    %514 = tpu.matmul %512, %513, %cst_538 {dimension_numbers = #tpu.dot_dimension_numbers<[1], [0], [0], [1], [0, 0, 1, 1], [], []>} : vector<8x40xbf16>, vector<40x96xbf16>, vector<8x96xf32> -> vector<8x96xf32>
    %515 = arith.addf %510, %514 : vector<8x96xf32>
    %c0_539 = arith.constant 0 : index
    %c0_540 = arith.constant 0 : index
    %516 = vector.load %arg9[%c0_539, %c0_540] : memref<8x96xf32, #tpu.memory_space<vmem>>, vector<8x96xf32>
    tpu.vector_store %arg9[%c0_539, %c0_540], %515 {strides = array<i32>} : memref<8x96xf32, #tpu.memory_space<vmem>>, vector<8x96xf32>,
    %c0_541 = arith.constant 0 : index
    %c0_542 = arith.constant 0 : index
    %517 = vector.load %arg9[%c0_541, %c0_542] : memref<8x96xf32, #tpu.memory_space<vmem>>, vector<8x96xf32>
    %c14_543 = arith.constant 14 : index
    %c0_544 = arith.constant 0 : index
    %c0_545 = arith.constant 0 : index
    %518 = vector.load %arg5[%c14_543, %c0_544, %c0_545] : memref<25x8x40xbf16, #tpu.memory_space<vmem>>, vector<1x8x40xbf16>
    %519 = vector.shape_cast %518 : vector<1x8x40xbf16> to vector<8x40xbf16>
    %520 = vector.extract_strided_slice %416 {offsets = [0, 28], sizes = [40, 96], strides = [1, 1]} : vector<40x256xbf16> to vector<40x96xbf16>
    %cst_546 = arith.constant dense<0.000000e+00> : vector<8x96xf32>
    %521 = tpu.matmul %519, %520, %cst_546 {dimension_numbers = #tpu.dot_dimension_numbers<[1], [0], [0], [1], [0, 0, 1, 1], [], []>} : vector<8x40xbf16>, vector<40x96xbf16>, vector<8x96xf32> -> vector<8x96xf32>
    %522 = arith.addf %517, %521 : vector<8x96xf32>
    %c0_547 = arith.constant 0 : index
    %c0_548 = arith.constant 0 : index
    %523 = vector.load %arg9[%c0_547, %c0_548] : memref<8x96xf32, #tpu.memory_space<vmem>>, vector<8x96xf32>
    tpu.vector_store %arg9[%c0_547, %c0_548], %522 {strides = array<i32>} : memref<8x96xf32, #tpu.memory_space<vmem>>, vector<8x96xf32>,
    %c0_549 = arith.constant 0 : index
    %c0_550 = arith.constant 0 : index
    %524 = vector.load %arg9[%c0_549, %c0_550] : memref<8x96xf32, #tpu.memory_space<vmem>>, vector<8x96xf32>
    %c15_551 = arith.constant 15 : index
    %c0_552 = arith.constant 0 : index
    %c0_553 = arith.constant 0 : index
    %525 = vector.load %arg5[%c15_551, %c0_552, %c0_553] : memref<25x8x40xbf16, #tpu.memory_space<vmem>>, vector<1x8x40xbf16>
    %526 = vector.shape_cast %525 : vector<1x8x40xbf16> to vector<8x40xbf16>
    %527 = vector.extract_strided_slice %416 {offsets = [0, 36], sizes = [40, 96], strides = [1, 1]} : vector<40x256xbf16> to vector<40x96xbf16>
    %cst_554 = arith.constant dense<0.000000e+00> : vector<8x96xf32>
    %528 = tpu.matmul %526, %527, %cst_554 {dimension_numbers = #tpu.dot_dimension_numbers<[1], [0], [0], [1], [0, 0, 1, 1], [], []>} : vector<8x40xbf16>, vector<40x96xbf16>, vector<8x96xf32> -> vector<8x96xf32>
    %529 = arith.addf %524, %528 : vector<8x96xf32>
    %c0_555 = arith.constant 0 : index
    %c0_556 = arith.constant 0 : index
    %530 = vector.load %arg9[%c0_555, %c0_556] : memref<8x96xf32, #tpu.memory_space<vmem>>, vector<8x96xf32>
    tpu.vector_store %arg9[%c0_555, %c0_556], %529 {strides = array<i32>} : memref<8x96xf32, #tpu.memory_space<vmem>>, vector<8x96xf32>,
    %c0_557 = arith.constant 0 : index
    %c0_558 = arith.constant 0 : index
    %531 = vector.load %arg9[%c0_557, %c0_558] : memref<8x96xf32, #tpu.memory_space<vmem>>, vector<8x96xf32>
    %c16_559 = arith.constant 16 : index
    %c0_560 = arith.constant 0 : index
    %c0_561 = arith.constant 0 : index
    %532 = vector.load %arg5[%c16_559, %c0_560, %c0_561] : memref<25x8x40xbf16, #tpu.memory_space<vmem>>, vector<1x8x40xbf16>
    %533 = vector.shape_cast %532 : vector<1x8x40xbf16> to vector<8x40xbf16>
    %534 = vector.extract_strided_slice %416 {offsets = [0, 37], sizes = [40, 96], strides = [1, 1]} : vector<40x256xbf16> to vector<40x96xbf16>
    %cst_562 = arith.constant dense<0.000000e+00> : vector<8x96xf32>
    %535 = tpu.matmul %533, %534, %cst_562 {dimension_numbers = #tpu.dot_dimension_numbers<[1], [0], [0], [1], [0, 0, 1, 1], [], []>} : vector<8x40xbf16>, vector<40x96xbf16>, vector<8x96xf32> -> vector<8x96xf32>
    %536 = arith.addf %531, %535 : vector<8x96xf32>
    %c0_563 = arith.constant 0 : index
    %c0_564 = arith.constant 0 : index
    %537 = vector.load %arg9[%c0_563, %c0_564] : memref<8x96xf32, #tpu.memory_space<vmem>>, vector<8x96xf32>
    tpu.vector_store %arg9[%c0_563, %c0_564], %536 {strides = array<i32>} : memref<8x96xf32, #tpu.memory_space<vmem>>, vector<8x96xf32>,
    %c0_565 = arith.constant 0 : index
    %c0_566 = arith.constant 0 : index
    %538 = vector.load %arg9[%c0_565, %c0_566] : memref<8x96xf32, #tpu.memory_space<vmem>>, vector<8x96xf32>
    %c17_567 = arith.constant 17 : index
    %c0_568 = arith.constant 0 : index
    %c0_569 = arith.constant 0 : index
    %539 = vector.load %arg5[%c17_567, %c0_568, %c0_569] : memref<25x8x40xbf16, #tpu.memory_space<vmem>>, vector<1x8x40xbf16>
    %540 = vector.shape_cast %539 : vector<1x8x40xbf16> to vector<8x40xbf16>
    %541 = vector.extract_strided_slice %416 {offsets = [0, 38], sizes = [40, 96], strides = [1, 1]} : vector<40x256xbf16> to vector<40x96xbf16>
    %cst_570 = arith.constant dense<0.000000e+00> : vector<8x96xf32>
    %542 = tpu.matmul %540, %541, %cst_570 {dimension_numbers = #tpu.dot_dimension_numbers<[1], [0], [0], [1], [0, 0, 1, 1], [], []>} : vector<8x40xbf16>, vector<40x96xbf16>, vector<8x96xf32> -> vector<8x96xf32>
    %543 = arith.addf %538, %542 : vector<8x96xf32>
    %c0_571 = arith.constant 0 : index
    %c0_572 = arith.constant 0 : index
    %544 = vector.load %arg9[%c0_571, %c0_572] : memref<8x96xf32, #tpu.memory_space<vmem>>, vector<8x96xf32>
    tpu.vector_store %arg9[%c0_571, %c0_572], %543 {strides = array<i32>} : memref<8x96xf32, #tpu.memory_space<vmem>>, vector<8x96xf32>,
    %c0_573 = arith.constant 0 : index
    %c0_574 = arith.constant 0 : index
    %545 = vector.load %arg9[%c0_573, %c0_574] : memref<8x96xf32, #tpu.memory_space<vmem>>, vector<8x96xf32>
    %c18_575 = arith.constant 18 : index
    %c0_576 = arith.constant 0 : index
    %c0_577 = arith.constant 0 : index
    %546 = vector.load %arg5[%c18_575, %c0_576, %c0_577] : memref<25x8x40xbf16, #tpu.memory_space<vmem>>, vector<1x8x40xbf16>
    %547 = vector.shape_cast %546 : vector<1x8x40xbf16> to vector<8x40xbf16>
    %548 = vector.extract_strided_slice %416 {offsets = [0, 39], sizes = [40, 96], strides = [1, 1]} : vector<40x256xbf16> to vector<40x96xbf16>
    %cst_578 = arith.constant dense<0.000000e+00> : vector<8x96xf32>
    %549 = tpu.matmul %547, %548, %cst_578 {dimension_numbers = #tpu.dot_dimension_numbers<[1], [0], [0], [1], [0, 0, 1, 1], [], []>} : vector<8x40xbf16>, vector<40x96xbf16>, vector<8x96xf32> -> vector<8x96xf32>
    %550 = arith.addf %545, %549 : vector<8x96xf32>
    %c0_579 = arith.constant 0 : index
    %c0_580 = arith.constant 0 : index
    %551 = vector.load %arg9[%c0_579, %c0_580] : memref<8x96xf32, #tpu.memory_space<vmem>>, vector<8x96xf32>
    tpu.vector_store %arg9[%c0_579, %c0_580], %550 {strides = array<i32>} : memref<8x96xf32, #tpu.memory_space<vmem>>, vector<8x96xf32>,
    %c0_581 = arith.constant 0 : index
    %c0_582 = arith.constant 0 : index
    %552 = vector.load %arg9[%c0_581, %c0_582] : memref<8x96xf32, #tpu.memory_space<vmem>>, vector<8x96xf32>
    %c19_583 = arith.constant 19 : index
    %c0_584 = arith.constant 0 : index
    %c0_585 = arith.constant 0 : index
    %553 = vector.load %arg5[%c19_583, %c0_584, %c0_585] : memref<25x8x40xbf16, #tpu.memory_space<vmem>>, vector<1x8x40xbf16>
    %554 = vector.shape_cast %553 : vector<1x8x40xbf16> to vector<8x40xbf16>
    %555 = vector.extract_strided_slice %416 {offsets = [0, 40], sizes = [40, 96], strides = [1, 1]} : vector<40x256xbf16> to vector<40x96xbf16>
    %cst_586 = arith.constant dense<0.000000e+00> : vector<8x96xf32>
    %556 = tpu.matmul %554, %555, %cst_586 {dimension_numbers = #tpu.dot_dimension_numbers<[1], [0], [0], [1], [0, 0, 1, 1], [], []>} : vector<8x40xbf16>, vector<40x96xbf16>, vector<8x96xf32> -> vector<8x96xf32>
    %557 = arith.addf %552, %556 : vector<8x96xf32>
    %c0_587 = arith.constant 0 : index
    %c0_588 = arith.constant 0 : index
    %558 = vector.load %arg9[%c0_587, %c0_588] : memref<8x96xf32, #tpu.memory_space<vmem>>, vector<8x96xf32>
    tpu.vector_store %arg9[%c0_587, %c0_588], %557 {strides = array<i32>} : memref<8x96xf32, #tpu.memory_space<vmem>>, vector<8x96xf32>,
    %c0_589 = arith.constant 0 : index
    %c0_590 = arith.constant 0 : index
    %559 = vector.load %arg9[%c0_589, %c0_590] : memref<8x96xf32, #tpu.memory_space<vmem>>, vector<8x96xf32>
    %c20_591 = arith.constant 20 : index
    %c0_592 = arith.constant 0 : index
    %c0_593 = arith.constant 0 : index
    %560 = vector.load %arg5[%c20_591, %c0_592, %c0_593] : memref<25x8x40xbf16, #tpu.memory_space<vmem>>, vector<1x8x40xbf16>
    %561 = vector.shape_cast %560 : vector<1x8x40xbf16> to vector<8x40xbf16>
    %562 = vector.extract_strided_slice %416 {offsets = [0, 48], sizes = [40, 96], strides = [1, 1]} : vector<40x256xbf16> to vector<40x96xbf16>
    %cst_594 = arith.constant dense<0.000000e+00> : vector<8x96xf32>
    %563 = tpu.matmul %561, %562, %cst_594 {dimension_numbers = #tpu.dot_dimension_numbers<[1], [0], [0], [1], [0, 0, 1, 1], [], []>} : vector<8x40xbf16>, vector<40x96xbf16>, vector<8x96xf32> -> vector<8x96xf32>
    %564 = arith.addf %559, %563 : vector<8x96xf32>
    %c0_595 = arith.constant 0 : index
    %c0_596 = arith.constant 0 : index
    %565 = vector.load %arg9[%c0_595, %c0_596] : memref<8x96xf32, #tpu.memory_space<vmem>>, vector<8x96xf32>
    tpu.vector_store %arg9[%c0_595, %c0_596], %564 {strides = array<i32>} : memref<8x96xf32, #tpu.memory_space<vmem>>, vector<8x96xf32>,
    %c0_597 = arith.constant 0 : index
    %c0_598 = arith.constant 0 : index
    %566 = vector.load %arg9[%c0_597, %c0_598] : memref<8x96xf32, #tpu.memory_space<vmem>>, vector<8x96xf32>
    %c21_599 = arith.constant 21 : index
    %c0_600 = arith.constant 0 : index
    %c0_601 = arith.constant 0 : index
    %567 = vector.load %arg5[%c21_599, %c0_600, %c0_601] : memref<25x8x40xbf16, #tpu.memory_space<vmem>>, vector<1x8x40xbf16>
    %568 = vector.shape_cast %567 : vector<1x8x40xbf16> to vector<8x40xbf16>
    %569 = vector.extract_strided_slice %416 {offsets = [0, 49], sizes = [40, 96], strides = [1, 1]} : vector<40x256xbf16> to vector<40x96xbf16>
    %cst_602 = arith.constant dense<0.000000e+00> : vector<8x96xf32>
    %570 = tpu.matmul %568, %569, %cst_602 {dimension_numbers = #tpu.dot_dimension_numbers<[1], [0], [0], [1], [0, 0, 1, 1], [], []>} : vector<8x40xbf16>, vector<40x96xbf16>, vector<8x96xf32> -> vector<8x96xf32>
    %571 = arith.addf %566, %570 : vector<8x96xf32>
    %c0_603 = arith.constant 0 : index
    %c0_604 = arith.constant 0 : index
    %572 = vector.load %arg9[%c0_603, %c0_604] : memref<8x96xf32, #tpu.memory_space<vmem>>, vector<8x96xf32>
    tpu.vector_store %arg9[%c0_603, %c0_604], %571 {strides = array<i32>} : memref<8x96xf32, #tpu.memory_space<vmem>>, vector<8x96xf32>,
    %c0_605 = arith.constant 0 : index
    %c0_606 = arith.constant 0 : index
    %573 = vector.load %arg9[%c0_605, %c0_606] : memref<8x96xf32, #tpu.memory_space<vmem>>, vector<8x96xf32>
    %c22_607 = arith.constant 22 : index
    %c0_608 = arith.constant 0 : index
    %c0_609 = arith.constant 0 : index
    %574 = vector.load %arg5[%c22_607, %c0_608, %c0_609] : memref<25x8x40xbf16, #tpu.memory_space<vmem>>, vector<1x8x40xbf16>
    %575 = vector.shape_cast %574 : vector<1x8x40xbf16> to vector<8x40xbf16>
    %576 = vector.extract_strided_slice %416 {offsets = [0, 50], sizes = [40, 96], strides = [1, 1]} : vector<40x256xbf16> to vector<40x96xbf16>
    %cst_610 = arith.constant dense<0.000000e+00> : vector<8x96xf32>
    %577 = tpu.matmul %575, %576, %cst_610 {dimension_numbers = #tpu.dot_dimension_numbers<[1], [0], [0], [1], [0, 0, 1, 1], [], []>} : vector<8x40xbf16>, vector<40x96xbf16>, vector<8x96xf32> -> vector<8x96xf32>
    %578 = arith.addf %573, %577 : vector<8x96xf32>
    %c0_611 = arith.constant 0 : index
    %c0_612 = arith.constant 0 : index
    %579 = vector.load %arg9[%c0_611, %c0_612] : memref<8x96xf32, #tpu.memory_space<vmem>>, vector<8x96xf32>
    tpu.vector_store %arg9[%c0_611, %c0_612], %578 {strides = array<i32>} : memref<8x96xf32, #tpu.memory_space<vmem>>, vector<8x96xf32>,
    %c0_613 = arith.constant 0 : index
    %c0_614 = arith.constant 0 : index
    %580 = vector.load %arg9[%c0_613, %c0_614] : memref<8x96xf32, #tpu.memory_space<vmem>>, vector<8x96xf32>
    %c23_615 = arith.constant 23 : index
    %c0_616 = arith.constant 0 : index
    %c0_617 = arith.constant 0 : index
    %581 = vector.load %arg5[%c23_615, %c0_616, %c0_617] : memref<25x8x40xbf16, #tpu.memory_space<vmem>>, vector<1x8x40xbf16>
    %582 = vector.shape_cast %581 : vector<1x8x40xbf16> to vector<8x40xbf16>
    %583 = vector.extract_strided_slice %416 {offsets = [0, 51], sizes = [40, 96], strides = [1, 1]} : vector<40x256xbf16> to vector<40x96xbf16>
    %cst_618 = arith.constant dense<0.000000e+00> : vector<8x96xf32>
    %584 = tpu.matmul %582, %583, %cst_618 {dimension_numbers = #tpu.dot_dimension_numbers<[1], [0], [0], [1], [0, 0, 1, 1], [], []>} : vector<8x40xbf16>, vector<40x96xbf16>, vector<8x96xf32> -> vector<8x96xf32>
    %585 = arith.addf %580, %584 : vector<8x96xf32>
    %c0_619 = arith.constant 0 : index
    %c0_620 = arith.constant 0 : index
    %586 = vector.load %arg9[%c0_619, %c0_620] : memref<8x96xf32, #tpu.memory_space<vmem>>, vector<8x96xf32>
    tpu.vector_store %arg9[%c0_619, %c0_620], %585 {strides = array<i32>} : memref<8x96xf32, #tpu.memory_space<vmem>>, vector<8x96xf32>,
    %c0_621 = arith.constant 0 : index
    %c0_622 = arith.constant 0 : index
    %587 = vector.load %arg9[%c0_621, %c0_622] : memref<8x96xf32, #tpu.memory_space<vmem>>, vector<8x96xf32>
    %c24_623 = arith.constant 24 : index
    %c0_624 = arith.constant 0 : index
    %c0_625 = arith.constant 0 : index
    %588 = vector.load %arg5[%c24_623, %c0_624, %c0_625] : memref<25x8x40xbf16, #tpu.memory_space<vmem>>, vector<1x8x40xbf16>
    %589 = vector.shape_cast %588 : vector<1x8x40xbf16> to vector<8x40xbf16>
    %590 = vector.extract_strided_slice %416 {offsets = [0, 52], sizes = [40, 96], strides = [1, 1]} : vector<40x256xbf16> to vector<40x96xbf16>
    %cst_626 = arith.constant dense<0.000000e+00> : vector<8x96xf32>
    %591 = tpu.matmul %589, %590, %cst_626 {dimension_numbers = #tpu.dot_dimension_numbers<[1], [0], [0], [1], [0, 0, 1, 1], [], []>} : vector<8x40xbf16>, vector<40x96xbf16>, vector<8x96xf32> -> vector<8x96xf32>
    %592 = arith.addf %587, %591 : vector<8x96xf32>
    %c0_627 = arith.constant 0 : index
    %c0_628 = arith.constant 0 : index
    %593 = vector.load %arg9[%c0_627, %c0_628] : memref<8x96xf32, #tpu.memory_space<vmem>>, vector<8x96xf32>
    tpu.vector_store %arg9[%c0_627, %c0_628], %592 {strides = array<i32>} : memref<8x96xf32, #tpu.memory_space<vmem>>, vector<8x96xf32>,
    %c0_629 = arith.constant 0 : index
    %c0_630 = arith.constant 0 : index
    %594 = vector.load %arg9[%c0_629, %c0_630] : memref<8x96xf32, #tpu.memory_space<vmem>>, vector<8x96xf32>
    %c0_631 = arith.constant 0 : index
    %c2_632 = arith.constant 2 : index
    %c0_633 = arith.constant 0 : index
    %c0_634 = arith.constant 0 : index
    %595 = vector.load %arg6[%c0_631, %c2_632, %c0_633, %c0_634] : memref<1x4x8x96xf32, #tpu.memory_space<vmem>>, vector<1x1x8x96xf32>
    %596 = vector.shape_cast %595 : vector<1x1x8x96xf32> to vector<8x96xf32>
    %597 = vector.shape_cast %594 : vector<8x96xf32> to vector<1x1x8x96xf32>
    tpu.vector_store %arg6[%c0_631, %c2_632, %c0_633, %c0_634], %597 {strides = array<i32>} : memref<1x4x8x96xf32, #tpu.memory_space<vmem>>, vector<1x1x8x96xf32>,
    %c4_i32_635 = arith.constant 4 : i32
    %598 = arith.muli %arg1, %c4_i32_635 : i32
    %c2_i32 = arith.constant 2 : i32
    %599 = arith.addi %598, %c2_i32 : i32
    %c8_i32_636 = arith.constant 8 : i32
    %600 = arith.cmpi slt, %599, %c8_i32_636 : i32
    %601 = arith.extui %600 : i1 to i32
    %602 = arith.sitofp %601 : i32 to f32
    %603 = vector.broadcast %602 : f32 to vector<1x96xf32>
    %604 = arith.mulf %8, %603 : vector<1x96xf32>
    %605 = vector.broadcast %604 : vector<1x96xf32> to vector<8x96xf32>
    %606 = arith.mulf %594, %605 : vector<8x96xf32>
    %c0_637 = arith.constant 0 : index
    %c0_638 = arith.constant 0 : index
    %607 = vector.load %arg10[%c0_637, %c0_638] : memref<8x1xf32, #tpu.memory_space<vmem>>, vector<8x1xf32>
    %cst_639 = arith.constant dense<0.000000e+00> : vector<8xf32>
    %608 = vector.multi_reduction <add>, %606, %cst_639 [1] : vector<8x96xf32> to vector<8xf32>
    %609 = vector.shape_cast %608 : vector<8xf32> to vector<8x1xf32>
    %610 = arith.addf %607, %609 : vector<8x1xf32>
    %c0_640 = arith.constant 0 : index
    %c0_641 = arith.constant 0 : index
    %611 = vector.load %arg10[%c0_640, %c0_641] : memref<8x1xf32, #tpu.memory_space<vmem>>, vector<8x1xf32>
    tpu.vector_store %arg10[%c0_640, %c0_641], %610 {strides = array<i32>} : memref<8x1xf32, #tpu.memory_space<vmem>>, vector<8x1xf32>,
    %c0_642 = arith.constant 0 : index
    %c0_643 = arith.constant 0 : index
    %612 = vector.load %arg11[%c0_642, %c0_643] : memref<8x1xf32, #tpu.memory_space<vmem>>, vector<8x1xf32>
    %613 = arith.mulf %606, %606 : vector<8x96xf32>
    %cst_644 = arith.constant dense<0.000000e+00> : vector<8xf32>
    %614 = vector.multi_reduction <add>, %613, %cst_644 [1] : vector<8x96xf32> to vector<8xf32>
    %615 = vector.shape_cast %614 : vector<8xf32> to vector<8x1xf32>
    %616 = arith.addf %612, %615 : vector<8x1xf32>
    %c0_645 = arith.constant 0 : index
    %c0_646 = arith.constant 0 : index
    %617 = vector.load %arg11[%c0_645, %c0_646] : memref<8x1xf32, #tpu.memory_space<vmem>>, vector<8x1xf32>
    tpu.vector_store %arg11[%c0_645, %c0_646], %616 {strides = array<i32>} : memref<8x1xf32, #tpu.memory_space<vmem>>, vector<8x1xf32>,
    %618 = vector.extract_strided_slice %7 {offsets = [3, 0, 0], sizes = [5, 8, 256], strides = [1, 1, 1]} : vector<8x8x256xbf16> to vector<5x8x256xbf16>
    %619 = vector.shape_cast %618 : vector<5x8x256xbf16> to vector<40x256xbf16>
    %cst_647 = arith.constant 0.000000e+00 : f32
    %620 = vector.broadcast %cst_647 : f32 to vector<8x96xf32>
    %c0_648 = arith.constant 0 : index
    %c0_649 = arith.constant 0 : index
    %621 = vector.load %arg9[%c0_648, %c0_649] : memref<8x96xf32, #tpu.memory_space<vmem>>, vector<8x96xf32>
    tpu.vector_store %arg9[%c0_648, %c0_649], %620 {strides = array<i32>} : memref<8x96xf32, #tpu.memory_space<vmem>>, vector<8x96xf32>,
    %c0_650 = arith.constant 0 : index
    %c0_651 = arith.constant 0 : index
    %622 = vector.load %arg9[%c0_650, %c0_651] : memref<8x96xf32, #tpu.memory_space<vmem>>, vector<8x96xf32>
    %c0_652 = arith.constant 0 : index
    %c0_653 = arith.constant 0 : index
    %c0_654 = arith.constant 0 : index
    %623 = vector.load %arg5[%c0_652, %c0_653, %c0_654] : memref<25x8x40xbf16, #tpu.memory_space<vmem>>, vector<1x8x40xbf16>
    %624 = vector.shape_cast %623 : vector<1x8x40xbf16> to vector<8x40xbf16>
    %625 = vector.extract_strided_slice %619 {offsets = [0, 0], sizes = [40, 96], strides = [1, 1]} : vector<40x256xbf16> to vector<40x96xbf16>
    %cst_655 = arith.constant dense<0.000000e+00> : vector<8x96xf32>
    %626 = tpu.matmul %624, %625, %cst_655 {dimension_numbers = #tpu.dot_dimension_numbers<[1], [0], [0], [1], [0, 0, 1, 1], [], []>} : vector<8x40xbf16>, vector<40x96xbf16>, vector<8x96xf32> -> vector<8x96xf32>
    %627 = arith.addf %622, %626 : vector<8x96xf32>
    %c0_656 = arith.constant 0 : index
    %c0_657 = arith.constant 0 : index
    %628 = vector.load %arg9[%c0_656, %c0_657] : memref<8x96xf32, #tpu.memory_space<vmem>>, vector<8x96xf32>
    tpu.vector_store %arg9[%c0_656, %c0_657], %627 {strides = array<i32>} : memref<8x96xf32, #tpu.memory_space<vmem>>, vector<8x96xf32>,
    %c0_658 = arith.constant 0 : index
    %c0_659 = arith.constant 0 : index
    %629 = vector.load %arg9[%c0_658, %c0_659] : memref<8x96xf32, #tpu.memory_space<vmem>>, vector<8x96xf32>
    %c1_660 = arith.constant 1 : index
    %c0_661 = arith.constant 0 : index
    %c0_662 = arith.constant 0 : index
    %630 = vector.load %arg5[%c1_660, %c0_661, %c0_662] : memref<25x8x40xbf16, #tpu.memory_space<vmem>>, vector<1x8x40xbf16>
    %631 = vector.shape_cast %630 : vector<1x8x40xbf16> to vector<8x40xbf16>
    %632 = vector.extract_strided_slice %619 {offsets = [0, 1], sizes = [40, 96], strides = [1, 1]} : vector<40x256xbf16> to vector<40x96xbf16>
    %cst_663 = arith.constant dense<0.000000e+00> : vector<8x96xf32>
    %633 = tpu.matmul %631, %632, %cst_663 {dimension_numbers = #tpu.dot_dimension_numbers<[1], [0], [0], [1], [0, 0, 1, 1], [], []>} : vector<8x40xbf16>, vector<40x96xbf16>, vector<8x96xf32> -> vector<8x96xf32>
    %634 = arith.addf %629, %633 : vector<8x96xf32>
    %c0_664 = arith.constant 0 : index
    %c0_665 = arith.constant 0 : index
    %635 = vector.load %arg9[%c0_664, %c0_665] : memref<8x96xf32, #tpu.memory_space<vmem>>, vector<8x96xf32>
    tpu.vector_store %arg9[%c0_664, %c0_665], %634 {strides = array<i32>} : memref<8x96xf32, #tpu.memory_space<vmem>>, vector<8x96xf32>,
    %c0_666 = arith.constant 0 : index
    %c0_667 = arith.constant 0 : index
    %636 = vector.load %arg9[%c0_666, %c0_667] : memref<8x96xf32, #tpu.memory_space<vmem>>, vector<8x96xf32>
    %c2_668 = arith.constant 2 : index
    %c0_669 = arith.constant 0 : index
    %c0_670 = arith.constant 0 : index
    %637 = vector.load %arg5[%c2_668, %c0_669, %c0_670] : memref<25x8x40xbf16, #tpu.memory_space<vmem>>, vector<1x8x40xbf16>
    %638 = vector.shape_cast %637 : vector<1x8x40xbf16> to vector<8x40xbf16>
    %639 = vector.extract_strided_slice %619 {offsets = [0, 2], sizes = [40, 96], strides = [1, 1]} : vector<40x256xbf16> to vector<40x96xbf16>
    %cst_671 = arith.constant dense<0.000000e+00> : vector<8x96xf32>
    %640 = tpu.matmul %638, %639, %cst_671 {dimension_numbers = #tpu.dot_dimension_numbers<[1], [0], [0], [1], [0, 0, 1, 1], [], []>} : vector<8x40xbf16>, vector<40x96xbf16>, vector<8x96xf32> -> vector<8x96xf32>
    %641 = arith.addf %636, %640 : vector<8x96xf32>
    %c0_672 = arith.constant 0 : index
    %c0_673 = arith.constant 0 : index
    %642 = vector.load %arg9[%c0_672, %c0_673] : memref<8x96xf32, #tpu.memory_space<vmem>>, vector<8x96xf32>
    tpu.vector_store %arg9[%c0_672, %c0_673], %641 {strides = array<i32>} : memref<8x96xf32, #tpu.memory_space<vmem>>, vector<8x96xf32>,
    %c0_674 = arith.constant 0 : index
    %c0_675 = arith.constant 0 : index
    %643 = vector.load %arg9[%c0_674, %c0_675] : memref<8x96xf32, #tpu.memory_space<vmem>>, vector<8x96xf32>
    %c3_676 = arith.constant 3 : index
    %c0_677 = arith.constant 0 : index
    %c0_678 = arith.constant 0 : index
    %644 = vector.load %arg5[%c3_676, %c0_677, %c0_678] : memref<25x8x40xbf16, #tpu.memory_space<vmem>>, vector<1x8x40xbf16>
    %645 = vector.shape_cast %644 : vector<1x8x40xbf16> to vector<8x40xbf16>
    %646 = vector.extract_strided_slice %619 {offsets = [0, 3], sizes = [40, 96], strides = [1, 1]} : vector<40x256xbf16> to vector<40x96xbf16>
    %cst_679 = arith.constant dense<0.000000e+00> : vector<8x96xf32>
    %647 = tpu.matmul %645, %646, %cst_679 {dimension_numbers = #tpu.dot_dimension_numbers<[1], [0], [0], [1], [0, 0, 1, 1], [], []>} : vector<8x40xbf16>, vector<40x96xbf16>, vector<8x96xf32> -> vector<8x96xf32>
    %648 = arith.addf %643, %647 : vector<8x96xf32>
    %c0_680 = arith.constant 0 : index
    %c0_681 = arith.constant 0 : index
    %649 = vector.load %arg9[%c0_680, %c0_681] : memref<8x96xf32, #tpu.memory_space<vmem>>, vector<8x96xf32>
    tpu.vector_store %arg9[%c0_680, %c0_681], %648 {strides = array<i32>} : memref<8x96xf32, #tpu.memory_space<vmem>>, vector<8x96xf32>,
    %c0_682 = arith.constant 0 : index
    %c0_683 = arith.constant 0 : index
    %650 = vector.load %arg9[%c0_682, %c0_683] : memref<8x96xf32, #tpu.memory_space<vmem>>, vector<8x96xf32>
    %c4_684 = arith.constant 4 : index
    %c0_685 = arith.constant 0 : index
    %c0_686 = arith.constant 0 : index
    %651 = vector.load %arg5[%c4_684, %c0_685, %c0_686] : memref<25x8x40xbf16, #tpu.memory_space<vmem>>, vector<1x8x40xbf16>
    %652 = vector.shape_cast %651 : vector<1x8x40xbf16> to vector<8x40xbf16>
    %653 = vector.extract_strided_slice %619 {offsets = [0, 4], sizes = [40, 96], strides = [1, 1]} : vector<40x256xbf16> to vector<40x96xbf16>
    %cst_687 = arith.constant dense<0.000000e+00> : vector<8x96xf32>
    %654 = tpu.matmul %652, %653, %cst_687 {dimension_numbers = #tpu.dot_dimension_numbers<[1], [0], [0], [1], [0, 0, 1, 1], [], []>} : vector<8x40xbf16>, vector<40x96xbf16>, vector<8x96xf32> -> vector<8x96xf32>
    %655 = arith.addf %650, %654 : vector<8x96xf32>
    %c0_688 = arith.constant 0 : index
    %c0_689 = arith.constant 0 : index
    %656 = vector.load %arg9[%c0_688, %c0_689] : memref<8x96xf32, #tpu.memory_space<vmem>>, vector<8x96xf32>
    tpu.vector_store %arg9[%c0_688, %c0_689], %655 {strides = array<i32>} : memref<8x96xf32, #tpu.memory_space<vmem>>, vector<8x96xf32>,
    %c0_690 = arith.constant 0 : index
    %c0_691 = arith.constant 0 : index
    %657 = vector.load %arg9[%c0_690, %c0_691] : memref<8x96xf32, #tpu.memory_space<vmem>>, vector<8x96xf32>
    %c5_692 = arith.constant 5 : index
    %c0_693 = arith.constant 0 : index
    %c0_694 = arith.constant 0 : index
    %658 = vector.load %arg5[%c5_692, %c0_693, %c0_694] : memref<25x8x40xbf16, #tpu.memory_space<vmem>>, vector<1x8x40xbf16>
    %659 = vector.shape_cast %658 : vector<1x8x40xbf16> to vector<8x40xbf16>
    %660 = vector.extract_strided_slice %619 {offsets = [0, 12], sizes = [40, 96], strides = [1, 1]} : vector<40x256xbf16> to vector<40x96xbf16>
    %cst_695 = arith.constant dense<0.000000e+00> : vector<8x96xf32>
    %661 = tpu.matmul %659, %660, %cst_695 {dimension_numbers = #tpu.dot_dimension_numbers<[1], [0], [0], [1], [0, 0, 1, 1], [], []>} : vector<8x40xbf16>, vector<40x96xbf16>, vector<8x96xf32> -> vector<8x96xf32>
    %662 = arith.addf %657, %661 : vector<8x96xf32>
    %c0_696 = arith.constant 0 : index
    %c0_697 = arith.constant 0 : index
    %663 = vector.load %arg9[%c0_696, %c0_697] : memref<8x96xf32, #tpu.memory_space<vmem>>, vector<8x96xf32>
    tpu.vector_store %arg9[%c0_696, %c0_697], %662 {strides = array<i32>} : memref<8x96xf32, #tpu.memory_space<vmem>>, vector<8x96xf32>,
    %c0_698 = arith.constant 0 : index
    %c0_699 = arith.constant 0 : index
    %664 = vector.load %arg9[%c0_698, %c0_699] : memref<8x96xf32, #tpu.memory_space<vmem>>, vector<8x96xf32>
    %c6_700 = arith.constant 6 : index
    %c0_701 = arith.constant 0 : index
    %c0_702 = arith.constant 0 : index
    %665 = vector.load %arg5[%c6_700, %c0_701, %c0_702] : memref<25x8x40xbf16, #tpu.memory_space<vmem>>, vector<1x8x40xbf16>
    %666 = vector.shape_cast %665 : vector<1x8x40xbf16> to vector<8x40xbf16>
    %667 = vector.extract_strided_slice %619 {offsets = [0, 13], sizes = [40, 96], strides = [1, 1]} : vector<40x256xbf16> to vector<40x96xbf16>
    %cst_703 = arith.constant dense<0.000000e+00> : vector<8x96xf32>
    %668 = tpu.matmul %666, %667, %cst_703 {dimension_numbers = #tpu.dot_dimension_numbers<[1], [0], [0], [1], [0, 0, 1, 1], [], []>} : vector<8x40xbf16>, vector<40x96xbf16>, vector<8x96xf32> -> vector<8x96xf32>
    %669 = arith.addf %664, %668 : vector<8x96xf32>
    %c0_704 = arith.constant 0 : index
    %c0_705 = arith.constant 0 : index
    %670 = vector.load %arg9[%c0_704, %c0_705] : memref<8x96xf32, #tpu.memory_space<vmem>>, vector<8x96xf32>
    tpu.vector_store %arg9[%c0_704, %c0_705], %669 {strides = array<i32>} : memref<8x96xf32, #tpu.memory_space<vmem>>, vector<8x96xf32>,
    %c0_706 = arith.constant 0 : index
    %c0_707 = arith.constant 0 : index
    %671 = vector.load %arg9[%c0_706, %c0_707] : memref<8x96xf32, #tpu.memory_space<vmem>>, vector<8x96xf32>
    %c7_708 = arith.constant 7 : index
    %c0_709 = arith.constant 0 : index
    %c0_710 = arith.constant 0 : index
    %672 = vector.load %arg5[%c7_708, %c0_709, %c0_710] : memref<25x8x40xbf16, #tpu.memory_space<vmem>>, vector<1x8x40xbf16>
    %673 = vector.shape_cast %672 : vector<1x8x40xbf16> to vector<8x40xbf16>
    %674 = vector.extract_strided_slice %619 {offsets = [0, 14], sizes = [40, 96], strides = [1, 1]} : vector<40x256xbf16> to vector<40x96xbf16>
    %cst_711 = arith.constant dense<0.000000e+00> : vector<8x96xf32>
    %675 = tpu.matmul %673, %674, %cst_711 {dimension_numbers = #tpu.dot_dimension_numbers<[1], [0], [0], [1], [0, 0, 1, 1], [], []>} : vector<8x40xbf16>, vector<40x96xbf16>, vector<8x96xf32> -> vector<8x96xf32>
    %676 = arith.addf %671, %675 : vector<8x96xf32>
    %c0_712 = arith.constant 0 : index
    %c0_713 = arith.constant 0 : index
    %677 = vector.load %arg9[%c0_712, %c0_713] : memref<8x96xf32, #tpu.memory_space<vmem>>, vector<8x96xf32>
    tpu.vector_store %arg9[%c0_712, %c0_713], %676 {strides = array<i32>} : memref<8x96xf32, #tpu.memory_space<vmem>>, vector<8x96xf32>,
    %c0_714 = arith.constant 0 : index
    %c0_715 = arith.constant 0 : index
    %678 = vector.load %arg9[%c0_714, %c0_715] : memref<8x96xf32, #tpu.memory_space<vmem>>, vector<8x96xf32>
    %c8_716 = arith.constant 8 : index
    %c0_717 = arith.constant 0 : index
    %c0_718 = arith.constant 0 : index
    %679 = vector.load %arg5[%c8_716, %c0_717, %c0_718] : memref<25x8x40xbf16, #tpu.memory_space<vmem>>, vector<1x8x40xbf16>
    %680 = vector.shape_cast %679 : vector<1x8x40xbf16> to vector<8x40xbf16>
    %681 = vector.extract_strided_slice %619 {offsets = [0, 15], sizes = [40, 96], strides = [1, 1]} : vector<40x256xbf16> to vector<40x96xbf16>
    %cst_719 = arith.constant dense<0.000000e+00> : vector<8x96xf32>
    %682 = tpu.matmul %680, %681, %cst_719 {dimension_numbers = #tpu.dot_dimension_numbers<[1], [0], [0], [1], [0, 0, 1, 1], [], []>} : vector<8x40xbf16>, vector<40x96xbf16>, vector<8x96xf32> -> vector<8x96xf32>
    %683 = arith.addf %678, %682 : vector<8x96xf32>
    %c0_720 = arith.constant 0 : index
    %c0_721 = arith.constant 0 : index
    %684 = vector.load %arg9[%c0_720, %c0_721] : memref<8x96xf32, #tpu.memory_space<vmem>>, vector<8x96xf32>
    tpu.vector_store %arg9[%c0_720, %c0_721], %683 {strides = array<i32>} : memref<8x96xf32, #tpu.memory_space<vmem>>, vector<8x96xf32>,
    %c0_722 = arith.constant 0 : index
    %c0_723 = arith.constant 0 : index
    %685 = vector.load %arg9[%c0_722, %c0_723] : memref<8x96xf32, #tpu.memory_space<vmem>>, vector<8x96xf32>
    %c9_724 = arith.constant 9 : index
    %c0_725 = arith.constant 0 : index
    %c0_726 = arith.constant 0 : index
    %686 = vector.load %arg5[%c9_724, %c0_725, %c0_726] : memref<25x8x40xbf16, #tpu.memory_space<vmem>>, vector<1x8x40xbf16>
    %687 = vector.shape_cast %686 : vector<1x8x40xbf16> to vector<8x40xbf16>
    %688 = vector.extract_strided_slice %619 {offsets = [0, 16], sizes = [40, 96], strides = [1, 1]} : vector<40x256xbf16> to vector<40x96xbf16>
    %cst_727 = arith.constant dense<0.000000e+00> : vector<8x96xf32>
    %689 = tpu.matmul %687, %688, %cst_727 {dimension_numbers = #tpu.dot_dimension_numbers<[1], [0], [0], [1], [0, 0, 1, 1], [], []>} : vector<8x40xbf16>, vector<40x96xbf16>, vector<8x96xf32> -> vector<8x96xf32>
    %690 = arith.addf %685, %689 : vector<8x96xf32>
    %c0_728 = arith.constant 0 : index
    %c0_729 = arith.constant 0 : index
    %691 = vector.load %arg9[%c0_728, %c0_729] : memref<8x96xf32, #tpu.memory_space<vmem>>, vector<8x96xf32>
    tpu.vector_store %arg9[%c0_728, %c0_729], %690 {strides = array<i32>} : memref<8x96xf32, #tpu.memory_space<vmem>>, vector<8x96xf32>,
    %c0_730 = arith.constant 0 : index
    %c0_731 = arith.constant 0 : index
    %692 = vector.load %arg9[%c0_730, %c0_731] : memref<8x96xf32, #tpu.memory_space<vmem>>, vector<8x96xf32>
    %c10_732 = arith.constant 10 : index
    %c0_733 = arith.constant 0 : index
    %c0_734 = arith.constant 0 : index
    %693 = vector.load %arg5[%c10_732, %c0_733, %c0_734] : memref<25x8x40xbf16, #tpu.memory_space<vmem>>, vector<1x8x40xbf16>
    %694 = vector.shape_cast %693 : vector<1x8x40xbf16> to vector<8x40xbf16>
    %695 = vector.extract_strided_slice %619 {offsets = [0, 24], sizes = [40, 96], strides = [1, 1]} : vector<40x256xbf16> to vector<40x96xbf16>
    %cst_735 = arith.constant dense<0.000000e+00> : vector<8x96xf32>
    %696 = tpu.matmul %694, %695, %cst_735 {dimension_numbers = #tpu.dot_dimension_numbers<[1], [0], [0], [1], [0, 0, 1, 1], [], []>} : vector<8x40xbf16>, vector<40x96xbf16>, vector<8x96xf32> -> vector<8x96xf32>
    %697 = arith.addf %692, %696 : vector<8x96xf32>
    %c0_736 = arith.constant 0 : index
    %c0_737 = arith.constant 0 : index
    %698 = vector.load %arg9[%c0_736, %c0_737] : memref<8x96xf32, #tpu.memory_space<vmem>>, vector<8x96xf32>
    tpu.vector_store %arg9[%c0_736, %c0_737], %697 {strides = array<i32>} : memref<8x96xf32, #tpu.memory_space<vmem>>, vector<8x96xf32>,
    %c0_738 = arith.constant 0 : index
    %c0_739 = arith.constant 0 : index
    %699 = vector.load %arg9[%c0_738, %c0_739] : memref<8x96xf32, #tpu.memory_space<vmem>>, vector<8x96xf32>
    %c11_740 = arith.constant 11 : index
    %c0_741 = arith.constant 0 : index
    %c0_742 = arith.constant 0 : index
    %700 = vector.load %arg5[%c11_740, %c0_741, %c0_742] : memref<25x8x40xbf16, #tpu.memory_space<vmem>>, vector<1x8x40xbf16>
    %701 = vector.shape_cast %700 : vector<1x8x40xbf16> to vector<8x40xbf16>
    %702 = vector.extract_strided_slice %619 {offsets = [0, 25], sizes = [40, 96], strides = [1, 1]} : vector<40x256xbf16> to vector<40x96xbf16>
    %cst_743 = arith.constant dense<0.000000e+00> : vector<8x96xf32>
    %703 = tpu.matmul %701, %702, %cst_743 {dimension_numbers = #tpu.dot_dimension_numbers<[1], [0], [0], [1], [0, 0, 1, 1], [], []>} : vector<8x40xbf16>, vector<40x96xbf16>, vector<8x96xf32> -> vector<8x96xf32>
    %704 = arith.addf %699, %703 : vector<8x96xf32>
    %c0_744 = arith.constant 0 : index
    %c0_745 = arith.constant 0 : index
    %705 = vector.load %arg9[%c0_744, %c0_745] : memref<8x96xf32, #tpu.memory_space<vmem>>, vector<8x96xf32>
    tpu.vector_store %arg9[%c0_744, %c0_745], %704 {strides = array<i32>} : memref<8x96xf32, #tpu.memory_space<vmem>>, vector<8x96xf32>,
    %c0_746 = arith.constant 0 : index
    %c0_747 = arith.constant 0 : index
    %706 = vector.load %arg9[%c0_746, %c0_747] : memref<8x96xf32, #tpu.memory_space<vmem>>, vector<8x96xf32>
    %c12_748 = arith.constant 12 : index
    %c0_749 = arith.constant 0 : index
    %c0_750 = arith.constant 0 : index
    %707 = vector.load %arg5[%c12_748, %c0_749, %c0_750] : memref<25x8x40xbf16, #tpu.memory_space<vmem>>, vector<1x8x40xbf16>
    %708 = vector.shape_cast %707 : vector<1x8x40xbf16> to vector<8x40xbf16>
    %709 = vector.extract_strided_slice %619 {offsets = [0, 26], sizes = [40, 96], strides = [1, 1]} : vector<40x256xbf16> to vector<40x96xbf16>
    %cst_751 = arith.constant dense<0.000000e+00> : vector<8x96xf32>
    %710 = tpu.matmul %708, %709, %cst_751 {dimension_numbers = #tpu.dot_dimension_numbers<[1], [0], [0], [1], [0, 0, 1, 1], [], []>} : vector<8x40xbf16>, vector<40x96xbf16>, vector<8x96xf32> -> vector<8x96xf32>
    %711 = arith.addf %706, %710 : vector<8x96xf32>
    %c0_752 = arith.constant 0 : index
    %c0_753 = arith.constant 0 : index
    %712 = vector.load %arg9[%c0_752, %c0_753] : memref<8x96xf32, #tpu.memory_space<vmem>>, vector<8x96xf32>
    tpu.vector_store %arg9[%c0_752, %c0_753], %711 {strides = array<i32>} : memref<8x96xf32, #tpu.memory_space<vmem>>, vector<8x96xf32>,
    %c0_754 = arith.constant 0 : index
    %c0_755 = arith.constant 0 : index
    %713 = vector.load %arg9[%c0_754, %c0_755] : memref<8x96xf32, #tpu.memory_space<vmem>>, vector<8x96xf32>
    %c13_756 = arith.constant 13 : index
    %c0_757 = arith.constant 0 : index
    %c0_758 = arith.constant 0 : index
    %714 = vector.load %arg5[%c13_756, %c0_757, %c0_758] : memref<25x8x40xbf16, #tpu.memory_space<vmem>>, vector<1x8x40xbf16>
    %715 = vector.shape_cast %714 : vector<1x8x40xbf16> to vector<8x40xbf16>
    %716 = vector.extract_strided_slice %619 {offsets = [0, 27], sizes = [40, 96], strides = [1, 1]} : vector<40x256xbf16> to vector<40x96xbf16>
    %cst_759 = arith.constant dense<0.000000e+00> : vector<8x96xf32>
    %717 = tpu.matmul %715, %716, %cst_759 {dimension_numbers = #tpu.dot_dimension_numbers<[1], [0], [0], [1], [0, 0, 1, 1], [], []>} : vector<8x40xbf16>, vector<40x96xbf16>, vector<8x96xf32> -> vector<8x96xf32>
    %718 = arith.addf %713, %717 : vector<8x96xf32>
    %c0_760 = arith.constant 0 : index
    %c0_761 = arith.constant 0 : index
    %719 = vector.load %arg9[%c0_760, %c0_761] : memref<8x96xf32, #tpu.memory_space<vmem>>, vector<8x96xf32>
    tpu.vector_store %arg9[%c0_760, %c0_761], %718 {strides = array<i32>} : memref<8x96xf32, #tpu.memory_space<vmem>>, vector<8x96xf32>,
    %c0_762 = arith.constant 0 : index
    %c0_763 = arith.constant 0 : index
    %720 = vector.load %arg9[%c0_762, %c0_763] : memref<8x96xf32, #tpu.memory_space<vmem>>, vector<8x96xf32>
    %c14_764 = arith.constant 14 : index
    %c0_765 = arith.constant 0 : index
    %c0_766 = arith.constant 0 : index
    %721 = vector.load %arg5[%c14_764, %c0_765, %c0_766] : memref<25x8x40xbf16, #tpu.memory_space<vmem>>, vector<1x8x40xbf16>
    %722 = vector.shape_cast %721 : vector<1x8x40xbf16> to vector<8x40xbf16>
    %723 = vector.extract_strided_slice %619 {offsets = [0, 28], sizes = [40, 96], strides = [1, 1]} : vector<40x256xbf16> to vector<40x96xbf16>
    %cst_767 = arith.constant dense<0.000000e+00> : vector<8x96xf32>
    %724 = tpu.matmul %722, %723, %cst_767 {dimension_numbers = #tpu.dot_dimension_numbers<[1], [0], [0], [1], [0, 0, 1, 1], [], []>} : vector<8x40xbf16>, vector<40x96xbf16>, vector<8x96xf32> -> vector<8x96xf32>
    %725 = arith.addf %720, %724 : vector<8x96xf32>
    %c0_768 = arith.constant 0 : index
    %c0_769 = arith.constant 0 : index
    %726 = vector.load %arg9[%c0_768, %c0_769] : memref<8x96xf32, #tpu.memory_space<vmem>>, vector<8x96xf32>
    tpu.vector_store %arg9[%c0_768, %c0_769], %725 {strides = array<i32>} : memref<8x96xf32, #tpu.memory_space<vmem>>, vector<8x96xf32>,
    %c0_770 = arith.constant 0 : index
    %c0_771 = arith.constant 0 : index
    %727 = vector.load %arg9[%c0_770, %c0_771] : memref<8x96xf32, #tpu.memory_space<vmem>>, vector<8x96xf32>
    %c15_772 = arith.constant 15 : index
    %c0_773 = arith.constant 0 : index
    %c0_774 = arith.constant 0 : index
    %728 = vector.load %arg5[%c15_772, %c0_773, %c0_774] : memref<25x8x40xbf16, #tpu.memory_space<vmem>>, vector<1x8x40xbf16>
    %729 = vector.shape_cast %728 : vector<1x8x40xbf16> to vector<8x40xbf16>
    %730 = vector.extract_strided_slice %619 {offsets = [0, 36], sizes = [40, 96], strides = [1, 1]} : vector<40x256xbf16> to vector<40x96xbf16>
    %cst_775 = arith.constant dense<0.000000e+00> : vector<8x96xf32>
    %731 = tpu.matmul %729, %730, %cst_775 {dimension_numbers = #tpu.dot_dimension_numbers<[1], [0], [0], [1], [0, 0, 1, 1], [], []>} : vector<8x40xbf16>, vector<40x96xbf16>, vector<8x96xf32> -> vector<8x96xf32>
    %732 = arith.addf %727, %731 : vector<8x96xf32>
    %c0_776 = arith.constant 0 : index
    %c0_777 = arith.constant 0 : index
    %733 = vector.load %arg9[%c0_776, %c0_777] : memref<8x96xf32, #tpu.memory_space<vmem>>, vector<8x96xf32>
    tpu.vector_store %arg9[%c0_776, %c0_777], %732 {strides = array<i32>} : memref<8x96xf32, #tpu.memory_space<vmem>>, vector<8x96xf32>,
    %c0_778 = arith.constant 0 : index
    %c0_779 = arith.constant 0 : index
    %734 = vector.load %arg9[%c0_778, %c0_779] : memref<8x96xf32, #tpu.memory_space<vmem>>, vector<8x96xf32>
    %c16_780 = arith.constant 16 : index
    %c0_781 = arith.constant 0 : index
    %c0_782 = arith.constant 0 : index
    %735 = vector.load %arg5[%c16_780, %c0_781, %c0_782] : memref<25x8x40xbf16, #tpu.memory_space<vmem>>, vector<1x8x40xbf16>
    %736 = vector.shape_cast %735 : vector<1x8x40xbf16> to vector<8x40xbf16>
    %737 = vector.extract_strided_slice %619 {offsets = [0, 37], sizes = [40, 96], strides = [1, 1]} : vector<40x256xbf16> to vector<40x96xbf16>
    %cst_783 = arith.constant dense<0.000000e+00> : vector<8x96xf32>
    %738 = tpu.matmul %736, %737, %cst_783 {dimension_numbers = #tpu.dot_dimension_numbers<[1], [0], [0], [1], [0, 0, 1, 1], [], []>} : vector<8x40xbf16>, vector<40x96xbf16>, vector<8x96xf32> -> vector<8x96xf32>
    %739 = arith.addf %734, %738 : vector<8x96xf32>
    %c0_784 = arith.constant 0 : index
    %c0_785 = arith.constant 0 : index
    %740 = vector.load %arg9[%c0_784, %c0_785] : memref<8x96xf32, #tpu.memory_space<vmem>>, vector<8x96xf32>
    tpu.vector_store %arg9[%c0_784, %c0_785], %739 {strides = array<i32>} : memref<8x96xf32, #tpu.memory_space<vmem>>, vector<8x96xf32>,
    %c0_786 = arith.constant 0 : index
    %c0_787 = arith.constant 0 : index
    %741 = vector.load %arg9[%c0_786, %c0_787] : memref<8x96xf32, #tpu.memory_space<vmem>>, vector<8x96xf32>
    %c17_788 = arith.constant 17 : index
    %c0_789 = arith.constant 0 : index
    %c0_790 = arith.constant 0 : index
    %742 = vector.load %arg5[%c17_788, %c0_789, %c0_790] : memref<25x8x40xbf16, #tpu.memory_space<vmem>>, vector<1x8x40xbf16>
    %743 = vector.shape_cast %742 : vector<1x8x40xbf16> to vector<8x40xbf16>
    %744 = vector.extract_strided_slice %619 {offsets = [0, 38], sizes = [40, 96], strides = [1, 1]} : vector<40x256xbf16> to vector<40x96xbf16>
    %cst_791 = arith.constant dense<0.000000e+00> : vector<8x96xf32>
    %745 = tpu.matmul %743, %744, %cst_791 {dimension_numbers = #tpu.dot_dimension_numbers<[1], [0], [0], [1], [0, 0, 1, 1], [], []>} : vector<8x40xbf16>, vector<40x96xbf16>, vector<8x96xf32> -> vector<8x96xf32>
    %746 = arith.addf %741, %745 : vector<8x96xf32>
    %c0_792 = arith.constant 0 : index
    %c0_793 = arith.constant 0 : index
    %747 = vector.load %arg9[%c0_792, %c0_793] : memref<8x96xf32, #tpu.memory_space<vmem>>, vector<8x96xf32>
    tpu.vector_store %arg9[%c0_792, %c0_793], %746 {strides = array<i32>} : memref<8x96xf32, #tpu.memory_space<vmem>>, vector<8x96xf32>,
    %c0_794 = arith.constant 0 : index
    %c0_795 = arith.constant 0 : index
    %748 = vector.load %arg9[%c0_794, %c0_795] : memref<8x96xf32, #tpu.memory_space<vmem>>, vector<8x96xf32>
    %c18_796 = arith.constant 18 : index
    %c0_797 = arith.constant 0 : index
    %c0_798 = arith.constant 0 : index
    %749 = vector.load %arg5[%c18_796, %c0_797, %c0_798] : memref<25x8x40xbf16, #tpu.memory_space<vmem>>, vector<1x8x40xbf16>
    %750 = vector.shape_cast %749 : vector<1x8x40xbf16> to vector<8x40xbf16>
    %751 = vector.extract_strided_slice %619 {offsets = [0, 39], sizes = [40, 96], strides = [1, 1]} : vector<40x256xbf16> to vector<40x96xbf16>
    %cst_799 = arith.constant dense<0.000000e+00> : vector<8x96xf32>
    %752 = tpu.matmul %750, %751, %cst_799 {dimension_numbers = #tpu.dot_dimension_numbers<[1], [0], [0], [1], [0, 0, 1, 1], [], []>} : vector<8x40xbf16>, vector<40x96xbf16>, vector<8x96xf32> -> vector<8x96xf32>
    %753 = arith.addf %748, %752 : vector<8x96xf32>
    %c0_800 = arith.constant 0 : index
    %c0_801 = arith.constant 0 : index
    %754 = vector.load %arg9[%c0_800, %c0_801] : memref<8x96xf32, #tpu.memory_space<vmem>>, vector<8x96xf32>
    tpu.vector_store %arg9[%c0_800, %c0_801], %753 {strides = array<i32>} : memref<8x96xf32, #tpu.memory_space<vmem>>, vector<8x96xf32>,
    %c0_802 = arith.constant 0 : index
    %c0_803 = arith.constant 0 : index
    %755 = vector.load %arg9[%c0_802, %c0_803] : memref<8x96xf32, #tpu.memory_space<vmem>>, vector<8x96xf32>
    %c19_804 = arith.constant 19 : index
    %c0_805 = arith.constant 0 : index
    %c0_806 = arith.constant 0 : index
    %756 = vector.load %arg5[%c19_804, %c0_805, %c0_806] : memref<25x8x40xbf16, #tpu.memory_space<vmem>>, vector<1x8x40xbf16>
    %757 = vector.shape_cast %756 : vector<1x8x40xbf16> to vector<8x40xbf16>
    %758 = vector.extract_strided_slice %619 {offsets = [0, 40], sizes = [40, 96], strides = [1, 1]} : vector<40x256xbf16> to vector<40x96xbf16>
    %cst_807 = arith.constant dense<0.000000e+00> : vector<8x96xf32>
    %759 = tpu.matmul %757, %758, %cst_807 {dimension_numbers = #tpu.dot_dimension_numbers<[1], [0], [0], [1], [0, 0, 1, 1], [], []>} : vector<8x40xbf16>, vector<40x96xbf16>, vector<8x96xf32> -> vector<8x96xf32>
    %760 = arith.addf %755, %759 : vector<8x96xf32>
    %c0_808 = arith.constant 0 : index
    %c0_809 = arith.constant 0 : index
    %761 = vector.load %arg9[%c0_808, %c0_809] : memref<8x96xf32, #tpu.memory_space<vmem>>, vector<8x96xf32>
    tpu.vector_store %arg9[%c0_808, %c0_809], %760 {strides = array<i32>} : memref<8x96xf32, #tpu.memory_space<vmem>>, vector<8x96xf32>,
    %c0_810 = arith.constant 0 : index
    %c0_811 = arith.constant 0 : index
    %762 = vector.load %arg9[%c0_810, %c0_811] : memref<8x96xf32, #tpu.memory_space<vmem>>, vector<8x96xf32>
    %c20_812 = arith.constant 20 : index
    %c0_813 = arith.constant 0 : index
    %c0_814 = arith.constant 0 : index
    %763 = vector.load %arg5[%c20_812, %c0_813, %c0_814] : memref<25x8x40xbf16, #tpu.memory_space<vmem>>, vector<1x8x40xbf16>
    %764 = vector.shape_cast %763 : vector<1x8x40xbf16> to vector<8x40xbf16>
    %765 = vector.extract_strided_slice %619 {offsets = [0, 48], sizes = [40, 96], strides = [1, 1]} : vector<40x256xbf16> to vector<40x96xbf16>
    %cst_815 = arith.constant dense<0.000000e+00> : vector<8x96xf32>
    %766 = tpu.matmul %764, %765, %cst_815 {dimension_numbers = #tpu.dot_dimension_numbers<[1], [0], [0], [1], [0, 0, 1, 1], [], []>} : vector<8x40xbf16>, vector<40x96xbf16>, vector<8x96xf32> -> vector<8x96xf32>
    %767 = arith.addf %762, %766 : vector<8x96xf32>
    %c0_816 = arith.constant 0 : index
    %c0_817 = arith.constant 0 : index
    %768 = vector.load %arg9[%c0_816, %c0_817] : memref<8x96xf32, #tpu.memory_space<vmem>>, vector<8x96xf32>
    tpu.vector_store %arg9[%c0_816, %c0_817], %767 {strides = array<i32>} : memref<8x96xf32, #tpu.memory_space<vmem>>, vector<8x96xf32>,
    %c0_818 = arith.constant 0 : index
    %c0_819 = arith.constant 0 : index
    %769 = vector.load %arg9[%c0_818, %c0_819] : memref<8x96xf32, #tpu.memory_space<vmem>>, vector<8x96xf32>
    %c21_820 = arith.constant 21 : index
    %c0_821 = arith.constant 0 : index
    %c0_822 = arith.constant 0 : index
    %770 = vector.load %arg5[%c21_820, %c0_821, %c0_822] : memref<25x8x40xbf16, #tpu.memory_space<vmem>>, vector<1x8x40xbf16>
    %771 = vector.shape_cast %770 : vector<1x8x40xbf16> to vector<8x40xbf16>
    %772 = vector.extract_strided_slice %619 {offsets = [0, 49], sizes = [40, 96], strides = [1, 1]} : vector<40x256xbf16> to vector<40x96xbf16>
    %cst_823 = arith.constant dense<0.000000e+00> : vector<8x96xf32>
    %773 = tpu.matmul %771, %772, %cst_823 {dimension_numbers = #tpu.dot_dimension_numbers<[1], [0], [0], [1], [0, 0, 1, 1], [], []>} : vector<8x40xbf16>, vector<40x96xbf16>, vector<8x96xf32> -> vector<8x96xf32>
    %774 = arith.addf %769, %773 : vector<8x96xf32>
    %c0_824 = arith.constant 0 : index
    %c0_825 = arith.constant 0 : index
    %775 = vector.load %arg9[%c0_824, %c0_825] : memref<8x96xf32, #tpu.memory_space<vmem>>, vector<8x96xf32>
    tpu.vector_store %arg9[%c0_824, %c0_825], %774 {strides = array<i32>} : memref<8x96xf32, #tpu.memory_space<vmem>>, vector<8x96xf32>,
    %c0_826 = arith.constant 0 : index
    %c0_827 = arith.constant 0 : index
    %776 = vector.load %arg9[%c0_826, %c0_827] : memref<8x96xf32, #tpu.memory_space<vmem>>, vector<8x96xf32>
    %c22_828 = arith.constant 22 : index
    %c0_829 = arith.constant 0 : index
    %c0_830 = arith.constant 0 : index
    %777 = vector.load %arg5[%c22_828, %c0_829, %c0_830] : memref<25x8x40xbf16, #tpu.memory_space<vmem>>, vector<1x8x40xbf16>
    %778 = vector.shape_cast %777 : vector<1x8x40xbf16> to vector<8x40xbf16>
    %779 = vector.extract_strided_slice %619 {offsets = [0, 50], sizes = [40, 96], strides = [1, 1]} : vector<40x256xbf16> to vector<40x96xbf16>
    %cst_831 = arith.constant dense<0.000000e+00> : vector<8x96xf32>
    %780 = tpu.matmul %778, %779, %cst_831 {dimension_numbers = #tpu.dot_dimension_numbers<[1], [0], [0], [1], [0, 0, 1, 1], [], []>} : vector<8x40xbf16>, vector<40x96xbf16>, vector<8x96xf32> -> vector<8x96xf32>
    %781 = arith.addf %776, %780 : vector<8x96xf32>
    %c0_832 = arith.constant 0 : index
    %c0_833 = arith.constant 0 : index
    %782 = vector.load %arg9[%c0_832, %c0_833] : memref<8x96xf32, #tpu.memory_space<vmem>>, vector<8x96xf32>
    tpu.vector_store %arg9[%c0_832, %c0_833], %781 {strides = array<i32>} : memref<8x96xf32, #tpu.memory_space<vmem>>, vector<8x96xf32>,
    %c0_834 = arith.constant 0 : index
    %c0_835 = arith.constant 0 : index
    %783 = vector.load %arg9[%c0_834, %c0_835] : memref<8x96xf32, #tpu.memory_space<vmem>>, vector<8x96xf32>
    %c23_836 = arith.constant 23 : index
    %c0_837 = arith.constant 0 : index
    %c0_838 = arith.constant 0 : index
    %784 = vector.load %arg5[%c23_836, %c0_837, %c0_838] : memref<25x8x40xbf16, #tpu.memory_space<vmem>>, vector<1x8x40xbf16>
    %785 = vector.shape_cast %784 : vector<1x8x40xbf16> to vector<8x40xbf16>
    %786 = vector.extract_strided_slice %619 {offsets = [0, 51], sizes = [40, 96], strides = [1, 1]} : vector<40x256xbf16> to vector<40x96xbf16>
    %cst_839 = arith.constant dense<0.000000e+00> : vector<8x96xf32>
    %787 = tpu.matmul %785, %786, %cst_839 {dimension_numbers = #tpu.dot_dimension_numbers<[1], [0], [0], [1], [0, 0, 1, 1], [], []>} : vector<8x40xbf16>, vector<40x96xbf16>, vector<8x96xf32> -> vector<8x96xf32>
    %788 = arith.addf %783, %787 : vector<8x96xf32>
    %c0_840 = arith.constant 0 : index
    %c0_841 = arith.constant 0 : index
    %789 = vector.load %arg9[%c0_840, %c0_841] : memref<8x96xf32, #tpu.memory_space<vmem>>, vector<8x96xf32>
    tpu.vector_store %arg9[%c0_840, %c0_841], %788 {strides = array<i32>} : memref<8x96xf32, #tpu.memory_space<vmem>>, vector<8x96xf32>,
    %c0_842 = arith.constant 0 : index
    %c0_843 = arith.constant 0 : index
    %790 = vector.load %arg9[%c0_842, %c0_843] : memref<8x96xf32, #tpu.memory_space<vmem>>, vector<8x96xf32>
    %c24_844 = arith.constant 24 : index
    %c0_845 = arith.constant 0 : index
    %c0_846 = arith.constant 0 : index
    %791 = vector.load %arg5[%c24_844, %c0_845, %c0_846] : memref<25x8x40xbf16, #tpu.memory_space<vmem>>, vector<1x8x40xbf16>
    %792 = vector.shape_cast %791 : vector<1x8x40xbf16> to vector<8x40xbf16>
    %793 = vector.extract_strided_slice %619 {offsets = [0, 52], sizes = [40, 96], strides = [1, 1]} : vector<40x256xbf16> to vector<40x96xbf16>
    %cst_847 = arith.constant dense<0.000000e+00> : vector<8x96xf32>
    %794 = tpu.matmul %792, %793, %cst_847 {dimension_numbers = #tpu.dot_dimension_numbers<[1], [0], [0], [1], [0, 0, 1, 1], [], []>} : vector<8x40xbf16>, vector<40x96xbf16>, vector<8x96xf32> -> vector<8x96xf32>
    %795 = arith.addf %790, %794 : vector<8x96xf32>
    %c0_848 = arith.constant 0 : index
    %c0_849 = arith.constant 0 : index
    %796 = vector.load %arg9[%c0_848, %c0_849] : memref<8x96xf32, #tpu.memory_space<vmem>>, vector<8x96xf32>
    tpu.vector_store %arg9[%c0_848, %c0_849], %795 {strides = array<i32>} : memref<8x96xf32, #tpu.memory_space<vmem>>, vector<8x96xf32>,
    %c0_850 = arith.constant 0 : index
    %c0_851 = arith.constant 0 : index
    %797 = vector.load %arg9[%c0_850, %c0_851] : memref<8x96xf32, #tpu.memory_space<vmem>>, vector<8x96xf32>
    %c0_852 = arith.constant 0 : index
    %c3_853 = arith.constant 3 : index
    %c0_854 = arith.constant 0 : index
    %c0_855 = arith.constant 0 : index
    %798 = vector.load %arg6[%c0_852, %c3_853, %c0_854, %c0_855] : memref<1x4x8x96xf32, #tpu.memory_space<vmem>>, vector<1x1x8x96xf32>
    %799 = vector.shape_cast %798 : vector<1x1x8x96xf32> to vector<8x96xf32>
    %800 = vector.shape_cast %797 : vector<8x96xf32> to vector<1x1x8x96xf32>
    tpu.vector_store %arg6[%c0_852, %c3_853, %c0_854, %c0_855], %800 {strides = array<i32>} : memref<1x4x8x96xf32, #tpu.memory_space<vmem>>, vector<1x1x8x96xf32>,
    %c4_i32_856 = arith.constant 4 : i32
    %801 = arith.muli %arg1, %c4_i32_856 : i32
    %c3_i32 = arith.constant 3 : i32
    %802 = arith.addi %801, %c3_i32 : i32
    %c8_i32_857 = arith.constant 8 : i32
    %803 = arith.cmpi slt, %802, %c8_i32_857 : i32
    %804 = arith.extui %803 : i1 to i32
    %805 = arith.sitofp %804 : i32 to f32
    %806 = vector.broadcast %805 : f32 to vector<1x96xf32>
    %807 = arith.mulf %8, %806 : vector<1x96xf32>
    %808 = vector.broadcast %807 : vector<1x96xf32> to vector<8x96xf32>
    %809 = arith.mulf %797, %808 : vector<8x96xf32>
    %c0_858 = arith.constant 0 : index
    %c0_859 = arith.constant 0 : index
    %810 = vector.load %arg10[%c0_858, %c0_859] : memref<8x1xf32, #tpu.memory_space<vmem>>, vector<8x1xf32>
    %cst_860 = arith.constant dense<0.000000e+00> : vector<8xf32>
    %811 = vector.multi_reduction <add>, %809, %cst_860 [1] : vector<8x96xf32> to vector<8xf32>
    %812 = vector.shape_cast %811 : vector<8xf32> to vector<8x1xf32>
    %813 = arith.addf %810, %812 : vector<8x1xf32>
    %c0_861 = arith.constant 0 : index
    %c0_862 = arith.constant 0 : index
    %814 = vector.load %arg10[%c0_861, %c0_862] : memref<8x1xf32, #tpu.memory_space<vmem>>, vector<8x1xf32>
    tpu.vector_store %arg10[%c0_861, %c0_862], %813 {strides = array<i32>} : memref<8x1xf32, #tpu.memory_space<vmem>>, vector<8x1xf32>,
    %c0_863 = arith.constant 0 : index
    %c0_864 = arith.constant 0 : index
    %815 = vector.load %arg11[%c0_863, %c0_864] : memref<8x1xf32, #tpu.memory_space<vmem>>, vector<8x1xf32>
    %816 = arith.mulf %809, %809 : vector<8x96xf32>
    %cst_865 = arith.constant dense<0.000000e+00> : vector<8xf32>
    %817 = vector.multi_reduction <add>, %816, %cst_865 [1] : vector<8x96xf32> to vector<8xf32>
    %818 = vector.shape_cast %817 : vector<8xf32> to vector<8x1xf32>
    %819 = arith.addf %815, %818 : vector<8x1xf32>
    %c0_866 = arith.constant 0 : index
    %c0_867 = arith.constant 0 : index
    %820 = vector.load %arg11[%c0_866, %c0_867] : memref<8x1xf32, #tpu.memory_space<vmem>>, vector<8x1xf32>
    tpu.vector_store %arg11[%c0_866, %c0_867], %819 {strides = array<i32>} : memref<8x1xf32, #tpu.memory_space<vmem>>, vector<8x1xf32>,
    %c1_i32_868 = arith.constant 1 : i32
    %821 = arith.cmpi eq, %arg1, %c1_i32_868 : i32
    %822 = arith.extui %821 : i1 to i32
    %c0_i32_869 = arith.constant 0 : i32
    %823 = arith.cmpi ne, %822, %c0_i32_869 : i32
    scf.if %823 {
      %c0_870 = arith.constant 0 : index
      %c0_871 = arith.constant 0 : index
      %824 = vector.load %arg10[%c0_870, %c0_871] : memref<8x1xf32, #tpu.memory_space<vmem>>, vector<8x1xf32>
      %c0_872 = arith.constant 0 : index
      %c0_873 = arith.constant 0 : index
      %c0_874 = arith.constant 0 : index
      %825 = vector.load %arg7[%c0_872, %c0_873, %c0_874] : memref<1x8x1xf32, #tpu.memory_space<vmem>>, vector<1x8x1xf32>
      %826 = vector.shape_cast %825 : vector<1x8x1xf32> to vector<8x1xf32>
      %827 = vector.shape_cast %824 : vector<8x1xf32> to vector<1x8x1xf32>
      tpu.vector_store %arg7[%c0_872, %c0_873, %c0_874], %827 {strides = array<i32>} : memref<1x8x1xf32, #tpu.memory_space<vmem>>, vector<1x8x1xf32>,
      %c0_875 = arith.constant 0 : index
      %c0_876 = arith.constant 0 : index
      %828 = vector.load %arg11[%c0_875, %c0_876] : memref<8x1xf32, #tpu.memory_space<vmem>>, vector<8x1xf32>
      %c0_877 = arith.constant 0 : index
      %c0_878 = arith.constant 0 : index
      %c0_879 = arith.constant 0 : index
      %829 = vector.load %arg8[%c0_877, %c0_878, %c0_879] : memref<1x8x1xf32, #tpu.memory_space<vmem>>, vector<1x8x1xf32>
      %830 = vector.shape_cast %829 : vector<1x8x1xf32> to vector<8x1xf32>
      %831 = vector.shape_cast %828 : vector<8x1xf32> to vector<1x8x1xf32>
      tpu.vector_store %arg8[%c0_877, %c0_878, %c0_879], %831 {strides = array<i32>} : memref<1x8x1xf32, #tpu.memory_space<vmem>>, vector<1x8x1xf32>,
    } else {
    }
    return
  }
  func.func @transform_0(%arg0: i32, %arg1: i32) -> (i32, i32, i32, i32) {
    %c0_i32 = arith.constant 0 : i32
    %0 = arith.addi %arg1, %c0_i32 : i32
    %c0_i32_0 = arith.constant 0 : i32
    %c0_i32_1 = arith.constant 0 : i32
    %c0_i32_2 = arith.constant 0 : i32
    return %arg0, %0, %c0_i32_0, %c0_i32_1 : i32, i32, i32, i32
  }
  func.func @transform_1(%arg0: i32, %arg1: i32) -> (i32, i32, i32, i32) {
    %c1_i32 = arith.constant 1 : i32
    %0 = arith.addi %arg1, %c1_i32 : i32
    %c0_i32 = arith.constant 0 : i32
    %c0_i32_0 = arith.constant 0 : i32
    %c0_i32_1 = arith.constant 0 : i32
    return %arg0, %0, %c0_i32, %c0_i32_0 : i32, i32, i32, i32
  }
  func.func @transform_2(%arg0: i32, %arg1: i32) -> (i32, i32) {
    %c0_i32 = arith.constant 0 : i32
    %c0_i32_0 = arith.constant 0 : i32
    %c0_i32_1 = arith.constant 0 : i32
    return %c0_i32, %c0_i32_0 : i32, i32
  }
  func.func @transform_3(%arg0: i32, %arg1: i32) -> (i32, i32, i32) {
    %c0_i32 = arith.constant 0 : i32
    %c0_i32_0 = arith.constant 0 : i32
    %c0_i32_1 = arith.constant 0 : i32
    %c0_i32_2 = arith.constant 0 : i32
    return %c0_i32, %c0_i32_0, %c0_i32_1 : i32, i32, i32
  }
  func.func @transform_4(%arg0: i32, %arg1: i32) -> (i32, i32, i32, i32) {
    %c0_i32 = arith.constant 0 : i32
    %c0_i32_0 = arith.constant 0 : i32
    %c0_i32_1 = arith.constant 0 : i32
    return %arg0, %arg1, %c0_i32, %c0_i32_0 : i32, i32, i32, i32
  }
  func.func @transform_5(%arg0: i32, %arg1: i32) -> (i32, i32, i32) {
    %c0_i32 = arith.constant 0 : i32
    %c0_i32_0 = arith.constant 0 : i32
    %c0_i32_1 = arith.constant 0 : i32
    return %arg0, %c0_i32, %c0_i32_0 : i32, i32, i32
  }
  func.func @transform_6(%arg0: i32, %arg1: i32) -> (i32, i32, i32) {
    %c0_i32 = arith.constant 0 : i32
    %c0_i32_0 = arith.constant 0 : i32
    %c0_i32_1 = arith.constant 0 : i32
    return %arg0, %c0_i32, %c0_i32_0 : i32, i32, i32
  }
}

module attributes {stable_mosaic.version = 11 : i64} {
  func.func @_bn_prelu_kernel(%arg0: i32, %arg1: memref<4x8x96xf32, #tpu.memory_space<vmem>>, %arg2: memref<1x8x1xf32, #tpu.memory_space<vmem>>, %arg3: memref<1x8x1xf32, #tpu.memory_space<vmem>>, %arg4: memref<1x8x1xf32, #tpu.memory_space<vmem>>, %arg5: memref<4x8x96xf32, #tpu.memory_space<vmem>>) attributes {dimension_semantics = [#tpu.dimension_semantics<parallel>], iteration_bounds = array<i64: 4>, scalar_prefetch = 0 : i64, scratch_operands = 0 : i64, tpu.core_type = #tpu.core_type<tc>, window_params = [{transform_indices = @transform_0, window_bounds = array<i64: 4, 8, 96>}, {pipeline_mode = #tpu.pipeline_mode<synchronous>, transform_indices = @transform_1, window_bounds = array<i64: 1, 8, 1>}, {pipeline_mode = #tpu.pipeline_mode<synchronous>, transform_indices = @transform_2, window_bounds = array<i64: 1, 8, 1>}, {pipeline_mode = #tpu.pipeline_mode<synchronous>, transform_indices = @transform_3, window_bounds = array<i64: 1, 8, 1>}, {transform_indices = @transform_4, window_bounds = array<i64: 4, 8, 96>}]} {
    %c0 = arith.constant 0 : index
    %c0_0 = arith.constant 0 : index
    %c0_1 = arith.constant 0 : index
    %0 = vector.load %arg1[%c0, %c0_0, %c0_1] : memref<4x8x96xf32, #tpu.memory_space<vmem>>, vector<4x8x96xf32>
    %c0_2 = arith.constant 0 : index
    %c0_3 = arith.constant 0 : index
    %c0_4 = arith.constant 0 : index
    %1 = vector.load %arg2[%c0_2, %c0_3, %c0_4] : memref<1x8x1xf32, #tpu.memory_space<vmem>>, vector<1x8x1xf32>
    %2 = vector.broadcast %1 : vector<1x8x1xf32> to vector<4x8x96xf32>
    %3 = arith.mulf %0, %2 : vector<4x8x96xf32>
    %c0_5 = arith.constant 0 : index
    %c0_6 = arith.constant 0 : index
    %c0_7 = arith.constant 0 : index
    %4 = vector.load %arg3[%c0_5, %c0_6, %c0_7] : memref<1x8x1xf32, #tpu.memory_space<vmem>>, vector<1x8x1xf32>
    %5 = vector.broadcast %4 : vector<1x8x1xf32> to vector<4x8x96xf32>
    %6 = arith.addf %3, %5 : vector<4x8x96xf32>
    %cst = arith.constant 0.000000e+00 : f32
    %7 = vector.broadcast %cst : f32 to vector<4x8x96xf32>
    %8 = arith.cmpf oge, %6, %7 : vector<4x8x96xf32>
    %c0_8 = arith.constant 0 : index
    %c0_9 = arith.constant 0 : index
    %c0_10 = arith.constant 0 : index
    %9 = vector.load %arg4[%c0_8, %c0_9, %c0_10] : memref<1x8x1xf32, #tpu.memory_space<vmem>>, vector<1x8x1xf32>
    %10 = vector.broadcast %9 : vector<1x8x1xf32> to vector<4x8x96xf32>
    %11 = arith.mulf %10, %6 : vector<4x8x96xf32>
    %12 = arith.select %8, %6, %11 : vector<4x8x96xi1>, vector<4x8x96xf32>
    %c0_11 = arith.constant 0 : index
    %c0_12 = arith.constant 0 : index
    %c0_13 = arith.constant 0 : index
    %13 = vector.load %arg5[%c0_11, %c0_12, %c0_13] : memref<4x8x96xf32, #tpu.memory_space<vmem>>, vector<4x8x96xf32>
    tpu.vector_store %arg5[%c0_11, %c0_12, %c0_13], %12 {strides = array<i32>} : memref<4x8x96xf32, #tpu.memory_space<vmem>>, vector<4x8x96xf32>,
    return
  }
  func.func @transform_0(%arg0: i32) -> (i32, i32, i32) {
    %c0_i32 = arith.constant 0 : i32
    %c0_i32_0 = arith.constant 0 : i32
    %c0_i32_1 = arith.constant 0 : i32
    return %arg0, %c0_i32, %c0_i32_0 : i32, i32, i32
  }
  func.func @transform_1(%arg0: i32) -> (i32, i32, i32) {
    %c0_i32 = arith.constant 0 : i32
    %c0_i32_0 = arith.constant 0 : i32
    %c0_i32_1 = arith.constant 0 : i32
    %c0_i32_2 = arith.constant 0 : i32
    return %c0_i32, %c0_i32_0, %c0_i32_1 : i32, i32, i32
  }
  func.func @transform_2(%arg0: i32) -> (i32, i32, i32) {
    %c0_i32 = arith.constant 0 : i32
    %c0_i32_0 = arith.constant 0 : i32
    %c0_i32_1 = arith.constant 0 : i32
    %c0_i32_2 = arith.constant 0 : i32
    return %c0_i32, %c0_i32_0, %c0_i32_1 : i32, i32, i32
  }
  func.func @transform_3(%arg0: i32) -> (i32, i32, i32) {
    %c0_i32 = arith.constant 0 : i32
    %c0_i32_0 = arith.constant 0 : i32
    %c0_i32_1 = arith.constant 0 : i32
    %c0_i32_2 = arith.constant 0 : i32
    return %c0_i32, %c0_i32_0, %c0_i32_1 : i32, i32, i32
  }
  func.func @transform_4(%arg0: i32) -> (i32, i32, i32) {
    %c0_i32 = arith.constant 0 : i32
    %c0_i32_0 = arith.constant 0 : i32
    %c0_i32_1 = arith.constant 0 : i32
    return %arg0, %c0_i32, %c0_i32_0 : i32, i32, i32
  }
}

</mosaic_0001>

<bundles_post_ra>
// kernel: down_transition.6
= control target key start
LH: loop header
LB: loop body
LE: loop exit
PB: predicated region body
PF: predicated region fallthrough
CT: control target
= control target key end

     0   :  { %v350_v3 = vmov 0   ;;  %vm112_vm0 = vcmask 261120   ;;  %vm297_vm1 = vcmask 7168   ;;  %s461_s0 = inlined_call_operand.vmem [shape: bf16[32,1024], index: 0, kind: input, shape index: {}]   ;;  %s462_s1 = inlined_call_operand.vmem [shape: bf16[8,32], index: 1, kind: input, shape index: {}]   ;;  %s463_s2 = inlined_call_operand.vmem [shape: f32[8,1024], index: 2, kind: output, shape index: {0}]   ;;  %s464_s3 = inlined_call_operand.vmem [shape: f32[1,8,1], index: 3, kind: output, shape index: {1}]   ;;  %s465_s4 = inlined_call_operand.vmem [shape: f32[1,8,1], index: 4, kind: output, shape index: {2}]  }
   0x1   :  { %v16_v0 = vld [vmem:[%s461_s0] sm:$0xff]  ;;  %v17_v2 = vld [vmem:[%s461_s0 + $0x8] sm:$0xff]  ;;  %148 = vmatprep.mubr.bf16.mxu0 %v350_v3  ;;  %189 = vmatprep.mubr.bf16.mxu1 %v350_v3  ;;  %v18_v15 = vld [vmem:[%s461_s0 + $0x10] sm:$0xff] }
   0x2   :  { %v20_v1 = vld [vmem:[%s461_s0 + $0x20] sm:$0xff]  ;;  %v21_v6 = vld [vmem:[%s461_s0 + $0x28] sm:$0xff]  ;;  %v22_v16 = vld [vmem:[%s461_s0 + $0x30] sm:$0xff] }
   0x3   :  { %v330_v4 = vcombine.high %v16_v0, %v20_v1  ;;  %v329_v5 = vcombine.low %v16_v0, %v20_v1  ;;  %v24_v7 = vld [vmem:[%s461_s0 + $0x40] sm:$0xff]  ;;  %v332_v9 = vcombine.high %v17_v2, %v21_v6  ;;  %v331_v10 = vcombine.low %v17_v2, %v21_v6  ;;  %v25_v12 = vld [vmem:[%s461_s0 + $0x48] sm:$0xff]  ;;  %v19_v17 = vld [vmem:[%s461_s0 + $0x18] sm:$0xff] }
   0x4   :  { %v28_v8 = vld [vmem:[%s461_s0 + $0x60] sm:$0xff]  ;;  %v29_v13 = vld [vmem:[%s461_s0 + $0x68] sm:$0xff]  ;;  %v23_v19 = vld [vmem:[%s461_s0 + $0x38] sm:$0xff]  ;;  %v334_v21 = vcombine.high %v18_v15, %v22_v16  ;;  %v333_v28 = vcombine.low %v18_v15, %v22_v16 }
   0x5   :  { %v338_v11 = vcombine.high %v24_v7, %v28_v8  ;;  %116 = vmatprep.subr.bf16.mxu0 %v330_v4  ;;  %v340_v14 = vcombine.high %v25_v12, %v29_v13  ;;  %157 = vmatprep.subr.bf16.mxu1 %v332_v9  ;;  %v337_v18 = vcombine.low %v24_v7, %v28_v8  ;;  %v26_v23 = vld [vmem:[%s461_s0 + $0x50] sm:$0xff]  ;;  %v27_v25 = vld [vmem:[%s461_s0 + $0x58] sm:$0xff]  ;;  %v15_v27 = vld [vmem:[%s462_s1] sm:$0xf] }
   0x6   :  { %117 = vmatpush1.bf16.msra.mxu0 %v329_v5  ;;  %158 = vmatpush1.bf16.msra.mxu1 %v331_v10  ;;  %v339_v20 = vcombine.low %v25_v12, %v29_v13  ;;  %v336_v22 = vcombine.high %v19_v17, %v23_v19  ;;  %v30_v24 = vld [vmem:[%s461_s0 + $0x70] sm:$0xff]  ;;  %v31_v26 = vld [vmem:[%s461_s0 + $0x78] sm:$0xff]  ;;  %v335_v29 = vcombine.low %v19_v17, %v23_v19 }
   0x7   :  { %118 = vmatprep.subr.bf16.mxu0 %v338_v11  ;;  %159 = vmatprep.subr.bf16.mxu1 %v340_v14  ;;  %v342_v30 = vcombine.high %v26_v23, %v30_v24  ;;  %v344_v31 = vcombine.high %v27_v25, %v31_v26  ;;  %v341_v32 = vcombine.low %v26_v23, %v30_v24 }
   0x8   :  { %v343_v33 = vcombine.low %v27_v25, %v31_v26 }
   0xa   :  { %119 = vmatpush1.bf16.msra.mxu0 %v337_v18  ;;  %160 = vmatpush1.bf16.msra.mxu1 %v339_v20 }
   0xb   :  { %198 = vmatprep.subr.bf16.mxu0 %v334_v21  ;;  %239 = vmatprep.subr.bf16.mxu1 %v336_v22 }
   0xd   :  { %345 = vmatmul.mubr.msk.bf16.vlgmr.msra.gmra.mrb[0].mxu0 %vm112_vm0, %v15_v27  ;;  %346 = vmatmul.mubr.msk.bf16.vlgmr.msra.gmra.mrb[0].mxu1 %vm112_vm0, %v15_v27 }
   0xe   :  { %199 = vmatpush1.bf16.msra.mxu0 %v333_v28  ;;  %240 = vmatpush1.bf16.msra.mxu1 %v335_v29 }
   0xf   :  { %200 = vmatprep.subr.bf16.mxu0 %v342_v30  ;;  %241 = vmatprep.subr.bf16.mxu1 %v344_v31 }
  0x10   :  { %230 = vmatprep.mubr.bf16.mxu0 %v350_v3  ;;  %271 = vmatprep.mubr.bf16.mxu1 %v350_v3 }
  0x12   :  { %201 = vmatpush1.bf16.msra.mxu0 %v341_v32  ;;  %242 = vmatpush1.bf16.msra.mxu1 %v343_v33 }
  0x15   :  { %347 = vmatmul.mubr.msk.bf16.vlgmr.msra.gmra.mrb[4].mxu0 %vm112_vm0, %v15_v27  ;;  %348 = vmatmul.mubr.msk.bf16.vlgmr.msra.gmra.mrb[4].mxu1 %vm112_vm0, %v15_v27 }
  0xe0   :  { %v150_v34 = vpop.f32.mrb[0].mxu0  ;;  %v191_v37 = vpop.f32.mrb[0].mxu1 }
  0xe1   :  { %280 = vst [vmem:[%s463_s2] sm:$0xff] %v150_v34  ;;  %v299_v35 = vmul.f32 %v150_v34, %v150_v34  ;;  %v152_v36 = vpop.f32.mrb[1].mxu0  ;;  %282 = vst [vmem:[%s463_s2 + $0x10] sm:$0xff] %v191_v37  ;;  %v301_v41 = vmul.f32 %v191_v37, %v191_v37  ;;  %v193_v42 = vpop.f32.mrb[1].mxu1 }
  0xe2   :  { %281 = vst [vmem:[%s463_s2 + $0x8] sm:$0xff] %v152_v36  ;;  %v288_v38 = vadd.f32 %v152_v36, %v150_v34  ;;  %v300_v39 = vmul.f32 %v152_v36, %v152_v36  ;;  %v154_v40 = vpop.f32.mrb[2].mxu0  ;;  %283 = vst [vmem:[%s463_s2 + $0x18] sm:$0xff] %v193_v42  ;;  %v195_v44 = vpop.f32.mrb[2].mxu1  ;;  %v302_v47 = vmul.f32 %v193_v42, %v193_v42 }
  0xe3   :  { %v155_v43 = vpop.f32.mrb[3].mxu0  ;;  %v196_v48 = vpop.f32.mrb[3].mxu1 }
  0xe4   :  { %v307_v45 = vadd.f32 %v300_v39, %v299_v35  ;;  %v289_v46 = vadd.f32 %v288_v38, %v191_v37 }
  0xe6   :  { %v308_v49 = vadd.f32 %v307_v45, %v301_v41  ;;  %v290_v50 = vadd.f32 %v289_v46, %v193_v42 }
  0xe8   :  { %v309_v51 = vadd.f32 %v308_v49, %v302_v47  ;;  %v232_v52 = vpop.f32.mrb[4].mxu0  ;;  %v273_v56 = vpop.f32.mrb[4].mxu1 }
  0xe9   :  { %284 = vst [vmem:[%s463_s2 + $0x20] sm:$0xff] %v232_v52  ;;  %v291_v53 = vadd.f32 %v290_v50, %v232_v52  ;;  %v303_v54 = vmul.f32 %v232_v52, %v232_v52  ;;  %v234_v55 = vpop.f32.mrb[5].mxu0  ;;  %286 = vst [vmem:[%s463_s2 + $0x30] sm:$0xff] %v273_v56  ;;  %v275_v59 = vpop.f32.mrb[5].mxu1  ;;  %v305_v62 = vmul.f32 %v273_v56, %v273_v56 }
  0xea   :  { %285 = vst [vmem:[%s463_s2 + $0x28] sm:$0xff] %v234_v55  ;;  %v304_v57 = vmul.f32 %v234_v55, %v234_v55  ;;  %v236_v58 = vpop.f32.mrb[6].mxu0  ;;  %287 = vst [vmem:[%s463_s2 + $0x38] sm:$0xff] %v275_v59  ;;  %v277_v0 = vpop.f32.mrb[6].mxu1  ;;  %v306_v5 = vmul.f32 %v275_v59, %v275_v59 }
  0xeb   :  { %v310_v60 = vadd.f32 %v309_v51, %v303_v54  ;;  %v292_v61 = vadd.f32 %v291_v53, %v234_v55  ;;  %v237_v63 = vpop.f32.mrb[7].mxu0  ;;  %v278_v1 = vpop.f32.mrb[7].mxu1 }
  0xed   :  { %v293_v2 = vadd.f32 %v292_v61, %v273_v56  ;;  %v311_v3 = vadd.f32 %v310_v60, %v304_v57 }
  0xef   :  { %v294_v4 = vadd.f32 %v293_v2, %v275_v59  ;;  %v312_v6 = vadd.f32 %v311_v3, %v305_v62 }
  0xf1   :  { %295 = vadd.xlane.f32.xlu0 %v294_v4  ;;  %v313_v7 = vadd.f32 %v312_v6, %v306_v5 }
  0xf5   :  { %314 = vadd.xlane.f32.xlu0 %v313_v7 }
 0x17e   :  { %v296_v8 = vpop.xlane.xlu0 %295 }
 0x17f   :  { %298 = vst.msk [vmem:[%s464_s3] sm:$0xff] %vm297_vm1, %v296_v8 }
 0x182   :  { %v315_v9 = vpop.xlane.xlu0 %314 }
 0x183   :  { %316 = vst.msk [vmem:[%s465_s4] sm:$0xff] %vm297_vm1, %v315_v9 }

// kernel: down_transition.7
= control target key start
LH: loop header
LB: loop body
LE: loop exit
PB: predicated region body
PF: predicated region fallthrough
CT: control target
= control target key end

     0   :  { %v98_v0 = vmov 0   ;;  %s189_s1 = inlined_call_operand.vmem [shape: f32[8,1], index: 1, kind: input, shape index: {}]   ;;  %s190_s2 = inlined_call_operand.vmem [shape: f32[8,1], index: 2, kind: input, shape index: {}]   ;;  %s191_s3 = inlined_call_operand.vmem [shape: f32[8,1], index: 3, kind: input, shape index: {}]   ;;  %s192_s0 = inlined_call_operand.vmem [shape: f32[8,1024], index: 0, kind: input, shape index: {}]   ;;  %s193_s4 = inlined_call_operand.vmem [shape: f32[8,1024], index: 4, kind: output, shape index: {}]  }
   0x1   :  { %96 = vset.pattern.permute.xlu0 %v98_v0  ;;  %v25_v1 = vld [vmem:[%s189_s1] sm:$0xff]  ;;  %97 = vset.pattern.permute.xlu1 %v98_v0  ;;  %v18_v5 = vld [vmem:[%s192_s0 + $0x8] sm:$0xff]  ;;  %v19_v7 = vld [vmem:[%s192_s0 + $0x10] sm:$0xff] }
   0x2   :  { %v61_v2 = vld [vmem:[%s191_s3] sm:$0xff]  ;;  %28 = vperm.xlu0 %96, %v25_v1   ;;  %v20_v8 = vld [vmem:[%s192_s0 + $0x18] sm:$0xff]  ;;  %v22_v10 = vld [vmem:[%s192_s0 + $0x28] sm:$0xff] }
   0x3   :  { %64 = vperm.xlu1 %97, %v61_v2   ;;  %v39_v3 = vld [vmem:[%s190_s2] sm:$0xff]  ;;  %v23_v11 = vld [vmem:[%s192_s0 + $0x30] sm:$0xff]  ;;  %v24_v12 = vld [vmem:[%s192_s0 + $0x38] sm:$0xff] }
   0x4   :  { %v17_v4 = vld [vmem:[%s192_s0] sm:$0xff] }
   0x5   :  { %v21_v9 = vld [vmem:[%s192_s0 + $0x20] sm:$0xff] }
   0x6   :  { %42 = vperm.xlu0 %96, %v39_v3  }
  0x81   :  { %v29_v6 = vpop.permute.xlu0 %28 }
  0x82   :  { %v31_v13 = vmul.f32 %v29_v6, %v17_v4  ;;  %v32_v14 = vmul.f32 %v29_v6, %v18_v5  ;;  %v33_v15 = vmul.f32 %v29_v6, %v19_v7  ;;  %v34_v16 = vmul.f32 %v29_v6, %v20_v8  ;;  %v65_v30 = vpop.permute.xlu1 %64 }
  0x83   :  { %v35_v18 = vmul.f32 %v29_v6, %v21_v9  ;;  %v36_v19 = vmul.f32 %v29_v6, %v22_v10  ;;  %v37_v20 = vmul.f32 %v29_v6, %v23_v11  ;;  %v38_v21 = vmul.f32 %v29_v6, %v24_v12 }
  0x85   :  { %v43_v17 = vpop.permute.xlu0 %42 }
  0x86   :  { %v45_v22 = vadd.f32 %v43_v17, %v31_v13  ;;  %v46_v23 = vadd.f32 %v43_v17, %v32_v14  ;;  %v47_v24 = vadd.f32 %v43_v17, %v33_v15  ;;  %v48_v25 = vadd.f32 %v43_v17, %v34_v16 }
  0x87   :  { %v49_v26 = vadd.f32 %v43_v17, %v35_v18  ;;  %v50_v27 = vadd.f32 %v43_v17, %v36_v19  ;;  %v51_v28 = vadd.f32 %v43_v17, %v37_v20  ;;  %v52_v29 = vadd.f32 %v43_v17, %v38_v21 }
  0x88   :  { %vm53_vm0 = vcmp.ge.f32.partialorder %v45_v22, 0.0  ;;  %vm54_vm1 = vcmp.ge.f32.partialorder %v46_v23, 0.0  ;;  %vm55_vm2 = vcmp.ge.f32.partialorder %v47_v24, 0.0  ;;  %vm56_vm3 = vcmp.ge.f32.partialorder %v48_v25, 0.0 }
  0x89   :  { %vm57_vm4 = vcmp.ge.f32.partialorder %v49_v26, 0.0  ;;  %vm58_vm5 = vcmp.ge.f32.partialorder %v50_v27, 0.0  ;;  %vm59_vm6 = vcmp.ge.f32.partialorder %v51_v28, 0.0  ;;  %vm60_vm7 = vcmp.ge.f32.partialorder %v52_v29, 0.0 }
  0x8a   :  { %v67_v31 = vmul.f32 %v65_v30, %v45_v22  ;;  %v68_v32 = vmul.f32 %v65_v30, %v46_v23  ;;  %v69_v33 = vmul.f32 %v65_v30, %v47_v24  ;;  %v70_v34 = vmul.f32 %v65_v30, %v48_v25 }
  0x8b   :  { %v71_v35 = vmul.f32 %v65_v30, %v49_v26  ;;  %v72_v36 = vmul.f32 %v65_v30, %v50_v27  ;;  %v73_v37 = vmul.f32 %v65_v30, %v51_v28  ;;  %v74_v38 = vmul.f32 %v65_v30, %v52_v29 }
  0x8c   :  { %v75_v39 = vsel %vm53_vm0, %v45_v22, %v67_v31  ;;  %v76_v40 = vsel %vm54_vm1, %v46_v23, %v68_v32  ;;  %v77_v41 = vsel %vm55_vm2, %v47_v24, %v69_v33  ;;  %v78_v42 = vsel %vm56_vm3, %v48_v25, %v70_v34 }
  0x8d   :  { %v79_v43 = vsel %vm57_vm4, %v49_v26, %v71_v35  ;;  %v80_v44 = vsel %vm58_vm5, %v50_v27, %v72_v36  ;;  %v81_v45 = vsel %vm59_vm6, %v51_v28, %v73_v37  ;;  %v82_v46 = vsel %vm60_vm7, %v52_v29, %v74_v38  ;;  %83 = vst [vmem:[%s193_s4] sm:$0xff] %v75_v39 }
  0x8e   :  { %84 = vst [vmem:[%s193_s4 + $0x8] sm:$0xff] %v76_v40  ;;  %85 = vst [vmem:[%s193_s4 + $0x10] sm:$0xff] %v77_v41 }
  0x8f   :  { %86 = vst [vmem:[%s193_s4 + $0x18] sm:$0xff] %v78_v42  ;;  %87 = vst [vmem:[%s193_s4 + $0x20] sm:$0xff] %v79_v43 }
  0x90   :  { %88 = vst [vmem:[%s193_s4 + $0x28] sm:$0xff] %v80_v44  ;;  %89 = vst [vmem:[%s193_s4 + $0x30] sm:$0xff] %v81_v45 }
  0x91   :  { %90 = vst [vmem:[%s193_s4 + $0x38] sm:$0xff] %v82_v46 }

// kernel: down_transition.9
= control target key start
LH: loop header
LB: loop body
LE: loop exit
PB: predicated region body
PF: predicated region fallthrough
CT: control target
= control target key end

     0   :  { %s360_s15 = smov 0   ;;  %s390_s0 = inlined_call_operand.vmem [shape: f32[16,8,96], index: 0, kind: input, shape index: {}]   ;;  %s391_s1 = inlined_call_operand.vmem [shape: f32[1,8,1], index: 1, kind: input, shape index: {}]   ;;  %s392_s2 = inlined_call_operand.vmem [shape: f32[1,8,1], index: 2, kind: input, shape index: {}]   ;;  %s393_s3 = inlined_call_operand.vmem [shape: f32[1,8,1], index: 3, kind: input, shape index: {}]   ;;  %s394_s4 = inlined_call_operand.vmem [shape: f32[16,8,96], index: 4, kind: output, shape index: {}]  }
   0x1 LB: > { %s304_s16 = sadd.s32 4294967295, %s332_s15   ;;  %p308_p0 = scmp.ge.s32.totalorder %s332_s15, 1  ;;  %s332_s15 = sphi %s360_s15, %s14_s15  }
   0x2   : > { %p163_p1 = scmp.lt.s32.totalorder %s332_s15, 5 }
   0x4   : > { %p164_p2 = pnand %p308_p0, %p163_p1 }
   0x5   : > { %v205_v0 = vld [vmem:[%s391_s1] sm:$0xff] (!%p164_p2)  ;;  %v334_v2 = vmov (!%p164_p2), 0   ;;  %s309_s23 = sshll.u32 (!%p164_p2), %s304_s16, 2  ;;  %vm243_vm0 = vcmask (!%p164_p2), 785408  }
   0x6   : > { %167 = sbr.rel (%p164_p2) target bundleno = 147 (0x93), region = 36  ;;  %v229_v1 = vld [vmem:[%s393_s3] sm:$0xff] (!%p164_p2)  ;;  %324 = vset.pattern.permute.xlu0 (!%p164_p2), %v334_v2  ;;  %325 = vset.pattern.permute.xlu1 (!%p164_p2), %v334_v2  ;;  %p190_p3 = scmp.lt.s32.totalorder (!%p164_p2), %s309_s23, 15 }
   0x7   : > { %208 = vperm.xlu0 (!%p164_p2), %324, %v205_v0   ;;  %232 = vperm.xlu1 (!%p164_p2), %325, %v229_v1   ;;  %v215_v3 = vld [vmem:[%s392_s2] sm:$0xff] (!%p164_p2) }
   0xb   : > { %218 = vperm.xlu0 (!%p164_p2), %324, %v215_v3  }
   0xd   : > { %s396_s23 = smov (!%p190_p3, %s309_s23), 15 }
   0xe   : > { %s310_s24 = sshll.u32 %s396_s23, 3 }
   0xf   : > { %s193_s27 = scalar_lea.vmem %s390_s0, %s310_s24  ;;  %s199_s30 = scalar_lea.vmem %s394_s4, %s310_s24 }
  0x10   : > { %v201_v4 = vld [vmem:[%s193_s27] sm:$0xff]  ;;  %v202_v6 = vld [vmem:[%s193_s27 + $0x8] sm:$0xff]  ;;  %v203_v7 = vld [vmem:[%s193_s27 + $0x10] sm:$0xff] }
  0x11   : > { %v204_v8 = vld [vmem:[%s193_s27 + $0x18] sm:$0xff] }
  0x86   : > { %v209_v5 = vpop.permute.xlu0 %208  ;;  %v233_v18 = vpop.permute.xlu1 %232 }
  0x87   : > { %v211_v9 = vmul.f32 %v209_v5, %v201_v4  ;;  %v212_v10 = vmul.f32 %v209_v5, %v202_v6  ;;  %v213_v11 = vmul.f32 %v209_v5, %v203_v7  ;;  %v214_v12 = vmul.f32 %v209_v5, %v204_v8 }
  0x8a   : > { %v219_v13 = vpop.permute.xlu0 %218 }
  0x8b   : > { %v221_v14 = vadd.f32 %v219_v13, %v211_v9  ;;  %v222_v15 = vadd.f32 %v219_v13, %v212_v10  ;;  %v223_v16 = vadd.f32 %v219_v13, %v213_v11  ;;  %v224_v17 = vadd.f32 %v219_v13, %v214_v12 }
  0x8d   : > { %vm225_vm1 = vcmp.ge.f32.partialorder %v221_v14, 0.0  ;;  %vm226_vm2 = vcmp.ge.f32.partialorder %v222_v15, 0.0  ;;  %vm227_vm3 = vcmp.ge.f32.partialorder %v223_v16, 0.0  ;;  %vm228_vm4 = vcmp.ge.f32.partialorder %v224_v17, 0.0 }
  0x8e   : > { %v235_v19 = vmul.f32 %v233_v18, %v221_v14  ;;  %v236_v20 = vmul.f32 %v233_v18, %v222_v15  ;;  %v237_v21 = vmul.f32 %v233_v18, %v223_v16  ;;  %v238_v22 = vmul.f32 %v233_v18, %v224_v17 }
  0x90   : > { %v239_v23 = vsel %vm225_vm1, %v221_v14, %v235_v19  ;;  %v240_v24 = vsel %vm226_vm2, %v222_v15, %v236_v20  ;;  %v241_v25 = vsel %vm227_vm3, %v223_v16, %v237_v21  ;;  %v242_v26 = vsel %vm228_vm4, %v224_v17, %v238_v22 }
  0x91   : > { %244 = vst.msk [vmem:[%s199_s30] sm:$0xff] %vm243_vm0, %v239_v23  ;;  %245 = vst.msk [vmem:[%s199_s30 + $0x8] sm:$0xff] %vm243_vm0, %v240_v24 }
  0x92   : > { %246 = vst.msk [vmem:[%s199_s30 + $0x10] sm:$0xff] %vm243_vm0, %v241_v25  ;;  %247 = vst.msk [vmem:[%s199_s30 + $0x18] sm:$0xff] %vm243_vm0, %v242_v26 }
  0x93 PF: > { %s14_s15 = sadd.s32 1, %s332_s15  }
  0x94   : > { %p11_p4 = scmp.ge.s32.totalorder %s14_s15, 6  }
  0x96   :  { %13 = sbr.rel (!%p11_p4) target bundleno = 1 (0x1), region = 66 }

// kernel: down_transition.8
= control target key start
LH: loop header
LB: loop body
LE: loop exit
PB: predicated region body
PF: predicated region fallthrough
CT: control target
= control target key end

     0   :  { %s8526_s21 = smov 0   ;;  %s8528_s22 = smov 0   ;;  %s11415_s0 = inlined_call_operand.vmem [shape: bf16[2,12,8,256], index: 0, kind: input, shape index: {}, may-alias: {0,1}]   ;;  %s11416_s1 = inlined_call_operand.vmem [shape: bf16[2,12,8,256], index: 1, kind: input, shape index: {}, may-alias: {0,1}]   ;;  %s11417_s2 = inlined_call_operand.vmem [shape: f32[1,96], index: 2, kind: input, shape index: {}]   ;;  %s11418_s3 = inlined_call_operand.vmem [shape: bf16[25,8,40], index: 3, kind: input, shape index: {}]   ;;  %s11419_s4 = inlined_call_operand.vmem [shape: f32[2,8,8,96], index: 4, kind: output, shape index: {0}]   ;;  %s11420_s5 = inlined_call_operand.vmem [shape: f32[2,8,1], index: 5, kind: output, shape index: {1}]   ;;  %s11421_s6 = inlined_call_operand.vmem [shape: f32[2,8,1], index: 6, kind: output, shape index: {2}]  }
   0x1   :  { %11486 = sst [smem:[#allocation21_spill]] %s11415_s0  ;;  %s8530_s23 = smov 0  }
   0x2   :  { %11487 = sst [smem:[#allocation22_spill]] %s11416_s1  ;;  %s8532_s24 = smov 0  }
   0x3   :  { %11488 = sst [smem:[#allocation23_spill]] %s11419_s4  ;;  %s8534_s25 = smov 0  }
   0x4   :  { %11489 = sst [smem:[#allocation24_spill]] %s11420_s5 }
   0x5   :  { %11490 = sst [smem:[#allocation25_spill]] %s11421_s6 }
   0x6 LB: > { %11491 = sst [smem:[#allocation5_spill]] %s8454_s23  ;;  %s26_s26 = sadd.s32 1, %s8454_s23  ;;  %s8462_s25 = sphi %s8534_s25, %s17_s25   ;;  %s8458_s24 = sphi %s8532_s24, %s11557_s24   ;;  %s8454_s23 = sphi %s8530_s23, %s11556_s23   ;;  %s8450_s22 = sphi %s8528_s22, %s11555_s22   ;;  %s8446_s21 = sphi %s8526_s21, %s11554_s21  }
   0x7   : > { %11492 = sst [smem:[#allocation6_spill]] %s8458_s24  ;;  %s29_s27 = sadd.s32 1, %s8458_s24 }
   0x8   : > { %11493 = sst [smem:[#allocation7_spill]] %s8462_s25  ;;  %p27_p0 = scmp.ge.s32.totalorder %s26_s26, 2 }
   0x9   : > { %p6697_p1 = scmp.ge.s32.totalorder %s8462_s25, 1  ;;  %p261_p2 = scmp.lt.s32.totalorder %s8462_s25, 5 }
   0xa   : > { %s11559_s26 = smov (%p27_p0, %s26_s26), 0  ;;  %s11561_s27 = smov (!%p27_p0, %s29_s27), %s8458_s24 }
   0xb   : > { %11494 = sst [smem:[#allocation8_spill]] %s11559_s26  ;;  %p262_p3 = pnand %p6697_p1, %p261_p2 }
   0xc   : > { %p31_p4 = scmp.ge.s32.totalorder %s11561_s27, 2 }
   0xd   : > { %265 = sbr.rel (%p262_p3) target bundleno = 1556 (0x614), region = 36 }
   0xe   : > { %s11563_s27 = smov (%p31_p4, %s11561_s27), 0 }
   0xf   : > { %11495 = sst [smem:[#allocation9_spill]] %s11563_s27 }
  0x14   : > { %s8559_s28 = sshll.u32 %s8446_s21, 2  ;;  %p320_p5 = scmp.lt.s32.totalorder %s8450_s22, 1 }
  0x15   : > { %p322_p6 = scmp.lt.s32.totalorder %s8559_s28, 11  ;;  %s6934_s29 = sadd.s32 4, %s8559_s28 }
  0x16   : > { %s11565_s22 = smov (!%p320_p5, %s8450_s22), 1  ;;  %p334_p7 = scmp.lt.s32.totalorder %s6934_s29, 11 }
  0x17   : > { %s323_s30 = scalar_select %p322_p6, %s8559_s28, 11 }
  0x18   : > { %s8335_s7 = smul.u32 24, %s11565_s22  ;;  %p346_p8 = scmp.lt.s32.totalorder %s8559_s28, 7 }
  0x19   : > { %s6699_s8 = sshll.u32 %s323_s30, 1  ;;  %s8565_s10 = sshll.u32 %s11565_s22, 3 }
  0x1a   : > { %s326_s9 = sadd.s32 %s8335_s7, %s6699_s8  ;;  %s11497_s0 = sld [smem:[#allocation21_spill]] }
  0x1b   : > { %s6700_s11 = sshll.u32 %s326_s9, 2  ;;  %s11567_s29 = smov (!%p334_p7, %s6934_s29), 11 }
  0x1c   : > { %s347_s22 = scalar_select %p346_p8, %s8559_s28, 7 }
  0x1d   : > { %s6702_s30 = sshll.u32 %s11567_s29, 1  ;;  %s11499_s1 = sld [smem:[#allocation22_spill]] }
  0x1e   : > { %s338_s8 = sadd.s32 %s8335_s7, %s6702_s30  ;;  %s349_s27 = sadd.s32 %s8565_s10, %s347_s22 }
  0x1f   : > { %s6703_s26 = sshll.u32 %s338_s8, 2  ;;  %s6706_s9 = sshll.u32 %s349_s27, 3 }
  0x20   : > { %s8574_s17 = scalar_lea.vmem %s11497_s0, %s6700_s11  ;;  %s11500_s4 = sld [smem:[#allocation23_spill]] }
  0x21   : > { %p6709_p9 = scmp.ne.s32.totalorder %s8446_s21, 0 }
  0x22   : > { %vm366_vm0 = vcmask (!%p6709_p9), 7168   ;;  %v8464_v0 = vmov (!%p6709_p9), 0.0  }
  0x23   : > { %s8585_s12 = scalar_lea.vmem %s11499_s1, %s6703_s26  ;;  %365 = sbr.rel (%p6709_p9) target bundleno = 42 (0x2a), region = 40  ;;  %367 = vst.msk [vmem:[#allocation3] sm:$0xff] (!%p6709_p9), %vm366_vm0, %v8464_v0  ;;  %368 = vst.msk [vmem:[#allocation4] sm:$0xff] (!%p6709_p9), %vm366_vm0, %v8464_v0 }
  0x26   : > { %s8590_s11 = scalar_lea.vmem %s11500_s4, %s6706_s9 }
  0x2a PF: > { %v8594_v1 = vld [vmem:[%s8585_s12] sm:$0xff]  ;;  %v8604_v4 = vld [vmem:[%s8574_s17 + $0x18] sm:$0xff]  ;;  %v8607_v5 = vld [vmem:[%s8574_s17 + $0x8] sm:$0xff]  ;;  %v11484_v7 = vmov 0.0   ;;  %s11466_s23 = smov 127   ;;  %vm8467_vm1 = vmmov 0  }
  0x2b   : > { %v8597_v2 = vld [vmem:[%s8574_s17] sm:$0xff]  ;;  %v8601_v3 = vcombine.low %v8594_v1, %v8594_v1  ;;  %v8610_v6 = vld [vmem:[%s8574_s17 + $0x10] sm:$0xff]  ;;  %7335 = vmatprep.subr.bf16.mxu0 %v11484_v7  ;;  %7345 = vmatprep.subr.bf16.mxu1 %v11484_v7  ;;  %vm401_vm2 = vcmask 1043456   ;;  %s11464_s24 = smov 126   ;;  %vm397_vm3 = vcmask 326656   ;;  %s11462_s29 = smov 125   ;;  %v8739_v14 = vcombine.high %v8594_v1, %v8594_v1 }
  0x2c   : > { %v8616_v8 = vcombine.low %v8597_v2, %v8607_v5  ;;  %v8624_v9 = vcombine.low %v8610_v6, %v8604_v4  ;;  %7341 = vmatprep.mubr.msk.bf16.mxu0 %vm8467_vm1, %v11484_v7  ;;  %7351 = vmatprep.mubr.msk.bf16.mxu1 %vm8467_vm1, %v11484_v7  ;;  %v381_v11 = vld [vmem:[%s11418_s3] sm:$0xf]  ;;  %s11458_s7 = smov 124   ;;  %s11460_s16 = smov 116   ;;  %v8723_v12 = vcombine.high %v8597_v2, %v8607_v5  ;;  %v6714_v22 = vld [vmem:[%s11418_s3 + $0x4] sm:$0xf] }
  0x2d   : > { %454 = vrot.lane.b32.xlu1 %v8601_v3, %s11466_s23  ;;  %v403_v10 = vsel %vm401_vm2, %v8601_v3, 0  ;;  %s11456_s18 = smov 115   ;;  %s11454_s19 = smov 114   ;;  %v8731_v13 = vcombine.high %v8610_v6, %v8604_v4  ;;  %v6716_v26 = vld [vmem:[%s11418_s3 + $0x8] sm:$0xf]  ;;  %vm378_vm4 = vcmask 785408  }
  0x2e   : > { %450 = vrot.lane.b32.xlu0 %v8616_v8, %s11466_s23  ;;  %7336 = vmatpush3.bf16.msra.mxu0 %v8616_v8  ;;  %s11452_s22 = smov 113   ;;  %s11450_s30 = smov 112   ;;  %v6718_v32 = vld [vmem:[%s11418_s3 + $0xc] sm:$0xf]  ;;  %v6720_v37 = vld [vmem:[%s11418_s3 + $0x10] sm:$0xf] }
  0x2f   : > { %7337 = vmatprep.subr.bf16.mxu0 %v11484_v7  ;;  %s11448_s8 = smov 104   ;;  %s11446_s9 = smov 103   ;;  %v6722_v43 = vld [vmem:[%s11418_s3 + $0x14] sm:$0xf]  ;;  %v6724_v47 = vld [vmem:[%s11418_s3 + $0x18] sm:$0xf] }
  0x30   : > { %s11442_s13 = smov 102   ;;  %s11444_s15 = smov 101   ;;  %v6726_v53 = vld [vmem:[%s11418_s3 + $0x1c] sm:$0xf]  ;;  %v6728_v57 = vld [vmem:[%s11418_s3 + $0x20] sm:$0xf] }
  0x31   : > { %509 = vrot.lane.b32.xlu1 %v8616_v8, %s11464_s24  ;;  %s11430_s26 = smov 100   ;;  %s11428_s27 = smov 92   ;;  %v6730_v63 = vld [vmem:[%s11418_s3 + $0x24] sm:$0xf]  ;;  %379 = vst.msk [vmem:[#allocation2] sm:$0xff] %vm378_vm4, %v11484_v7  ;;  %vm1296_vm5 = vcmask 752640  }
  0x32   : > { %452 = vrot.lane.b32.xlu0 %v8624_v9, %s11466_s23  ;;  %7338 = vmatpush3.bf16.msra.mxu0 %v8624_v9  ;;  %s11424_s20 = smov 91   ;;  %s11426_s14 = smov 90   ;;  %vm1365_vm6 = vcmask 744448   ;;  %vm1434_vm7 = vcmask 736256   ;;  %vm1503_vm8 = vcmask 728064   ;;  %vm1572_vm9 = vcmask 719872  }
  0x33   : > { %7339 = vmatprep.subr.bf16.mxu0 %v11484_v7  ;;  %vm1641_vm10 = vcmask 654336   ;;  %vm1710_vm11 = vcmask 646144   ;;  %vm1779_vm12 = vcmask 637952   ;;  %vm1848_vm13 = vcmask 629760   ;;  %s11529_s1 = smov 77   ;;  %s11530_s6 = smov 76  }
  0x34   : > { %vm1917_vm14 = vcmask 621568   ;;  %s11531_s25 = smov 127   ;;  %s11533_s5 = smov 125   ;;  %vm1991_vm15 = vcmask 7168  }
  0x35   : > { %513 = vrot.lane.b32.xlu1 %v8601_v3, %s11464_s24  ;;  %s11534_s4 = smov 124   ;;  %p1974_p10 = scmp.lt.s32.totalorder %s8559_s28, 8 }
  0x36   : > { %511 = vrot.lane.b32.xlu0 %v8624_v9, %s11464_s24  ;;  %7340 = vmatpush3.bf16.msra.mxu0 %v403_v10  ;;  %p6930_p0 = scmp.ne.s32.totalorder %s8446_s21, 1 }
  0x37   : > { %7355 = vmatprep.subr.bf16.mxu0 %v11484_v7 }
  0x39   : > { %570 = vrot.lane.b32.xlu1 %v8624_v9, %s11462_s29  ;;  %7342 = vmatmul.mubr.msk.bf16.vlgmr.msra.gmra.mrb[0].mxu0 %vm397_vm3, %v381_v11  ;;  %v6732_v11 = vld [vmem:[%s11418_s3 + $0x28] sm:$0xf] }
  0x3a   : > { %568 = vrot.lane.b32.xlu0 %v8616_v8, %s11462_s29  ;;  %7361 = vmatprep.mubr.msk.bf16.mxu0 %vm8467_vm1, %v11484_v7 }
  0x3d   : > { %627 = vrot.lane.b32.xlu1 %v8616_v8, %s11458_s7 }
  0x3e   : > { %572 = vrot.lane.b32.xlu0 %v8601_v3, %s11462_s29 }
  0x41   : > { %631 = vrot.lane.b32.xlu1 %v8601_v3, %s11458_s7 }
  0x42   : > { %629 = vrot.lane.b32.xlu0 %v8624_v9, %s11458_s7 }
  0x45   : > { %688 = vrot.lane.b32.xlu1 %v8624_v9, %s11460_s16 }
  0x46   : > { %686 = vrot.lane.b32.xlu0 %v8616_v8, %s11460_s16 }
  0x49   : > { %745 = vrot.lane.b32.xlu1 %v8616_v8, %s11456_s18 }
  0x4a   : > { %690 = vrot.lane.b32.xlu0 %v8601_v3, %s11460_s16 }
  0x4d   : > { %749 = vrot.lane.b32.xlu1 %v8601_v3, %s11456_s18 }
  0x4e   : > { %747 = vrot.lane.b32.xlu0 %v8624_v9, %s11456_s18 }
  0x51   : > { %806 = vrot.lane.b32.xlu1 %v8624_v9, %s11454_s19 }
  0x52   : > { %804 = vrot.lane.b32.xlu0 %v8616_v8, %s11454_s19 }
  0x55   : > { %863 = vrot.lane.b32.xlu1 %v8616_v8, %s11452_s22 }
  0x56   : > { %808 = vrot.lane.b32.xlu0 %v8601_v3, %s11454_s19 }
  0x59   : > { %867 = vrot.lane.b32.xlu1 %v8601_v3, %s11452_s22 }
  0x5a   : > { %865 = vrot.lane.b32.xlu0 %v8624_v9, %s11452_s22 }
  0x5d   : > { %924 = vrot.lane.b32.xlu1 %v8624_v9, %s11450_s30 }
  0x5e   : > { %922 = vrot.lane.b32.xlu0 %v8616_v8, %s11450_s30 }
  0x61   : > { %981 = vrot.lane.b32.xlu1 %v8616_v8, %s11448_s8 }
  0x62   : > { %926 = vrot.lane.b32.xlu0 %v8601_v3, %s11450_s30 }
  0x65   : > { %985 = vrot.lane.b32.xlu1 %v8601_v3, %s11448_s8 }
  0x66   : > { %983 = vrot.lane.b32.xlu0 %v8624_v9, %s11448_s8 }
  0x69   : > { %1042 = vrot.lane.b32.xlu1 %v8624_v9, %s11446_s9 }
  0x6a   : > { %1040 = vrot.lane.b32.xlu0 %v8616_v8, %s11446_s9 }
  0x6d   : > { %1099 = vrot.lane.b32.xlu1 %v8616_v8, %s11442_s13 }
  0x6e   : > { %1044 = vrot.lane.b32.xlu0 %v8601_v3, %s11446_s9 }
  0x71   : > { %1103 = vrot.lane.b32.xlu1 %v8601_v3, %s11442_s13 }
  0x72   : > { %1101 = vrot.lane.b32.xlu0 %v8624_v9, %s11442_s13 }
  0x75   : > { %1160 = vrot.lane.b32.xlu1 %v8624_v9, %s11444_s15 }
  0x76   : > { %1158 = vrot.lane.b32.xlu0 %v8616_v8, %s11444_s15 }
  0x79   : > { %1217 = vrot.lane.b32.xlu1 %v8616_v8, %s11430_s26 }
  0x7a   : > { %1162 = vrot.lane.b32.xlu0 %v8601_v3, %s11444_s15 }
  0x7d   : > { %1221 = vrot.lane.b32.xlu1 %v8601_v3, %s11430_s26 }
  0x7e   : > { %1219 = vrot.lane.b32.xlu0 %v8624_v9, %s11430_s26  ;;  %s11434_s26 = smov 88  }
  0x81   : > { %1286 = vrot.lane.b32.xlu1 %v8723_v12, %s11428_s27 }
  0x82   : > { %1284 = vrot.lane.b32.xlu0 %v8616_v8, %s11428_s27 }
  0x85   : > { %1290 = vrot.lane.b32.xlu1 %v8731_v13, %s11428_s27 }
  0x86   : > { %1288 = vrot.lane.b32.xlu0 %v8624_v9, %s11428_s27 }
  0x89   : > { %1294 = vrot.lane.b32.xlu1 %v8739_v14, %s11428_s27 }
  0x8a   : > { %1292 = vrot.lane.b32.xlu0 %v8601_v3, %s11428_s27  ;;  %s11515_s27 = smov 114  }
  0x8d   : > { %1355 = vrot.lane.b32.xlu1 %v8723_v12, %s11424_s20 }
  0x8e   : > { %1353 = vrot.lane.b32.xlu0 %v8616_v8, %s11424_s20 }
  0x91   : > { %1359 = vrot.lane.b32.xlu1 %v8731_v13, %s11424_s20 }
  0x92   : > { %1357 = vrot.lane.b32.xlu0 %v8624_v9, %s11424_s20 }
  0x95   : > { %1363 = vrot.lane.b32.xlu1 %v8739_v14, %s11424_s20 }
  0x96   : > { %1361 = vrot.lane.b32.xlu0 %v8601_v3, %s11424_s20  ;;  %s11432_s20 = smov 89  }
  0x99   : > { %1424 = vrot.lane.b32.xlu1 %v8723_v12, %s11426_s14 }
  0x9a   : > { %1422 = vrot.lane.b32.xlu0 %v8616_v8, %s11426_s14 }
  0x9d   : > { %1428 = vrot.lane.b32.xlu1 %v8731_v13, %s11426_s14 }
  0x9e   : > { %1426 = vrot.lane.b32.xlu0 %v8624_v9, %s11426_s14 }
  0x9f   : > { %v455_v15 = vpop.permute.xlu1 %454 }
  0xa0   : > { %v451_v16 = vpop.permute.xlu0 %450  ;;  %v462_v19 = vsel %vm401_vm2, %v455_v15, 0 }
  0xa1   : > { %7346 = vmatpush3.bf16.msra.mxu1 %v451_v16  ;;  %1432 = vrot.lane.b32.xlu1 %v8739_v14, %s11426_s14 }
  0xa2   : > { %1430 = vrot.lane.b32.xlu0 %v8601_v3, %s11426_s14  ;;  %7347 = vmatprep.subr.bf16.mxu1 %v11484_v7  ;;  %s11501_s14 = smov 100  }
  0xa3   : > { %v510_v17 = vpop.permute.xlu1 %509 }
  0xa4   : > { %v8772_v18 = vpop.permute.xlu0 %452  ;;  %7356 = vmatpush3.bf16.msra.mxu0 %v510_v17 }
  0xa5   : > { %7348 = vmatpush3.bf16.msra.mxu1 %v8772_v18  ;;  %1493 = vrot.lane.b32.xlu1 %v8723_v12, %s11432_s20 }
  0xa6   : > { %1491 = vrot.lane.b32.xlu0 %v8616_v8, %s11432_s20  ;;  %7349 = vmatprep.subr.bf16.mxu1 %v11484_v7 }
  0xa7   : > { %v514_v20 = vpop.permute.xlu1 %513  ;;  %7357 = vmatprep.subr.bf16.mxu0 %v11484_v7 }
  0xa8   : > { %v8782_v21 = vpop.permute.xlu0 %511  ;;  %v521_v23 = vsel %vm401_vm2, %v514_v20, 0 }
  0xa9   : > { %7350 = vmatpush3.bf16.msra.mxu1 %v462_v19  ;;  %1497 = vrot.lane.b32.xlu1 %v8731_v13, %s11432_s20 }
  0xaa   : > { %1495 = vrot.lane.b32.xlu0 %v8624_v9, %s11432_s20  ;;  %7358 = vmatpush3.bf16.msra.mxu0 %v8782_v21 }
  0xab   : > { %v8793_v24 = vpop.permute.xlu1 %570  ;;  %7359 = vmatprep.subr.bf16.mxu0 %v11484_v7  ;;  %7365 = vmatprep.subr.bf16.mxu1 %v11484_v7 }
  0xac   : > { %7352 = vmatmul.mubr.msk.bf16.vlgmr.msra.gmra.mrb[0].mxu1 %vm397_vm3, %v6714_v22  ;;  %v569_v25 = vpop.permute.xlu0 %568  ;;  %v6734_v22 = vld [vmem:[%s11418_s3 + $0x2c] sm:$0xf] }
  0xad   : > { %1501 = vrot.lane.b32.xlu1 %v8739_v14, %s11432_s20  ;;  %7366 = vmatpush3.bf16.msra.mxu1 %v569_v25 }
  0xae   : > { %1499 = vrot.lane.b32.xlu0 %v8601_v3, %s11432_s20  ;;  %7360 = vmatpush3.bf16.msra.mxu0 %v521_v23  ;;  %s11436_s20 = smov 80  }
  0xaf   : > { %v628_v27 = vpop.permute.xlu1 %627  ;;  %7367 = vmatprep.subr.bf16.mxu1 %v11484_v7  ;;  %7375 = vmatprep.subr.bf16.mxu0 %v11484_v7 }
  0xb0   : > { %v573_v28 = vpop.permute.xlu0 %572  ;;  %7371 = vmatprep.mubr.msk.bf16.mxu1 %vm8467_vm1, %v11484_v7 }
  0xb1   : > { %1562 = vrot.lane.b32.xlu1 %v8723_v12, %s11434_s26  ;;  %7362 = vmatmul.mubr.msk.bf16.vlgmr.msra.gmra.mrb[4].mxu0 %vm397_vm3, %v6716_v26  ;;  %v580_v29 = vsel %vm401_vm2, %v573_v28, 0 }
  0xb2   : > { %1560 = vrot.lane.b32.xlu0 %v8616_v8, %s11434_s26  ;;  %7368 = vmatpush3.bf16.msra.mxu1 %v8793_v24 }
  0xb3   : > { %v632_v30 = vpop.permute.xlu1 %631  ;;  %7369 = vmatprep.subr.bf16.mxu1 %v11484_v7  ;;  %7376 = vmatpush3.bf16.msra.mxu0 %v628_v27  ;;  %v6736_v27 = vld [vmem:[%s11418_s3 + $0x30] sm:$0xf] }
  0xb4   : > { %v8817_v31 = vpop.permute.xlu0 %629  ;;  %7377 = vmatprep.subr.bf16.mxu0 %v11484_v7  ;;  %7381 = vmatprep.mubr.msk.bf16.mxu0 %vm8467_vm1, %v11484_v7  ;;  %v639_v34 = vsel %vm401_vm2, %v632_v30, 0 }
  0xb5   : > { %1566 = vrot.lane.b32.xlu1 %v8731_v13, %s11434_s26 }
  0xb6   : > { %1564 = vrot.lane.b32.xlu0 %v8624_v9, %s11434_s26  ;;  %7370 = vmatpush3.bf16.msra.mxu1 %v580_v29 }
  0xb7   : > { %v8829_v33 = vpop.permute.xlu1 %688  ;;  %7378 = vmatpush3.bf16.msra.mxu0 %v8817_v31  ;;  %7385 = vmatprep.subr.bf16.mxu1 %v11484_v7 }
  0xb8   : > { %v687_v35 = vpop.permute.xlu0 %686  ;;  %7379 = vmatprep.subr.bf16.mxu0 %v11484_v7 }
  0xb9   : > { %1570 = vrot.lane.b32.xlu1 %v8739_v14, %s11434_s26  ;;  %7372 = vmatmul.mubr.msk.bf16.vlgmr.msra.gmra.mrb[4].mxu1 %vm397_vm3, %v6718_v32 }
  0xba   : > { %1568 = vrot.lane.b32.xlu0 %v8601_v3, %s11434_s26  ;;  %7386 = vmatpush3.bf16.msra.mxu1 %v687_v35  ;;  %s11438_s26 = smov 79  }
  0xbb   : > { %v746_v36 = vpop.permute.xlu1 %745  ;;  %7380 = vmatpush3.bf16.msra.mxu0 %v639_v34  ;;  %7387 = vmatprep.subr.bf16.mxu1 %v11484_v7 }
  0xbc   : > { %v691_v38 = vpop.permute.xlu0 %690  ;;  %7395 = vmatprep.subr.bf16.mxu0 %v11484_v7  ;;  %7391 = vmatprep.mubr.msk.bf16.mxu1 %vm8467_vm1, %v11484_v7 }
  0xbd   : > { %1631 = vrot.lane.b32.xlu1 %v8723_v12, %s11436_s20  ;;  %v698_v40 = vsel %vm401_vm2, %v691_v38, 0 }
  0xbe   : > { %1629 = vrot.lane.b32.xlu0 %v8616_v8, %s11436_s20  ;;  %7382 = vmatmul.mubr.msk.bf16.vlgmr.msra.gmra.mrb[8].mxu0 %vm397_vm3, %v6720_v37  ;;  %v9036_v37 = vcombine.low %v8607_v5, %v8610_v6 }
  0xbf   : > { %v750_v39 = vpop.permute.xlu1 %749  ;;  %7388 = vmatpush3.bf16.msra.mxu1 %v8829_v33  ;;  %7396 = vmatpush3.bf16.msra.mxu0 %v746_v36 }
  0xc0   : > { %v8854_v41 = vpop.permute.xlu0 %747  ;;  %7389 = vmatprep.subr.bf16.mxu1 %v11484_v7  ;;  %7397 = vmatprep.subr.bf16.mxu0 %v11484_v7  ;;  %v757_v44 = vsel %vm401_vm2, %v750_v39, 0  ;;  %v9040_v39 = vld [vmem:[%s8585_s12 + $0x8] sm:$0xff] }
  0xc1   : > { %1635 = vrot.lane.b32.xlu1 %v8731_v13, %s11436_s20  ;;  %7401 = vmatprep.mubr.msk.bf16.mxu0 %vm8467_vm1, %v11484_v7  ;;  %v9058_v5 = vcombine.low %v9040_v39, %v9040_v39 }
  0xc2   : > { %1633 = vrot.lane.b32.xlu0 %v8624_v9, %s11436_s20 }
  0xc3   : > { %v8864_v42 = vpop.permute.xlu1 %806  ;;  %7390 = vmatpush3.bf16.msra.mxu1 %v698_v40  ;;  %7398 = vmatpush3.bf16.msra.mxu0 %v8854_v41 }
  0xc4   : > { %v805_v45 = vpop.permute.xlu0 %804  ;;  %7399 = vmatprep.subr.bf16.mxu0 %v11484_v7  ;;  %7405 = vmatprep.subr.bf16.mxu1 %v11484_v7 }
  0xc5   : > { %1639 = vrot.lane.b32.xlu1 %v8739_v14, %s11436_s20 }
  0xc6   : > { %1637 = vrot.lane.b32.xlu0 %v8601_v3, %s11436_s20  ;;  %7392 = vmatmul.mubr.msk.bf16.vlgmr.msra.gmra.mrb[8].mxu1 %vm397_vm3, %v6722_v43  ;;  %s11440_s20 = smov 78  }
  0xc7   : > { %v864_v46 = vpop.permute.xlu1 %863  ;;  %7400 = vmatpush3.bf16.msra.mxu0 %v757_v44  ;;  %7406 = vmatpush3.bf16.msra.mxu1 %v805_v45 }
  0xc8   : > { %v809_v48 = vpop.permute.xlu0 %808  ;;  %7407 = vmatprep.subr.bf16.mxu1 %v11484_v7  ;;  %7415 = vmatprep.subr.bf16.mxu0 %v11484_v7 }
  0xc9   : > { %1700 = vrot.lane.b32.xlu1 %v8723_v12, %s11438_s26  ;;  %7411 = vmatprep.mubr.msk.bf16.mxu1 %vm8467_vm1, %v11484_v7  ;;  %v816_v50 = vsel %vm401_vm2, %v809_v48, 0 }
  0xca   : > { %1698 = vrot.lane.b32.xlu0 %v8616_v8, %s11438_s26  ;;  %7402 = vmatmul.mubr.msk.bf16.vlgmr.msra.gmra.mrb[12].mxu0 %vm397_vm3, %v6724_v47 }
  0xcb   : > { %v868_v49 = vpop.permute.xlu1 %867  ;;  %7408 = vmatpush3.bf16.msra.mxu1 %v8864_v42  ;;  %7416 = vmatpush3.bf16.msra.mxu0 %v864_v46  ;;  %v6742_v46 = vld [vmem:[%s11418_s3 + $0x3c] sm:$0xf] }
  0xcc   : > { %v8892_v51 = vpop.permute.xlu0 %865  ;;  %7409 = vmatprep.subr.bf16.mxu1 %v11484_v7  ;;  %7417 = vmatprep.subr.bf16.mxu0 %v11484_v7  ;;  %v875_v54 = vsel %vm401_vm2, %v868_v49, 0 }
  0xcd   : > { %1704 = vrot.lane.b32.xlu1 %v8731_v13, %s11438_s26  ;;  %7421 = vmatprep.mubr.msk.bf16.mxu0 %vm8467_vm1, %v11484_v7 }
  0xce   : > { %1702 = vrot.lane.b32.xlu0 %v8624_v9, %s11438_s26 }
  0xcf   : > { %v8902_v52 = vpop.permute.xlu1 %924  ;;  %7410 = vmatpush3.bf16.msra.mxu1 %v816_v50  ;;  %7418 = vmatpush3.bf16.msra.mxu0 %v8892_v51 }
  0xd0   : > { %v923_v55 = vpop.permute.xlu0 %922  ;;  %7419 = vmatprep.subr.bf16.mxu0 %v11484_v7  ;;  %7425 = vmatprep.subr.bf16.mxu1 %v11484_v7 }
  0xd1   : > { %1708 = vrot.lane.b32.xlu1 %v8739_v14, %s11438_s26 }
  0xd2   : > { %1706 = vrot.lane.b32.xlu0 %v8601_v3, %s11438_s26  ;;  %7412 = vmatmul.mubr.msk.bf16.vlgmr.msra.gmra.mrb[12].mxu1 %vm397_vm3, %v6726_v53  ;;  %s11470_s26 = smov 77  }
  0xd3   : > { %v982_v56 = vpop.permute.xlu1 %981  ;;  %7420 = vmatpush3.bf16.msra.mxu0 %v875_v54  ;;  %7426 = vmatpush3.bf16.msra.mxu1 %v923_v55 }
  0xd4   : > { %v927_v58 = vpop.permute.xlu0 %926  ;;  %7427 = vmatprep.subr.bf16.mxu1 %v11484_v7  ;;  %7435 = vmatprep.subr.bf16.mxu0 %v11484_v7 }
  0xd5   : > { %1769 = vrot.lane.b32.xlu1 %v8723_v12, %s11440_s20  ;;  %7431 = vmatprep.mubr.msk.bf16.mxu1 %vm8467_vm1, %v11484_v7  ;;  %v934_v60 = vsel %vm401_vm2, %v927_v58, 0 }
  0xd6   : > { %1767 = vrot.lane.b32.xlu0 %v8616_v8, %s11440_s20  ;;  %7422 = vmatmul.mubr.msk.bf16.vlgmr.msra.gmra.mrb[16].mxu0 %vm397_vm3, %v6728_v57  ;;  %v380_v57 = vld [vmem:[#allocation2] sm:$0xff] }
  0xd7   : > { %v986_v59 = vpop.permute.xlu1 %985  ;;  %7428 = vmatpush3.bf16.msra.mxu1 %v8902_v52  ;;  %7436 = vmatpush3.bf16.msra.mxu0 %v982_v56 }
  0xd8   : > { %v8930_v61 = vpop.permute.xlu0 %983  ;;  %7429 = vmatprep.subr.bf16.mxu1 %v11484_v7  ;;  %7437 = vmatprep.subr.bf16.mxu0 %v11484_v7  ;;  %v993_v0 = vsel %vm401_vm2, %v986_v59, 0 }
  0xd9   : > { %1773 = vrot.lane.b32.xlu1 %v8731_v13, %s11440_s20  ;;  %7441 = vmatprep.mubr.msk.bf16.mxu0 %vm8467_vm1, %v11484_v7 }
  0xda   : > { %1771 = vrot.lane.b32.xlu0 %v8624_v9, %s11440_s20 }
  0xdb   : > { %v8940_v62 = vpop.permute.xlu1 %1042  ;;  %7430 = vmatpush3.bf16.msra.mxu1 %v934_v60  ;;  %7438 = vmatpush3.bf16.msra.mxu0 %v8930_v61  ;;  %v6747_v60 = vld [vmem:[%s11418_s3 + $0x40] sm:$0xf] }
  0xdc   : > { %v1041_v2 = vpop.permute.xlu0 %1040  ;;  %7445 = vmatprep.subr.bf16.mxu1 %v11484_v7  ;;  %7439 = vmatprep.subr.bf16.mxu0 %v11484_v7 }
  0xdd   : > { %1777 = vrot.lane.b32.xlu1 %v8739_v14, %s11440_s20 }
  0xde   : > { %1775 = vrot.lane.b32.xlu0 %v8601_v3, %s11440_s20  ;;  %7432 = vmatmul.mubr.msk.bf16.vlgmr.msra.gmra.mrb[16].mxu1 %vm397_vm3, %v6730_v63  ;;  %s11468_s20 = smov 76  }
  0xdf   : > { %v1100_v10 = vpop.permute.xlu1 %1099  ;;  %7446 = vmatpush3.bf16.msra.mxu1 %v1041_v2  ;;  %7440 = vmatpush3.bf16.msra.mxu0 %v993_v0 }
  0xe0   : > { %v1045_v15 = vpop.permute.xlu0 %1044  ;;  %7447 = vmatprep.subr.bf16.mxu1 %v11484_v7  ;;  %7455 = vmatprep.subr.bf16.mxu0 %v11484_v7 }
  0xe1   : > { %1838 = vrot.lane.b32.xlu1 %v8723_v12, %s11470_s26  ;;  %7451 = vmatprep.mubr.msk.bf16.mxu1 %vm8467_vm1, %v11484_v7  ;;  %v1052_v17 = vsel %vm401_vm2, %v1045_v15, 0 }
  0xe2   : > { %1836 = vrot.lane.b32.xlu0 %v8616_v8, %s11470_s26  ;;  %7442 = vmatmul.mubr.msk.bf16.vlgmr.msra.gmra.mrb[20].mxu0 %vm397_vm3, %v6732_v11 }
  0xe3   : > { %v1104_v16 = vpop.permute.xlu1 %1103  ;;  %7448 = vmatpush3.bf16.msra.mxu1 %v8940_v62  ;;  %7456 = vmatpush3.bf16.msra.mxu0 %v1100_v10 }
  0xe4   : > { %v8968_v19 = vpop.permute.xlu0 %1101  ;;  %7449 = vmatprep.subr.bf16.mxu1 %v11484_v7  ;;  %7457 = vmatprep.subr.bf16.mxu0 %v11484_v7  ;;  %v1111_v23 = vsel %vm401_vm2, %v1104_v16, 0 }
  0xe5   : > { %1842 = vrot.lane.b32.xlu1 %v8731_v13, %s11470_s26  ;;  %7461 = vmatprep.mubr.msk.bf16.mxu0 %vm8467_vm1, %v11484_v7 }
  0xe6   : > { %1840 = vrot.lane.b32.xlu0 %v8624_v9, %s11470_s26 }
  0xe7   : > { %v8978_v20 = vpop.permute.xlu1 %1160  ;;  %7450 = vmatpush3.bf16.msra.mxu1 %v1052_v17  ;;  %7458 = vmatpush3.bf16.msra.mxu0 %v8968_v19 }
  0xe8   : > { %v1159_v25 = vpop.permute.xlu0 %1158  ;;  %7465 = vmatprep.subr.bf16.mxu1 %v11484_v7  ;;  %7459 = vmatprep.subr.bf16.mxu0 %v11484_v7 }
  0xe9   : > { %1846 = vrot.lane.b32.xlu1 %v8739_v14, %s11470_s26 }
  0xea   : > { %1844 = vrot.lane.b32.xlu0 %v8601_v3, %s11470_s26  ;;  %7452 = vmatmul.mubr.msk.bf16.vlgmr.msra.gmra.mrb[20].mxu1 %vm397_vm3, %v6734_v22 }
  0xeb   : > { %v1218_v26 = vpop.permute.xlu1 %1217  ;;  %7466 = vmatpush3.bf16.msra.mxu1 %v1159_v25  ;;  %7460 = vmatpush3.bf16.msra.mxu0 %v1111_v23 }
  0xec   : > { %v1163_v28 = vpop.permute.xlu0 %1162  ;;  %7467 = vmatprep.subr.bf16.mxu1 %v11484_v7  ;;  %7475 = vmatprep.subr.bf16.mxu0 %v11484_v7 }
  0xed   : > { %1907 = vrot.lane.b32.xlu1 %v8723_v12, %s11468_s20  ;;  %7471 = vmatprep.mubr.msk.bf16.mxu1 %vm8467_vm1, %v11484_v7  ;;  %v1170_v30 = vsel %vm401_vm2, %v1163_v28, 0  ;;  %v6738_v12 = vld [vmem:[%s11418_s3 + $0x34] sm:$0xf] }
  0xee   : > { %1905 = vrot.lane.b32.xlu0 %v8616_v8, %s11468_s20  ;;  %7462 = vmatmul.mubr.msk.bf16.vlgmr.msra.gmra.mrb[24].mxu0 %vm397_vm3, %v6736_v27 }
  0xef   : > { %v1222_v29 = vpop.permute.xlu1 %1221  ;;  %7468 = vmatpush3.bf16.msra.mxu1 %v8978_v20  ;;  %7476 = vmatpush3.bf16.msra.mxu0 %v1218_v26 }
  0xf0   : > { %v9008_v32 = vpop.permute.xlu0 %1219  ;;  %7469 = vmatprep.subr.bf16.mxu1 %v11484_v7  ;;  %7477 = vmatprep.subr.bf16.mxu0 %v11484_v7  ;;  %v1229_v34 = vsel %vm401_vm2, %v1222_v29, 0 }
  0xf1   : > { %1911 = vrot.lane.b32.xlu1 %v8731_v13, %s11468_s20  ;;  %7481 = vmatprep.mubr.msk.bf16.mxu0 %vm8467_vm1, %v11484_v7  ;;  %v9027_v13 = vcombine.low %v8604_v4, %v8594_v1  ;;  %v6740_v1 = vld [vmem:[%s11418_s3 + $0x38] sm:$0xf] }
  0xf2   : > { %1909 = vrot.lane.b32.xlu0 %v8624_v9, %s11468_s20 }
  0xf3   : > { %v1287_v8 = vpop.permute.xlu1 %1286  ;;  %7470 = vmatpush3.bf16.msra.mxu1 %v1170_v30  ;;  %7478 = vmatpush3.bf16.msra.mxu0 %v9008_v32  ;;  %v6749_v30 = vld [vmem:[%s11418_s3 + $0x44] sm:$0xf] }
  0xf4   : > { %v1285_v35 = vpop.permute.xlu0 %1284  ;;  %7479 = vmatprep.subr.bf16.mxu0 %v11484_v7  ;;  %7485 = vmatprep.subr.bf16.mxu1 %v11484_v7 }
  0xf5   : > { %v1297_v36 = vsel %vm1296_vm5, %v1285_v35, %v1287_v8  ;;  %1915 = vrot.lane.b32.xlu1 %v8739_v14, %s11468_s20 }
  0xf6   : > { %1913 = vrot.lane.b32.xlu0 %v8601_v3, %s11468_s20  ;;  %7472 = vmatmul.mubr.msk.bf16.vlgmr.msra.gmra.mrb[24].mxu1 %vm397_vm3, %v6738_v12 }
  0xf7   : > { %v1291_v38 = vpop.permute.xlu1 %1290  ;;  %7480 = vmatpush3.bf16.msra.mxu0 %v1229_v34  ;;  %7486 = vmatpush3.bf16.msra.mxu1 %v1297_v36 }
  0xf8   : > { %v1289_v4 = vpop.permute.xlu0 %1288  ;;  %7487 = vmatprep.subr.bf16.mxu1 %v11484_v7  ;;  %7495 = vmatprep.subr.bf16.mxu0 %v11484_v7 }
  0xf9   : > { %v9048_v3 = vsel %vm1296_vm5, %v1289_v4, %v1291_v38  ;;  %2062 = vrot.lane.b32.xlu1 %v9027_v13, %s11466_s23  ;;  %7491 = vmatprep.mubr.msk.bf16.mxu1 %vm8467_vm1, %v11484_v7 }
  0xfa   : > { %2060 = vrot.lane.b32.xlu0 %v9036_v37, %s11466_s23  ;;  %7482 = vmatmul.mubr.msk.bf16.vlgmr.msra.gmra.mrb[28].mxu0 %vm397_vm3, %v6740_v1 }
  0xfb   : > { %v1295_v6 = vpop.permute.xlu1 %1294  ;;  %7488 = vmatpush3.bf16.msra.mxu1 %v9048_v3  ;;  %7501 = vmatprep.mubr.msk.bf16.mxu0 %vm8467_vm1, %v11484_v7 }
  0xfc   : > { %v1293_v14 = vpop.permute.xlu0 %1292  ;;  %7489 = vmatprep.subr.bf16.mxu1 %v11484_v7 }
  0xfd   : > { %v1299_v40 = vsel %vm1296_vm5, %v1293_v14, %v1295_v6  ;;  %2118 = vrot.lane.b32.xlu1 %v9036_v37, %s11464_s24 }
  0xfe   : > { %v1306_v43 = vsel %vm401_vm2, %v1299_v40, 0  ;;  %2064 = vrot.lane.b32.xlu0 %v9058_v5, %s11466_s23  ;;  %v6751_v40 = vld [vmem:[%s11418_s3 + $0x48] sm:$0xf] }
  0xff   : > { %v1356_v44 = vpop.permute.xlu1 %1355  ;;  %7490 = vmatpush3.bf16.msra.mxu1 %v1306_v43 }
 0x100   : > { %v1354_v45 = vpop.permute.xlu0 %1353  ;;  %7505 = vmatprep.subr.bf16.mxu1 %v11484_v7 }
 0x101   : > { %v1366_v47 = vsel %vm1365_vm6, %v1354_v45, %v1356_v44  ;;  %2122 = vrot.lane.b32.xlu1 %v9058_v5, %s11464_s24 }
 0x102   : > { %2120 = vrot.lane.b32.xlu0 %v9027_v13, %s11464_s24  ;;  %7496 = vmatpush3.bf16.msra.mxu0 %v1366_v47 }
 0x103   : > { %v1360_v48 = vpop.permute.xlu1 %1359  ;;  %7497 = vmatprep.subr.bf16.mxu0 %v11484_v7  ;;  %7492 = vmatmul.mubr.msk.bf16.vlgmr.msra.gmra.mrb[28].mxu1 %vm397_vm3, %v6742_v46 }
 0x104   : > { %v1358_v49 = vpop.permute.xlu0 %1357  ;;  %7511 = vmatprep.mubr.msk.bf16.mxu1 %vm8467_vm1, %v11484_v7 }
 0x105   : > { %v9085_v50 = vsel %vm1365_vm6, %v1358_v49, %v1360_v48  ;;  %2178 = vrot.lane.b32.xlu1 %v9027_v13, %s11462_s29 }
 0x106   : > { %2176 = vrot.lane.b32.xlu0 %v9036_v37, %s11462_s29  ;;  %7498 = vmatpush3.bf16.msra.mxu0 %v9085_v50 }
 0x107   : > { %v1364_v53 = vpop.permute.xlu1 %1363  ;;  %7499 = vmatprep.subr.bf16.mxu0 %v11484_v7 }
 0x108   : > { %v1362_v54 = vpop.permute.xlu0 %1361 }
 0x109   : > { %v1368_v55 = vsel %vm1365_vm6, %v1362_v54, %v1364_v53  ;;  %2234 = vrot.lane.b32.xlu1 %v9036_v37, %s11458_s7 }
 0x10a   : > { %v1375_v56 = vsel %vm401_vm2, %v1368_v55, 0  ;;  %2180 = vrot.lane.b32.xlu0 %v9058_v5, %s11462_s29 }
 0x10b   : > { %v1425_v58 = vpop.permute.xlu1 %1424  ;;  %7500 = vmatpush3.bf16.msra.mxu0 %v1375_v56  ;;  %v6753_v56 = vld [vmem:[%s11418_s3 + $0x4c] sm:$0xf] }
 0x10c   : > { %v1423_v59 = vpop.permute.xlu0 %1422  ;;  %7515 = vmatprep.subr.bf16.mxu0 %v11484_v7  ;;  %v439_v63 = vpop.f32.mrb[0].mxu0 }
 0x10d   : > { %v1435_v0 = vsel %vm1434_vm7, %v1423_v59, %v1425_v58  ;;  %2238 = vrot.lane.b32.xlu1 %v9058_v5, %s11458_s7  ;;  %v445_v2 = vadd.f32 %v439_v63, %v380_v57  ;;  %v7343_v10 = vpop.f32.mrb[1].mxu0 }
 0x10e   : > { %2236 = vrot.lane.b32.xlu0 %v9027_v13, %s11458_s7  ;;  %7506 = vmatpush3.bf16.msra.mxu1 %v1435_v0  ;;  %v442_v11 = vpop.f32.mrb[2].mxu0 }
 0x10f   : > { %v1429_v15 = vpop.permute.xlu1 %1428  ;;  %7507 = vmatprep.subr.bf16.mxu1 %v11484_v7  ;;  %7502 = vmatmul.mubr.msk.bf16.vlgmr.msra.gmra.mrb[32].mxu0 %vm397_vm3, %v6747_v60  ;;  %446 = vst.msk [vmem:[#allocation2] sm:$0xff] %vm378_vm4, %v445_v2  ;;  %v7344_v16 = vpop.f32.mrb[3].mxu0 }
 0x110   : > { %v1427_v17 = vpop.permute.xlu0 %1426  ;;  %7521 = vmatprep.mubr.msk.bf16.mxu0 %vm8467_vm1, %v11484_v7  ;;  %v6755_v16 = vld [vmem:[%s11418_s3 + $0x50] sm:$0xf] }
 0x111   : > { %v9114_v22 = vsel %vm1434_vm7, %v1427_v17, %v1429_v15  ;;  %2294 = vrot.lane.b32.xlu1 %v9027_v13, %s11460_s16 }
 0x112   : > { %2292 = vrot.lane.b32.xlu0 %v9036_v37, %s11460_s16  ;;  %7508 = vmatpush3.bf16.msra.mxu1 %v9114_v22 }
 0x113   : > { %v1433_v23 = vpop.permute.xlu1 %1432  ;;  %7509 = vmatprep.subr.bf16.mxu1 %v11484_v7 }
 0x114   : > { %v1431_v25 = vpop.permute.xlu0 %1430 }
 0x115   : > { %v1437_v26 = vsel %vm1434_vm7, %v1431_v25, %v1433_v23  ;;  %2350 = vrot.lane.b32.xlu1 %v9036_v37, %s11456_s18 }
 0x116   : > { %v1444_v27 = vsel %vm401_vm2, %v1437_v26, 0  ;;  %2296 = vrot.lane.b32.xlu0 %v9058_v5, %s11460_s16 }
 0x117   : > { %v1494_v28 = vpop.permute.xlu1 %1493  ;;  %7510 = vmatpush3.bf16.msra.mxu1 %v1444_v27 }
 0x118   : > { %v1492_v29 = vpop.permute.xlu0 %1491  ;;  %7525 = vmatprep.subr.bf16.mxu1 %v11484_v7 }
 0x119   : > { %v1504_v8 = vsel %vm1503_vm8, %v1492_v29, %v1494_v28  ;;  %2354 = vrot.lane.b32.xlu1 %v9058_v5, %s11456_s18 }
 0x11a   : > { %2352 = vrot.lane.b32.xlu0 %v9027_v13, %s11456_s18  ;;  %7516 = vmatpush3.bf16.msra.mxu0 %v1504_v8  ;;  %s11509_s18 = smov 78  }
 0x11b   : > { %v1498_v12 = vpop.permute.xlu1 %1497  ;;  %7517 = vmatprep.subr.bf16.mxu0 %v11484_v7  ;;  %7512 = vmatmul.mubr.msk.bf16.vlgmr.msra.gmra.mrb[32].mxu1 %vm397_vm3, %v6749_v30 }
 0x11c   : > { %v1496_v34 = vpop.permute.xlu0 %1495  ;;  %7531 = vmatprep.mubr.msk.bf16.mxu1 %vm8467_vm1, %v11484_v7 }
 0x11d   : > { %v9142_v35 = vsel %vm1503_vm8, %v1496_v34, %v1498_v12  ;;  %2410 = vrot.lane.b32.xlu1 %v9027_v13, %s11454_s19  ;;  %v6757_v34 = vld [vmem:[%s11418_s3 + $0x54] sm:$0xf] }
 0x11e   : > { %2408 = vrot.lane.b32.xlu0 %v9036_v37, %s11454_s19  ;;  %7518 = vmatpush3.bf16.msra.mxu0 %v9142_v35 }
 0x11f   : > { %v1502_v36 = vpop.permute.xlu1 %1501  ;;  %7519 = vmatprep.subr.bf16.mxu0 %v11484_v7 }
 0x120   : > { %v1500_v38 = vpop.permute.xlu0 %1499 }
 0x121   : > { %v1506_v1 = vsel %vm1503_vm8, %v1500_v38, %v1502_v36  ;;  %2466 = vrot.lane.b32.xlu1 %v9036_v37, %s11452_s22  ;;  %v8415_v38 = vld [vmem:[%s8574_s17 + $0x8] sm:$0xff] }
 0x122   : > { %v1513_v4 = vsel %vm401_vm2, %v1506_v1, 0  ;;  %2412 = vrot.lane.b32.xlu0 %v9058_v5, %s11454_s19  ;;  %v8416_v1 = vld [vmem:[%s8574_s17 + $0x10] sm:$0xff]  ;;  %s11508_s19 = smov 79  }
 0x123   : > { %v1563_v6 = vpop.permute.xlu1 %1562  ;;  %7520 = vmatpush3.bf16.msra.mxu0 %v1513_v4  ;;  %v9249_v4 = vcombine.high %v8415_v38, %v8416_v1  ;;  %v6763_v38 = vld [vmem:[%s11418_s3 + $0x60] sm:$0xf] }
 0x124   : > { %v1561_v14 = vpop.permute.xlu0 %1560  ;;  %7535 = vmatprep.subr.bf16.mxu0 %v11484_v7 }
 0x125   : > { %v1573_v43 = vsel %vm1572_vm9, %v1561_v14, %v1563_v6  ;;  %2470 = vrot.lane.b32.xlu1 %v9058_v5, %s11452_s22 }
 0x126   : > { %2468 = vrot.lane.b32.xlu0 %v9027_v13, %s11452_s22  ;;  %7526 = vmatpush3.bf16.msra.mxu1 %v1573_v43  ;;  %v9263_v43 = vld [vmem:[%s8585_s12] sm:$0xff]  ;;  %s11516_s22 = smov 113  }
 0x127   : > { %v1567_v44 = vpop.permute.xlu1 %1566  ;;  %7527 = vmatprep.subr.bf16.mxu1 %v11484_v7  ;;  %7522 = vmatmul.mubr.msk.bf16.vlgmr.msra.gmra.mrb[36].mxu0 %vm397_vm3, %v6751_v40 }
 0x128   : > { %v1565_v45 = vpop.permute.xlu0 %1564  ;;  %7541 = vmatprep.mubr.msk.bf16.mxu0 %vm8467_vm1, %v11484_v7 }
 0x129   : > { %v9170_v46 = vsel %vm1572_vm9, %v1565_v45, %v1567_v44  ;;  %2526 = vrot.lane.b32.xlu1 %v9027_v13, %s11450_s30  ;;  %v8418_v44 = vld [vmem:[%s8574_s17 + $0x18] sm:$0xff]  ;;  %s11503_s17 = smov 91  }
 0x12a   : > { %2524 = vrot.lane.b32.xlu0 %v9036_v37, %s11450_s30  ;;  %7528 = vmatpush3.bf16.msra.mxu1 %v9170_v46  ;;  %v9267_v45 = vcombine.high %v8418_v44, %v9263_v43 }
 0x12b   : > { %v1571_v47 = vpop.permute.xlu1 %1570  ;;  %7529 = vmatprep.subr.bf16.mxu1 %v11484_v7 }
 0x12c   : > { %v1569_v48 = vpop.permute.xlu0 %1568 }
 0x12d   : > { %v1575_v49 = vsel %vm1572_vm9, %v1569_v48, %v1571_v47  ;;  %2582 = vrot.lane.b32.xlu1 %v9036_v37, %s11448_s8 }
 0x12e   : > { %v1582_v53 = vsel %vm401_vm2, %v1575_v49, 0  ;;  %2528 = vrot.lane.b32.xlu0 %v9058_v5, %s11450_s30  ;;  %s11505_s30 = smov 89  }
 0x12f   : > { %v1632_v54 = vpop.permute.xlu1 %1631  ;;  %7530 = vmatpush3.bf16.msra.mxu1 %v1582_v53  ;;  %v9278_v53 = vcombine.high %v9040_v39, %v9040_v39 }
 0x130   : > { %v1630_v55 = vpop.permute.xlu0 %1629  ;;  %7545 = vmatprep.subr.bf16.mxu1 %v11484_v7 }
 0x131   : > { %v1642_v57 = vsel %vm1641_vm10, %v1630_v55, %v1632_v54  ;;  %2586 = vrot.lane.b32.xlu1 %v9058_v5, %s11448_s8 }
 0x132   : > { %2584 = vrot.lane.b32.xlu0 %v9027_v13, %s11448_s8  ;;  %7536 = vmatpush3.bf16.msra.mxu0 %v1642_v57  ;;  %v6759_v57 = vld [vmem:[%s11418_s3 + $0x58] sm:$0xf]  ;;  %s11506_s8 = smov 88  }
 0x133   : > { %v1636_v58 = vpop.permute.xlu1 %1635  ;;  %7537 = vmatprep.subr.bf16.mxu0 %v11484_v7  ;;  %7532 = vmatmul.mubr.msk.bf16.vlgmr.msra.gmra.mrb[36].mxu1 %vm397_vm3, %v6753_v56 }
 0x134   : > { %v1634_v59 = vpop.permute.xlu0 %1633  ;;  %7551 = vmatprep.mubr.msk.bf16.mxu1 %vm8467_vm1, %v11484_v7 }
 0x135   : > { %v9198_v60 = vsel %vm1641_vm10, %v1634_v59, %v1636_v58  ;;  %2642 = vrot.lane.b32.xlu1 %v9027_v13, %s11446_s9 }
 0x136   : > { %2640 = vrot.lane.b32.xlu0 %v9036_v37, %s11446_s9  ;;  %7538 = vmatpush3.bf16.msra.mxu0 %v9198_v60 }
 0x137   : > { %v1640_v63 = vpop.permute.xlu1 %1639  ;;  %7539 = vmatprep.subr.bf16.mxu0 %v11484_v7 }
 0x138   : > { %v1638_v0 = vpop.permute.xlu0 %1637 }
 0x139   : > { %v1644_v2 = vsel %vm1641_vm10, %v1638_v0, %v1640_v63  ;;  %2698 = vrot.lane.b32.xlu1 %v9036_v37, %s11442_s13 }
 0x13a   : > { %v1651_v10 = vsel %vm401_vm2, %v1644_v2, 0  ;;  %2644 = vrot.lane.b32.xlu0 %v9058_v5, %s11446_s9  ;;  %s11507_s9 = smov 80  }
 0x13b   : > { %v1701_v11 = vpop.permute.xlu1 %1700  ;;  %7540 = vmatpush3.bf16.msra.mxu0 %v1651_v10 }
 0x13c   : > { %v1699_v15 = vpop.permute.xlu0 %1698  ;;  %7555 = vmatprep.subr.bf16.mxu0 %v11484_v7 }
 0x13d   : > { %v1711_v17 = vsel %vm1710_vm11, %v1699_v15, %v1701_v11  ;;  %2702 = vrot.lane.b32.xlu1 %v9058_v5, %s11442_s13 }
 0x13e   : > { %2700 = vrot.lane.b32.xlu0 %v9027_v13, %s11442_s13  ;;  %7546 = vmatpush3.bf16.msra.mxu1 %v1711_v17  ;;  %s11502_s13 = smov 92   ;;  %v6761_v17 = vld [vmem:[%s11418_s3 + $0x5c] sm:$0xf] }
 0x13f   : > { %v1705_v23 = vpop.permute.xlu1 %1704  ;;  %7547 = vmatprep.subr.bf16.mxu1 %v11484_v7  ;;  %7542 = vmatmul.mubr.msk.bf16.vlgmr.msra.gmra.mrb[40].mxu0 %vm397_vm3, %v6755_v16 }
 0x140   : > { %v1703_v25 = vpop.permute.xlu0 %1702  ;;  %7561 = vmatprep.mubr.msk.bf16.mxu0 %vm8467_vm1, %v11484_v7 }
 0x141   : > { %v9226_v26 = vsel %vm1710_vm11, %v1703_v25, %v1705_v23  ;;  %2758 = vrot.lane.b32.xlu1 %v9027_v13, %s11444_s15 }
 0x142   : > { %2756 = vrot.lane.b32.xlu0 %v9036_v37, %s11444_s15  ;;  %7548 = vmatpush3.bf16.msra.mxu1 %v9226_v26 }
 0x143   : > { %v1709_v27 = vpop.permute.xlu1 %1708  ;;  %7549 = vmatprep.subr.bf16.mxu1 %v11484_v7 }
 0x144   : > { %v1707_v28 = vpop.permute.xlu0 %1706 }
 0x145   : > { %v1713_v29 = vsel %vm1710_vm11, %v1707_v28, %v1709_v27  ;;  %2814 = vrot.lane.b32.xlu1 %v9036_v37, %s11501_s14 }
 0x146   : > { %v1720_v30 = vsel %vm401_vm2, %v1713_v29, 0  ;;  %2760 = vrot.lane.b32.xlu0 %v9058_v5, %s11444_s15  ;;  %s11504_s15 = smov 90  }
 0x147   : > { %v1770_v8 = vpop.permute.xlu1 %1769  ;;  %7550 = vmatpush3.bf16.msra.mxu1 %v1720_v30 }
 0x148   : > { %v1768_v12 = vpop.permute.xlu0 %1767  ;;  %7565 = vmatprep.subr.bf16.mxu1 %v11484_v7 }
 0x149   : > { %v1780_v36 = vsel %vm1779_vm12, %v1768_v12, %v1770_v8  ;;  %2818 = vrot.lane.b32.xlu1 %v9058_v5, %s11501_s14  ;;  %v2014_v12 = vsel %vm401_vm2, %v9058_v5, 0 }
 0x14a   : > { %2816 = vrot.lane.b32.xlu0 %v9027_v13, %s11501_s14  ;;  %7556 = vmatpush3.bf16.msra.mxu0 %v1780_v36 }
 0x14b   : > { %v1774_v6 = vpop.permute.xlu1 %1773  ;;  %7552 = vmatmul.mubr.msk.bf16.vlgmr.msra.gmra.mrb[40].mxu1 %vm397_vm3, %v6757_v34  ;;  %7557 = vmatprep.subr.bf16.mxu0 %v11484_v7 }
 0x14c   : > { %v1772_v14 = vpop.permute.xlu0 %1771  ;;  %7571 = vmatprep.mubr.msk.bf16.mxu1 %vm8467_vm1, %v11484_v7 }
 0x14d   : > { %v9258_v40 = vsel %vm1779_vm12, %v1772_v14, %v1774_v6  ;;  %2878 = vrot.lane.b32.xlu1 %v9249_v4, %s11502_s13  ;;  %v2002_v6 = vld [vmem:[%s11418_s3] sm:$0xf] }
 0x14e   : > { %2876 = vrot.lane.b32.xlu0 %v9036_v37, %s11502_s13  ;;  %7558 = vmatpush3.bf16.msra.mxu0 %v9258_v40 }
 0x14f   : > { %v1778_v47 = vpop.permute.xlu1 %1777  ;;  %7559 = vmatprep.subr.bf16.mxu0 %v11484_v7 }
 0x150   : > { %v1776_v48 = vpop.permute.xlu0 %1775 }
 0x151   : > { %v1782_v49 = vsel %vm1779_vm12, %v1776_v48, %v1778_v47  ;;  %2882 = vrot.lane.b32.xlu1 %v9267_v45, %s11502_s13 }
 0x152   : > { %v1789_v54 = vsel %vm401_vm2, %v1782_v49, 0  ;;  %2880 = vrot.lane.b32.xlu0 %v9027_v13, %s11502_s13 }
 0x153   : > { %v1839_v55 = vpop.permute.xlu1 %1838  ;;  %7560 = vmatpush3.bf16.msra.mxu0 %v1789_v54 }
 0x154   : > { %v1837_v56 = vpop.permute.xlu0 %1836  ;;  %7575 = vmatprep.subr.bf16.mxu0 %v11484_v7 }
 0x155   : > { %v1849_v58 = vsel %vm1848_vm13, %v1837_v56, %v1839_v55  ;;  %2886 = vrot.lane.b32.xlu1 %v9278_v53, %s11502_s13  ;;  %v6770_v56 = vld [vmem:[%s11418_s3 + $0x4] sm:$0xf] }
 0x156   : > { %2884 = vrot.lane.b32.xlu0 %v9058_v5, %s11502_s13  ;;  %7566 = vmatpush3.bf16.msra.mxu1 %v1849_v58  ;;  %v6772_v58 = vld [vmem:[%s11418_s3 + $0x8] sm:$0xf] }
 0x157   : > { %v1843_v39 = vpop.permute.xlu1 %1842  ;;  %7562 = vmatmul.mubr.msk.bf16.vlgmr.msra.gmra.mrb[44].mxu0 %vm397_vm3, %v6759_v57  ;;  %7567 = vmatprep.subr.bf16.mxu1 %v11484_v7 }
 0x158   : > { %v1841_v59 = vpop.permute.xlu0 %1840  ;;  %7581 = vmatprep.mubr.msk.bf16.mxu0 %vm8467_vm1, %v11484_v7 }
 0x159   : > { %v9297_v63 = vsel %vm1848_vm13, %v1841_v59, %v1843_v39  ;;  %2945 = vrot.lane.b32.xlu1 %v9249_v4, %s11503_s17 }
 0x15a   : > { %2943 = vrot.lane.b32.xlu0 %v9036_v37, %s11503_s17  ;;  %7568 = vmatpush3.bf16.msra.mxu1 %v9297_v63 }
 0x15b   : > { %v1847_v0 = vpop.permute.xlu1 %1846  ;;  %7569 = vmatprep.subr.bf16.mxu1 %v11484_v7 }
 0x15c   : > { %v1845_v2 = vpop.permute.xlu0 %1844 }
 0x15d   : > { %v1851_v10 = vsel %vm1848_vm13, %v1845_v2, %v1847_v0  ;;  %2949 = vrot.lane.b32.xlu1 %v9267_v45, %s11503_s17  ;;  %v447_v0 = vld [vmem:[#allocation2] sm:$0xff] }
 0x15e   : > { %v1858_v11 = vsel %vm401_vm2, %v1851_v10, 0  ;;  %2947 = vrot.lane.b32.xlu0 %v9027_v13, %s11503_s17 }
 0x15f   : > { %v1908_v15 = vpop.permute.xlu1 %1907  ;;  %7570 = vmatpush3.bf16.msra.mxu1 %v1858_v11 }
 0x160   : > { %v1906_v16 = vpop.permute.xlu0 %1905  ;;  %7585 = vmatprep.subr.bf16.mxu1 %v11484_v7 }
 0x161   : > { %v1918_v23 = vsel %vm1917_vm14, %v1906_v16, %v1908_v15  ;;  %2953 = vrot.lane.b32.xlu1 %v9278_v53, %s11503_s17 }
 0x162   : > { %2951 = vrot.lane.b32.xlu0 %v9058_v5, %s11503_s17  ;;  %7576 = vmatpush3.bf16.msra.mxu0 %v1918_v23 }
 0x163   : > { %v1912_v25 = vpop.permute.xlu1 %1911  ;;  %7572 = vmatmul.mubr.msk.bf16.vlgmr.msra.gmra.mrb[44].mxu1 %vm397_vm3, %v6761_v17  ;;  %7577 = vmatprep.subr.bf16.mxu0 %v11484_v7 }
 0x164   : > { %v1910_v27 = vpop.permute.xlu0 %1909  ;;  %7586 = vmatpush3.bf16.msra.mxu1 %v9036_v37  ;;  %7591 = vmatprep.mubr.msk.bf16.mxu1 %vm8467_vm1, %v11484_v7 }
 0x165   : > { %v9326_v28 = vsel %vm1917_vm14, %v1910_v27, %v1912_v25  ;;  %3012 = vrot.lane.b32.xlu1 %v9249_v4, %s11504_s15  ;;  %7587 = vmatprep.subr.bf16.mxu1 %v11484_v7 }
 0x166   : > { %3010 = vrot.lane.b32.xlu0 %v9036_v37, %s11504_s15  ;;  %7578 = vmatpush3.bf16.msra.mxu0 %v9326_v28 }
 0x167   : > { %v1916_v29 = vpop.permute.xlu1 %1915  ;;  %7579 = vmatprep.subr.bf16.mxu0 %v11484_v7 }
 0x168   : > { %v1914_v30 = vpop.permute.xlu0 %1913  ;;  %7588 = vmatpush3.bf16.msra.mxu1 %v9027_v13 }
 0x169   : > { %v1920_v8 = vsel %vm1917_vm14, %v1914_v30, %v1916_v29  ;;  %3016 = vrot.lane.b32.xlu1 %v9267_v45, %s11504_s15  ;;  %7589 = vmatprep.subr.bf16.mxu1 %v11484_v7  ;;  %v6774_v29 = vld [vmem:[%s11418_s3 + $0xc] sm:$0xf] }
 0x16a   : > { %v1927_v34 = vsel %vm401_vm2, %v1920_v8, 0  ;;  %3014 = vrot.lane.b32.xlu0 %v9027_v13, %s11504_s15 }
 0x16b   : > { %v9345_v36 = vpop.permute.xlu1 %2062  ;;  %7580 = vmatpush3.bf16.msra.mxu0 %v1927_v34 }
 0x16c   : > { %v2061_v1 = vpop.permute.xlu0 %2060  ;;  %7590 = vmatpush3.bf16.msra.mxu1 %v2014_v12  ;;  %7595 = vmatprep.subr.bf16.mxu0 %v11484_v7 }
 0x16d   : > { %3020 = vrot.lane.b32.xlu1 %v9278_v53, %s11504_s15  ;;  %7605 = vmatprep.subr.bf16.mxu1 %v11484_v7 }
 0x16e   : > { %3018 = vrot.lane.b32.xlu0 %v9058_v5, %s11504_s15  ;;  %7582 = vmatmul.mubr.msk.bf16.vlgmr.msra.gmra.mrb[48].mxu0 %vm397_vm3, %v6763_v38 }
 0x16f   : > { %v2119_v14 = vpop.permute.xlu1 %2118  ;;  %7596 = vmatpush3.bf16.msra.mxu0 %v2061_v1  ;;  %7592 = vmatmul.mubr.msk.bf16.vlgmr.msra.gmra.mrb[48].mxu1 %vm397_vm3, %v2002_v6 }
 0x170   : > { %v2065_v44 = vpop.permute.xlu0 %2064  ;;  %7597 = vmatprep.subr.bf16.mxu0 %v11484_v7  ;;  %7601 = vmatprep.mubr.msk.bf16.mxu0 %vm8467_vm1, %v11484_v7 }
 0x171   : > { %3079 = vrot.lane.b32.xlu1 %v9249_v4, %s11505_s30  ;;  %7606 = vmatpush3.bf16.msra.mxu1 %v2119_v14  ;;  %v2072_v48 = vsel %vm401_vm2, %v2065_v44, 0  ;;  %v6776_v14 = vld [vmem:[%s11418_s3 + $0x10] sm:$0xf] }
 0x172   : > { %3077 = vrot.lane.b32.xlu0 %v9036_v37, %s11505_s30  ;;  %7607 = vmatprep.subr.bf16.mxu1 %v11484_v7 }
 0x173   : > { %v2123_v47 = vpop.permute.xlu1 %2122  ;;  %7598 = vmatpush3.bf16.msra.mxu0 %v9345_v36  ;;  %7611 = vmatprep.mubr.msk.bf16.mxu1 %vm8467_vm1, %v11484_v7 }
 0x174   : > { %v9373_v49 = vpop.permute.xlu0 %2120  ;;  %7599 = vmatprep.subr.bf16.mxu0 %v11484_v7  ;;  %v2130_v54 = vsel %vm401_vm2, %v2123_v47, 0 }
 0x175   : > { %3083 = vrot.lane.b32.xlu1 %v9267_v45, %s11505_s30  ;;  %7608 = vmatpush3.bf16.msra.mxu1 %v9373_v49 }
 0x176   : > { %3081 = vrot.lane.b32.xlu0 %v9027_v13, %s11505_s30  ;;  %7609 = vmatprep.subr.bf16.mxu1 %v11484_v7 }
 0x177   : > { %v9383_v55 = vpop.permute.xlu1 %2178  ;;  %7600 = vmatpush3.bf16.msra.mxu0 %v2072_v48 }
 0x178   : > { %v2177_v57 = vpop.permute.xlu0 %2176  ;;  %7615 = vmatprep.subr.bf16.mxu0 %v11484_v7 }
 0x179   : > { %3087 = vrot.lane.b32.xlu1 %v9278_v53, %s11505_s30  ;;  %7610 = vmatpush3.bf16.msra.mxu1 %v2130_v54 }
 0x17a   : > { %3085 = vrot.lane.b32.xlu0 %v9058_v5, %s11505_s30  ;;  %7602 = vmatmul.mubr.msk.bf16.vlgmr.msra.gmra.mrb[52].mxu0 %vm397_vm3, %v6770_v56 }
 0x17b   : > { %v2235_v39 = vpop.permute.xlu1 %2234  ;;  %7616 = vmatpush3.bf16.msra.mxu0 %v2177_v57  ;;  %7621 = vmatprep.mubr.msk.bf16.mxu0 %vm8467_vm1, %v11484_v7 }
 0x17c   : > { %v2181_v59 = vpop.permute.xlu0 %2180  ;;  %7617 = vmatprep.subr.bf16.mxu0 %v11484_v7  ;;  %7612 = vmatmul.mubr.msk.bf16.vlgmr.msra.gmra.mrb[52].mxu1 %vm397_vm3, %v6772_v58 }
 0x17d   : > { %3146 = vrot.lane.b32.xlu1 %v9249_v4, %s11506_s8  ;;  %7625 = vmatprep.subr.bf16.mxu1 %v11484_v7  ;;  %v2188_v11 = vsel %vm401_vm2, %v2181_v59, 0 }
 0x17e   : > { %3144 = vrot.lane.b32.xlu0 %v9036_v37, %s11506_s8  ;;  %7626 = vmatpush3.bf16.msra.mxu1 %v2235_v39 }
 0x17f   : > { %v498_v2 = vpop.f32.mrb[0].mxu1  ;;  %v2239_v10 = vpop.permute.xlu1 %2238  ;;  %7618 = vmatpush3.bf16.msra.mxu0 %v9383_v55  ;;  %7627 = vmatprep.subr.bf16.mxu1 %v11484_v7 }
 0x180   : > { %v504_v15 = vadd.f32 %v498_v2, %v447_v0  ;;  %v7353_v16 = vpop.f32.mrb[1].mxu1  ;;  %v9409_v17 = vpop.permute.xlu0 %2236  ;;  %7619 = vmatprep.subr.bf16.mxu0 %v11484_v7  ;;  %7631 = vmatprep.mubr.msk.bf16.mxu1 %vm8467_vm1, %v11484_v7  ;;  %v2246_v30 = vsel %vm401_vm2, %v2239_v10, 0  ;;  %v6778_v10 = vld [vmem:[%s11418_s3 + $0x14] sm:$0xf] }
 0x181   : > { %v501_v23 = vpop.f32.mrb[2].mxu1  ;;  %3150 = vrot.lane.b32.xlu1 %v9267_v45, %s11506_s8 }
 0x182   : > { %505 = vst.msk [vmem:[#allocation2] sm:$0xff] %vm378_vm4, %v504_v15  ;;  %v7354_v25 = vpop.f32.mrb[3].mxu1  ;;  %3148 = vrot.lane.b32.xlu0 %v9027_v13, %s11506_s8  ;;  %7628 = vmatpush3.bf16.msra.mxu1 %v9409_v17 }
 0x183   : > { %v9420_v27 = vpop.permute.xlu1 %2294  ;;  %7620 = vmatpush3.bf16.msra.mxu0 %v2188_v11  ;;  %7629 = vmatprep.subr.bf16.mxu1 %v11484_v7 }
 0x184   : > { %v2293_v8 = vpop.permute.xlu0 %2292  ;;  %v557_v12 = vpop.f32.mrb[4].mxu0  ;;  %7635 = vmatprep.subr.bf16.mxu0 %v11484_v7 }
 0x185   : > { %3154 = vrot.lane.b32.xlu1 %v9278_v53, %s11506_s8  ;;  %v7363_v34 = vpop.f32.mrb[5].mxu0 }
 0x186   : > { %3152 = vrot.lane.b32.xlu0 %v9058_v5, %s11506_s8  ;;  %v560_v38 = vpop.f32.mrb[6].mxu0  ;;  %7622 = vmatmul.mubr.msk.bf16.vlgmr.msra.gmra.mrb[56].mxu0 %vm397_vm3, %v6774_v29 }
 0x187   : > { %v2351_v1 = vpop.permute.xlu1 %2350  ;;  %v7364_v6 = vpop.f32.mrb[7].mxu0  ;;  %7636 = vmatpush3.bf16.msra.mxu0 %v2293_v8  ;;  %7630 = vmatpush3.bf16.msra.mxu1 %v2246_v30  ;;  %v6780_v8 = vld [vmem:[%s11418_s3 + $0x18] sm:$0xf] }
 0x188   : > { %v2297_v44 = vpop.permute.xlu0 %2296  ;;  %7637 = vmatprep.subr.bf16.mxu0 %v11484_v7  ;;  %7641 = vmatprep.mubr.msk.bf16.mxu0 %vm8467_vm1, %v11484_v7 }
 0x189   : > { %v506_v47 = vld [vmem:[#allocation2] sm:$0xff]  ;;  %3213 = vrot.lane.b32.xlu1 %v9249_v4, %s11507_s9  ;;  %7645 = vmatprep.subr.bf16.mxu1 %v11484_v7  ;;  %v2304_v56 = vsel %vm401_vm2, %v2297_v44, 0 }
 0x18a   : > { %v563_v48 = vadd.f32 %v557_v12, %v506_v47  ;;  %3211 = vrot.lane.b32.xlu0 %v9036_v37, %s11507_s9  ;;  %7632 = vmatmul.mubr.msk.bf16.vlgmr.msra.gmra.mrb[56].mxu1 %vm397_vm3, %v6776_v14 }
 0x18b   : > { %v2355_v54 = vpop.permute.xlu1 %2354  ;;  %7638 = vmatpush3.bf16.msra.mxu0 %v9420_v27  ;;  %7646 = vmatpush3.bf16.msra.mxu1 %v2351_v1 }
 0x18c   : > { %564 = vst.msk [vmem:[#allocation2] sm:$0xff] %vm378_vm4, %v563_v48  ;;  %v9448_v57 = vpop.permute.xlu0 %2352  ;;  %v616_v58 = vpop.f32.mrb[4].mxu1  ;;  %7639 = vmatprep.subr.bf16.mxu0 %v11484_v7  ;;  %7647 = vmatprep.subr.bf16.mxu1 %v11484_v7  ;;  %v2362_v11 = vsel %vm401_vm2, %v2355_v54, 0 }
 0x18d   : > { %3217 = vrot.lane.b32.xlu1 %v9267_v45, %s11507_s9  ;;  %v7373_v39 = vpop.f32.mrb[5].mxu1  ;;  %7651 = vmatprep.mubr.msk.bf16.mxu1 %vm8467_vm1, %v11484_v7 }
 0x18e   : > { %3215 = vrot.lane.b32.xlu0 %v9027_v13, %s11507_s9  ;;  %v619_v59 = vpop.f32.mrb[6].mxu1 }
 0x18f   : > { %v9458_v0 = vpop.permute.xlu1 %2410  ;;  %v7374_v2 = vpop.f32.mrb[7].mxu1  ;;  %7640 = vmatpush3.bf16.msra.mxu0 %v2304_v56  ;;  %7648 = vmatpush3.bf16.msra.mxu1 %v9448_v57  ;;  %v6782_v56 = vld [vmem:[%s11418_s3 + $0x1c] sm:$0xf] }
 0x190   : > { %v2409_v15 = vpop.permute.xlu0 %2408  ;;  %7655 = vmatprep.subr.bf16.mxu0 %v11484_v7  ;;  %7649 = vmatprep.subr.bf16.mxu1 %v11484_v7 }
 0x191   : > { %3221 = vrot.lane.b32.xlu1 %v9278_v53, %s11507_s9  ;;  %v675_v16 = vpop.f32.mrb[8].mxu0 }
 0x192   : > { %3219 = vrot.lane.b32.xlu0 %v9058_v5, %s11507_s9  ;;  %v7383_v23 = vpop.f32.mrb[9].mxu0  ;;  %7642 = vmatmul.mubr.msk.bf16.vlgmr.msra.gmra.mrb[60].mxu0 %vm397_vm3, %v6778_v10 }
 0x193   : > { %v565_v25 = vld [vmem:[#allocation2] sm:$0xff]  ;;  %v2467_v29 = vpop.permute.xlu1 %2466  ;;  %v678_v30 = vpop.f32.mrb[10].mxu0  ;;  %7656 = vmatpush3.bf16.msra.mxu0 %v2409_v15  ;;  %7650 = vmatpush3.bf16.msra.mxu1 %v2362_v11 }
 0x194   : > { %v622_v12 = vadd.f32 %v616_v58, %v565_v25  ;;  %v2413_v34 = vpop.permute.xlu0 %2412  ;;  %v7384_v38 = vpop.f32.mrb[11].mxu0  ;;  %7657 = vmatprep.subr.bf16.mxu0 %v11484_v7  ;;  %7661 = vmatprep.mubr.msk.bf16.mxu0 %vm8467_vm1, %v11484_v7 }
 0x195   : > { %3280 = vrot.lane.b32.xlu1 %v9249_v4, %s11508_s19  ;;  %7665 = vmatprep.subr.bf16.mxu1 %v11484_v7  ;;  %v2420_v6 = vsel %vm401_vm2, %v2413_v34, 0 }
 0x196   : > { %623 = vst.msk [vmem:[#allocation2] sm:$0xff] %vm378_vm4, %v622_v12  ;;  %3278 = vrot.lane.b32.xlu0 %v9036_v37, %s11508_s19  ;;  %7652 = vmatmul.mubr.msk.bf16.vlgmr.msra.gmra.mrb[60].mxu1 %vm397_vm3, %v6780_v8 }
 0x197   : > { %v2471_v1 = vpop.permute.xlu1 %2470  ;;  %7658 = vmatpush3.bf16.msra.mxu0 %v9458_v0  ;;  %7666 = vmatpush3.bf16.msra.mxu1 %v2467_v29  ;;  %v6784_v29 = vld [vmem:[%s11418_s3 + $0x20] sm:$0xf] }
 0x198   : > { %v9487_v14 = vpop.permute.xlu0 %2468  ;;  %7659 = vmatprep.subr.bf16.mxu0 %v11484_v7  ;;  %7667 = vmatprep.subr.bf16.mxu1 %v11484_v7  ;;  %v2478_v58 = vsel %vm401_vm2, %v2471_v1, 0 }
 0x199   : > { %3284 = vrot.lane.b32.xlu1 %v9267_v45, %s11508_s19  ;;  %v734_v44 = vpop.f32.mrb[8].mxu1  ;;  %7671 = vmatprep.mubr.msk.bf16.mxu1 %vm8467_vm1, %v11484_v7 }
 0x19a   : > { %3282 = vrot.lane.b32.xlu0 %v9027_v13, %s11508_s19  ;;  %v7393_v47 = vpop.f32.mrb[9].mxu1 }
 0x19b   : > { %v9497_v48 = vpop.permute.xlu1 %2526  ;;  %v737_v54 = vpop.f32.mrb[10].mxu1  ;;  %7660 = vmatpush3.bf16.msra.mxu0 %v2420_v6  ;;  %7668 = vmatpush3.bf16.msra.mxu1 %v9487_v14 }
 0x19c   : > { %v2525_v39 = vpop.permute.xlu0 %2524  ;;  %v7394_v59 = vpop.f32.mrb[11].mxu1  ;;  %7675 = vmatprep.subr.bf16.mxu0 %v11484_v7  ;;  %7669 = vmatprep.subr.bf16.mxu1 %v11484_v7 }
 0x19d   : > { %v624_v2 = vld [vmem:[#allocation2] sm:$0xff]  ;;  %3288 = vrot.lane.b32.xlu1 %v9278_v53, %s11508_s19  ;;  %v9508_v10 = vpop.f32.mrb[12].mxu0 }
 0x19e   : > { %v681_v11 = vadd.f32 %v675_v16, %v624_v2  ;;  %3286 = vrot.lane.b32.xlu0 %v9058_v5, %s11508_s19  ;;  %v7403_v15 = vpop.f32.mrb[13].mxu0  ;;  %7662 = vmatmul.mubr.msk.bf16.vlgmr.msra.gmra.mrb[64].mxu0 %vm397_vm3, %v6782_v56  ;;  %v6786_v56 = vld [vmem:[%s11418_s3 + $0x24] sm:$0xf] }
 0x19f   : > { %v2583_v23 = vpop.permute.xlu1 %2582  ;;  %v796_v25 = vpop.f32.mrb[14].mxu0  ;;  %7676 = vmatpush3.bf16.msra.mxu0 %v2525_v39  ;;  %7670 = vmatpush3.bf16.msra.mxu1 %v2478_v58 }
 0x1a0   : > { %682 = vst.msk [vmem:[#allocation2] sm:$0xff] %vm378_vm4, %v681_v11  ;;  %v2529_v30 = vpop.permute.xlu0 %2528  ;;  %v7404_v8 = vpop.f32.mrb[15].mxu0  ;;  %7677 = vmatprep.subr.bf16.mxu0 %v11484_v7  ;;  %7681 = vmatprep.mubr.msk.bf16.mxu0 %vm8467_vm1, %v11484_v7  ;;  %v6788_v25 = vld [vmem:[%s11418_s3 + $0x28] sm:$0xf] }
 0x1a1   : > { %3347 = vrot.lane.b32.xlu1 %v9249_v4, %s11509_s18  ;;  %7685 = vmatprep.subr.bf16.mxu1 %v11484_v7  ;;  %v2536_v12 = vsel %vm401_vm2, %v2529_v30, 0 }
 0x1a2   : > { %3345 = vrot.lane.b32.xlu0 %v9036_v37, %s11509_s18  ;;  %7672 = vmatmul.mubr.msk.bf16.vlgmr.msra.gmra.mrb[64].mxu1 %vm397_vm3, %v6784_v29 }
 0x1a3   : > { %v2587_v16 = vpop.permute.xlu1 %2586  ;;  %7678 = vmatpush3.bf16.msra.mxu0 %v9497_v48  ;;  %7686 = vmatpush3.bf16.msra.mxu1 %v2583_v23 }
 0x1a4   : > { %v9528_v34 = vpop.permute.xlu0 %2584  ;;  %7679 = vmatprep.subr.bf16.mxu0 %v11484_v7  ;;  %7687 = vmatprep.subr.bf16.mxu1 %v11484_v7  ;;  %v2594_v58 = vsel %vm401_vm2, %v2587_v16, 0 }
 0x1a5   : > { %3351 = vrot.lane.b32.xlu1 %v9267_v45, %s11509_s18  ;;  %v9534_v38 = vpop.f32.mrb[12].mxu1  ;;  %7691 = vmatprep.mubr.msk.bf16.mxu1 %vm8467_vm1, %v11484_v7 }
 0x1a6   : > { %3349 = vrot.lane.b32.xlu0 %v9027_v13, %s11509_s18  ;;  %v7413_v1 = vpop.f32.mrb[13].mxu1 }
 0x1a7   : > { %v683_v6 = vld [vmem:[#allocation2] sm:$0xff]  ;;  %v9540_v47 = vpop.permute.xlu1 %2642  ;;  %v855_v54 = vpop.f32.mrb[14].mxu1  ;;  %7680 = vmatpush3.bf16.msra.mxu0 %v2536_v12  ;;  %7688 = vmatpush3.bf16.msra.mxu1 %v9528_v34 }
 0x1a8   : > { %v740_v39 = vadd.f32 %v734_v44, %v683_v6  ;;  %v2641_v59 = vpop.permute.xlu0 %2640  ;;  %v7414_v2 = vpop.f32.mrb[15].mxu1  ;;  %7695 = vmatprep.subr.bf16.mxu0 %v11484_v7  ;;  %7689 = vmatprep.subr.bf16.mxu1 %v11484_v7 }
 0x1a9   : > { %3355 = vrot.lane.b32.xlu1 %v9278_v53, %s11509_s18  ;;  %v9551_v11 = vpop.f32.mrb[16].mxu0 }
 0x1aa   : > { %741 = vst.msk [vmem:[#allocation2] sm:$0xff] %vm378_vm4, %v740_v39  ;;  %3353 = vrot.lane.b32.xlu0 %v9058_v5, %s11509_s18  ;;  %v7423_v15 = vpop.f32.mrb[17].mxu0  ;;  %7682 = vmatmul.mubr.msk.bf16.vlgmr.msra.gmra.mrb[68].mxu0 %vm397_vm3, %v6786_v56 }
 0x1ab   : > { %v2699_v44 = vpop.permute.xlu1 %2698  ;;  %v914_v23 = vpop.f32.mrb[18].mxu0  ;;  %7696 = vmatpush3.bf16.msra.mxu0 %v2641_v59  ;;  %7690 = vmatpush3.bf16.msra.mxu1 %v2594_v58  ;;  %v6790_v59 = vld [vmem:[%s11418_s3 + $0x2c] sm:$0xf] }
 0x1ac   : > { %v2645_v29 = vpop.permute.xlu0 %2644  ;;  %v7424_v30 = vpop.f32.mrb[19].mxu0  ;;  %7697 = vmatprep.subr.bf16.mxu0 %v11484_v7  ;;  %7701 = vmatprep.mubr.msk.bf16.mxu0 %vm8467_vm1, %v11484_v7 }
 0x1ad   : > { %3414 = vrot.lane.b32.xlu1 %v9249_v4, %s11470_s26  ;;  %7705 = vmatprep.subr.bf16.mxu1 %v11484_v7  ;;  %v2652_v16 = vsel %vm401_vm2, %v2645_v29, 0  ;;  %v6792_v30 = vld [vmem:[%s11418_s3 + $0x30] sm:$0xf] }
 0x1ae   : > { %3412 = vrot.lane.b32.xlu0 %v9036_v37, %s11470_s26  ;;  %7692 = vmatmul.mubr.msk.bf16.vlgmr.msra.gmra.mrb[68].mxu1 %vm397_vm3, %v6788_v25 }
 0x1af   : > { %v2703_v8 = vpop.permute.xlu1 %2702  ;;  %7698 = vmatpush3.bf16.msra.mxu0 %v9540_v47  ;;  %7706 = vmatpush3.bf16.msra.mxu1 %v2699_v44 }
 0x1b0   : > { %v9571_v12 = vpop.permute.xlu0 %2700  ;;  %7699 = vmatprep.subr.bf16.mxu0 %v11484_v7  ;;  %7707 = vmatprep.subr.bf16.mxu1 %v11484_v7  ;;  %v2710_v2 = vsel %vm401_vm2, %v2703_v8, 0 }
 0x1b1   : > { %v742_v1 = vld [vmem:[#allocation2] sm:$0xff]  ;;  %3418 = vrot.lane.b32.xlu1 %v9267_v45, %s11470_s26  ;;  %v9577_v6 = vpop.f32.mrb[16].mxu1  ;;  %7711 = vmatprep.mubr.msk.bf16.mxu1 %vm8467_vm1, %v11484_v7 }
 0x1b2   : > { %v799_v54 = vadd.f32 %v9508_v10, %v742_v1  ;;  %3416 = vrot.lane.b32.xlu0 %v9027_v13, %s11470_s26  ;;  %v7433_v56 = vpop.f32.mrb[17].mxu1 }
 0x1b3   : > { %v9584_v58 = vpop.permute.xlu1 %2758  ;;  %v973_v39 = vpop.f32.mrb[18].mxu1  ;;  %7700 = vmatpush3.bf16.msra.mxu0 %v2652_v16  ;;  %7708 = vmatpush3.bf16.msra.mxu1 %v9571_v12 }
 0x1b4   : > { %800 = vst.msk [vmem:[#allocation2] sm:$0xff] %vm378_vm4, %v799_v54  ;;  %v2757_v15 = vpop.permute.xlu0 %2756  ;;  %v7434_v10 = vpop.f32.mrb[19].mxu1  ;;  %7715 = vmatprep.subr.bf16.mxu0 %v11484_v7  ;;  %7709 = vmatprep.subr.bf16.mxu1 %v11484_v7 }
 0x1b5   : > { %3422 = vrot.lane.b32.xlu1 %v9278_v53, %s11470_s26  ;;  %v9596_v44 = vpop.f32.mrb[20].mxu0 }
 0x1b6   : > { %3420 = vrot.lane.b32.xlu0 %v9058_v5, %s11470_s26  ;;  %v7443_v23 = vpop.f32.mrb[21].mxu0  ;;  %7702 = vmatmul.mubr.msk.bf16.vlgmr.msra.gmra.mrb[72].mxu0 %vm397_vm3, %v6790_v59  ;;  %s11521_s26 = smov 102  }
 0x1b7   : > { %v2815_v25 = vpop.permute.xlu1 %2814  ;;  %v1032_v29 = vpop.f32.mrb[22].mxu0  ;;  %7716 = vmatpush3.bf16.msra.mxu0 %v2757_v15  ;;  %7710 = vmatpush3.bf16.msra.mxu1 %v2710_v2 }
 0x1b8   : > { %v2761_v8 = vpop.permute.xlu0 %2760  ;;  %v7444_v16 = vpop.f32.mrb[23].mxu0  ;;  %7717 = vmatprep.subr.bf16.mxu0 %v11484_v7  ;;  %7721 = vmatprep.mubr.msk.bf16.mxu0 %vm8467_vm1, %v11484_v7 }
 0x1b9   : > { %3481 = vrot.lane.b32.xlu1 %v9249_v4, %s11468_s20  ;;  %7725 = vmatprep.subr.bf16.mxu1 %v11484_v7  ;;  %v2768_v39 = vsel %vm401_vm2, %v2761_v8, 0  ;;  %v9630_v4 = vld [vmem:[%s8585_s12 + $0x10] sm:$0xff]  ;;  %v9651_v16 = vld [vmem:[%s8585_s12 + $0x8] sm:$0xff] }
 0x1ba   : > { %3479 = vrot.lane.b32.xlu0 %v9036_v37, %s11468_s20  ;;  %7712 = vmatmul.mubr.msk.bf16.vlgmr.msra.gmra.mrb[72].mxu1 %vm397_vm3, %v6792_v30  ;;  %v9644_v30 = vcombine.low %v9630_v4, %v9630_v4 }
 0x1bb   : > { %v801_v1 = vld [vmem:[#allocation2] sm:$0xff]  ;;  %v2819_v54 = vpop.permute.xlu1 %2818  ;;  %7718 = vmatpush3.bf16.msra.mxu0 %v9584_v58  ;;  %7726 = vmatpush3.bf16.msra.mxu1 %v2815_v25 }
 0x1bc   : > { %v858_v56 = vadd.f32 %v9534_v38, %v801_v1  ;;  %v9616_v59 = vpop.permute.xlu0 %2816  ;;  %7719 = vmatprep.subr.bf16.mxu0 %v11484_v7  ;;  %7727 = vmatprep.subr.bf16.mxu1 %v11484_v7  ;;  %v2826_v10 = vsel %vm401_vm2, %v2819_v54, 0  ;;  %v9655_v1 = vcombine.low %v9263_v43, %v9651_v16 }
 0x1bd   : > { %11510 = vst [vmem:[#allocation10_spill] sm:$0xff] %v9616_v59  ;;  %3485 = vrot.lane.b32.xlu1 %v9267_v45, %s11468_s20  ;;  %v9622_v37 = vpop.f32.mrb[20].mxu1  ;;  %7731 = vmatprep.mubr.msk.bf16.mxu1 %vm8467_vm1, %v11484_v7  ;;  %v6794_v45 = vld [vmem:[%s11418_s3 + $0x34] sm:$0xf] }
 0x1be   : > { %859 = vst.msk [vmem:[#allocation2] sm:$0xff] %vm378_vm4, %v858_v56  ;;  %3483 = vrot.lane.b32.xlu0 %v9027_v13, %s11468_s20  ;;  %v7453_v38 = vpop.f32.mrb[21].mxu1 }
 0x1bf   : > { %v2879_v2 = vpop.permute.xlu1 %2878  ;;  %v1091_v15 = vpop.f32.mrb[22].mxu1  ;;  %7720 = vmatpush3.bf16.msra.mxu0 %v2768_v39  ;;  %7728 = vmatpush3.bf16.msra.mxu1 %v9616_v59  ;;  %v6796_v39 = vld [vmem:[%s11418_s3 + $0x38] sm:$0xf] }
 0x1c0   : > { %v2877_v23 = vpop.permute.xlu0 %2876  ;;  %v7454_v25 = vpop.f32.mrb[23].mxu1  ;;  %7735 = vmatprep.subr.bf16.mxu0 %v11484_v7  ;;  %7729 = vmatprep.subr.bf16.mxu1 %v11484_v7 }
 0x1c1   : > { %v2888_v29 = vsel %vm1296_vm5, %v2877_v23, %v2879_v2  ;;  %3489 = vrot.lane.b32.xlu1 %v9278_v53, %s11468_s20  ;;  %v9646_v8 = vpop.f32.mrb[24].mxu0 }
 0x1c2   : > { %3487 = vrot.lane.b32.xlu0 %v9058_v5, %s11468_s20  ;;  %v7463_v54 = vpop.f32.mrb[25].mxu0  ;;  %7722 = vmatmul.mubr.msk.bf16.vlgmr.msra.gmra.mrb[76].mxu0 %vm397_vm3, %v6794_v45  ;;  %s11523_s20 = smov 101  }
 0x1c3   : > { %v2883_v56 = vpop.permute.xlu1 %2882  ;;  %v1150_v53 = vpop.f32.mrb[26].mxu0  ;;  %7736 = vmatpush3.bf16.msra.mxu0 %v2888_v29  ;;  %7730 = vmatpush3.bf16.msra.mxu1 %v2826_v10 }
 0x1c4   : > { %v2881_v38 = vpop.permute.xlu0 %2880  ;;  %v7464_v2 = vpop.f32.mrb[27].mxu0  ;;  %7737 = vmatprep.subr.bf16.mxu0 %v11484_v7  ;;  %7741 = vmatprep.mubr.msk.bf16.mxu0 %vm8467_vm1, %v11484_v7  ;;  %v6798_v53 = vld [vmem:[%s11418_s3 + $0x3c] sm:$0xf] }
 0x1c5   : > { %v860_v5 = vld [vmem:[#allocation2] sm:$0xff]  ;;  %v9665_v43 = vsel %vm1296_vm5, %v2881_v38, %v2883_v56  ;;  %3633 = vrot.lane.b32.xlu1 %v9644_v30, %s11466_s23  ;;  %7745 = vmatprep.subr.bf16.mxu1 %v11484_v7 }
 0x1c6   : > { %11511 = vst [vmem:[#allocation11_spill] sm:$0xff] %v9665_v43  ;;  %v917_v15 = vadd.f32 %v9551_v11, %v860_v5  ;;  %3631 = vrot.lane.b32.xlu0 %v9655_v1, %s11466_s23  ;;  %7732 = vmatmul.mubr.msk.bf16.vlgmr.msra.gmra.mrb[76].mxu1 %vm397_vm3, %v6796_v39  ;;  %s5015_s23 = sadd.s32 2, %s8559_s28 }
 0x1c7   : > { %v2887_v45 = vpop.permute.xlu1 %2886  ;;  %7738 = vmatpush3.bf16.msra.mxu0 %v9665_v43  ;;  %7751 = vmatprep.mubr.msk.bf16.mxu1 %vm8467_vm1, %v11484_v7  ;;  %p5016_p12 = scmp.lt.s32.totalorder %s5015_s23, 8 }
 0x1c8   : > { %918 = vst.msk [vmem:[#allocation2] sm:$0xff] %vm378_vm4, %v917_v15  ;;  %v2885_v10 = vpop.permute.xlu0 %2884  ;;  %7739 = vmatprep.subr.bf16.mxu0 %v11484_v7 }
 0x1c9   : > { %v2890_v23 = vsel %vm1296_vm5, %v2885_v10, %v2887_v45  ;;  %3688 = vrot.lane.b32.xlu1 %v9644_v30, %s11464_s24  ;;  %v9682_v11 = vpop.f32.mrb[24].mxu1 }
 0x1ca   : > { %v2897_v25 = vsel %vm401_vm2, %v2890_v23, 0  ;;  %3686 = vrot.lane.b32.xlu0 %v9655_v1, %s11464_s24  ;;  %v7473_v29 = vpop.f32.mrb[25].mxu1  ;;  %s11517_s24 = smov 112  }
 0x1cb   : > { %v2946_v54 = vpop.permute.xlu1 %2945  ;;  %v1209_v56 = vpop.f32.mrb[26].mxu1  ;;  %7740 = vmatpush3.bf16.msra.mxu0 %v2897_v25 }
 0x1cc   : > { %v2944_v39 = vpop.permute.xlu0 %2943  ;;  %v7474_v38 = vpop.f32.mrb[27].mxu1  ;;  %7755 = vmatprep.subr.bf16.mxu0 %v11484_v7 }
 0x1cd   : > { %v2955_v2 = vsel %vm1365_vm6, %v2944_v39, %v2946_v54  ;;  %3743 = vrot.lane.b32.xlu1 %v9644_v30, %s11462_s29  ;;  %v9694_v5 = vpop.f32.mrb[28].mxu0 }
 0x1ce   : > { %3741 = vrot.lane.b32.xlu0 %v9655_v1, %s11462_s29  ;;  %v7483_v15 = vpop.f32.mrb[29].mxu0  ;;  %7742 = vmatmul.mubr.msk.bf16.vlgmr.msra.gmra.mrb[80].mxu0 %vm397_vm3, %v6798_v53  ;;  %s11519_s29 = smov 104  }
 0x1cf   : > { %v919_v45 = vld [vmem:[#allocation2] sm:$0xff]  ;;  %v2950_v10 = vpop.permute.xlu1 %2949  ;;  %7746 = vmatpush3.bf16.msra.mxu1 %v2955_v2  ;;  %v1268_v23 = vpop.f32.mrb[30].mxu0  ;;  %7761 = vmatprep.mubr.msk.bf16.mxu0 %vm8467_vm1, %v11484_v7 }
 0x1d0   : > { %v976_v25 = vadd.f32 %v9577_v6, %v919_v45  ;;  %v2948_v29 = vpop.permute.xlu0 %2947  ;;  %v7484_v54 = vpop.f32.mrb[31].mxu0  ;;  %7747 = vmatprep.subr.bf16.mxu1 %v11484_v7 }
 0x1d1   : > { %v9704_v56 = vsel %vm1365_vm6, %v2948_v29, %v2950_v10  ;;  %3798 = vrot.lane.b32.xlu1 %v9644_v30, %s11458_s7 }
 0x1d2   : > { %11512 = vst [vmem:[#allocation12_spill] sm:$0xff] %v9704_v56  ;;  %977 = vst.msk [vmem:[#allocation2] sm:$0xff] %vm378_vm4, %v976_v25  ;;  %3796 = vrot.lane.b32.xlu0 %v9655_v1, %s11458_s7  ;;  %v6803_v25 = vld [vmem:[%s11418_s3 + $0x40] sm:$0xf]  ;;  %s11513_s7 = smov 115  }
 0x1d3   : > { %v2954_v53 = vpop.permute.xlu1 %2953  ;;  %7748 = vmatpush3.bf16.msra.mxu1 %v9704_v56 }
 0x1d4   : > { %v2952_v39 = vpop.permute.xlu0 %2951  ;;  %7749 = vmatprep.subr.bf16.mxu1 %v11484_v7 }
 0x1d5   : > { %v2957_v6 = vsel %vm1365_vm6, %v2952_v39, %v2954_v53  ;;  %3853 = vrot.lane.b32.xlu1 %v9644_v30, %s11460_s16 }
 0x1d6   : > { %v2964_v38 = vsel %vm401_vm2, %v2957_v6, 0  ;;  %3851 = vrot.lane.b32.xlu0 %v9655_v1, %s11460_s16  ;;  %v9719_v2 = vpop.f32.mrb[28].mxu1  ;;  %s11520_s16 = smov 103  }
 0x1d7   : > { %v3013_v15 = vpop.permute.xlu1 %3012  ;;  %7750 = vmatpush3.bf16.msra.mxu1 %v2964_v38  ;;  %v7493_v45 = vpop.f32.mrb[29].mxu1 }
 0x1d8   : > { %v3011_v10 = vpop.permute.xlu0 %3010  ;;  %v1345_v23 = vpop.f32.mrb[30].mxu1  ;;  %7765 = vmatprep.subr.bf16.mxu1 %v11484_v7 }
 0x1d9   : > { %v978_v29 = vld [vmem:[#allocation2] sm:$0xff]  ;;  %v3022_v54 = vsel %vm1434_vm7, %v3011_v10, %v3013_v15  ;;  %3908 = vrot.lane.b32.xlu1 %v9644_v30, %s11513_s7  ;;  %v7494_v53 = vpop.f32.mrb[31].mxu1 }
 0x1da   : > { %v1035_v39 = vadd.f32 %v9596_v44, %v978_v29  ;;  %3906 = vrot.lane.b32.xlu0 %v9655_v1, %s11513_s7  ;;  %7756 = vmatpush3.bf16.msra.mxu0 %v3022_v54  ;;  %v6805_v53 = vld [vmem:[%s11418_s3 + $0x44] sm:$0xf] }
 0x1db   : > { %v3017_v6 = vpop.permute.xlu1 %3016  ;;  %7757 = vmatprep.subr.bf16.mxu0 %v11484_v7  ;;  %7752 = vmatmul.mubr.msk.bf16.vlgmr.msra.gmra.mrb[80].mxu1 %vm397_vm3, %v6803_v25 }
 0x1dc   : > { %1036 = vst.msk [vmem:[#allocation2] sm:$0xff] %vm378_vm4, %v1035_v39  ;;  %v3015_v38 = vpop.permute.xlu0 %3014  ;;  %7771 = vmatprep.mubr.msk.bf16.mxu1 %vm8467_vm1, %v11484_v7 }
 0x1dd   : > { %v9737_v15 = vsel %vm1434_vm7, %v3015_v38, %v3017_v6  ;;  %3963 = vrot.lane.b32.xlu1 %v9644_v30, %s11515_s27 }
 0x1de   : > { %11514 = vst [vmem:[#allocation13_spill] sm:$0xff] %v9737_v15  ;;  %3961 = vrot.lane.b32.xlu0 %v9655_v1, %s11515_s27  ;;  %7758 = vmatpush3.bf16.msra.mxu0 %v9737_v15 }
 0x1df   : > { %v3021_v44 = vpop.permute.xlu1 %3020  ;;  %7759 = vmatprep.subr.bf16.mxu0 %v11484_v7 }
 0x1e0   : > { %v3019_v45 = vpop.permute.xlu0 %3018 }
 0x1e1   : > { %v3024_v10 = vsel %vm1434_vm7, %v3019_v45, %v3021_v44  ;;  %4018 = vrot.lane.b32.xlu1 %v9644_v30, %s11516_s22 }
 0x1e2   : > { %v3031_v23 = vsel %vm401_vm2, %v3024_v10, 0  ;;  %4016 = vrot.lane.b32.xlu0 %v9655_v1, %s11516_s22  ;;  %v9751_v25 = vpop.f32.mrb[32].mxu0 }
 0x1e3   : > { %v1037_v29 = vld [vmem:[#allocation2] sm:$0xff]  ;;  %v3080_v54 = vpop.permute.xlu1 %3079  ;;  %7760 = vmatpush3.bf16.msra.mxu0 %v3031_v23  ;;  %v7503_v39 = vpop.f32.mrb[33].mxu0 }
 0x1e4   : > { %v1094_v6 = vadd.f32 %v9622_v37, %v1037_v29  ;;  %v3078_v38 = vpop.permute.xlu0 %3077  ;;  %7775 = vmatprep.subr.bf16.mxu0 %v11484_v7  ;;  %v1414_v44 = vpop.f32.mrb[34].mxu0 }
 0x1e5   : > { %v3089_v45 = vsel %vm1503_vm8, %v3078_v38, %v3080_v54  ;;  %4073 = vrot.lane.b32.xlu1 %v9644_v30, %s11517_s24  ;;  %v7504_v10 = vpop.f32.mrb[35].mxu0 }
 0x1e6   : > { %1095 = vst.msk [vmem:[#allocation2] sm:$0xff] %vm378_vm4, %v1094_v6  ;;  %4071 = vrot.lane.b32.xlu0 %v9655_v1, %s11517_s24  ;;  %7762 = vmatmul.mubr.msk.bf16.vlgmr.msra.gmra.mrb[84].mxu0 %vm397_vm3, %v6805_v53 }
 0x1e7   : > { %v3084_v23 = vpop.permute.xlu1 %3083  ;;  %7766 = vmatpush3.bf16.msra.mxu1 %v3089_v45  ;;  %7781 = vmatprep.mubr.msk.bf16.mxu0 %vm8467_vm1, %v11484_v7 }
 0x1e8   : > { %v3082_v37 = vpop.permute.xlu0 %3081  ;;  %7767 = vmatprep.subr.bf16.mxu1 %v11484_v7 }
 0x1e9   : > { %v9769_v29 = vsel %vm1503_vm8, %v3082_v37, %v3084_v23  ;;  %4128 = vrot.lane.b32.xlu1 %v9644_v30, %s11519_s29 }
 0x1ea   : > { %11518 = vst [vmem:[#allocation14_spill] sm:$0xff] %v9769_v29  ;;  %4126 = vrot.lane.b32.xlu0 %v9655_v1, %s11519_s29 }
 0x1eb   : > { %v3088_v54 = vpop.permute.xlu1 %3087  ;;  %7768 = vmatpush3.bf16.msra.mxu1 %v9769_v29 }
 0x1ec   : > { %v3086_v53 = vpop.permute.xlu0 %3085  ;;  %7769 = vmatprep.subr.bf16.mxu1 %v11484_v7 }
 0x1ed   : > { %v1096_v39 = vld [vmem:[#allocation2] sm:$0xff]  ;;  %v3091_v6 = vsel %vm1503_vm8, %v3086_v53, %v3088_v54  ;;  %4183 = vrot.lane.b32.xlu1 %v9644_v30, %s11520_s16  ;;  %v6807_v54 = vld [vmem:[%s11418_s3 + $0x48] sm:$0xf] }
 0x1ee   : > { %v1153_v38 = vadd.f32 %v9646_v8, %v1096_v39  ;;  %v3098_v44 = vsel %vm401_vm2, %v3091_v6, 0  ;;  %4181 = vrot.lane.b32.xlu0 %v9655_v1, %s11520_s16  ;;  %v9784_v45 = vpop.f32.mrb[32].mxu1 }
 0x1ef   : > { %v3147_v10 = vpop.permute.xlu1 %3146  ;;  %7770 = vmatpush3.bf16.msra.mxu1 %v3098_v44  ;;  %v7513_v23 = vpop.f32.mrb[33].mxu1 }
 0x1f0   : > { %1154 = vst.msk [vmem:[#allocation2] sm:$0xff] %vm378_vm4, %v1153_v38  ;;  %v3145_v37 = vpop.permute.xlu0 %3144  ;;  %7785 = vmatprep.subr.bf16.mxu1 %v11484_v7  ;;  %v1483_v8 = vpop.f32.mrb[34].mxu1 }
 0x1f1   : > { %v3156_v53 = vsel %vm1572_vm9, %v3145_v37, %v3147_v10  ;;  %4238 = vrot.lane.b32.xlu1 %v9644_v30, %s11521_s26  ;;  %v7514_v39 = vpop.f32.mrb[35].mxu1 }
 0x1f2   : > { %4236 = vrot.lane.b32.xlu0 %v9655_v1, %s11521_s26  ;;  %7776 = vmatpush3.bf16.msra.mxu0 %v3156_v53  ;;  %v8420_v53 = vld [vmem:[%s8585_s12] sm:$0xff] }
 0x1f3   : > { %v3151_v6 = vpop.permute.xlu1 %3150  ;;  %7777 = vmatprep.subr.bf16.mxu0 %v11484_v7  ;;  %7772 = vmatmul.mubr.msk.bf16.vlgmr.msra.gmra.mrb[84].mxu1 %vm397_vm3, %v6807_v54  ;;  %v9815_v39 = vcombine.high %v8420_v53, %v9651_v16 }
 0x1f4   : > { %v3149_v38 = vpop.permute.xlu0 %3148  ;;  %7791 = vmatprep.mubr.msk.bf16.mxu1 %vm8467_vm1, %v11484_v7 }
 0x1f5   : > { %v9801_v44 = vsel %vm1572_vm9, %v3149_v38, %v3151_v6  ;;  %4293 = vrot.lane.b32.xlu1 %v9644_v30, %s11523_s20 }
 0x1f6   : > { %11522 = vst [vmem:[#allocation15_spill] sm:$0xff] %v9801_v44  ;;  %4291 = vrot.lane.b32.xlu0 %v9655_v1, %s11523_s20  ;;  %7778 = vmatpush3.bf16.msra.mxu0 %v9801_v44 }
 0x1f7   : > { %v1155_v10 = vld [vmem:[#allocation2] sm:$0xff]  ;;  %v3155_v23 = vpop.permute.xlu1 %3154  ;;  %7779 = vmatprep.subr.bf16.mxu0 %v11484_v7 }
 0x1f8   : > { %v1212_v37 = vadd.f32 %v9682_v11, %v1155_v10  ;;  %v3153_v54 = vpop.permute.xlu0 %3152  ;;  %v6809_v10 = vld [vmem:[%s11418_s3 + $0x4c] sm:$0xf] }
 0x1f9   : > { %v3158_v8 = vsel %vm1572_vm9, %v3153_v54, %v3155_v23  ;;  %4348 = vrot.lane.b32.xlu1 %v9644_v30, %s11501_s14 }
 0x1fa   : > { %1213 = vst.msk [vmem:[#allocation2] sm:$0xff] %vm378_vm4, %v1212_v37  ;;  %v3165_v6 = vsel %vm401_vm2, %v3158_v8, 0  ;;  %4346 = vrot.lane.b32.xlu0 %v9655_v1, %s11501_s14  ;;  %v9821_v38 = vpop.f32.mrb[36].mxu0  ;;  %v9832_v8 = vcombine.high %v9630_v4, %v9630_v4 }
 0x1fb   : > { %v3214_v11 = vpop.permute.xlu1 %3213  ;;  %7780 = vmatpush3.bf16.msra.mxu0 %v3165_v6  ;;  %v7523_v23 = vpop.f32.mrb[37].mxu0 }
 0x1fc   : > { %v3212_v54 = vpop.permute.xlu0 %3211  ;;  %7795 = vmatprep.subr.bf16.mxu0 %v11484_v7  ;;  %v1552_v53 = vpop.f32.mrb[38].mxu0 }
 0x1fd   : > { %v3223_v37 = vsel %vm1641_vm10, %v3212_v54, %v3214_v11  ;;  %4406 = vrot.lane.b32.xlu1 %v9815_v39, %s11502_s13  ;;  %v7524_v44 = vpop.f32.mrb[39].mxu0 }
 0x1fe   : > { %4404 = vrot.lane.b32.xlu0 %v9655_v1, %s11502_s13  ;;  %7782 = vmatmul.mubr.msk.bf16.vlgmr.msra.gmra.mrb[88].mxu0 %vm397_vm3, %v6809_v10 }
 0x1ff   : > { %v3218_v6 = vpop.permute.xlu1 %3217  ;;  %7786 = vmatpush3.bf16.msra.mxu1 %v3223_v37  ;;  %7801 = vmatprep.mubr.msk.bf16.mxu0 %vm8467_vm1, %v11484_v7 }
 0x200   : > { %v3216_v23 = vpop.permute.xlu0 %3215  ;;  %7787 = vmatprep.subr.bf16.mxu1 %v11484_v7 }
 0x201   : > { %v1214_v11 = vld [vmem:[#allocation2] sm:$0xff]  ;;  %v9841_v54 = vsel %vm1641_vm10, %v3216_v23, %v3218_v6  ;;  %4410 = vrot.lane.b32.xlu1 %v9832_v8, %s11502_s13 }
 0x202   : > { %11524 = vst [vmem:[#allocation16_spill] sm:$0xff] %v9841_v54  ;;  %v1271_v44 = vadd.f32 %v9694_v5, %v1214_v11  ;;  %4408 = vrot.lane.b32.xlu0 %v9644_v30, %s11502_s13 }
 0x203   : > { %v3222_v10 = vpop.permute.xlu1 %3221  ;;  %7788 = vmatpush3.bf16.msra.mxu1 %v9841_v54 }
 0x204   : > { %1272 = vst.msk [vmem:[#allocation2] sm:$0xff] %vm378_vm4, %v1271_v44  ;;  %v3220_v53 = vpop.permute.xlu0 %3219  ;;  %7789 = vmatprep.subr.bf16.mxu1 %v11484_v7  ;;  %v6811_v44 = vld [vmem:[%s11418_s3 + $0x50] sm:$0xf] }
 0x205   : > { %v3225_v37 = vsel %vm1641_vm10, %v3220_v53, %v3222_v10  ;;  %4467 = vrot.lane.b32.xlu1 %v9815_v39, %s11503_s17 }
 0x206   : > { %v3232_v6 = vsel %vm401_vm2, %v3225_v37, 0  ;;  %4465 = vrot.lane.b32.xlu0 %v9655_v1, %s11503_s17  ;;  %v9857_v5 = vpop.f32.mrb[36].mxu1 }
 0x207   : > { %v3281_v23 = vpop.permute.xlu1 %3280  ;;  %7790 = vmatpush3.bf16.msra.mxu1 %v3232_v6  ;;  %v7533_v11 = vpop.f32.mrb[37].mxu1 }
 0x208   : > { %v3279_v54 = vpop.permute.xlu0 %3278  ;;  %7805 = vmatprep.subr.bf16.mxu1 %v11484_v7  ;;  %v1621_v10 = vpop.f32.mrb[38].mxu1 }
 0x209   : > { %v3290_v53 = vsel %vm1710_vm11, %v3279_v54, %v3281_v23  ;;  %4471 = vrot.lane.b32.xlu1 %v9832_v8, %s11503_s17  ;;  %v7534_v37 = vpop.f32.mrb[39].mxu1 }
 0x20a   : > { %4469 = vrot.lane.b32.xlu0 %v9644_v30, %s11503_s17  ;;  %7796 = vmatpush3.bf16.msra.mxu0 %v3290_v53  ;;  %v6813_v53 = vld [vmem:[%s11418_s3 + $0x54] sm:$0xf] }
 0x20b   : > { %v1273_v6 = vld [vmem:[#allocation2] sm:$0xff]  ;;  %v3285_v11 = vpop.permute.xlu1 %3284  ;;  %7797 = vmatprep.subr.bf16.mxu0 %v11484_v7  ;;  %7792 = vmatmul.mubr.msk.bf16.vlgmr.msra.gmra.mrb[88].mxu1 %vm397_vm3, %v6811_v44 }
 0x20c   : > { %v1348_v29 = vadd.f32 %v9719_v2, %v1273_v6  ;;  %v3283_v15 = vpop.permute.xlu0 %3282  ;;  %7811 = vmatprep.mubr.msk.bf16.mxu1 %vm8467_vm1, %v11484_v7 }
 0x20d   : > { %v9874_v54 = vsel %vm1710_vm11, %v3283_v15, %v3285_v11  ;;  %4528 = vrot.lane.b32.xlu1 %v9815_v39, %s11504_s15 }
 0x20e   : > { %11525 = vst [vmem:[#allocation17_spill] sm:$0xff] %v9874_v54  ;;  %1349 = vst.msk [vmem:[#allocation2] sm:$0xff] %vm378_vm4, %v1348_v29  ;;  %4526 = vrot.lane.b32.xlu0 %v9655_v1, %s11504_s15  ;;  %7798 = vmatpush3.bf16.msra.mxu0 %v9874_v54 }
 0x20f   : > { %v3289_v23 = vpop.permute.xlu1 %3288  ;;  %7799 = vmatprep.subr.bf16.mxu0 %v11484_v7 }
 0x210   : > { %v3287_v2 = vpop.permute.xlu0 %3286 }
 0x211   : > { %v3292_v44 = vsel %vm1710_vm11, %v3287_v2, %v3289_v23  ;;  %4532 = vrot.lane.b32.xlu1 %v9832_v8, %s11504_s15 }
 0x212   : > { %v3299_v15 = vsel %vm401_vm2, %v3292_v44, 0  ;;  %4530 = vrot.lane.b32.xlu0 %v9644_v30, %s11504_s15  ;;  %v9889_v29 = vpop.f32.mrb[40].mxu0 }
 0x213   : > { %v3348_v10 = vpop.permute.xlu1 %3347  ;;  %7800 = vmatpush3.bf16.msra.mxu0 %v3299_v15  ;;  %v7543_v37 = vpop.f32.mrb[41].mxu0 }
 0x214   : > { %v3346_v6 = vpop.permute.xlu0 %3345  ;;  %7815 = vmatprep.subr.bf16.mxu0 %v11484_v7  ;;  %v1690_v11 = vpop.f32.mrb[42].mxu0 }
 0x215   : > { %v1350_v23 = vld [vmem:[#allocation2] sm:$0xff]  ;;  %v3357_v2 = vsel %vm1779_vm12, %v3346_v6, %v3348_v10  ;;  %4589 = vrot.lane.b32.xlu1 %v9815_v39, %s11505_s30  ;;  %v7544_v44 = vpop.f32.mrb[43].mxu0 }
 0x216   : > { %v1417_v54 = vadd.f32 %v9751_v25, %v1350_v23  ;;  %4587 = vrot.lane.b32.xlu0 %v9655_v1, %s11505_s30  ;;  %7802 = vmatmul.mubr.msk.bf16.vlgmr.msra.gmra.mrb[92].mxu0 %vm397_vm3, %v6813_v53 }
 0x217   : > { %v3352_v15 = vpop.permute.xlu1 %3351  ;;  %7806 = vmatpush3.bf16.msra.mxu1 %v3357_v2  ;;  %7821 = vmatprep.mubr.msk.bf16.mxu0 %vm8467_vm1, %v11484_v7 }
 0x218   : > { %1418 = vst.msk [vmem:[#allocation2] sm:$0xff] %vm378_vm4, %v1417_v54  ;;  %v3350_v37 = vpop.permute.xlu0 %3349  ;;  %7807 = vmatprep.subr.bf16.mxu1 %v11484_v7 }
 0x219   : > { %v9907_v10 = vsel %vm1779_vm12, %v3350_v37, %v3352_v15  ;;  %4593 = vrot.lane.b32.xlu1 %v9832_v8, %s11505_s30 }
 0x21a   : > { %11526 = vst [vmem:[#allocation18_spill] sm:$0xff] %v9907_v10  ;;  %4591 = vrot.lane.b32.xlu0 %v9644_v30, %s11505_s30 }
 0x21b   : > { %v3356_v25 = vpop.permute.xlu1 %3355  ;;  %7808 = vmatpush3.bf16.msra.mxu1 %v9907_v10 }
 0x21c   : > { %v3354_v53 = vpop.permute.xlu0 %3353  ;;  %7809 = vmatprep.subr.bf16.mxu1 %v11484_v7 }
 0x21d   : > { %v3359_v54 = vsel %vm1779_vm12, %v3354_v53, %v3356_v25  ;;  %4650 = vrot.lane.b32.xlu1 %v9815_v39, %s11506_s8  ;;  %v6815_v25 = vld [vmem:[%s11418_s3 + $0x58] sm:$0xf] }
 0x21e   : > { %v3366_v6 = vsel %vm401_vm2, %v3359_v54, 0  ;;  %4648 = vrot.lane.b32.xlu0 %v9655_v1, %s11506_s8  ;;  %v9921_v11 = vpop.f32.mrb[40].mxu1 }
 0x21f   : > { %v1419_v23 = vld [vmem:[#allocation2] sm:$0xff]  ;;  %v3415_v2 = vpop.permute.xlu1 %3414  ;;  %7810 = vmatpush3.bf16.msra.mxu1 %v3366_v6  ;;  %v7553_v44 = vpop.f32.mrb[41].mxu1 }
 0x220   : > { %v1486_v15 = vadd.f32 %v9784_v45, %v1419_v23  ;;  %v3413_v37 = vpop.permute.xlu0 %3412  ;;  %7825 = vmatprep.subr.bf16.mxu1 %v11484_v7  ;;  %v1759_v53 = vpop.f32.mrb[42].mxu1 }
 0x221   : > { %v3424_v54 = vsel %vm1848_vm13, %v3413_v37, %v3415_v2  ;;  %4654 = vrot.lane.b32.xlu1 %v9832_v8, %s11506_s8  ;;  %v7554_v10 = vpop.f32.mrb[43].mxu1 }
 0x222   : > { %1487 = vst.msk [vmem:[#allocation2] sm:$0xff] %vm378_vm4, %v1486_v15  ;;  %4652 = vrot.lane.b32.xlu0 %v9644_v30, %s11506_s8  ;;  %7816 = vmatpush3.bf16.msra.mxu0 %v3424_v54 }
 0x223   : > { %v3419_v45 = vpop.permute.xlu1 %3418  ;;  %7817 = vmatprep.subr.bf16.mxu0 %v11484_v7  ;;  %7812 = vmatmul.mubr.msk.bf16.vlgmr.msra.gmra.mrb[92].mxu1 %vm397_vm3, %v6815_v25 }
 0x224   : > { %v3417_v6 = vpop.permute.xlu0 %3416  ;;  %7831 = vmatprep.mubr.msk.bf16.mxu1 %vm8467_vm1, %v11484_v7 }
 0x225   : > { %v9939_v23 = vsel %vm1848_vm13, %v3417_v6, %v3419_v45  ;;  %4711 = vrot.lane.b32.xlu1 %v9815_v39, %s11507_s9  ;;  %v6817_v45 = vld [vmem:[%s11418_s3 + $0x5c] sm:$0xf] }
 0x226   : > { %11527 = vst [vmem:[#allocation19_spill] sm:$0xff] %v9939_v23  ;;  %4709 = vrot.lane.b32.xlu0 %v9655_v1, %s11507_s9  ;;  %7818 = vmatpush3.bf16.msra.mxu0 %v9939_v23 }
 0x227   : > { %v3423_v10 = vpop.permute.xlu1 %3422  ;;  %7819 = vmatprep.subr.bf16.mxu0 %v11484_v7 }
 0x228   : > { %v3421_v2 = vpop.permute.xlu0 %3420 }
 0x229   : > { %v1488_v44 = vld [vmem:[#allocation2] sm:$0xff]  ;;  %v3426_v15 = vsel %vm1848_vm13, %v3421_v2, %v3423_v10  ;;  %4715 = vrot.lane.b32.xlu1 %v9832_v8, %s11507_s9 }
 0x22a   : > { %v1555_v37 = vadd.f32 %v9821_v38, %v1488_v44  ;;  %v3433_v25 = vsel %vm401_vm2, %v3426_v15, 0  ;;  %4713 = vrot.lane.b32.xlu0 %v9644_v30, %s11507_s9  ;;  %v9954_v53 = vpop.f32.mrb[44].mxu0 }
 0x22b   : > { %7820 = vmatpush3.bf16.msra.mxu0 %v3433_v25  ;;  %v3482_v54 = vpop.permute.xlu1 %3481  ;;  %v7563_v6 = vpop.f32.mrb[45].mxu0 }
 0x22c   : > { %1556 = vst.msk [vmem:[#allocation2] sm:$0xff] %vm378_vm4, %v1555_v37  ;;  %v3480_v10 = vpop.permute.xlu0 %3479  ;;  %7835 = vmatprep.subr.bf16.mxu0 %v11484_v7  ;;  %v1828_v38 = vpop.f32.mrb[46].mxu0 }
 0x22d   : > { %v3491_v2 = vsel %vm1917_vm14, %v3480_v10, %v3482_v54  ;;  %4772 = vrot.lane.b32.xlu1 %v9815_v39, %s11508_s19  ;;  %v7564_v44 = vpop.f32.mrb[47].mxu0  ;;  %v3585_v10 = vsel %vm401_vm2, %v9644_v30, 0 }
 0x22e   : > { %4770 = vrot.lane.b32.xlu0 %v9655_v1, %s11508_s19  ;;  %7822 = vmatmul.mubr.msk.bf16.vlgmr.msra.gmra.mrb[96].mxu0 %vm397_vm3, %v6817_v45  ;;  %v6819_v44 = vld [vmem:[%s11418_s3 + $0x60] sm:$0xf] }
 0x22f   : > { %7826 = vmatpush3.bf16.msra.mxu1 %v3491_v2  ;;  %7836 = vmatpush3.bf16.msra.mxu0 %v8624_v9  ;;  %v3486_v15 = vpop.permute.xlu1 %3485 }
 0x230   : > { %v3484_v37 = vpop.permute.xlu0 %3483  ;;  %7827 = vmatprep.subr.bf16.mxu1 %v11484_v7  ;;  %7837 = vmatprep.subr.bf16.mxu0 %v11484_v7 }
 0x231   : > { %v9971_v25 = vsel %vm1917_vm14, %v3484_v37, %v3486_v15  ;;  %4776 = vrot.lane.b32.xlu1 %v9832_v8, %s11508_s19  ;;  %7841 = vmatprep.mubr.msk.bf16.mxu0 %vm8467_vm1, %v11484_v7 }
 0x232   : > { %11528 = vst [vmem:[#allocation20_spill] sm:$0xff] %v9971_v25  ;;  %4774 = vrot.lane.b32.xlu0 %v9644_v30, %s11508_s19 }
 0x233   : > { %v1557_v54 = vld [vmem:[#allocation2] sm:$0xff]  ;;  %7828 = vmatpush3.bf16.msra.mxu1 %v9971_v25  ;;  %7838 = vmatpush3.bf16.msra.mxu0 %v9655_v1  ;;  %v3490_v9 = vpop.permute.xlu1 %3489 }
 0x234   : > { %v1624_v45 = vadd.f32 %v9857_v5, %v1557_v54  ;;  %v3488_v6 = vpop.permute.xlu0 %3487  ;;  %7829 = vmatprep.subr.bf16.mxu1 %v11484_v7  ;;  %7839 = vmatprep.subr.bf16.mxu0 %v11484_v7 }
 0x235   : > { %v3493_v38 = vsel %vm1917_vm14, %v3488_v6, %v3490_v9  ;;  %4833 = vrot.lane.b32.xlu1 %v9815_v39, %s11509_s18  ;;  %v3575_v9 = vld [vmem:[%s11418_s3] sm:$0xf] }
 0x236   : > { %1625 = vst.msk [vmem:[#allocation2] sm:$0xff] %vm378_vm4, %v1624_v45  ;;  %v3500_v2 = vsel %vm401_vm2, %v3493_v38, 0  ;;  %4831 = vrot.lane.b32.xlu0 %v9655_v1, %s11509_s18  ;;  %v9993_v5 = vpop.f32.mrb[44].mxu1 }
 0x237   : > { %7830 = vmatpush3.bf16.msra.mxu1 %v3500_v2  ;;  %7840 = vmatpush3.bf16.msra.mxu0 %v3585_v10  ;;  %v3634_v15 = vpop.permute.xlu1 %3633  ;;  %v7573_v37 = vpop.f32.mrb[45].mxu1 }
 0x238   : > { %7845 = vmatprep.subr.bf16.mxu1 %v11484_v7  ;;  %v3632_v54 = vpop.permute.xlu0 %3631  ;;  %7855 = vmatprep.subr.bf16.mxu0 %v11484_v7  ;;  %v1897_v45 = vpop.f32.mrb[46].mxu1 }
 0x239   : > { %4837 = vrot.lane.b32.xlu1 %v9832_v8, %s11509_s18  ;;  %v7574_v6 = vpop.f32.mrb[47].mxu1 }
 0x23a   : > { %4835 = vrot.lane.b32.xlu0 %v9644_v30, %s11509_s18  ;;  %7832 = vmatmul.mubr.msk.bf16.vlgmr.msra.gmra.mrb[96].mxu1 %vm397_vm3, %v6819_v44 }
 0x23b   : > { %7842 = vmatmul.mubr.msk.bf16.vlgmr.msra.gmra.mrb[100].mxu0 %vm397_vm3, %v3575_v9  ;;  %7846 = vmatpush3.bf16.msra.mxu1 %v8772_v18  ;;  %v3689_v10 = vpop.permute.xlu1 %3688 }
 0x23c   : > { %7856 = vmatpush3.bf16.msra.mxu0 %v8782_v21  ;;  %7847 = vmatprep.subr.bf16.mxu1 %v11484_v7  ;;  %v3687_v38 = vpop.permute.xlu0 %3686  ;;  %v3640_v21 = vsel %vm401_vm2, %v3634_v15, 0  ;;  %v6825_v15 = vld [vmem:[%s11418_s3 + $0x4] sm:$0xf] }
 0x23d   : > { %v1626_v2 = vld [vmem:[#allocation2] sm:$0xff]  ;;  %4894 = vrot.lane.b32.xlu1 %v9815_v39, %s11529_s1  ;;  %7857 = vmatprep.subr.bf16.mxu0 %v11484_v7 }
 0x23e   : > { %v1693_v37 = vadd.f32 %v9889_v29, %v1626_v2  ;;  %4892 = vrot.lane.b32.xlu0 %v9655_v1, %s11529_s1  ;;  %7851 = vmatprep.mubr.msk.bf16.mxu1 %vm8467_vm1, %v11484_v7  ;;  %v3695_v29 = vsel %vm401_vm2, %v3689_v10, 0 }
 0x23f   : > { %7848 = vmatpush3.bf16.msra.mxu1 %v3632_v54  ;;  %7861 = vmatprep.mubr.msk.bf16.mxu0 %vm8467_vm1, %v11484_v7  ;;  %v3744_v18 = vpop.permute.xlu1 %3743 }
 0x240   : > { %1694 = vst.msk [vmem:[#allocation2] sm:$0xff] %vm378_vm4, %v1693_v37  ;;  %7858 = vmatpush3.bf16.msra.mxu0 %v3687_v38  ;;  %7849 = vmatprep.subr.bf16.mxu1 %v11484_v7  ;;  %v3742_v44 = vpop.permute.xlu0 %3741  ;;  %v6827_v38 = vld [vmem:[%s11418_s3 + $0x8] sm:$0xf] }
 0x241   : > { %4898 = vrot.lane.b32.xlu1 %v9832_v8, %s11529_s1  ;;  %7859 = vmatprep.subr.bf16.mxu0 %v11484_v7  ;;  %v10029_v54 = vpop.f32.mrb[48].mxu0 }
 0x242   : > { %4896 = vrot.lane.b32.xlu0 %v9644_v30, %s11529_s1  ;;  %v7583_v9 = vpop.f32.mrb[49].mxu0  ;;  %v10033_v45 = vpop.f32.mrb[48].mxu1 }
 0x243   : > { %7850 = vmatpush3.bf16.msra.mxu1 %v3640_v21  ;;  %v3799_v6 = vpop.permute.xlu1 %3798  ;;  %v1966_v10 = vpop.f32.mrb[50].mxu0 }
 0x244   : > { %7860 = vmatpush3.bf16.msra.mxu0 %v3695_v29  ;;  %7865 = vmatprep.subr.bf16.mxu1 %v11484_v7  ;;  %v3797_v2 = vpop.permute.xlu0 %3796  ;;  %v7584_v37 = vpop.f32.mrb[51].mxu0  ;;  %v10049_v29 = vld [vmem:[%s8585_s12 + $0x18] sm:$0xff] }
 0x245   : > { %4955 = vrot.lane.b32.xlu1 %v9815_v39, %s11530_s6  ;;  %7875 = vmatprep.subr.bf16.mxu0 %v11484_v7  ;;  %v7593_v21 = vpop.f32.mrb[49].mxu1 }
 0x246   : > { %4953 = vrot.lane.b32.xlu0 %v9655_v1, %s11530_s6  ;;  %7852 = vmatmul.mubr.msk.bf16.vlgmr.msra.gmra.mrb[100].mxu1 %vm397_vm3, %v6825_v15  ;;  %v2053_v9 = vpop.f32.mrb[50].mxu1  ;;  %v10061_v1 = vcombine.low %v10049_v29, %v10049_v29  ;;  %v6831_v15 = vld [vmem:[%s11418_s3 + $0x10] sm:$0xf] }
 0x247   : > { %v1695_v10 = vld [vmem:[#allocation2] sm:$0xff]  ;;  %7862 = vmatmul.mubr.msk.bf16.vlgmr.msra.gmra.mrb[104].mxu0 %vm397_vm3, %v6827_v38  ;;  %7866 = vmatpush3.bf16.msra.mxu1 %v8793_v24  ;;  %v3854_v37 = vpop.permute.xlu1 %3853  ;;  %v7594_v25 = vpop.f32.mrb[51].mxu1  ;;  %v10068_v24 = vcombine.low %v9651_v16, %v9630_v4 }
 0x248   : > { %v1762_v39 = vadd.f32 %v9921_v11, %v1695_v10  ;;  %7876 = vmatpush3.bf16.msra.mxu0 %v8817_v31  ;;  %7867 = vmatprep.subr.bf16.mxu1 %v11484_v7  ;;  %v3852_v21 = vpop.permute.xlu0 %3851  ;;  %v6829_v25 = vld [vmem:[%s11418_s3 + $0xc] sm:$0xf] }
 0x249   : > { %4959 = vrot.lane.b32.xlu1 %v9832_v8, %s11530_s6  ;;  %7877 = vmatprep.subr.bf16.mxu0 %v11484_v7  ;;  %v3750_v8 = vsel %vm401_vm2, %v3744_v18, 0 }
 0x24a   : > { %1763 = vst.msk [vmem:[#allocation2] sm:$0xff] %vm378_vm4, %v1762_v39  ;;  %4957 = vrot.lane.b32.xlu0 %v9644_v30, %s11530_s6  ;;  %7871 = vmatprep.mubr.msk.bf16.mxu1 %vm8467_vm1, %v11484_v7  ;;  %v3805_v30 = vsel %vm401_vm2, %v3799_v6, 0 }
 0x24b   : > { %7868 = vmatpush3.bf16.msra.mxu1 %v3742_v44  ;;  %7881 = vmatprep.mubr.msk.bf16.mxu0 %vm8467_vm1, %v11484_v7  ;;  %v3909_v31 = vpop.permute.xlu1 %3908 }
 0x24c   : > { %7878 = vmatpush3.bf16.msra.mxu0 %v3797_v2  ;;  %7869 = vmatprep.subr.bf16.mxu1 %v11484_v7  ;;  %v3907_v11 = vpop.permute.xlu0 %3906 }
 0x24d   : > { %5101 = vrot.lane.b32.xlu1 %v10061_v1, %s11531_s25  ;;  %7879 = vmatprep.subr.bf16.mxu0 %v11484_v7  ;;  %v10080_v4 = vpop.f32.mrb[52].mxu0 }
 0x24e   : > { %5099 = vrot.lane.b32.xlu0 %v10068_v24, %s11531_s25  ;;  %v7603_v16 = vpop.f32.mrb[53].mxu0  ;;  %s11532_s25 = smov 126  }
 0x24f   : > { %7870 = vmatpush3.bf16.msra.mxu1 %v3750_v8  ;;  %v10087_v18 = vpop.permute.xlu1 %3963  ;;  %v2111_v44 = vpop.f32.mrb[54].mxu0 }
 0x250   : > { %7880 = vmatpush3.bf16.msra.mxu0 %v3805_v30  ;;  %7885 = vmatprep.subr.bf16.mxu1 %v11484_v7  ;;  %v10093_v6 = vpop.permute.xlu0 %3961  ;;  %v7604_v38 = vpop.f32.mrb[55].mxu0  ;;  %v3915_v44 = vsel %vm401_vm2, %v3909_v31, 0 }
 0x251   : > { %v1764_v2 = vld [vmem:[#allocation2] sm:$0xff]  ;;  %5156 = vrot.lane.b32.xlu1 %v10061_v1, %s11532_s25  ;;  %7895 = vmatprep.subr.bf16.mxu0 %v11484_v7  ;;  %v10098_v9 = vpop.f32.mrb[52].mxu1 }
 0x252   : > { %v1831_v10 = vadd.f32 %v9954_v53, %v1764_v2  ;;  %5154 = vrot.lane.b32.xlu0 %v10068_v24, %s11532_s25  ;;  %7872 = vmatmul.mubr.msk.bf16.vlgmr.msra.gmra.mrb[104].mxu1 %vm397_vm3, %v6829_v25  ;;  %v7613_v39 = vpop.f32.mrb[53].mxu1 }
 0x253   : > { %7882 = vmatmul.mubr.msk.bf16.vlgmr.msra.gmra.mrb[108].mxu0 %vm397_vm3, %v6831_v15  ;;  %7886 = vmatpush3.bf16.msra.mxu1 %v8829_v33  ;;  %v4019_v8 = vpop.permute.xlu1 %4018  ;;  %v2169_v30 = vpop.f32.mrb[54].mxu1 }
 0x254   : > { %1832 = vst.msk [vmem:[#allocation2] sm:$0xff] %vm378_vm4, %v1831_v10  ;;  %7896 = vmatpush3.bf16.msra.mxu0 %v8854_v41  ;;  %7887 = vmatprep.subr.bf16.mxu1 %v11484_v7  ;;  %v4017_v16 = vpop.permute.xlu0 %4016  ;;  %v7614_v53 = vpop.f32.mrb[55].mxu1  ;;  %v3860_v41 = vsel %vm401_vm2, %v3854_v37, 0  ;;  %v6833_v37 = vld [vmem:[%s11418_s3 + $0x14] sm:$0xf] }
 0x255   : > { %5211 = vrot.lane.b32.xlu1 %v10061_v1, %s11533_s5  ;;  %7897 = vmatprep.subr.bf16.mxu0 %v11484_v7  ;;  %v6835_v10 = vld [vmem:[%s11418_s3 + $0x18] sm:$0xf] }
 0x256   : > { %5209 = vrot.lane.b32.xlu0 %v10068_v24, %s11533_s5  ;;  %7891 = vmatprep.mubr.msk.bf16.mxu1 %vm8467_vm1, %v11484_v7  ;;  %s11549_s5 = sld [smem:[#allocation24_spill]] (!%p6930_p0) }
 0x257   : > { %7888 = vmatpush3.bf16.msra.mxu1 %v3852_v21  ;;  %7901 = vmatprep.mubr.msk.bf16.mxu0 %vm8467_vm1, %v11484_v7  ;;  %v10118_v33 = vpop.permute.xlu1 %4073 }
 0x258   : > { %7898 = vmatpush3.bf16.msra.mxu0 %v3907_v11  ;;  %7889 = vmatprep.subr.bf16.mxu1 %v11484_v7  ;;  %v10122_v25 = vpop.permute.xlu0 %4071 }
 0x259   : > { %5266 = vrot.lane.b32.xlu1 %v10061_v1, %s11534_s4  ;;  %7899 = vmatprep.subr.bf16.mxu0 %v11484_v7  ;;  %v10128_v21 = vpop.f32.mrb[56].mxu0 }
 0x25a   : > { %5264 = vrot.lane.b32.xlu0 %v10068_v24, %s11534_s4  ;;  %v7623_v15 = vpop.f32.mrb[57].mxu0  ;;  %s11535_s4 = smov 116  }
 0x25b   : > { %v1833_v38 = vld [vmem:[#allocation2] sm:$0xff]  ;;  %7890 = vmatpush3.bf16.msra.mxu1 %v3860_v41  ;;  %v10135_v11 = vpop.permute.xlu1 %4128  ;;  %v2227_v31 = vpop.f32.mrb[58].mxu0 }
 0x25c   : > { %v1900_v2 = vadd.f32 %v9993_v5, %v1833_v38  ;;  %7900 = vmatpush3.bf16.msra.mxu0 %v3915_v44  ;;  %7905 = vmatprep.subr.bf16.mxu1 %v11484_v7  ;;  %v10142_v39 = vpop.permute.xlu0 %4126  ;;  %v7624_v30 = vpop.f32.mrb[59].mxu0  ;;  %v4025_v31 = vsel %vm401_vm2, %v4019_v8, 0 }
 0x25d   : > { %5321 = vrot.lane.b32.xlu1 %v10061_v1, %s11535_s4  ;;  %7915 = vmatprep.subr.bf16.mxu0 %v11484_v7  ;;  %v10147_v53 = vpop.f32.mrb[56].mxu1 }
 0x25e   : > { %1901 = vst.msk [vmem:[#allocation2] sm:$0xff] %vm378_vm4, %v1900_v2  ;;  %5319 = vrot.lane.b32.xlu0 %v10068_v24, %s11535_s4  ;;  %7892 = vmatmul.mubr.msk.bf16.vlgmr.msra.gmra.mrb[108].mxu1 %vm397_vm3, %v6833_v37  ;;  %v7633_v5 = vpop.f32.mrb[57].mxu1 }
 0x25f   : > { %7902 = vmatmul.mubr.msk.bf16.vlgmr.msra.gmra.mrb[112].mxu0 %vm397_vm3, %v6835_v10  ;;  %7906 = vmatpush3.bf16.msra.mxu1 %v8864_v42  ;;  %v10155_v41 = vpop.permute.xlu1 %4183  ;;  %v2285_v44 = vpop.f32.mrb[58].mxu1 }
 0x260   : > { %7916 = vmatpush3.bf16.msra.mxu0 %v8892_v51  ;;  %7907 = vmatprep.subr.bf16.mxu1 %v11484_v7  ;;  %v10159_v15 = vpop.permute.xlu0 %4181  ;;  %v7634_v38 = vpop.f32.mrb[59].mxu1  ;;  %v3970_v51 = vsel %vm401_vm2, %v10087_v18, 0 }
 0x261   : > { %5376 = vrot.lane.b32.xlu1 %v10061_v1, %s11513_s7  ;;  %7917 = vmatprep.subr.bf16.mxu0 %v11484_v7 }
 0x262   : > { %5374 = vrot.lane.b32.xlu0 %v10068_v24, %s11513_s7  ;;  %7911 = vmatprep.mubr.msk.bf16.mxu1 %vm8467_vm1, %v11484_v7 }
 0x263   : > { %7908 = vmatpush3.bf16.msra.mxu1 %v10093_v6  ;;  %7921 = vmatprep.mubr.msk.bf16.mxu0 %vm8467_vm1, %v11484_v7  ;;  %v10171_v42 = vpop.permute.xlu1 %4238 }
 0x264   : > { %7918 = vmatpush3.bf16.msra.mxu0 %v4017_v16  ;;  %7909 = vmatprep.subr.bf16.mxu1 %v11484_v7  ;;  %v10176_v37 = vpop.permute.xlu0 %4236  ;;  %v6837_v16 = vld [vmem:[%s11418_s3 + $0x1c] sm:$0xf] }
 0x265   : > { %v1902_v2 = vld [vmem:[#allocation2] sm:$0xff]  ;;  %5431 = vrot.lane.b32.xlu1 %v10061_v1, %s11515_s27  ;;  %7919 = vmatprep.subr.bf16.mxu0 %v11484_v7  ;;  %v10182_v6 = vpop.f32.mrb[60].mxu0 }
 0x266   : > { %v1969_v10 = vadd.f32 %v10029_v54, %v1902_v2  ;;  %5429 = vrot.lane.b32.xlu0 %v10068_v24, %s11515_s27  ;;  %v7643_v18 = vpop.f32.mrb[61].mxu0  ;;  %v6839_v54 = vld [vmem:[%s11418_s3 + $0x20] sm:$0xf] }
 0x267   : > { %7910 = vmatpush3.bf16.msra.mxu1 %v3970_v51  ;;  %v10190_v8 = vpop.permute.xlu1 %4293  ;;  %v2343_v30 = vpop.f32.mrb[62].mxu0 }
 0x268   : > { %1970 = vst.msk [vmem:[#allocation2] sm:$0xff] %vm378_vm4, %v1969_v10  ;;  %7920 = vmatpush3.bf16.msra.mxu0 %v4025_v31  ;;  %7925 = vmatprep.subr.bf16.mxu1 %v11484_v7  ;;  %v10197_v5 = vpop.permute.xlu0 %4291  ;;  %v7644_v44 = vpop.f32.mrb[63].mxu0 }
 0x269   : > { %5486 = vrot.lane.b32.xlu1 %v10061_v1, %s11516_s22  ;;  %7935 = vmatprep.subr.bf16.mxu0 %v11484_v7  ;;  %v10202_v38 = vpop.f32.mrb[60].mxu1 }
 0x26a   : > { %5484 = vrot.lane.b32.xlu0 %v10068_v24, %s11516_s22  ;;  %7912 = vmatmul.mubr.msk.bf16.vlgmr.msra.gmra.mrb[112].mxu1 %vm397_vm3, %v6837_v16  ;;  %v7653_v51 = vpop.f32.mrb[61].mxu1  ;;  %v4080_v16 = vsel %vm401_vm2, %v10118_v33, 0 }
 0x26b   : > { %7922 = vmatmul.mubr.msk.bf16.vlgmr.msra.gmra.mrb[116].mxu0 %vm397_vm3, %v6839_v54  ;;  %7926 = vmatpush3.bf16.msra.mxu1 %v8902_v52  ;;  %v10209_v31 = vpop.permute.xlu1 %4348  ;;  %v2401_v2 = vpop.f32.mrb[62].mxu1 }
 0x26c   : > { %7936 = vmatpush3.bf16.msra.mxu0 %v8930_v61  ;;  %7927 = vmatprep.subr.bf16.mxu1 %v11484_v7  ;;  %v10213_v10 = vpop.permute.xlu0 %4346  ;;  %v7654_v18 = vpop.f32.mrb[63].mxu1 }
 0x26d   : > { %5541 = vrot.lane.b32.xlu1 %v10061_v1, %s11517_s24  ;;  %7937 = vmatprep.subr.bf16.mxu0 %v11484_v7 }
 0x26e   : > { %5539 = vrot.lane.b32.xlu0 %v10068_v24, %s11517_s24  ;;  %7931 = vmatprep.mubr.msk.bf16.mxu1 %vm8467_vm1, %v11484_v7 }
 0x26f   : > { %v10222_v52 = vld [vmem:[#allocation2] sm:$0xff]  ;;  %7928 = vmatpush3.bf16.msra.mxu1 %v10122_v25  ;;  %7941 = vmatprep.mubr.msk.bf16.mxu0 %vm8467_vm1, %v11484_v7  ;;  %v10227_v61 = vpop.permute.xlu1 %4406  ;;  %v4135_v25 = vsel %vm401_vm2, %v10135_v11, 0  ;;  %v6843_v11 = vld [vmem:[%s11418_s3 + $0x28] sm:$0xf] }
 0x270   : > { %1972 = vst.msk [vmem:[%s8590_s11] sm:$0xff] %vm378_vm4, %v10222_v52  ;;  %2000 = vst.msk [vmem:[#allocation2] sm:$0xff] %vm378_vm4, %v11484_v7  ;;  %7938 = vmatpush3.bf16.msra.mxu0 %v10142_v39  ;;  %7929 = vmatprep.subr.bf16.mxu1 %v11484_v7  ;;  %v10238_v30 = vpop.permute.xlu0 %4404  ;;  %v6841_v39 = vld [vmem:[%s11418_s3 + $0x24] sm:$0xf] }
 0x271   : > { %5596 = vrot.lane.b32.xlu1 %v10061_v1, %s11519_s29  ;;  %7939 = vmatprep.subr.bf16.mxu0 %v11484_v7  ;;  %v10245_v33 = vpop.f32.mrb[64].mxu0 }
 0x272   : > { %5594 = vrot.lane.b32.xlu0 %v10068_v24, %s11519_s29  ;;  %v7663_v54 = vpop.f32.mrb[65].mxu0 }
 0x273   : > { %7930 = vmatpush3.bf16.msra.mxu1 %v4080_v16  ;;  %v10252_v44 = vpop.permute.xlu1 %4410  ;;  %v2459_v51 = vpop.f32.mrb[66].mxu0 }
 0x274   : > { %7940 = vmatpush3.bf16.msra.mxu0 %v4135_v25  ;;  %7945 = vmatprep.subr.bf16.mxu1 %v11484_v7  ;;  %v10258_v2 = vpop.permute.xlu0 %4408  ;;  %v7664_v18 = vpop.f32.mrb[67].mxu0 }
 0x275   : > { %5651 = vrot.lane.b32.xlu1 %v10061_v1, %s11520_s16  ;;  %7955 = vmatprep.subr.bf16.mxu0 %v11484_v7  ;;  %v10263_v16 = vpop.f32.mrb[64].mxu1 }
 0x276   : > { %5649 = vrot.lane.b32.xlu0 %v10068_v24, %s11520_s16  ;;  %7932 = vmatmul.mubr.msk.bf16.vlgmr.msra.gmra.mrb[116].mxu1 %vm397_vm3, %v6841_v39  ;;  %v7673_v25 = vpop.f32.mrb[65].mxu1  ;;  %v6847_v39 = vld [vmem:[%s11418_s3 + $0x30] sm:$0xf]  ;;  %s11551_s16 = sld [smem:[#allocation25_spill]] (!%p6930_p0) }
 0x277   : > { %v2001_v54 = vld [vmem:[#allocation2] sm:$0xff]  ;;  %7942 = vmatmul.mubr.msk.bf16.vlgmr.msra.gmra.mrb[120].mxu0 %vm397_vm3, %v6843_v11  ;;  %7946 = vmatpush3.bf16.msra.mxu1 %v8940_v62  ;;  %v10270_v51 = vpop.permute.xlu1 %4467  ;;  %v2517_v18 = vpop.f32.mrb[66].mxu1 }
 0x278   : > { %v2056_v23 = vadd.f32 %v10033_v45, %v2001_v54  ;;  %7956 = vmatpush3.bf16.msra.mxu0 %v8968_v19  ;;  %7947 = vmatprep.subr.bf16.mxu1 %v11484_v7  ;;  %v10275_v56 = vpop.permute.xlu0 %4465  ;;  %v7674_v43 = vpop.f32.mrb[67].mxu1  ;;  %v4190_v19 = vsel %vm401_vm2, %v10155_v41, 0  ;;  %v8421_v18 = vld [vmem:[%s8585_s12 + $0x8] sm:$0xff] }
 0x279   : > { %5706 = vrot.lane.b32.xlu1 %v10061_v1, %s11521_s26  ;;  %7957 = vmatprep.subr.bf16.mxu0 %v11484_v7 }
 0x27a   : > { %2057 = vst.msk [vmem:[#allocation2] sm:$0xff] %vm378_vm4, %v2056_v23  ;;  %5704 = vrot.lane.b32.xlu0 %v10068_v24, %s11521_s26  ;;  %7951 = vmatprep.mubr.msk.bf16.mxu1 %vm8467_vm1, %v11484_v7  ;;  %v4245_v23 = vsel %vm401_vm2, %v10171_v42, 0 }
 0x27b   : > { %7948 = vmatpush3.bf16.msra.mxu1 %v10159_v15  ;;  %7961 = vmatprep.mubr.msk.bf16.mxu0 %vm8467_vm1, %v11484_v7  ;;  %v10288_v62 = vpop.permute.xlu1 %4471  ;;  %v6845_v15 = vld [vmem:[%s11418_s3 + $0x2c] sm:$0xf] }
 0x27c   : > { %7958 = vmatpush3.bf16.msra.mxu0 %v10176_v37  ;;  %7949 = vmatprep.subr.bf16.mxu1 %v11484_v7  ;;  %v10294_v43 = vpop.permute.xlu0 %4469 }
 0x27d   : > { %5761 = vrot.lane.b32.xlu1 %v10061_v1, %s11523_s20  ;;  %7959 = vmatprep.subr.bf16.mxu0 %v11484_v7  ;;  %v10301_v45 = vpop.f32.mrb[68].mxu0 }
 0x27e   : > { %5759 = vrot.lane.b32.xlu0 %v10068_v24, %s11523_s20  ;;  %v7683_v41 = vpop.f32.mrb[69].mxu0 }
 0x27f   : > { %7950 = vmatpush3.bf16.msra.mxu1 %v4190_v19  ;;  %v10308_v37 = vpop.permute.xlu1 %4528  ;;  %v2575_v42 = vpop.f32.mrb[70].mxu0  ;;  %v8422_v19 = vld [vmem:[%s8585_s12 + $0x10] sm:$0xff] }
 0x280   : > { %7960 = vmatpush3.bf16.msra.mxu0 %v4245_v23  ;;  %7965 = vmatprep.subr.bf16.mxu1 %v11484_v7  ;;  %v10314_v11 = vpop.permute.xlu0 %4526  ;;  %v7684_v25 = vpop.f32.mrb[71].mxu0  ;;  %v10321_v41 = vcombine.high %v8421_v18, %v8422_v19  ;;  %v11536_v18 = vmov 0.0  }
 0x281   : > { %v2058_v54 = vld [vmem:[#allocation2] sm:$0xff]  ;;  %5816 = vrot.lane.b32.xlu1 %v10061_v1, %s11501_s14  ;;  %7975 = vmatprep.subr.bf16.mxu0 %v11484_v7  ;;  %v10323_v23 = vpop.f32.mrb[68].mxu1 }
 0x282   : > { %v2114_v42 = vadd.f32 %v10080_v4, %v2058_v54  ;;  %5814 = vrot.lane.b32.xlu0 %v10068_v24, %s11501_s14  ;;  %7952 = vmatmul.mubr.msk.bf16.vlgmr.msra.gmra.mrb[120].mxu1 %vm397_vm3, %v6845_v15  ;;  %v7693_v25 = vpop.f32.mrb[69].mxu1  ;;  %v4355_v15 = vsel %vm401_vm2, %v10209_v31, 0 }
 0x283   : > { %7962 = vmatmul.mubr.msk.bf16.vlgmr.msra.gmra.mrb[124].mxu0 %vm397_vm3, %v6847_v39  ;;  %7966 = vmatpush3.bf16.msra.mxu1 %v8978_v20  ;;  %v10331_v59 = vpop.permute.xlu1 %4532  ;;  %v2633_v7 = vpop.f32.mrb[70].mxu1  ;;  %v10343_v20 = vcombine.high %v10049_v29, %v10049_v29  ;;  %v6851_v25 = vld [vmem:[%s11418_s3 + $0x38] sm:$0xf] }
 0x284   : > { %2115 = vst.msk [vmem:[#allocation2] sm:$0xff] %vm378_vm4, %v2114_v42  ;;  %7976 = vmatpush3.bf16.msra.mxu0 %v9008_v32  ;;  %7967 = vmatprep.subr.bf16.mxu1 %v11536_v18  ;;  %v10336_v4 = vpop.permute.xlu0 %4530  ;;  %v7694_v54 = vpop.f32.mrb[71].mxu1  ;;  %v4300_v32 = vsel %vm401_vm2, %v10190_v8, 0 }
 0x285   : > { %5874 = vrot.lane.b32.xlu1 %v10321_v41, %s11502_s13  ;;  %7977 = vmatprep.subr.bf16.mxu0 %v11536_v18 }
 0x286   : > { %5872 = vrot.lane.b32.xlu0 %v10068_v24, %s11502_s13  ;;  %7971 = vmatprep.mubr.msk.bf16.mxu1 %vm8467_vm1, %v11536_v18 }
 0x287   : > { %7968 = vmatpush3.bf16.msra.mxu1 %v10197_v5  ;;  %7981 = vmatprep.mubr.msk.bf16.mxu0 %vm8467_vm1, %v11536_v18  ;;  %v10352_v7 = vpop.permute.xlu1 %4589 }
 0x288   : > { %7978 = vmatpush3.bf16.msra.mxu0 %v10213_v10  ;;  %7969 = vmatprep.subr.bf16.mxu1 %v11536_v18  ;;  %v10358_v29 = vpop.permute.xlu0 %4587  ;;  %v6849_v10 = vld [vmem:[%s11418_s3 + $0x34] sm:$0xf] }
 0x289   : > { %5878 = vrot.lane.b32.xlu1 %v10343_v20, %s11502_s13  ;;  %7979 = vmatprep.subr.bf16.mxu0 %v11536_v18  ;;  %v10365_v5 = vpop.f32.mrb[72].mxu0 }
 0x28a   : > { %5876 = vrot.lane.b32.xlu0 %v10061_v1, %s11502_s13  ;;  %v7703_v8 = vpop.f32.mrb[73].mxu0 }
 0x28b   : > { %v2116_v39 = vld [vmem:[#allocation2] sm:$0xff]  ;;  %7970 = vmatpush3.bf16.msra.mxu1 %v4300_v32  ;;  %v10372_v19 = vpop.permute.xlu1 %4593  ;;  %v2691_v31 = vpop.f32.mrb[74].mxu0 }
 0x28c   : > { %v2172_v42 = vadd.f32 %v10098_v9, %v2116_v39  ;;  %7980 = vmatpush3.bf16.msra.mxu0 %v4355_v15  ;;  %7985 = vmatprep.subr.bf16.mxu1 %v11536_v18  ;;  %v10379_v54 = vpop.permute.xlu0 %4591  ;;  %v7704_v8 = vpop.f32.mrb[75].mxu0  ;;  %v4412_v31 = vsel %vm1296_vm5, %v10238_v30, %v10227_v61 }
 0x28d   : > { %5935 = vrot.lane.b32.xlu1 %v10321_v41, %s11503_s17  ;;  %7995 = vmatprep.subr.bf16.mxu0 %v11536_v18  ;;  %v10384_v32 = vpop.f32.mrb[72].mxu1 }
 0x28e   : > { %2173 = vst.msk [vmem:[#allocation2] sm:$0xff] %vm378_vm4, %v2172_v42  ;;  %5933 = vrot.lane.b32.xlu0 %v10068_v24, %s11503_s17  ;;  %7972 = vmatmul.mubr.msk.bf16.vlgmr.msra.gmra.mrb[124].mxu1 %vm397_vm3, %v6849_v10  ;;  %v7713_v9 = vpop.f32.mrb[73].mxu1  ;;  %v4413_v10 = vsel %vm1296_vm5, %v10258_v2, %v10252_v44 }
 0x28f   : > { %7982 = vmatmul.mubr.msk.bf16.vlgmr.msra.gmra.mrb[128].mxu0 %vm397_vm3, %v6851_v25  ;;  %7986 = vmatpush3.bf16.msra.mxu1 %v9048_v3  ;;  %v10392_v15 = vpop.permute.xlu1 %4650  ;;  %v2749_v39 = vpop.f32.mrb[74].mxu1  ;;  %v4473_v3 = vsel %vm1365_vm6, %v10275_v56, %v10270_v51  ;;  %v4419_v61 = vsel %vm401_vm2, %v4413_v10, 0  ;;  %v6853_v25 = vld [vmem:[%s11418_s3 + $0x3c] sm:$0xf] }
 0x290   : > { %7996 = vmatpush3.bf16.msra.mxu0 %v9085_v50  ;;  %7987 = vmatprep.subr.bf16.mxu1 %v11536_v18  ;;  %v10399_v42 = vpop.permute.xlu0 %4648  ;;  %v7714_v8 = vpop.f32.mrb[75].mxu1  ;;  %v4474_v50 = vsel %vm1365_vm6, %v10294_v43, %v10288_v62 }
 0x291   : > { %5939 = vrot.lane.b32.xlu1 %v10343_v20, %s11503_s17  ;;  %7997 = vmatprep.subr.bf16.mxu0 %v11536_v18  ;;  %v4480_v44 = vsel %vm401_vm2, %v4474_v50, 0 }
 0x292   : > { %5937 = vrot.lane.b32.xlu0 %v10061_v1, %s11503_s17  ;;  %7991 = vmatprep.mubr.msk.bf16.mxu1 %vm8467_vm1, %v11536_v18 }
 0x293   : > { %7988 = vmatpush3.bf16.msra.mxu1 %v4412_v31  ;;  %8001 = vmatprep.mubr.msk.bf16.mxu0 %vm8467_vm1, %v11536_v18  ;;  %v10419_v56 = vpop.permute.xlu1 %4654 }
 0x294   : > { %7998 = vmatpush3.bf16.msra.mxu0 %v4473_v3  ;;  %7989 = vmatprep.subr.bf16.mxu1 %v11536_v18  ;;  %v10423_v30 = vpop.permute.xlu0 %4652 }
 0x295   : > { %v2174_v2 = vld [vmem:[#allocation2] sm:$0xff]  ;;  %5996 = vrot.lane.b32.xlu1 %v10321_v41, %s11504_s15  ;;  %7999 = vmatprep.subr.bf16.mxu0 %v11536_v18  ;;  %v10429_v51 = vpop.f32.mrb[76].mxu0 }
 0x296   : > { %v2230_v62 = vadd.f32 %v10128_v21, %v2174_v2  ;;  %5994 = vrot.lane.b32.xlu0 %v10068_v24, %s11504_s15  ;;  %v7723_v43 = vpop.f32.mrb[77].mxu0  ;;  %v6857_v21 = vld [vmem:[%s11418_s3 + $0x40] sm:$0xf] }
 0x297   : > { %7990 = vmatpush3.bf16.msra.mxu1 %v4419_v61  ;;  %v10437_v9 = vpop.permute.xlu1 %4711  ;;  %v2807_v39 = vpop.f32.mrb[78].mxu0  ;;  %v4535_v43 = vsel %vm1434_vm7, %v10336_v4, %v10331_v59 }
 0x298   : > { %2231 = vst.msk [vmem:[#allocation2] sm:$0xff] %vm378_vm4, %v2230_v62  ;;  %8000 = vmatpush3.bf16.msra.mxu0 %v4480_v44  ;;  %8005 = vmatprep.subr.bf16.mxu1 %v11536_v18  ;;  %v4710_v31 = vpop.permute.xlu0 %4709  ;;  %v7724_v8 = vpop.f32.mrb[79].mxu0  ;;  %v4534_v44 = vsel %vm1434_vm7, %v10314_v11, %v10308_v37  ;;  %v4541_v11 = vsel %vm401_vm2, %v4535_v43, 0  ;;  %v4657_v43 = vsel %vm1572_vm9, %v10423_v30, %v10419_v56 }
 0x299   : > { %6000 = vrot.lane.b32.xlu1 %v10343_v20, %s11504_s15  ;;  %8015 = vmatprep.subr.bf16.mxu0 %v11536_v18  ;;  %v10447_v10 = vpop.f32.mrb[76].mxu1 }
 0x29a   : > { %5998 = vrot.lane.b32.xlu0 %v10061_v1, %s11504_s15  ;;  %7992 = vmatmul.mubr.msk.bf16.vlgmr.msra.gmra.mrb[128].mxu1 %vm397_vm3, %v6853_v25  ;;  %v7733_v3 = vpop.f32.mrb[77].mxu1  ;;  %s5017_s15 = scalar_select %p5016_p12, 1, 0 }
 0x29b   : > { %8002 = vmatmul.mubr.msk.bf16.vlgmr.msra.gmra.mrb[132].mxu0 %vm397_vm3, %v6857_v21  ;;  %8006 = vmatpush3.bf16.msra.mxu1 %v9114_v22  ;;  %v4716_v50 = vpop.permute.xlu1 %4715  ;;  %v2865_v61 = vpop.f32.mrb[78].mxu1  ;;  %v4595_v22 = vsel %vm1503_vm8, %v10358_v29, %v10352_v7  ;;  %v6861_v21 = vld [vmem:[%s11418_s3 + $0x48] sm:$0xf] }
 0x29c   : > { %8016 = vmatpush3.bf16.msra.mxu0 %v9142_v35  ;;  %8007 = vmatprep.subr.bf16.mxu1 %v11536_v18  ;;  %v4714_v2 = vpop.permute.xlu0 %4713  ;;  %v7734_v62 = vpop.f32.mrb[79].mxu1  ;;  %v4596_v35 = vsel %vm1503_vm8, %v10379_v54, %v10372_v19  ;;  %v6859_v54 = vld [vmem:[%s11418_s3 + $0x44] sm:$0xf]  ;;  %s5018_s25 = scvt.s32.f32 %s5017_s15 }
 0x29d   : > { %6057 = vrot.lane.b32.xlu1 %v10321_v41, %s11505_s30  ;;  %8017 = vmatprep.subr.bf16.mxu0 %v11536_v18  ;;  %v4602_v29 = vsel %vm401_vm2, %v4596_v35, 0 }
 0x29e   : > { %6055 = vrot.lane.b32.xlu0 %v10068_v24, %s11505_s30  ;;  %8011 = vmatprep.mubr.msk.bf16.mxu1 %vm8467_vm1, %v11536_v18 }
 0x29f   : > { %v2232_v59 = vld [vmem:[#allocation2] sm:$0xff]  ;;  %8008 = vmatpush3.bf16.msra.mxu1 %v4534_v44  ;;  %8021 = vmatprep.mubr.msk.bf16.mxu0 %vm8467_vm1, %v11536_v18  ;;  %v10477_v37 = vpop.permute.xlu1 %4772  ;;  %v4656_v44 = vsel %vm1572_vm9, %v10399_v42, %v10392_v15  ;;  %v4663_v42 = vsel %vm401_vm2, %v4657_v43, 0 }
 0x2a0   : > { %v2288_v4 = vadd.f32 %v10147_v53, %v2232_v59  ;;  %8018 = vmatpush3.bf16.msra.mxu0 %v4595_v22  ;;  %8009 = vmatprep.subr.bf16.mxu1 %v11536_v18  ;;  %v10482_v7 = vpop.permute.xlu0 %4770  ;;  %v4717_v22 = vsel %vm1641_vm10, %v4710_v31, %v10437_v9  ;;  %v6863_v9 = vld [vmem:[%s11418_s3 + $0x4c] sm:$0xf] }
 0x2a1   : > { %6061 = vrot.lane.b32.xlu1 %v10343_v20, %s11505_s30  ;;  %8019 = vmatprep.subr.bf16.mxu0 %v11536_v18  ;;  %v10488_v19 = vpop.f32.mrb[80].mxu0 }
 0x2a2   : > { %2289 = vst.msk [vmem:[#allocation2] sm:$0xff] %vm378_vm4, %v2288_v4  ;;  %6059 = vrot.lane.b32.xlu0 %v10061_v1, %s11505_s30  ;;  %v7743_v53 = vpop.f32.mrb[81].mxu0  ;;  %s6483_s30 = sadd.s32 3, %s8559_s28 }
 0x2a3   : > { %8010 = vmatpush3.bf16.msra.mxu1 %v4541_v11  ;;  %v10496_v25 = vpop.permute.xlu1 %4776  ;;  %v2936_v39 = vpop.f32.mrb[82].mxu0  ;;  %p6484_p13 = scmp.lt.s32.totalorder %s6483_s30, 8 }
 0x2a4   : > { %8020 = vmatpush3.bf16.msra.mxu0 %v4602_v29  ;;  %8025 = vmatprep.subr.bf16.mxu1 %v11536_v18  ;;  %v4775_v8 = vpop.permute.xlu0 %4774  ;;  %v7744_v3 = vpop.f32.mrb[83].mxu0 }
 0x2a5   : > { %6118 = vrot.lane.b32.xlu1 %v10321_v41, %s11506_s8  ;;  %8035 = vmatprep.subr.bf16.mxu0 %v11536_v18  ;;  %v4779_v3 = vsel %vm1710_vm11, %v4775_v8, %v10496_v25 }
 0x2a6   : > { %6116 = vrot.lane.b32.xlu0 %v10068_v24, %s11506_s8  ;;  %8012 = vmatmul.mubr.msk.bf16.vlgmr.msra.gmra.mrb[132].mxu1 %vm397_vm3, %v6859_v54  ;;  %v4778_v54 = vsel %vm1710_vm11, %v10482_v7, %v10477_v37 }
 0x2a7   : > { %8022 = vmatmul.mubr.msk.bf16.vlgmr.msra.gmra.mrb[136].mxu0 %vm397_vm3, %v6861_v21  ;;  %8026 = vmatpush3.bf16.msra.mxu1 %v9170_v46  ;;  %v4834_v61 = vpop.permute.xlu1 %4833  ;;  %v4718_v46 = vsel %vm1641_vm10, %v4714_v2, %v4716_v50  ;;  %v6865_v2 = vld [vmem:[%s11418_s3 + $0x50] sm:$0xf] }
 0x2a8   : > { %8036 = vmatpush3.bf16.msra.mxu0 %v9198_v60  ;;  %8027 = vmatprep.subr.bf16.mxu1 %v11536_v18  ;;  %v4832_v62 = vpop.permute.xlu0 %4831 }
 0x2a9   : > { %v2290_v35 = vld [vmem:[#allocation2] sm:$0xff]  ;;  %6122 = vrot.lane.b32.xlu1 %v10343_v20, %s11506_s8  ;;  %8037 = vmatprep.subr.bf16.mxu0 %v11536_v18 }
 0x2aa   : > { %v2346_v60 = vadd.f32 %v10182_v6, %v2290_v35  ;;  %6120 = vrot.lane.b32.xlu0 %v10061_v1, %s11506_s8  ;;  %8031 = vmatprep.mubr.msk.bf16.mxu1 %vm8467_vm1, %v11536_v18  ;;  %v4724_v6 = vsel %vm401_vm2, %v4718_v46, 0  ;;  %s6485_s8 = scalar_select %p6484_p13, 1, 0 }
 0x2ab   : > { %8028 = vmatpush3.bf16.msra.mxu1 %v4656_v44  ;;  %8041 = vmatprep.mubr.msk.bf16.mxu0 %vm8467_vm1, %v11536_v18  ;;  %v4838_v15 = vpop.permute.xlu1 %4837  ;;  %v4839_v44 = vsel %vm1779_vm12, %v4832_v62, %v4834_v61  ;;  %v6867_v61 = vld [vmem:[%s11418_s3 + $0x54] sm:$0xf] }
 0x2ac   : > { %2347 = vst.msk [vmem:[#allocation2] sm:$0xff] %vm378_vm4, %v2346_v60  ;;  %8038 = vmatpush3.bf16.msra.mxu0 %v4717_v22  ;;  %8029 = vmatprep.subr.bf16.mxu1 %v11536_v18  ;;  %v4836_v56 = vpop.permute.xlu0 %4835  ;;  %v6869_v22 = vld [vmem:[%s11418_s3 + $0x58] sm:$0xf]  ;;  %s6486_s22 = scvt.s32.f32 %s6485_s8 }
 0x2ad   : > { %6179 = vrot.lane.b32.xlu1 %v10321_v41, %s11507_s9  ;;  %8039 = vmatprep.subr.bf16.mxu0 %v11536_v18 }
 0x2ae   : > { %6177 = vrot.lane.b32.xlu0 %v10068_v24, %s11507_s9  ;;  %v10540_v30 = vpop.f32.mrb[80].mxu1 }
 0x2af   : > { %8030 = vmatpush3.bf16.msra.mxu1 %v4663_v42  ;;  %v4895_v31 = vpop.permute.xlu1 %4894  ;;  %v7753_v50 = vpop.f32.mrb[81].mxu1 }
 0x2b0   : > { %8040 = vmatpush3.bf16.msra.mxu0 %v4724_v6  ;;  %8045 = vmatprep.subr.bf16.mxu1 %v11536_v18  ;;  %v4893_v59 = vpop.permute.xlu0 %4892  ;;  %v3003_v11 = vpop.f32.mrb[82].mxu1 }
 0x2b1   : > { %6183 = vrot.lane.b32.xlu1 %v10343_v20, %s11507_s9  ;;  %8055 = vmatprep.subr.bf16.mxu0 %v11536_v18  ;;  %v7754_v4 = vpop.f32.mrb[83].mxu1 }
 0x2b2   : > { %6181 = vrot.lane.b32.xlu0 %v10061_v1, %s11507_s9  ;;  %8032 = vmatmul.mubr.msk.bf16.vlgmr.msra.gmra.mrb[136].mxu1 %vm397_vm3, %v6863_v9  ;;  %v6871_v4 = vld [vmem:[%s11418_s3 + $0x5c] sm:$0xf]  ;;  %s11550_s9 = scalar_lea.vmem (!%p6930_p0), %s11549_s5, %s8565_s10 }
 0x2b3   : > { %v2348_v29 = vld [vmem:[#allocation2] sm:$0xff]  ;;  %8042 = vmatmul.mubr.msk.bf16.vlgmr.msra.gmra.mrb[140].mxu0 %vm397_vm3, %v6865_v2  ;;  %8046 = vmatpush3.bf16.msra.mxu1 %v9226_v26  ;;  %v4899_v53 = vpop.permute.xlu1 %4898  ;;  %v4840_v26 = vsel %vm1779_vm12, %v4836_v56, %v4838_v15  ;;  %v4900_v56 = vsel %vm1848_vm13, %v4893_v59, %v4895_v31 }
 0x2b4   : > { %v2404_v39 = vadd.f32 %v10202_v38, %v2348_v29  ;;  %8056 = vmatpush3.bf16.msra.mxu0 %v9258_v40  ;;  %8047 = vmatprep.subr.bf16.mxu1 %v11536_v18  ;;  %v4897_v21 = vpop.permute.xlu0 %4896  ;;  %v4785_v38 = vsel %vm401_vm2, %v4779_v3, 0  ;;  %v4846_v7 = vsel %vm401_vm2, %v4840_v26, 0 }
 0x2b5   : > { %6240 = vrot.lane.b32.xlu1 %v10321_v41, %s11508_s19  ;;  %8057 = vmatprep.subr.bf16.mxu0 %v11536_v18 }
 0x2b6   : > { %2405 = vst.msk [vmem:[#allocation2] sm:$0xff] %vm378_vm4, %v2404_v39  ;;  %6238 = vrot.lane.b32.xlu0 %v10068_v24, %s11508_s19  ;;  %8051 = vmatprep.mubr.msk.bf16.mxu1 %vm8467_vm1, %v11536_v18  ;;  %v6873_v39 = vld [vmem:[%s11418_s3 + $0x60] sm:$0xf] }
 0x2b7   : > { %8048 = vmatpush3.bf16.msra.mxu1 %v4778_v54  ;;  %8061 = vmatprep.mubr.msk.bf16.mxu0 %vm8467_vm1, %v11536_v18  ;;  %v4956_v40 = vpop.permute.xlu1 %4955 }
 0x2b8   : > { %8058 = vmatpush3.bf16.msra.mxu0 %v4839_v44  ;;  %8049 = vmatprep.subr.bf16.mxu1 %v11536_v18  ;;  %v4954_v37 = vpop.permute.xlu0 %4953 }
 0x2b9   : > { %6244 = vrot.lane.b32.xlu1 %v10343_v20, %s11508_s19  ;;  %8059 = vmatprep.subr.bf16.mxu0 %v11536_v18  ;;  %v10583_v25 = vpop.f32.mrb[84].mxu0  ;;  %v4961_v9 = vsel %vm1917_vm14, %v4954_v37, %v4956_v40 }
 0x2ba   : > { %6242 = vrot.lane.b32.xlu0 %v10061_v1, %s11508_s19  ;;  %v7763_v8 = vpop.f32.mrb[85].mxu0 }
 0x2bb   : > { %8050 = vmatpush3.bf16.msra.mxu1 %v4785_v38  ;;  %v4960_v62 = vpop.permute.xlu1 %4959  ;;  %v3070_v43 = vpop.f32.mrb[86].mxu0  ;;  %v5043_v8 = vld [vmem:[%s11418_s3] sm:$0xf] }
 0x2bc   : > { %8060 = vmatpush3.bf16.msra.mxu0 %v4846_v7  ;;  %8065 = vmatprep.subr.bf16.mxu1 %v11536_v18  ;;  %v4958_v35 = vpop.permute.xlu0 %4957  ;;  %v7764_v46 = vpop.f32.mrb[87].mxu0 }
 0x2bd   : > { %v2406_v60 = vld [vmem:[#allocation2] sm:$0xff]  ;;  %6301 = vrot.lane.b32.xlu1 %v10321_v41, %s11509_s18  ;;  %8075 = vmatprep.subr.bf16.mxu0 %v11536_v18 }
 0x2be   : > { %v2462_v15 = vadd.f32 %v10245_v33, %v2406_v60  ;;  %6299 = vrot.lane.b32.xlu0 %v10068_v24, %s11509_s18  ;;  %8052 = vmatmul.mubr.msk.bf16.vlgmr.msra.gmra.mrb[140].mxu1 %vm397_vm3, %v6867_v61  ;;  %v4901_v33 = vsel %vm1848_vm13, %v4897_v21, %v4899_v53  ;;  %v1980_v60 = vlaneseq }
 0x2bf   : > { %8062 = vmatmul.mubr.msk.bf16.vlgmr.msra.gmra.mrb[144].mxu0 %vm397_vm3, %v6869_v22  ;;  %8066 = vmatpush3.bf16.msra.mxu1 %v9297_v63  ;;  %v5102_v42 = vpop.permute.xlu1 %5101  ;;  %v4962_v63 = vsel %vm1917_vm14, %v4958_v35, %v4960_v62  ;;  %v4907_v31 = vsel %vm401_vm2, %v4901_v33, 0 }
 0x2c0   : > { %2463 = vst.msk [vmem:[#allocation2] sm:$0xff] %vm378_vm4, %v2462_v15  ;;  %8076 = vmatpush3.bf16.msra.mxu0 %v9326_v28  ;;  %8067 = vmatprep.subr.bf16.mxu1 %v11536_v18  ;;  %v5100_v6 = vpop.permute.xlu0 %5099  ;;  %v4968_v2 = vsel %vm401_vm2, %v4962_v63, 0  ;;  %v5108_v38 = vsel %vm401_vm2, %v5102_v42, 0  ;;  %v1981_v63 = vshrl.u32 %v1980_v60, 7 }
 0x2c1   : > { %6305 = vrot.lane.b32.xlu1 %v10343_v20, %s11509_s18  ;;  %8077 = vmatprep.subr.bf16.mxu0 %v11536_v18 }
 0x2c2   : > { %6303 = vrot.lane.b32.xlu0 %v10061_v1, %s11509_s18  ;;  %8071 = vmatprep.mubr.msk.bf16.mxu1 %vm8467_vm1, %v11536_v18  ;;  %s11552_s18 = scalar_lea.vmem (!%p6930_p0), %s11551_s16, %s8565_s10 }
 0x2c3   : > { %8068 = vmatpush3.bf16.msra.mxu1 %v4900_v56  ;;  %8081 = vmatprep.mubr.msk.bf16.mxu0 %vm8467_vm1, %v11536_v18  ;;  %v10619_v28 = vpop.permute.xlu1 %5156 }
 0x2c4   : > { %8078 = vmatpush3.bf16.msra.mxu0 %v4961_v9  ;;  %8069 = vmatprep.subr.bf16.mxu1 %v11536_v18  ;;  %v10623_v50 = vpop.permute.xlu0 %5154  ;;  %v5163_v46 = vsel %vm401_vm2, %v10619_v28, 0  ;;  %v6883_v9 = vld [vmem:[%s11418_s3 + $0xc] sm:$0xf] }
 0x2c5   : > { %6362 = vrot.lane.b32.xlu1 %v10321_v41, %s11529_s1  ;;  %8079 = vmatprep.subr.bf16.mxu0 %v11536_v18 }
 0x2c6   : > { %6360 = vrot.lane.b32.xlu0 %v10068_v24, %s11529_s1  ;;  %v10631_v59 = vpop.f32.mrb[84].mxu1 }
 0x2c7   : > { %v2464_v11 = vld [vmem:[#allocation2] sm:$0xff]  ;;  %8070 = vmatpush3.bf16.msra.mxu1 %v4907_v31  ;;  %v10636_v29 = vpop.permute.xlu1 %5211  ;;  %v7773_v53 = vpop.f32.mrb[85].mxu1 }
 0x2c8   : > { %v2520_v54 = vadd.f32 %v10263_v16, %v2464_v11  ;;  %8080 = vmatpush3.bf16.msra.mxu0 %v4968_v2  ;;  %8085 = vmatprep.subr.bf16.mxu1 %v11536_v18  ;;  %v5210_v21 = vpop.permute.xlu0 %5209  ;;  %v3137_v3 = vpop.f32.mrb[86].mxu1  ;;  %v5218_v42 = vsel %vm401_vm2, %v10636_v29, 0  ;;  %v10752_v53 = vsub.s32 0, %v1981_v63 }
 0x2c9   : > { %6366 = vrot.lane.b32.xlu1 %v10343_v20, %s11529_s1  ;;  %8095 = vmatprep.subr.bf16.mxu0 %v11536_v18  ;;  %v7774_v44 = vpop.f32.mrb[87].mxu1 }
 0x2ca   : > { %2521 = vst.msk [vmem:[#allocation2] sm:$0xff] %vm378_vm4, %v2520_v54  ;;  %6364 = vrot.lane.b32.xlu0 %v10061_v1, %s11529_s1  ;;  %8072 = vmatmul.mubr.msk.bf16.vlgmr.msra.gmra.mrb[144].mxu1 %vm397_vm3, %v6871_v4  ;;  %s3547_s1 = sadd.s32 1, %s8559_s28 }
 0x2cb   : > { %8082 = vmatmul.mubr.msk.bf16.vlgmr.msra.gmra.mrb[148].mxu0 %vm397_vm3, %v6873_v39  ;;  %8086 = vmatpush3.bf16.msra.mxu1 %v9027_v13  ;;  %v10652_v16 = vpop.permute.xlu1 %5266  ;;  %p11154_p11 = scmp.lt.s32.totalorder %s3547_s1, 8 }
 0x2cc   : > { %8096 = vmatpush3.bf16.msra.mxu0 %v9345_v36  ;;  %8087 = vmatprep.subr.bf16.mxu1 %v11536_v18  ;;  %v10656_v26 = vpop.permute.xlu0 %5264  ;;  %v5053_v36 = vsel %vm401_vm2, %v10061_v1, 0 }
 0x2cd   : > { %6423 = vrot.lane.b32.xlu1 %v10321_v41, %s11530_s6  ;;  %8097 = vmatprep.subr.bf16.mxu0 %v11536_v18  ;;  %s3549_s20 = scalar_select %p11154_p11, 1, 0 }
 0x2ce   : > { %6421 = vrot.lane.b32.xlu0 %v10068_v24, %s11530_s6  ;;  %8091 = vmatprep.mubr.msk.bf16.mxu1 %vm8467_vm1, %v11536_v18 }
 0x2cf   : > { %8088 = vmatpush3.bf16.msra.mxu1 %v10068_v24  ;;  %8101 = vmatprep.mubr.msk.bf16.mxu0 %vm8467_vm1, %v11536_v18  ;;  %v10668_v13 = vpop.permute.xlu1 %5321  ;;  %s3550_s7 = scvt.s32.f32 %s3549_s20 }
 0x2d0   : > { %8098 = vmatpush3.bf16.msra.mxu0 %v5100_v6  ;;  %8089 = vmatprep.subr.bf16.mxu1 %v11536_v18  ;;  %v10673_v41 = vpop.permute.xlu0 %5319 }
 0x2d1   : > { %v2522_v40 = vld [vmem:[#allocation2] sm:$0xff]  ;;  %6427 = vrot.lane.b32.xlu1 %v10343_v20, %s11530_s6  ;;  %8099 = vmatprep.subr.bf16.mxu0 %v11536_v18  ;;  %v10679_v24 = vpop.f32.mrb[88].mxu0 }
 0x2d2   : > { %v2578_v37 = vadd.f32 %v10301_v45, %v2522_v40  ;;  %6425 = vrot.lane.b32.xlu0 %v10061_v1, %s11530_s6  ;;  %v7783_v7 = vpop.f32.mrb[89].mxu0  ;;  %v6879_v45 = vld [vmem:[%s11418_s3 + $0x4] sm:$0xf]  ;;  %s1975_s6 = scalar_select %p1974_p10, 1, 0 }
 0x2d3   : > { %8090 = vmatpush3.bf16.msra.mxu1 %v5053_v36  ;;  %v10687_v61 = vpop.permute.xlu1 %5376  ;;  %v3204_v62 = vpop.f32.mrb[90].mxu0 }
 0x2d4   : > { %2579 = vst.msk [vmem:[#allocation2] sm:$0xff] %vm378_vm4, %v2578_v37  ;;  %8100 = vmatpush3.bf16.msra.mxu0 %v5108_v38  ;;  %8105 = vmatprep.subr.bf16.mxu1 %v11536_v18  ;;  %v10694_v20 = vpop.permute.xlu0 %5374  ;;  %v7784_v1 = vpop.f32.mrb[91].mxu0  ;;  %s1976_s13 = scvt.s32.f32 %s1975_s6 }
 0x2d5   : > { %8115 = vmatprep.subr.bf16.mxu0 %v11536_v18 }
 0x2d6   : > { %8092 = vmatmul.mubr.msk.bf16.vlgmr.msra.gmra.mrb[148].mxu1 %vm397_vm3, %v5043_v8  ;;  %v1977_v2 = vstv %s1976_s13 }
 0x2d7   : > { %8102 = vmatmul.mubr.msk.bf16.vlgmr.msra.gmra.mrb[152].mxu0 %vm397_vm3, %v6879_v45  ;;  %8106 = vmatpush3.bf16.msra.mxu1 %v9373_v49  ;;  %v10701_v43 = vpop.permute.xlu1 %5431 }
 0x2d8   : > { %8116 = vmatpush3.bf16.msra.mxu0 %v9383_v55  ;;  %8107 = vmatprep.subr.bf16.mxu1 %v11536_v18  ;;  %v10705_v22 = vpop.permute.xlu0 %5429 }
 0x2d9   : > { %8117 = vmatprep.subr.bf16.mxu0 %v11536_v18  ;;  %8111 = vmatprep.mubr.msk.bf16.mxu1 %vm8467_vm1, %v11536_v18 }
 0x2da   : > { %8121 = vmatprep.mubr.msk.bf16.mxu0 %vm8467_vm1, %v11536_v18 }
 0x2db   : > { %v2580_v35 = vld [vmem:[#allocation2] sm:$0xff]  ;;  %8108 = vmatpush3.bf16.msra.mxu1 %v10623_v50  ;;  %v10713_v49 = vpop.permute.xlu1 %5486 }
 0x2dc   : > { %v2636_v55 = vadd.f32 %v10323_v23, %v2580_v35  ;;  %8118 = vmatpush3.bf16.msra.mxu0 %v5210_v21  ;;  %8109 = vmatprep.subr.bf16.mxu1 %v11536_v18  ;;  %v10719_v15 = vpop.permute.xlu0 %5484  ;;  %v6881_v23 = vld [vmem:[%s11418_s3 + $0x8] sm:$0xf]  ;;  %v10742_v50 = vld [vmem:[%s11417_s2] sm:$0x1]  ;;  %v5273_v21 = vsel %vm401_vm2, %v10652_v16, 0 }
 0x2dd   : > { %8119 = vmatprep.subr.bf16.mxu0 %v11536_v18  ;;  %v1978_v29 = vmul.f32 %v1977_v2, %v10742_v50  ;;  %v6885_v16 = vld [vmem:[%s11418_s3 + $0x10] sm:$0xf] }
 0x2de   : > { %2637 = vst.msk [vmem:[#allocation2] sm:$0xff] %vm378_vm4, %v2636_v55  ;;  %v10725_v56 = vpop.f32.mrb[88].mxu1 }
 0x2df   : > { %8110 = vmatpush3.bf16.msra.mxu1 %v5163_v46  ;;  %v10730_v6 = vpop.permute.xlu1 %5541  ;;  %v7793_v33 = vpop.f32.mrb[89].mxu1  ;;  %v1983_v3 = vrot.slane %v1978_v29, %v10752_v53  ;;  %v5438_v46 = vsel %vm401_vm2, %v10701_v43, 0  ;;  %v6891_v43 = vld [vmem:[%s11418_s3 + $0x1c] sm:$0xf] }
 0x2e0   : > { %8120 = vmatpush3.bf16.msra.mxu0 %v5218_v42  ;;  %8125 = vmatprep.subr.bf16.mxu1 %v11536_v18  ;;  %v10736_v28 = vpop.permute.xlu0 %5539  ;;  %v3271_v31 = vpop.f32.mrb[90].mxu1 }
 0x2e1   : > { %8135 = vmatprep.subr.bf16.mxu0 %v11536_v18  ;;  %v7794_v11 = vpop.f32.mrb[91].mxu1  ;;  %v1985_v38 = vmul.f32 %v1983_v3, %v10222_v52 }
 0x2e2   : > { %8112 = vmatmul.mubr.msk.bf16.vlgmr.msra.gmra.mrb[152].mxu1 %vm397_vm3, %v6881_v23  ;;  %v5548_v11 = vsel %vm401_vm2, %v10730_v6, 0  ;;  %v6895_v6 = vld [vmem:[%s11418_s3 + $0x24] sm:$0xf] }
 0x2e3   : > { %8122 = vmatmul.mubr.msk.bf16.vlgmr.msra.gmra.mrb[156].mxu0 %vm397_vm3, %v6883_v9  ;;  %8126 = vmatpush3.bf16.msra.mxu1 %v9409_v17  ;;  %v10747_v4 = vpop.permute.xlu1 %5596  ;;  %v1987_v52 = vsel %vm378_vm4, %v1985_v38, 0.0  ;;  %v1994_v1 = vmul.f32 %v1985_v38, %v1985_v38 }
 0x2e4   : > { %8136 = vmatpush3.bf16.msra.mxu0 %v9420_v27  ;;  %8127 = vmatprep.subr.bf16.mxu1 %v11536_v18  ;;  %v10754_v54 = vpop.permute.xlu0 %5594 }
 0x2e5   : > { %v2638_v39 = vld [vmem:[#allocation2] sm:$0xff]  ;;  %8137 = vmatprep.subr.bf16.mxu0 %v11536_v18  ;;  %8131 = vmatprep.mubr.msk.bf16.mxu1 %vm8467_vm1, %v11536_v18 }
 0x2e6   : > { %v2694_v17 = vadd.f32 %v10365_v5, %v2638_v39  ;;  %8141 = vmatprep.mubr.msk.bf16.mxu0 %vm8467_vm1, %v11536_v18  ;;  %v5328_v5 = vsel %vm401_vm2, %v10668_v13, 0  ;;  %v6887_v13 = vld [vmem:[%s11418_s3 + $0x14] sm:$0xf] }
 0x2e7   : > { %8128 = vmatpush3.bf16.msra.mxu1 %v10656_v26  ;;  %v10763_v27 = vpop.permute.xlu1 %5651 }
 0x2e8   : > { %2695 = vst.msk [vmem:[#allocation2] sm:$0xff] %vm378_vm4, %v2694_v17  ;;  %8138 = vmatpush3.bf16.msra.mxu0 %v10673_v41  ;;  %8129 = vmatprep.subr.bf16.mxu1 %v11536_v18  ;;  %v10771_v44 = vpop.permute.xlu0 %5649 }
 0x2e9   : > { %8139 = vmatprep.subr.bf16.mxu0 %v11536_v18  ;;  %v10776_v26 = vpop.f32.mrb[92].mxu0 }
 0x2ea   : > { %v7803_v36 = vpop.f32.mrb[93].mxu0 }
 0x2eb   : > { %8130 = vmatpush3.bf16.msra.mxu1 %v5273_v21  ;;  %v10781_v41 = vpop.permute.xlu1 %5706  ;;  %v3338_v40 = vpop.f32.mrb[94].mxu0 }
 0x2ec   : > { %8140 = vmatpush3.bf16.msra.mxu0 %v5328_v5  ;;  %8145 = vmatprep.subr.bf16.mxu1 %v11536_v18  ;;  %v10788_v37 = vpop.permute.xlu0 %5704  ;;  %v7804_v7 = vpop.f32.mrb[95].mxu0  ;;  %v5658_v40 = vsel %vm401_vm2, %v10763_v27, 0  ;;  %v6899_v27 = vld [vmem:[%s11418_s3 + $0x2c] sm:$0xf] }
 0x2ed   : > { %8155 = vmatprep.subr.bf16.mxu0 %v11536_v18 }
 0x2ee   : > { %8132 = vmatmul.mubr.msk.bf16.vlgmr.msra.gmra.mrb[156].mxu1 %vm397_vm3, %v6885_v16 }
 0x2ef   : > { %v2696_v8 = vld [vmem:[#allocation2] sm:$0xff]  ;;  %8142 = vmatmul.mubr.msk.bf16.vlgmr.msra.gmra.mrb[160].mxu0 %vm397_vm3, %v6887_v13  ;;  %8146 = vmatpush3.bf16.msra.mxu1 %v9448_v57  ;;  %v10794_v62 = vpop.permute.xlu1 %5761 }
 0x2f0   : > { %v2752_v45 = vadd.f32 %v10384_v32, %v2696_v8  ;;  %8156 = vmatpush3.bf16.msra.mxu0 %v9458_v0  ;;  %8147 = vmatprep.subr.bf16.mxu1 %v11536_v18  ;;  %v10800_v35 = vpop.permute.xlu0 %5759  ;;  %v5383_v0 = vsel %vm401_vm2, %v10687_v61, 0  ;;  %v1995_v32 = vsel %vm378_vm4, %v1994_v1, 0.0  ;;  %v6889_v61 = vld [vmem:[%s11418_s3 + $0x18] sm:$0xf] }
 0x2f1   : > { %1988 = vadd.xlane.f32.xlu0 %v1987_v52  ;;  %8157 = vmatprep.subr.bf16.mxu0 %v11536_v18 }
 0x2f2   : > { %2753 = vst.msk [vmem:[#allocation2] sm:$0xff] %vm378_vm4, %v2752_v45  ;;  %8151 = vmatprep.mubr.msk.bf16.mxu1 %vm8467_vm1, %v11536_v18  ;;  %8161 = vmatprep.mubr.msk.bf16.mxu0 %vm8467_vm1, %v11536_v18 }
 0x2f3   : > { %8148 = vmatpush3.bf16.msra.mxu1 %v10694_v20  ;;  %v10809_v57 = vpop.permute.xlu1 %5816 }
 0x2f4   : > { %8158 = vmatpush3.bf16.msra.mxu0 %v10705_v22  ;;  %8149 = vmatprep.subr.bf16.mxu1 %v11536_v18  ;;  %v10816_v55 = vpop.permute.xlu0 %5814 }
 0x2f5   : > { %8159 = vmatprep.subr.bf16.mxu0 %v11536_v18  ;;  %1996 = vadd.xlane.f32.xlu1 %v1995_v32 }
 0x2f6   : > { %v10821_v20 = vpop.f32.mrb[92].mxu1 }
 0x2f7   : > { %8150 = vmatpush3.bf16.msra.mxu1 %v5383_v0  ;;  %v10826_v22 = vpop.permute.xlu1 %5874  ;;  %v7813_v60 = vpop.f32.mrb[93].mxu1 }
 0x2f8   : > { %8160 = vmatpush3.bf16.msra.mxu0 %v5438_v46  ;;  %8165 = vmatprep.subr.bf16.mxu1 %v11536_v18  ;;  %v10832_v42 = vpop.permute.xlu0 %5872  ;;  %v3405_v23 = vpop.f32.mrb[94].mxu1 }
 0x2f9   : > { %v2754_v33 = vld [vmem:[#allocation2] sm:$0xff]  ;;  %8175 = vmatprep.subr.bf16.mxu0 %v11536_v18  ;;  %v7814_v9 = vpop.f32.mrb[95].mxu1 }
 0x2fa   : > { %v2810_v63 = vadd.f32 %v10429_v51, %v2754_v33  ;;  %8152 = vmatmul.mubr.msk.bf16.vlgmr.msra.gmra.mrb[160].mxu1 %vm397_vm3, %v6889_v61  ;;  %v5493_v51 = vsel %vm401_vm2, %v10713_v49, 0  ;;  %v6893_v49 = vld [vmem:[%s11418_s3 + $0x20] sm:$0xf] }
 0x2fb   : > { %8162 = vmatmul.mubr.msk.bf16.vlgmr.msra.gmra.mrb[164].mxu0 %vm397_vm3, %v6891_v43  ;;  %8166 = vmatpush3.bf16.msra.mxu1 %v9487_v14  ;;  %v10839_v31 = vpop.permute.xlu1 %5878  ;;  %v5768_v43 = vsel %vm401_vm2, %v10794_v62, 0  ;;  %v6903_v62 = vld [vmem:[%s11418_s3 + $0x34] sm:$0xf] }
 0x2fc   : > { %2811 = vst.msk [vmem:[#allocation2] sm:$0xff] %vm378_vm4, %v2810_v63  ;;  %8176 = vmatpush3.bf16.msra.mxu0 %v9497_v48  ;;  %8167 = vmatprep.subr.bf16.mxu1 %v11536_v18  ;;  %v10844_v2 = vpop.permute.xlu0 %5876 }
 0x2fd   : > { %8177 = vmatprep.subr.bf16.mxu0 %v11536_v18  ;;  %8171 = vmatprep.mubr.msk.bf16.mxu1 %vm8467_vm1, %v11536_v18 }
 0x2fe   : > { %8181 = vmatprep.mubr.msk.bf16.mxu0 %vm8467_vm1, %v11536_v18 }
 0x2ff   : > { %8168 = vmatpush3.bf16.msra.mxu1 %v10719_v15  ;;  %v10852_v14 = vpop.permute.xlu1 %5935 }
 0x300   : > { %8178 = vmatpush3.bf16.msra.mxu0 %v10736_v28  ;;  %8169 = vmatprep.subr.bf16.mxu1 %v11536_v18  ;;  %v10858_v48 = vpop.permute.xlu0 %5933 }
 0x301   : > { %8179 = vmatprep.subr.bf16.mxu0 %v11536_v18  ;;  %v10863_v29 = vpop.f32.mrb[96].mxu0 }
 0x302   : > { %v7823_v39 = vpop.f32.mrb[97].mxu0 }
 0x303   : > { %v2812_v15 = vld [vmem:[#allocation2] sm:$0xff]  ;;  %8170 = vmatpush3.bf16.msra.mxu1 %v5493_v51  ;;  %v10868_v17 = vpop.permute.xlu1 %5939  ;;  %v3472_v28 = vpop.f32.mrb[98].mxu0  ;;  %v11537_v39 = vld [vmem:[#allocation10_spill] sm:$0xff] }
 0x304   : > { %v2868_v21 = vadd.f32 %v10447_v10, %v2812_v15  ;;  %8180 = vmatpush3.bf16.msra.mxu0 %v5548_v11  ;;  %8185 = vmatprep.subr.bf16.mxu1 %v11536_v18  ;;  %v10875_v3 = vpop.permute.xlu0 %5937  ;;  %v7824_v5 = vpop.f32.mrb[99].mxu0  ;;  %v5880_v28 = vsel %vm1296_vm5, %v10832_v42, %v10826_v22  ;;  %v5823_v22 = vsel %vm401_vm2, %v10809_v57, 0  ;;  %v6905_v57 = vld [vmem:[%s11418_s3 + $0x38] sm:$0xf] }
 0x305   : > { %8195 = vmatprep.subr.bf16.mxu0 %v11536_v18 }
 0x306   : > { %2869 = vst.msk [vmem:[#allocation2] sm:$0xff] %vm378_vm4, %v2868_v21  ;;  %8172 = vmatmul.mubr.msk.bf16.vlgmr.msra.gmra.mrb[164].mxu1 %vm397_vm3, %v6893_v49  ;;  %v11538_v49 = vld [vmem:[#allocation11_spill] sm:$0xff] }
 0x307   : > { %8182 = vmatmul.mubr.msk.bf16.vlgmr.msra.gmra.mrb[168].mxu0 %vm397_vm3, %v6895_v6  ;;  %8186 = vmatpush3.bf16.msra.mxu1 %v9528_v34  ;;  %v10882_v10 = vpop.permute.xlu1 %5996  ;;  %v5603_v34 = vsel %vm401_vm2, %v10747_v4, 0  ;;  %v6897_v4 = vld [vmem:[%s11418_s3 + $0x28] sm:$0xf]  ;;  %v5881_v6 = vsel %vm1296_vm5, %v10844_v2, %v10839_v31 }
 0x308   : > { %8196 = vmatpush3.bf16.msra.mxu0 %v9540_v47  ;;  %8187 = vmatprep.subr.bf16.mxu1 %v11536_v18  ;;  %v10886_v36 = vpop.permute.xlu0 %5994  ;;  %v5887_v31 = vsel %vm401_vm2, %v5881_v6, 0 }
 0x309   : > { %8197 = vmatprep.subr.bf16.mxu0 %v11536_v18  ;;  %8191 = vmatprep.mubr.msk.bf16.mxu1 %vm8467_vm1, %v11536_v18 }
 0x30a   : > { %8201 = vmatprep.mubr.msk.bf16.mxu0 %vm8467_vm1, %v11536_v18 }
 0x30b   : > { %8188 = vmatpush3.bf16.msra.mxu1 %v10754_v54  ;;  %v10894_v16 = vpop.permute.xlu1 %6000 }
 0x30c   : > { %8198 = vmatpush3.bf16.msra.mxu0 %v10771_v44  ;;  %8189 = vmatprep.subr.bf16.mxu1 %v11536_v18  ;;  %v10900_v47 = vpop.permute.xlu0 %5998 }
 0x30d   : > { %v2870_v13 = vld [vmem:[#allocation2] sm:$0xff]  ;;  %8199 = vmatprep.subr.bf16.mxu0 %v11536_v18  ;;  %v10905_v38 = vpop.f32.mrb[96].mxu1 }
 0x30e   : > { %v2939_v54 = vadd.f32 %v10488_v19, %v2870_v13  ;;  %v7833_v7 = vpop.f32.mrb[97].mxu1  ;;  %v10908_v8 = vpop.f32.mrb[100].mxu0  ;;  %v6907_v13 = vld [vmem:[%s11418_s3 + $0x3c] sm:$0xf] }
 0x30f   : > { %8190 = vmatpush3.bf16.msra.mxu1 %v5603_v34  ;;  %v3539_v44 = vpop.f32.mrb[98].mxu1  ;;  %v10919_v19 = vpop.permute.xlu1 %6057 }
 0x310   : > { %2940 = vst.msk [vmem:[#allocation2] sm:$0xff] %vm378_vm4, %v2939_v54  ;;  %8200 = vmatpush3.bf16.msra.mxu0 %v5658_v40  ;;  %8205 = vmatprep.subr.bf16.mxu1 %v11536_v18  ;;  %v7834_v45 = vpop.f32.mrb[99].mxu1  ;;  %v7843_v52 = vpop.f32.mrb[101].mxu0 }
 0x311   : > { %8215 = vmatprep.subr.bf16.mxu0 %v11536_v18  ;;  %v10922_v1 = vpop.permute.xlu0 %6055  ;;  %v3624_v0 = vpop.f32.mrb[102].mxu0  ;;  %v11539_v52 = vld [vmem:[#allocation12_spill] sm:$0xff] }
 0x312   : > { %8192 = vmatmul.mubr.msk.bf16.vlgmr.msra.gmra.mrb[168].mxu1 %vm397_vm3, %v6897_v4  ;;  %v7844_v32 = vpop.f32.mrb[103].mxu0 }
 0x313   : > { %8202 = vmatmul.mubr.msk.bf16.vlgmr.msra.gmra.mrb[172].mxu0 %vm397_vm3, %v6899_v27  ;;  %8206 = vmatpush3.bf16.msra.mxu1 %v9571_v12  ;;  %v10934_v61 = vpop.permute.xlu1 %6061  ;;  %v5713_v12 = vsel %vm401_vm2, %v10781_v41, 0  ;;  %v5941_v32 = vsel %vm1365_vm6, %v10858_v48, %v10852_v14 }
 0x314   : > { %8216 = vmatpush3.bf16.msra.mxu0 %v9584_v58  ;;  %8207 = vmatprep.subr.bf16.mxu1 %v11536_v18 }
 0x315   : > { %8217 = vmatprep.subr.bf16.mxu0 %v11536_v18  ;;  %8211 = vmatprep.mubr.msk.bf16.mxu1 %vm8467_vm1, %v11536_v18  ;;  %v10941_v60 = vpop.permute.xlu0 %6059 }
 0x316   : > { %8221 = vmatprep.mubr.msk.bf16.mxu0 %vm8467_vm1, %v11536_v18  ;;  %v6064_v6 = vsel %vm1503_vm8, %v10941_v60, %v10934_v61 }
 0x317   : > { %v2941_v46 = vld [vmem:[#allocation2] sm:$0xff]  ;;  %8208 = vmatpush3.bf16.msra.mxu1 %v10788_v37  ;;  %v10959_v9 = vpop.permute.xlu1 %6118  ;;  %v6070_v61 = vsel %vm401_vm2, %v6064_v6, 0 }
 0x318   : > { %v3006_v58 = vadd.f32 %v10540_v30, %v2941_v46  ;;  %8218 = vmatpush3.bf16.msra.mxu0 %v10800_v35  ;;  %8209 = vmatprep.subr.bf16.mxu1 %v11536_v18  ;;  %v6901_v30 = vld [vmem:[%s11418_s3 + $0x30] sm:$0xf] }
 0x319   : > { %8219 = vmatprep.subr.bf16.mxu0 %v11536_v18  ;;  %v10946_v23 = vpop.f32.mrb[100].mxu1  ;;  %v10962_v51 = vpop.permute.xlu0 %6116 }
 0x31a   : > { %3007 = vst.msk [vmem:[#allocation2] sm:$0xff] %vm378_vm4, %v3006_v58  ;;  %v7853_v37 = vpop.f32.mrb[101].mxu1  ;;  %v10949_v33 = vpop.f32.mrb[104].mxu0  ;;  %v5942_v58 = vsel %vm1365_vm6, %v10875_v3, %v10868_v17 }
 0x31b   : > { %8210 = vmatpush3.bf16.msra.mxu1 %v5713_v12  ;;  %v3679_v41 = vpop.f32.mrb[102].mxu1  ;;  %v7863_v63 = vpop.f32.mrb[105].mxu0  ;;  %v11540_v12 = vld [vmem:[#allocation13_spill] sm:$0xff]  ;;  %v5948_v48 = vsel %vm401_vm2, %v5942_v58, 0  ;;  %v6913_v37 = vld [vmem:[%s11418_s3 + $0x44] sm:$0xf] }
 0x31c   : > { %8220 = vmatpush3.bf16.msra.mxu0 %v5768_v43  ;;  %8225 = vmatprep.subr.bf16.mxu1 %v11536_v18  ;;  %v7854_v35 = vpop.f32.mrb[103].mxu1  ;;  %v3734_v11 = vpop.f32.mrb[106].mxu0  ;;  %v6002_v43 = vsel %vm1434_vm7, %v10886_v36, %v10882_v10 }
 0x31d   : > { %8235 = vmatprep.subr.bf16.mxu0 %v11536_v18  ;;  %v7864_v15 = vpop.f32.mrb[107].mxu0  ;;  %v10981_v34 = vpop.permute.xlu1 %6122 }
 0x31e   : > { %8212 = vmatmul.mubr.msk.bf16.vlgmr.msra.gmra.mrb[172].mxu1 %vm397_vm3, %v6901_v30  ;;  %v10987_v42 = vpop.permute.xlu0 %6120  ;;  %v11541_v15 = vld [vmem:[#allocation14_spill] sm:$0xff] }
 0x31f   : > { %8222 = vmatmul.mubr.msk.bf16.vlgmr.msra.gmra.mrb[176].mxu0 %vm397_vm3, %v6903_v62  ;;  %8226 = vmatpush3.bf16.msra.mxu1 %v11537_v39 }
 0x320   : > { %8236 = vmatpush3.bf16.msra.mxu0 %v11538_v49  ;;  %8227 = vmatprep.subr.bf16.mxu1 %v11536_v18 }
 0x321   : > { %v3008_v21 = vld [vmem:[#allocation2] sm:$0xff]  ;;  %8237 = vmatprep.subr.bf16.mxu0 %v11536_v18  ;;  %8231 = vmatprep.mubr.msk.bf16.mxu1 %vm8467_vm1, %v11536_v18  ;;  %v11003_v7 = vpop.permute.xlu1 %6179 }
 0x322   : > { %v3073_v5 = vadd.f32 %v10583_v25, %v3008_v21  ;;  %8241 = vmatprep.mubr.msk.bf16.mxu0 %vm8467_vm1, %v11536_v18  ;;  %v11006_v44 = vpop.permute.xlu0 %6177  ;;  %v11542_v21 = vld [vmem:[#allocation15_spill] sm:$0xff] }
 0x323   : > { %8228 = vmatpush3.bf16.msra.mxu1 %v10816_v55 }
 0x324   : > { %3074 = vst.msk [vmem:[#allocation2] sm:$0xff] %vm378_vm4, %v3073_v5  ;;  %8238 = vmatpush3.bf16.msra.mxu0 %v5880_v28  ;;  %8229 = vmatprep.subr.bf16.mxu1 %v11536_v18  ;;  %v6063_v28 = vsel %vm1503_vm8, %v10922_v1, %v10919_v19  ;;  %v6124_v5 = vsel %vm1572_vm9, %v10962_v51, %v10959_v9 }
 0x325   : > { %8239 = vmatprep.subr.bf16.mxu0 %v11536_v18  ;;  %v10991_v25 = vpop.f32.mrb[104].mxu1  ;;  %v11031_v14 = vpop.permute.xlu1 %6183  ;;  %v6125_v19 = vsel %vm1572_vm9, %v10987_v42, %v10981_v34  ;;  %v6915_v34 = vld [vmem:[%s11418_s3 + $0x48] sm:$0xf] }
 0x326   : > { %v7873_v2 = vpop.f32.mrb[105].mxu1  ;;  %v10993_v55 = vpop.f32.mrb[108].mxu0  ;;  %v6131_v9 = vsel %vm401_vm2, %v6125_v19, 0 }
 0x327   : > { %8230 = vmatpush3.bf16.msra.mxu1 %v5823_v22  ;;  %v3789_v40 = vpop.f32.mrb[106].mxu1  ;;  %v7883_v4 = vpop.f32.mrb[109].mxu0 }
 0x328   : > { %8240 = vmatpush3.bf16.msra.mxu0 %v5887_v31  ;;  %8245 = vmatprep.subr.bf16.mxu1 %v11536_v18  ;;  %v7874_v54 = vpop.f32.mrb[107].mxu1  ;;  %v3844_v27 = vpop.f32.mrb[110].mxu0  ;;  %v6917_v40 = vld [vmem:[%s11418_s3 + $0x4c] sm:$0xf] }
 0x329   : > { %8255 = vmatprep.subr.bf16.mxu0 %v11536_v18  ;;  %v7884_v0 = vpop.f32.mrb[111].mxu0  ;;  %v11035_v17 = vpop.permute.xlu0 %6181  ;;  %v11543_v4 = vld [vmem:[#allocation16_spill] sm:$0xff]  ;;  %v11544_v27 = vld [vmem:[#allocation17_spill] sm:$0xff] }
 0x32a   : > { %8232 = vmatmul.mubr.msk.bf16.vlgmr.msra.gmra.mrb[176].mxu1 %vm397_vm3, %v6905_v57  ;;  %v6241_v62 = vpop.permute.xlu1 %6240 }
 0x32b   : > { %v3075_v45 = vld [vmem:[#allocation2] sm:$0xff]  ;;  %8242 = vmatmul.mubr.msk.bf16.vlgmr.msra.gmra.mrb[180].mxu0 %vm397_vm3, %v6907_v13  ;;  %8246 = vmatpush3.bf16.msra.mxu1 %v11539_v52 }
 0x32c   : > { %v3140_v46 = vadd.f32 %v10631_v59, %v3075_v45  ;;  %8256 = vmatpush3.bf16.msra.mxu0 %v11540_v12  ;;  %8247 = vmatprep.subr.bf16.mxu1 %v11536_v18  ;;  %v6003_v59 = vsel %vm1434_vm7, %v10900_v47, %v10894_v16  ;;  %v6911_v16 = vld [vmem:[%s11418_s3 + $0x40] sm:$0xf]  ;;  %v6186_v45 = vsel %vm1641_vm10, %v11035_v17, %v11031_v14 }
 0x32d   : > { %8257 = vmatprep.subr.bf16.mxu0 %v11536_v18  ;;  %8251 = vmatprep.mubr.msk.bf16.mxu1 %vm8467_vm1, %v11536_v18  ;;  %v6009_v3 = vsel %vm401_vm2, %v6003_v59, 0  ;;  %v6239_v11 = vpop.permute.xlu0 %6238 }
 0x32e   : > { %3141 = vst.msk [vmem:[#allocation2] sm:$0xff] %vm378_vm4, %v3140_v46  ;;  %8261 = vmatprep.mubr.msk.bf16.mxu0 %vm8467_vm1, %v11536_v18  ;;  %v6245_v1 = vpop.permute.xlu1 %6244  ;;  %v6246_v52 = vsel %vm1710_vm11, %v6239_v11, %v6241_v62  ;;  %v6192_v46 = vsel %vm401_vm2, %v6186_v45, 0  ;;  %v3551_v45 = vstv %s3550_s7 }
 0x32f   : > { %8248 = vmatpush3.bf16.msra.mxu1 %v5941_v32 }
 0x330   : > { %8258 = vmatpush3.bf16.msra.mxu0 %v6002_v43  ;;  %8249 = vmatprep.subr.bf16.mxu1 %v11536_v18 }
 0x331   : > { %8259 = vmatprep.subr.bf16.mxu0 %v11536_v18  ;;  %v11039_v10 = vpop.f32.mrb[108].mxu1  ;;  %v6243_v60 = vpop.permute.xlu0 %6242 }
 0x332   : > { %v7893_v36 = vpop.f32.mrb[109].mxu1  ;;  %v11049_v35 = vpop.f32.mrb[112].mxu0  ;;  %v6247_v32 = vsel %vm1710_vm11, %v6243_v60, %v6245_v1 }
 0x333   : > { %8250 = vmatpush3.bf16.msra.mxu1 %v5948_v48  ;;  %v3899_v47 = vpop.f32.mrb[110].mxu1  ;;  %v7903_v39 = vpop.f32.mrb[113].mxu0  ;;  %v6253_v43 = vsel %vm401_vm2, %v6247_v32, 0  ;;  %v6919_v36 = vld [vmem:[%s11418_s3 + $0x50] sm:$0xf]  ;;  %v3552_v32 = vmul.f32 %v3551_v45, %v10742_v50 }
 0x334   : > { %8260 = vmatpush3.bf16.msra.mxu0 %v6009_v3  ;;  %8265 = vmatprep.subr.bf16.mxu1 %v11536_v18  ;;  %v7894_v30 = vpop.f32.mrb[111].mxu1  ;;  %v3954_v49 = vpop.f32.mrb[114].mxu0 }
 0x335   : > { %v3142_v41 = vld [vmem:[#allocation2] sm:$0xff]  ;;  %8275 = vmatprep.subr.bf16.mxu0 %v11536_v18  ;;  %v6302_v42 = vpop.permute.xlu1 %6301  ;;  %v6300_v13 = vpop.permute.xlu0 %6299 }
 0x336   : > { %v3207_v63 = vadd.f32 %v10679_v24, %v3142_v41  ;;  %8252 = vmatmul.mubr.msk.bf16.vlgmr.msra.gmra.mrb[180].mxu1 %vm397_vm3, %v6911_v16  ;;  %v7904_v24 = vpop.f32.mrb[115].mxu0  ;;  %v6921_v16 = vld [vmem:[%s11418_s3 + $0x54] sm:$0xf]  ;;  %v6307_v30 = vsel %vm1779_vm12, %v6300_v13, %v6302_v42 }
 0x337   : > { %8262 = vmatmul.mubr.msk.bf16.vlgmr.msra.gmra.mrb[184].mxu0 %vm397_vm3, %v6913_v37  ;;  %8266 = vmatpush3.bf16.msra.mxu1 %v11541_v15  ;;  %v11546_v37 = vld [vmem:[#allocation19_spill] sm:$0xff] }
 0x338   : > { %3208 = vst.msk [vmem:[#allocation2] sm:$0xff] %vm378_vm4, %v3207_v63  ;;  %8276 = vmatpush3.bf16.msra.mxu0 %v11542_v21  ;;  %8267 = vmatprep.subr.bf16.mxu1 %v11536_v18 }
 0x339   : > { %8277 = vmatprep.subr.bf16.mxu0 %v11536_v18  ;;  %8271 = vmatprep.mubr.msk.bf16.mxu1 %vm8467_vm1, %v11536_v18  ;;  %v6306_v0 = vpop.permute.xlu1 %6305 }
 0x33a   : > { %8281 = vmatprep.mubr.msk.bf16.mxu0 %vm8467_vm1, %v11536_v18 }
 0x33b   : > { %8268 = vmatpush3.bf16.msra.mxu1 %v6063_v28 }
 0x33c   : > { %8278 = vmatpush3.bf16.msra.mxu0 %v6124_v5  ;;  %8269 = vmatprep.subr.bf16.mxu1 %v11536_v18 }
 0x33d   : > { %8279 = vmatprep.subr.bf16.mxu0 %v11536_v18  ;;  %v11079_v51 = vpop.f32.mrb[112].mxu1  ;;  %v6363_v59 = vpop.permute.xlu1 %6362 }
 0x33e   : > { %v7913_v22 = vpop.f32.mrb[113].mxu1 }
 0x33f   : > { %v3209_v31 = vld [vmem:[#allocation2] sm:$0xff]  ;;  %8270 = vmatpush3.bf16.msra.mxu1 %v6070_v61  ;;  %v4009_v2 = vpop.f32.mrb[114].mxu1  ;;  %v6923_v61 = vld [vmem:[%s11418_s3 + $0x58] sm:$0xf] }
 0x340   : > { %v3274_v57 = vadd.f32 %v10725_v56, %v3209_v31  ;;  %8280 = vmatpush3.bf16.msra.mxu0 %v6131_v9  ;;  %8285 = vmatprep.subr.bf16.mxu1 %v11536_v18  ;;  %v7914_v54 = vpop.f32.mrb[115].mxu1  ;;  %v6185_v56 = vsel %vm1641_vm10, %v11006_v44, %v11003_v7  ;;  %v6304_v7 = vpop.permute.xlu0 %6303 }
 0x341   : > { %8295 = vmatprep.subr.bf16.mxu0 %v11536_v18  ;;  %v11109_v44 = vpop.f32.mrb[116].mxu0  ;;  %v6367_v47 = vpop.permute.xlu1 %6366  ;;  %v6308_v62 = vsel %vm1779_vm12, %v6304_v7, %v6306_v0  ;;  %v3557_v7 = vrot.slane %v3552_v32, %v10752_v53 }
 0x342   : > { %3275 = vst.msk [vmem:[#allocation2] sm:$0xff] %vm378_vm4, %v3274_v57  ;;  %8272 = vmatmul.mubr.msk.bf16.vlgmr.msra.gmra.mrb[184].mxu1 %vm397_vm3, %v6915_v34  ;;  %v7923_v12 = vpop.f32.mrb[117].mxu0  ;;  %v6314_v24 = vsel %vm401_vm2, %v6308_v62, 0  ;;  %v1993_v62 = vld [vmem:[#allocation4] sm:$0xff] }
 0x343   : > { %8282 = vmatmul.mubr.msk.bf16.vlgmr.msra.gmra.mrb[188].mxu0 %vm397_vm3, %v6917_v40  ;;  %8286 = vmatpush3.bf16.msra.mxu1 %v11543_v4  ;;  %v4064_v14 = vpop.f32.mrb[118].mxu0 }
 0x344   : > { %8296 = vmatpush3.bf16.msra.mxu0 %v11544_v27  ;;  %8287 = vmatprep.subr.bf16.mxu1 %v11536_v18  ;;  %v6361_v17 = vpop.permute.xlu0 %6360  ;;  %v7924_v3 = vpop.f32.mrb[119].mxu0 }
 0x345   : > { %8297 = vmatprep.subr.bf16.mxu0 %v11536_v18  ;;  %8291 = vmatprep.mubr.msk.bf16.mxu1 %vm8467_vm1, %v11536_v18  ;;  %v6368_v63 = vsel %vm1848_vm13, %v6361_v17, %v6363_v59  ;;  %v6424_v19 = vpop.permute.xlu1 %6423 }
 0x346   : > { %8301 = vmatprep.mubr.msk.bf16.mxu0 %vm8467_vm1, %v11536_v18 }
 0x347   : > { %8288 = vmatpush3.bf16.msra.mxu1 %v6185_v56 }
 0x348   : > { %8298 = vmatpush3.bf16.msra.mxu0 %v6246_v52  ;;  %8289 = vmatprep.subr.bf16.mxu1 %v11536_v18  ;;  %v6365_v41 = vpop.permute.xlu0 %6364 }
 0x349   : > { %v3276_v58 = vld [vmem:[#allocation2] sm:$0xff]  ;;  %8299 = vmatprep.subr.bf16.mxu0 %v11536_v18  ;;  %v11135_v11 = vpop.f32.mrb[116].mxu1  ;;  %v6369_v39 = vsel %vm1848_vm13, %v6365_v41, %v6367_v47  ;;  %v6428_v60 = vpop.permute.xlu1 %6427  ;;  %v1986_v47 = vld [vmem:[#allocation3] sm:$0xff] }
 0x34a   : > { %v3341_v48 = vadd.f32 %v10776_v26, %v3276_v58  ;;  %v11545_v26 = vld [vmem:[#allocation18_spill] sm:$0xff]  ;;  %v7933_v15 = vpop.f32.mrb[117].mxu1  ;;  %v6375_v5 = vsel %vm401_vm2, %v6369_v39, 0  ;;  %v11158_v9 = vpop.f32.mrb[120].mxu0 }
 0x34b   : > { %8290 = vmatpush3.bf16.msra.mxu1 %v6192_v46  ;;  %v4119_v28 = vpop.f32.mrb[118].mxu1  ;;  %v7943_v34 = vpop.f32.mrb[121].mxu0 }
 0x34c   : > { %3342 = vst.msk [vmem:[#allocation2] sm:$0xff] %vm378_vm4, %v3341_v48  ;;  %8300 = vmatpush3.bf16.msra.mxu0 %v6253_v43  ;;  %8305 = vmatprep.subr.bf16.mxu1 %v11536_v18  ;;  %v7934_v6 = vpop.f32.mrb[119].mxu1  ;;  %v6422_v1 = vpop.permute.xlu0 %6421 }
 0x34d   : > { %8315 = vmatprep.subr.bf16.mxu0 %v11536_v18  ;;  %v6429_v31 = vsel %vm1917_vm14, %v6422_v1, %v6424_v19  ;;  %v4174_v57 = vpop.f32.mrb[122].mxu0 }
 0x34e   : > { %8292 = vmatmul.mubr.msk.bf16.vlgmr.msra.gmra.mrb[188].mxu1 %vm397_vm3, %v6919_v36  ;;  %v7944_v13 = vpop.f32.mrb[123].mxu0 }
 0x34f   : > { %8302 = vmatmul.mubr.msk.bf16.vlgmr.msra.gmra.mrb[192].mxu0 %vm397_vm3, %v6921_v16  ;;  %8306 = vmatpush3.bf16.msra.mxu1 %v11545_v26 }
 0x350   : > { %8316 = vmatpush3.bf16.msra.mxu0 %v11546_v37  ;;  %8307 = vmatprep.subr.bf16.mxu1 %v11536_v18  ;;  %v6426_v22 = vpop.permute.xlu0 %6425 }
 0x351   : > { %8311 = vmatprep.mubr.msk.bf16.mxu1 %vm8467_vm1, %v11536_v18  ;;  %8317 = vmatprep.subr.bf16.mxu0 %v11536_v18  ;;  %v6430_v2 = vsel %vm1917_vm14, %v6426_v22, %v6428_v60 }
 0x352   : > { %8321 = vmatprep.mubr.msk.bf16.mxu0 %vm8467_vm1, %v11536_v18  ;;  %v6436_v54 = vsel %vm401_vm2, %v6430_v2, 0 }
 0x353   : > { %v3343_v49 = vld [vmem:[#allocation2] sm:$0xff]  ;;  %8308 = vmatpush3.bf16.msra.mxu1 %v6307_v30 }
 0x354   : > { %v3408_v21 = vadd.f32 %v10821_v20, %v3343_v49  ;;  %8309 = vmatprep.subr.bf16.mxu1 %v11536_v18  ;;  %8318 = vmatpush3.bf16.msra.mxu0 %v6368_v63  ;;  %v11547_v20 = vld [vmem:[#allocation20_spill] sm:$0xff] }
 0x355   : > { %8319 = vmatprep.subr.bf16.mxu0 %v11536_v18  ;;  %v11171_v4 = vpop.f32.mrb[120].mxu1 }
 0x356   : > { %3409 = vst.msk [vmem:[#allocation2] sm:$0xff] %vm378_vm4, %v3408_v21  ;;  %v7953_v56 = vpop.f32.mrb[121].mxu1  ;;  %v11177_v46 = vpop.f32.mrb[124].mxu0 }
 0x357   : > { %8310 = vmatpush3.bf16.msra.mxu1 %v6314_v24  ;;  %v4229_v52 = vpop.f32.mrb[122].mxu1  ;;  %v7963_v12 = vpop.f32.mrb[125].mxu0 }
 0x358   : > { %8325 = vmatprep.subr.bf16.mxu1 %v11536_v18  ;;  %8320 = vmatpush3.bf16.msra.mxu0 %v6375_v5  ;;  %v7954_v0 = vpop.f32.mrb[123].mxu1  ;;  %v4284_v43 = vpop.f32.mrb[126].mxu0 }
 0x359   : > { %v7964_v14 = vpop.f32.mrb[127].mxu0 }
 0x35a   : > { %8312 = vmatmul.mubr.msk.bf16.vlgmr.msra.gmra.mrb[192].mxu1 %vm397_vm3, %v6923_v61 }
 0x35b   : > { %8326 = vmatpush3.bf16.msra.mxu1 %v11547_v20  ;;  %8331 = vmatprep.mubr.msk.bf16.mxu1 %vm8467_vm1, %v11536_v18 }
 0x35c   : > { %8327 = vmatprep.subr.bf16.mxu1 %v11536_v18 }
 0x35d   : > { %v3410_v42 = vld [vmem:[#allocation2] sm:$0xff] }
 0x35e   : > { %v3475_v40 = vadd.f32 %v10863_v29, %v3410_v42 }
 0x35f   : > { %8328 = vmatpush3.bf16.msra.mxu1 %v6429_v31 }
 0x360   : > { %3476 = vst.msk [vmem:[#allocation2] sm:$0xff] %vm378_vm4, %v3475_v40  ;;  %8329 = vmatprep.subr.bf16.mxu1 %v11536_v18 }
 0x361   : > { %v11185_v3 = vpop.f32.mrb[124].mxu1 }
 0x362   : > { %v7973_v16 = vpop.f32.mrb[125].mxu1  ;;  %v11190_v49 = vpop.f32.mrb[128].mxu0 }
 0x363   : > { %8330 = vmatpush3.bf16.msra.mxu1 %v6436_v54  ;;  %v4339_v26 = vpop.f32.mrb[126].mxu1 }
 0x364   : > { %v7974_v37 = vpop.f32.mrb[127].mxu1 }
 0x367   : > { %v3477_v27 = vld [vmem:[#allocation2] sm:$0xff] }
 0x368   : > { %v3542_v29 = vadd.f32 %v10905_v38, %v3477_v27 }
 0x36a   : > { %3543 = vst.msk [vmem:[#allocation2] sm:$0xff] %vm378_vm4, %v3542_v29 }
 0x36d   : > { %v11195_v5 = vpop.f32.mrb[128].mxu1 }
 0x36e   : > { %v7993_v1 = vpop.f32.mrb[129].mxu1 }
 0x36f   : > { %v4458_v61 = vpop.f32.mrb[130].mxu1 }
 0x370   : > { %v7994_v20 = vpop.f32.mrb[131].mxu1 }
 0x371   : > { %v3544_v58 = vld [vmem:[#allocation2] sm:$0xff] }
 0x372   : > { %v3559_v59 = vmul.f32 %v3557_v7, %v3544_v58  ;;  %3573 = vst.msk [vmem:[#allocation2] sm:$0xff] %vm378_vm4, %v11536_v18  ;;  %6821 = vst.msk [vmem:[%s8590_s11 + $0x8] sm:$0xff] %vm378_vm4, %v3544_v58 }
 0x374   : > { %v3561_v38 = vsel %vm378_vm4, %v3559_v59, 0.0  ;;  %v3567_v48 = vmul.f32 %v3559_v59, %v3559_v59 }
 0x375   : > { %3562 = vadd.xlane.f32.xlu0 %v3561_v38 }
 0x376   : > { %v3568_v50 = vsel %vm378_vm4, %v3567_v48, 0.0 }
 0x379   : > { %v3574_v17 = vld [vmem:[#allocation2] sm:$0xff]  ;;  %3569 = vadd.xlane.f32.xlu0 %v3568_v50  ;;  %v11203_v57 = vpop.f32.mrb[132].mxu1 }
 0x37a   : > { %v3627_v36 = vadd.f32 %v10908_v8, %v3574_v17  ;;  %v7983_v8 = vpop.f32.mrb[129].mxu0  ;;  %v8013_v40 = vpop.f32.mrb[133].mxu1 }
 0x37b   : > { %v4394_v21 = vpop.f32.mrb[130].mxu0  ;;  %v4580_v13 = vpop.f32.mrb[134].mxu1 }
 0x37c   : > { %3628 = vst.msk [vmem:[#allocation2] sm:$0xff] %vm378_vm4, %v3627_v36  ;;  %v7984_v24 = vpop.f32.mrb[131].mxu0  ;;  %v8014_v54 = vpop.f32.mrb[135].mxu1 }
 0x37d   : > { %v11199_v22 = vpop.f32.mrb[132].mxu0 }
 0x37e   : > { %v1989_v30 = vpop.xlane.xlu0 %1988  ;;  %v8003_v31 = vpop.f32.mrb[133].mxu0 }
 0x37f   : > { %v1990_v41 = vadd.f32 %v1989_v30, %v1986_v47  ;;  %v4519_v34 = vpop.f32.mrb[134].mxu0 }
 0x380   : > { %v8004_v42 = vpop.f32.mrb[135].mxu0 }
 0x381   : > { %1992 = vst.msk [vmem:[#allocation3] sm:$0xff] %vm1991_vm15, %v1990_v41  ;;  %v11207_v27 = vpop.f32.mrb[136].mxu0 }
 0x382   : > { %v1997_v63 = vpop.xlane.xlu1 %1996  ;;  %v8023_v45 = vpop.f32.mrb[137].mxu0 }
 0x383   : > { %v3629_v39 = vld [vmem:[#allocation2] sm:$0xff]  ;;  %v1998_v15 = vadd.f32 %v1997_v63, %v1993_v62  ;;  %v4641_v52 = vpop.f32.mrb[138].mxu0 }
 0x384   : > { %v3682_v28 = vadd.f32 %v10946_v23, %v3629_v39  ;;  %v8024_v29 = vpop.f32.mrb[139].mxu0 }
 0x385   : > { %1999 = vst.msk [vmem:[#allocation4] sm:$0xff] %vm1991_vm15, %v1998_v15  ;;  %v11211_v32 = vpop.f32.mrb[136].mxu1 }
 0x386   : > { %3683 = vst.msk [vmem:[#allocation2] sm:$0xff] %vm378_vm4, %v3682_v28  ;;  %v8033_v7 = vpop.f32.mrb[137].mxu1  ;;  %v11215_v59 = vpop.f32.mrb[140].mxu0 }
 0x387   : > { %v4702_v12 = vpop.f32.mrb[138].mxu1  ;;  %v8043_v14 = vpop.f32.mrb[141].mxu0 }
 0x388   : > { %v8034_v58 = vpop.f32.mrb[139].mxu1  ;;  %v4763_v38 = vpop.f32.mrb[142].mxu0 }
 0x389   : > { %v8044_v48 = vpop.f32.mrb[143].mxu0 }
 0x38d   : > { %v3684_v6 = vld [vmem:[#allocation2] sm:$0xff] }
 0x38e   : > { %v3737_v19 = vadd.f32 %v10949_v33, %v3684_v6 }
 0x390   : > { %3738 = vst.msk [vmem:[#allocation2] sm:$0xff] %vm378_vm4, %v3737_v19 }
 0x391   : > { %v11219_v17 = vpop.f32.mrb[140].mxu1 }
 0x392   : > { %v8053_v36 = vpop.f32.mrb[141].mxu1  ;;  %v11223_v37 = vpop.f32.mrb[144].mxu0 }
 0x393   : > { %v4824_v16 = vpop.f32.mrb[142].mxu1  ;;  %v8063_v30 = vpop.f32.mrb[145].mxu0 }
 0x394   : > { %v8054_v26 = vpop.f32.mrb[143].mxu1  ;;  %v4885_v41 = vpop.f32.mrb[146].mxu0 }
 0x395   : > { %v8064_v62 = vpop.f32.mrb[147].mxu0 }
 0x397   : > { %v3739_v60 = vld [vmem:[#allocation2] sm:$0xff] }
 0x398   : > { %v3792_v23 = vadd.f32 %v10991_v25, %v3739_v60 }
 0x39a   : > { %3793 = vst.msk [vmem:[#allocation2] sm:$0xff] %vm378_vm4, %v3792_v23 }
 0x39d   : > { %v11227_v39 = vpop.f32.mrb[144].mxu1 }
 0x39e   : > { %v8073_v15 = vpop.f32.mrb[145].mxu1  ;;  %v11231_v24 = vpop.f32.mrb[148].mxu0 }
 0x39f   : > { %v4946_v28 = vpop.f32.mrb[146].mxu1  ;;  %v8083_v6 = vpop.f32.mrb[149].mxu0 }
 0x3a0   : > { %v8074_v8 = vpop.f32.mrb[147].mxu1  ;;  %v5007_v19 = vpop.f32.mrb[150].mxu0 }
 0x3a1   : > { %v3794_v2 = vld [vmem:[#allocation2] sm:$0xff]  ;;  %v8084_v1 = vpop.f32.mrb[151].mxu0 }
 0x3a2   : > { %v3847_v33 = vadd.f32 %v10993_v55, %v3794_v2 }
 0x3a4   : > { %3848 = vst.msk [vmem:[#allocation2] sm:$0xff] %vm378_vm4, %v3847_v33 }
 0x3aa   : > { %v11241_v40 = vpop.f32.mrb[152].mxu0 }
 0x3ab   : > { %v3849_v56 = vld [vmem:[#allocation2] sm:$0xff]  ;;  %v8103_v13 = vpop.f32.mrb[153].mxu0 }
 0x3ac   : > { %v3902_v25 = vadd.f32 %v11039_v10, %v3849_v56  ;;  %v5147_v54 = vpop.f32.mrb[154].mxu0 }
 0x3ad   : > { %v8104_v52 = vpop.f32.mrb[155].mxu0 }
 0x3ae   : > { %3903 = vst.msk [vmem:[#allocation2] sm:$0xff] %vm378_vm4, %v3902_v25  ;;  %v3566_v25 = vld [vmem:[#allocation4] sm:$0xff] }
 0x3b5   : > { %v3904_v0 = vld [vmem:[#allocation2] sm:$0xff] }
 0x3b6   : > { %v3957_v55 = vadd.f32 %v11049_v35, %v3904_v0 }
 0x3b8   : > { %3958 = vst.msk [vmem:[#allocation2] sm:$0xff] %vm378_vm4, %v3957_v55 }
 0x3bf   : > { %v3959_v43 = vld [vmem:[#allocation2] sm:$0xff] }
 0x3c0   : > { %v4012_v10 = vadd.f32 %v11079_v51, %v3959_v43  ;;  %v6927_v43 = vld [vmem:[%s11418_s3 + $0x60] sm:$0xf] }
 0x3c1   : > { %8332 = vmatmul.mubr.msk.bf16.vlgmr.msra.gmra.mrb[196].mxu1 %vm397_vm3, %v6927_v43 }
 0x3c2   : > { %4013 = vst.msk [vmem:[#allocation2] sm:$0xff] %vm378_vm4, %v4012_v10  ;;  %v11259_v10 = vpop.f32.mrb[156].mxu0 }
 0x3c3   : > { %v8123_v14 = vpop.f32.mrb[157].mxu0 }
 0x3c4   : > { %v5257_v48 = vpop.f32.mrb[158].mxu0 }
 0x3c9   : > { %v4014_v50 = vld [vmem:[#allocation2] sm:$0xff] }
 0x3ca   : > { %v4067_v35 = vadd.f32 %v11109_v44, %v4014_v50 }
 0x3cc   : > { %4068 = vst.msk [vmem:[#allocation2] sm:$0xff] %vm378_vm4, %v4067_v35  ;;  %v8124_v35 = vpop.f32.mrb[159].mxu0 }
 0x3cd   : > { %v11267_v30 = vpop.f32.mrb[160].mxu0 }
 0x3ce   : > { %v8143_v41 = vpop.f32.mrb[161].mxu0 }
 0x3d3   : > { %v4069_v47 = vld [vmem:[#allocation2] sm:$0xff] }
 0x3d4   : > { %v4122_v51 = vadd.f32 %v11135_v11, %v4069_v47 }
 0x3d6   : > { %4123 = vst.msk [vmem:[#allocation2] sm:$0xff] %vm378_vm4, %v4122_v51 }
 0x3dd   : > { %v4124_v63 = vld [vmem:[#allocation2] sm:$0xff] }
 0x3de   : > { %v4177_v44 = vadd.f32 %v11158_v9, %v4124_v63  ;;  %v11237_v9 = vpop.f32.mrb[148].mxu1  ;;  %v5367_v63 = vpop.f32.mrb[162].mxu0 }
 0x3df   : > { %v8093_v60 = vpop.f32.mrb[149].mxu1 }
 0x3e0   : > { %4178 = vst.msk [vmem:[#allocation2] sm:$0xff] %vm378_vm4, %v4177_v44  ;;  %v5092_v31 = vpop.f32.mrb[150].mxu1  ;;  %v8144_v44 = vpop.f32.mrb[163].mxu0 }
 0x3e1   : > { %v8094_v42 = vpop.f32.mrb[151].mxu1  ;;  %v11275_v6 = vpop.f32.mrb[164].mxu0 }
 0x3e2   : > { %v11251_v0 = vpop.f32.mrb[152].mxu1  ;;  %v8163_v19 = vpop.f32.mrb[165].mxu0 }
 0x3e3   : > { %v8113_v55 = vpop.f32.mrb[153].mxu1 }
 0x3e4   : > { %v5202_v12 = vpop.f32.mrb[154].mxu1  ;;  %v5019_v55 = vstv %s5018_s25 }
 0x3e5   : > { %v8114_v58 = vpop.f32.mrb[155].mxu1 }
 0x3e7   : > { %v4179_v21 = vld [vmem:[#allocation2] sm:$0xff] }
 0x3e8   : > { %v4232_v11 = vadd.f32 %v11171_v4, %v4179_v21  ;;  %v3560_v4 = vld [vmem:[#allocation3] sm:$0xff] }
 0x3ea   : > { %4233 = vst.msk [vmem:[#allocation2] sm:$0xff] %vm378_vm4, %v4232_v11 }
 0x3f1   : > { %v4234_v61 = vld [vmem:[#allocation2] sm:$0xff] }
 0x3f2   : > { %v4287_v20 = vadd.f32 %v11177_v46, %v4234_v61  ;;  %v5477_v61 = vpop.f32.mrb[166].mxu0 }
 0x3f4   : > { %4288 = vst.msk [vmem:[#allocation2] sm:$0xff] %vm378_vm4, %v4287_v20  ;;  %v8164_v20 = vpop.f32.mrb[167].mxu0 }
 0x3fb   : > { %v4289_v23 = vld [vmem:[#allocation2] sm:$0xff] }
 0x3fc   : > { %v4342_v34 = vadd.f32 %v11185_v3, %v4289_v23  ;;  %v6925_v3 = vld [vmem:[%s11418_s3 + $0x5c] sm:$0xf] }
 0x3fd   : > { %8322 = vmatmul.mubr.msk.bf16.vlgmr.msra.gmra.mrb[196].mxu0 %vm397_vm3, %v6925_v3 }
 0x3fe   : > { %4343 = vst.msk [vmem:[#allocation2] sm:$0xff] %vm378_vm4, %v4342_v34 }
 0x402   : > { %v3563_v2 = vpop.xlane.xlu0 %3562 }
 0x403   : > { %v3564_v33 = vadd.f32 %v3563_v2, %v3560_v4  ;;  %v11283_v4 = vpop.f32.mrb[168].mxu0 }
 0x404   : > { %v8183_v2 = vpop.f32.mrb[169].mxu0 }
 0x405   : > { %3565 = vst.msk [vmem:[#allocation3] sm:$0xff] %vm1991_vm15, %v3564_v33  ;;  %v4344_v46 = vld [vmem:[#allocation2] sm:$0xff]  ;;  %v5587_v13 = vpop.f32.mrb[170].mxu0 }
 0x406   : > { %v4397_v56 = vadd.f32 %v11190_v49, %v4344_v46  ;;  %v3570_v45 = vpop.xlane.xlu0 %3569  ;;  %v8184_v46 = vpop.f32.mrb[171].mxu0 }
 0x407   : > { %v3571_v29 = vadd.f32 %v3570_v45, %v3566_v25 }
 0x408   : > { %4398 = vst.msk [vmem:[#allocation2] sm:$0xff] %vm378_vm4, %v4397_v56 }
 0x409   : > { %3572 = vst.msk [vmem:[#allocation4] sm:$0xff] %vm1991_vm15, %v3571_v29  ;;  %v11292_v29 = vpop.f32.mrb[172].mxu0 }
 0x40f   : > { %v4399_v7 = vld [vmem:[#allocation2] sm:$0xff] }
 0x410   : > { %v4461_v49 = vadd.f32 %v11195_v5, %v4399_v7  ;;  %v11263_v5 = vpop.f32.mrb[156].mxu1 }
 0x411   : > { %v8133_v36 = vpop.f32.mrb[157].mxu1 }
 0x412   : > { %4462 = vst.msk [vmem:[#allocation2] sm:$0xff] %vm378_vm4, %v4461_v49  ;;  %v5312_v26 = vpop.f32.mrb[158].mxu1 }
 0x413   : > { %v8134_v51 = vpop.f32.mrb[159].mxu1 }
 0x414   : > { %v11271_v15 = vpop.f32.mrb[160].mxu1 }
 0x415   : > { %v8153_v28 = vpop.f32.mrb[161].mxu1 }
 0x416   : > { %v5422_v21 = vpop.f32.mrb[162].mxu1 }
 0x417   : > { %v8154_v11 = vpop.f32.mrb[163].mxu1 }
 0x418   : > { %v11279_v60 = vpop.f32.mrb[164].mxu1 }
 0x419   : > { %v4463_v38 = vld [vmem:[#allocation2] sm:$0xff]  ;;  %v8173_v23 = vpop.f32.mrb[165].mxu1 }
 0x41a   : > { %v4522_v50 = vadd.f32 %v11199_v22, %v4463_v38  ;;  %v5532_v34 = vpop.f32.mrb[166].mxu1 }
 0x41b   : > { %v8174_v42 = vpop.f32.mrb[167].mxu1 }
 0x41c   : > { %4523 = vst.msk [vmem:[#allocation2] sm:$0xff] %vm378_vm4, %v4522_v50  ;;  %v11288_v54 = vpop.f32.mrb[168].mxu1 }
 0x41d   : > { %v8193_v56 = vpop.f32.mrb[169].mxu1 }
 0x423   : > { %v4524_v16 = vld [vmem:[#allocation2] sm:$0xff] }
 0x424   : > { %v4583_v47 = vadd.f32 %v11203_v57, %v4524_v16 }
 0x426   : > { %4584 = vst.msk [vmem:[#allocation2] sm:$0xff] %vm378_vm4, %v4583_v47 }
 0x42d   : > { %v4585_v62 = vld [vmem:[#allocation2] sm:$0xff] }
 0x42e   : > { %v4644_v22 = vadd.f32 %v11207_v27, %v4585_v62 }
 0x430   : > { %4645 = vst.msk [vmem:[#allocation2] sm:$0xff] %vm378_vm4, %v4644_v22 }
 0x437   : > { %v4646_v8 = vld [vmem:[#allocation2] sm:$0xff] }
 0x438   : > { %v4705_v57 = vadd.f32 %v11211_v32, %v4646_v8 }
 0x43a   : > { %4706 = vst.msk [vmem:[#allocation2] sm:$0xff] %vm378_vm4, %v4705_v57 }
 0x441   : > { %v4707_v1 = vld [vmem:[#allocation2] sm:$0xff] }
 0x442   : > { %v4766_v27 = vadd.f32 %v11215_v59, %v4707_v1 }
 0x444   : > { %4767 = vst.msk [vmem:[#allocation2] sm:$0xff] %vm378_vm4, %v4766_v27 }
 0x44b   : > { %v4768_v31 = vld [vmem:[#allocation2] sm:$0xff] }
 0x44c   : > { %v4827_v32 = vadd.f32 %v11219_v17, %v4768_v31  ;;  %v5642_v17 = vpop.f32.mrb[170].mxu1 }
 0x44d   : > { %v8194_v52 = vpop.f32.mrb[171].mxu1 }
 0x44e   : > { %4828 = vst.msk [vmem:[#allocation2] sm:$0xff] %vm378_vm4, %v4827_v32  ;;  %v11303_v14 = vpop.f32.mrb[172].mxu1 }
 0x44f   : > { %v8213_v38 = vpop.f32.mrb[173].mxu1 }
 0x450   : > { %v5752_v50 = vpop.f32.mrb[174].mxu1 }
 0x455   : > { %v4829_v33 = vld [vmem:[#allocation2] sm:$0xff] }
 0x456   : > { %v4888_v59 = vadd.f32 %v11223_v37, %v4829_v33  ;;  %v8203_v37 = vpop.f32.mrb[173].mxu0 }
 0x457   : > { %v5697_v7 = vpop.f32.mrb[174].mxu0 }
 0x458   : > { %4889 = vst.msk [vmem:[#allocation2] sm:$0xff] %vm378_vm4, %v4888_v59  ;;  %v8204_v49 = vpop.f32.mrb[175].mxu0 }
 0x459   : > { %v11311_v51 = vpop.f32.mrb[176].mxu0 }
 0x45a   : > { %v8223_v62 = vpop.f32.mrb[177].mxu0 }
 0x45b   : > { %v5807_v63 = vpop.f32.mrb[178].mxu0 }
 0x45f   : > { %v4890_v25 = vld [vmem:[#allocation2] sm:$0xff] }
 0x460   : > { %v4949_v45 = vadd.f32 %v11227_v39, %v4890_v25  ;;  %v11299_v39 = vld [vmem:[%s11417_s2] sm:$0x1] }
 0x461   : > { %v5020_v58 = vmul.f32 %v11299_v39, %v5019_v55 }
 0x462   : > { %4950 = vst.msk [vmem:[#allocation2] sm:$0xff] %vm378_vm4, %v4949_v45 }
 0x463   : > { %v5025_v43 = vrot.slane %v5020_v58, %v10752_v53 }
 0x469   : > { %v4951_v3 = vld [vmem:[#allocation2] sm:$0xff] }
 0x46a   : > { %v5010_v12 = vadd.f32 %v11231_v24, %v4951_v3  ;;  %v8214_v24 = vpop.f32.mrb[175].mxu1 }
 0x46b   : > { %v11315_v44 = vpop.f32.mrb[176].mxu1 }
 0x46c   : > { %5011 = vst.msk [vmem:[#allocation2] sm:$0xff] %vm378_vm4, %v5010_v12  ;;  %v8233_v8 = vpop.f32.mrb[177].mxu1 }
 0x46d   : > { %v5862_v21 = vpop.f32.mrb[178].mxu1 }
 0x46e   : > { %v8234_v57 = vpop.f32.mrb[179].mxu1 }
 0x46f   : > { %v11323_v23 = vpop.f32.mrb[180].mxu1 }
 0x470   : > { %v8253_v31 = vpop.f32.mrb[181].mxu1 }
 0x471   : > { %v5987_v34 = vpop.f32.mrb[182].mxu1 }
 0x472   : > { %v8254_v32 = vpop.f32.mrb[183].mxu1 }
 0x473   : > { %v5012_v48 = vld [vmem:[#allocation2] sm:$0xff]  ;;  %v11331_v56 = vpop.f32.mrb[184].mxu1  ;;  %v5034_v32 = vld [vmem:[#allocation4] sm:$0xff] }
 0x474   : > { %v5027_v35 = vmul.f32 %v5025_v43, %v5012_v48  ;;  %5041 = vst.msk [vmem:[#allocation2] sm:$0xff] %vm378_vm4, %v11536_v18  ;;  %6875 = vst.msk [vmem:[%s8590_s11 + $0x10] sm:$0xff] %vm378_vm4, %v5012_v48  ;;  %v8224_v18 = vpop.f32.mrb[179].mxu0  ;;  %v8273_v25 = vpop.f32.mrb[185].mxu1 }
 0x475   : > { %v11319_v19 = vpop.f32.mrb[180].mxu0  ;;  %v6109_v17 = vpop.f32.mrb[186].mxu1 }
 0x476   : > { %v5029_v36 = vsel %vm378_vm4, %v5027_v35, 0.0  ;;  %v5035_v16 = vmul.f32 %v5027_v35, %v5027_v35  ;;  %v8243_v1 = vpop.f32.mrb[181].mxu0  ;;  %v8274_v45 = vpop.f32.mrb[187].mxu1 }
 0x477   : > { %5030 = vadd.xlane.f32.xlu1 %v5029_v36  ;;  %v5926_v61 = vpop.f32.mrb[182].mxu0  ;;  %v11339_v49 = vpop.f32.mrb[188].mxu1 }
 0x478   : > { %v5036_v26 = vsel %vm378_vm4, %v5035_v16, 0.0  ;;  %v8244_v27 = vpop.f32.mrb[183].mxu0  ;;  %v8293_v58 = vpop.f32.mrb[189].mxu1 }
 0x479   : > { %5037 = vadd.xlane.f32.xlu0 %v5036_v26  ;;  %v11327_v2 = vpop.f32.mrb[184].mxu0  ;;  %v6231_v43 = vpop.f32.mrb[190].mxu1 }
 0x47a   : > { %v8263_v33 = vpop.f32.mrb[185].mxu0  ;;  %v8294_v38 = vpop.f32.mrb[191].mxu1 }
 0x47b   : > { %v5042_v47 = vld [vmem:[#allocation2] sm:$0xff]  ;;  %v6048_v13 = vpop.f32.mrb[186].mxu0  ;;  %v6350_v26 = vpop.f32.mrb[192].mxu1 }
 0x47c   : > { %v5095_v41 = vadd.f32 %v11237_v9, %v5042_v47  ;;  %v8264_v59 = vpop.f32.mrb[187].mxu0 }
 0x47d   : > { %v11335_v37 = vpop.f32.mrb[188].mxu0 }
 0x47e   : > { %5096 = vst.msk [vmem:[#allocation2] sm:$0xff] %vm378_vm4, %v5095_v41  ;;  %v8283_v3 = vpop.f32.mrb[189].mxu0 }
 0x47f   : > { %v6170_v55 = vpop.f32.mrb[190].mxu0 }
 0x480   : > { %v8284_v7 = vpop.f32.mrb[191].mxu0 }
 0x481   : > { %v11343_v50 = vpop.f32.mrb[192].mxu0  ;;  %v6487_v7 = vstv %s6486_s22 }
 0x482   : > { %v8303_v35 = vpop.f32.mrb[193].mxu0 }
 0x483   : > { %v6292_v24 = vpop.f32.mrb[194].mxu0 }
 0x484   : > { %v8304_v36 = vpop.f32.mrb[195].mxu0 }
 0x485   : > { %v5097_v22 = vld [vmem:[#allocation2] sm:$0xff] }
 0x486   : > { %v5150_v28 = vadd.f32 %v11241_v40, %v5097_v22 }
 0x488   : > { %5151 = vst.msk [vmem:[#allocation2] sm:$0xff] %vm378_vm4, %v5150_v28 }
 0x48f   : > { %v5152_v11 = vld [vmem:[#allocation2] sm:$0xff] }
 0x490   : > { %v5205_v9 = vadd.f32 %v11251_v0, %v5152_v11 }
 0x492   : > { %5206 = vst.msk [vmem:[#allocation2] sm:$0xff] %vm378_vm4, %v5205_v9 }
 0x499   : > { %v5207_v20 = vld [vmem:[#allocation2] sm:$0xff] }
 0x49a   : > { %v5260_v40 = vadd.f32 %v11259_v10, %v5207_v20 }
 0x49c   : > { %5261 = vst.msk [vmem:[#allocation2] sm:$0xff] %vm378_vm4, %v5260_v40  ;;  %v5028_v40 = vld [vmem:[#allocation3] sm:$0xff] }
 0x4a3   : > { %v5262_v42 = vld [vmem:[#allocation2] sm:$0xff] }
 0x4a4   : > { %v5315_v0 = vadd.f32 %v11263_v5, %v5262_v42 }
 0x4a6   : > { %5316 = vst.msk [vmem:[#allocation2] sm:$0xff] %vm378_vm4, %v5315_v0 }
 0x4ad   : > { %v5317_v46 = vld [vmem:[#allocation2] sm:$0xff] }
 0x4ae   : > { %v5370_v10 = vadd.f32 %v11267_v30, %v5317_v46 }
 0x4b0   : > { %5371 = vst.msk [vmem:[#allocation2] sm:$0xff] %vm378_vm4, %v5370_v10 }
 0x4b7   : > { %v5372_v52 = vld [vmem:[#allocation2] sm:$0xff] }
 0x4b8   : > { %v5425_v5 = vadd.f32 %v11271_v15, %v5372_v52 }
 0x4ba   : > { %5426 = vst.msk [vmem:[#allocation2] sm:$0xff] %vm378_vm4, %v5425_v5 }
 0x4c1   : > { %v5427_v12 = vld [vmem:[#allocation2] sm:$0xff] }
 0x4c2   : > { %v5480_v30 = vadd.f32 %v11275_v6, %v5427_v12  ;;  %v8313_v6 = vpop.f32.mrb[193].mxu1 }
 0x4c3   : > { %v6353_v41 = vpop.f32.mrb[194].mxu1 }
 0x4c4   : > { %5481 = vst.msk [vmem:[#allocation2] sm:$0xff] %vm378_vm4, %v5480_v30  ;;  %v8314_v62 = vpop.f32.mrb[195].mxu1 }
 0x4c5   : > { %v6472_v57 = vpop.f32.mrb[196].mxu1 }
 0x4c6   : > { %v8333_v9 = vpop.f32.mrb[197].mxu1 }
 0x4cb   : > { %v5482_v48 = vld [vmem:[#allocation2] sm:$0xff] }
 0x4cc   : > { %v5535_v15 = vadd.f32 %v11279_v60, %v5482_v48 }
 0x4ce   : > { %5536 = vst.msk [vmem:[#allocation2] sm:$0xff] %vm378_vm4, %v5535_v15 }
 0x4d0   : > { %v6411_v18 = vpop.f32.mrb[196].mxu0 }
 0x4d1   : > { %v8323_v28 = vpop.f32.mrb[197].mxu0 }
 0x4d2   : > { %v6414_v60 = vpop.f32.mrb[198].mxu0 }
 0x4d3   : > { %v8324_v8 = vpop.f32.mrb[199].mxu0 }
 0x4d5   : > { %v5537_v16 = vld [vmem:[#allocation2] sm:$0xff] }
 0x4d6   : > { %v5590_v47 = vadd.f32 %v11283_v4, %v5537_v16  ;;  %v6475_v4 = vpop.f32.mrb[198].mxu1 }
 0x4d7   : > { %v8334_v1 = vpop.f32.mrb[199].mxu1 }
 0x4d8   : > { %5591 = vst.msk [vmem:[#allocation2] sm:$0xff] %vm378_vm4, %v5590_v47 }
 0x4df   : > { %v5592_v63 = vld [vmem:[#allocation2] sm:$0xff] }
 0x4e0   : > { %v5645_v22 = vadd.f32 %v11288_v54, %v5592_v63 }
 0x4e2   : > { %5646 = vst.msk [vmem:[#allocation2] sm:$0xff] %vm378_vm4, %v5645_v22 }
 0x4e9   : > { %v5647_v21 = vld [vmem:[#allocation2] sm:$0xff] }
 0x4ea   : > { %v5700_v11 = vadd.f32 %v11292_v29, %v5647_v21 }
 0x4ec   : > { %5701 = vst.msk [vmem:[#allocation2] sm:$0xff] %vm378_vm4, %v5700_v11 }
 0x4f3   : > { %v5702_v61 = vld [vmem:[#allocation2] sm:$0xff] }
 0x4f4   : > { %v5755_v27 = vadd.f32 %v11303_v14, %v5702_v61 }
 0x4f6   : > { %5756 = vst.msk [vmem:[#allocation2] sm:$0xff] %vm378_vm4, %v5755_v27 }
 0x4fd   : > { %v5757_v54 = vld [vmem:[#allocation2] sm:$0xff] }
 0x4fe   : > { %v5810_v20 = vadd.f32 %v11311_v51, %v5757_v54 }
 0x500   : > { %5811 = vst.msk [vmem:[#allocation2] sm:$0xff] %vm378_vm4, %v5810_v20 }
 0x504   : > { %v5031_v31 = vpop.xlane.xlu1 %5030 }
 0x505   : > { %v5032_v34 = vadd.f32 %v5031_v31, %v5028_v40 }
 0x506   : > { %v5038_v29 = vpop.xlane.xlu0 %5037 }
 0x507   : > { %v5812_v42 = vld [vmem:[#allocation2] sm:$0xff]  ;;  %5033 = vst.msk [vmem:[#allocation3] sm:$0xff] %vm1991_vm15, %v5032_v34  ;;  %v5039_v0 = vadd.f32 %v5038_v29, %v5034_v32 }
 0x508   : > { %v5865_v33 = vadd.f32 %v11315_v44, %v5812_v42 }
 0x509   : > { %5040 = vst.msk [vmem:[#allocation4] sm:$0xff] %vm1991_vm15, %v5039_v0 }
 0x50a   : > { %5866 = vst.msk [vmem:[#allocation2] sm:$0xff] %vm378_vm4, %v5865_v33 }
 0x50e   : > { %v6496_v15 = vld [vmem:[#allocation3] sm:$0xff] }
 0x510   : > { %v6502_v36 = vld [vmem:[#allocation4] sm:$0xff] }
 0x511   : > { %v5867_v14 = vld [vmem:[#allocation2] sm:$0xff] }
 0x512   : > { %v5929_v51 = vadd.f32 %v11319_v19, %v5867_v14 }
 0x514   : > { %5930 = vst.msk [vmem:[#allocation2] sm:$0xff] %vm378_vm4, %v5929_v51 }
 0x51b   : > { %v5931_v13 = vld [vmem:[#allocation2] sm:$0xff] }
 0x51c   : > { %v5990_v59 = vadd.f32 %v11323_v23, %v5931_v13 }
 0x51e   : > { %5991 = vst.msk [vmem:[#allocation2] sm:$0xff] %vm378_vm4, %v5990_v59 }
 0x525   : > { %v5992_v46 = vld [vmem:[#allocation2] sm:$0xff] }
 0x526   : > { %v6051_v10 = vadd.f32 %v11327_v2, %v5992_v46 }
 0x528   : > { %6052 = vst.msk [vmem:[#allocation2] sm:$0xff] %vm378_vm4, %v6051_v10 }
 0x52f   : > { %v6053_v44 = vld [vmem:[#allocation2] sm:$0xff] }
 0x530   : > { %v6112_v25 = vadd.f32 %v11331_v56, %v6053_v44 }
 0x532   : > { %6113 = vst.msk [vmem:[#allocation2] sm:$0xff] %vm378_vm4, %v6112_v25 }
 0x539   : > { %v6114_v17 = vld [vmem:[#allocation2] sm:$0xff] }
 0x53a   : > { %v6173_v19 = vadd.f32 %v11335_v37, %v6114_v17 }
 0x53c   : > { %6174 = vst.msk [vmem:[#allocation2] sm:$0xff] %vm378_vm4, %v6173_v19 }
 0x543   : > { %v6175_v45 = vld [vmem:[#allocation2] sm:$0xff] }
 0x544   : > { %v6234_v23 = vadd.f32 %v11339_v49, %v6175_v45  ;;  %v6488_v49 = vmul.f32 %v11299_v39, %v6487_v7 }
 0x546   : > { %6235 = vst.msk [vmem:[#allocation2] sm:$0xff] %vm378_vm4, %v6234_v23  ;;  %v6493_v30 = vrot.slane %v6488_v49, %v10752_v53 }
 0x54d   : > { %v6236_v52 = vld [vmem:[#allocation2] sm:$0xff] }
 0x54e   : > { %v6295_v2 = vadd.f32 %v11343_v50, %v6236_v52 }
 0x550   : > { %6296 = vst.msk [vmem:[#allocation2] sm:$0xff] %vm378_vm4, %v6295_v2 }
 0x557   : > { %v6297_v5 = vld [vmem:[#allocation2] sm:$0xff] }
 0x558   : > { %v6356_v3 = vadd.f32 %v6350_v26, %v6297_v5 }
 0x55a   : > { %6357 = vst.msk [vmem:[#allocation2] sm:$0xff] %vm378_vm4, %v6356_v3 }
 0x561   : > { %v6358_v56 = vld [vmem:[#allocation2] sm:$0xff] }
 0x562   : > { %v6417_v37 = vadd.f32 %v6411_v18, %v6358_v56 }
 0x564   : > { %6418 = vst.msk [vmem:[#allocation2] sm:$0xff] %vm378_vm4, %v6417_v37 }
 0x56b   : > { %v6419_v55 = vld [vmem:[#allocation2] sm:$0xff] }
 0x56c   : > { %v6478_v12 = vadd.f32 %v6472_v57, %v6419_v55 }
 0x56e   : > { %6479 = vst.msk [vmem:[#allocation2] sm:$0xff] %vm378_vm4, %v6478_v12 }
 0x575   : > { %v6480_v58 = vld [vmem:[#allocation2] sm:$0xff] }
 0x576   : > { %v6495_v43 = vmul.f32 %v6493_v30, %v6480_v58  ;;  %6929 = vst.msk [vmem:[%s8590_s11 + $0x18] sm:$0xff] %vm378_vm4, %v6480_v58 }
 0x578   : > { %v6497_v38 = vsel %vm378_vm4, %v6495_v43, 0.0  ;;  %v6503_v48 = vmul.f32 %v6495_v43, %v6495_v43 }
 0x579   : > { %6498 = vadd.xlane.f32.xlu1 %v6497_v38 }
 0x57a   : > { %v6504_v50 = vsel %vm378_vm4, %v6503_v48, 0.0 }
 0x57b   : > { %6505 = vadd.xlane.f32.xlu0 %v6504_v50 }
 0x605   : > { %6512 = sbr.rel (%p6930_p0) target bundleno = 1556 (0x614), region = 44 }
 0x606   : > { %v6499_v35 = vpop.xlane.xlu1 %6498 }
 0x607   : > { %v6500_v24 = vadd.f32 %v6499_v35, %v6496_v15 }
 0x608   : > { %v6506_v16 = vpop.xlane.xlu0 %6505 }
 0x609   : > { %6501 = vst.msk [vmem:[#allocation3] sm:$0xff] %vm1991_vm15, %v6500_v24  ;;  %v6507_v39 = vadd.f32 %v6506_v16, %v6502_v36 }
 0x60b   : > { %6508 = vst.msk [vmem:[#allocation4] sm:$0xff] %vm1991_vm15, %v6507_v39 }
 0x610   : > { %v6513_v53 = vld [vmem:[#allocation3] sm:$0xff] }
 0x611   : > { %6514 = vst.msk [vmem:[%s11550_s9] sm:$0xff] %vm1991_vm15, %v6513_v53 }
 0x612   : > { %v6515_v26 = vld [vmem:[#allocation4] sm:$0xff] }
 0x613   : > { %6516 = vst.msk [vmem:[%s11552_s18] sm:$0xff] %vm1991_vm15, %v6515_v26 }
 0x614 PF: > { %s11553_s21 = sld [smem:[#allocation7_spill]]  ;;  %s11555_s22 = sld [smem:[#allocation6_spill]] }
 0x615   : > { %s11556_s23 = sld [smem:[#allocation8_spill]]  ;;  %s11557_s24 = sld [smem:[#allocation9_spill]] }
 0x61a   : > { %s17_s25 = sadd.s32 1, %s11553_s21   ;;  %s11554_s21 = sld [smem:[#allocation5_spill]] }
 0x61b   : > { %p14_p1 = scmp.ge.s32.totalorder %s17_s25, 6  }
 0x61d   :  { %16 = sbr.rel (!%p14_p1) target bundleno = 6 (0x6), region = 128 }

</bundles_post_ra>
